<compile_context>
chip_gen: v7x
topology: tpu7x:2x2x1
jax: 0.10.0
libtpu: 0.0.40
codegen_flags: <defaults>
</compile_context>

<pallas_src>
import math

import jax
import jax.numpy as jnp
from jax.experimental import pallas as pl
from jax.experimental.pallas import tpu as pltpu


def _round_up(x, m):
    return ((x + m - 1) // m) * m


# ----------------------------------------------------------------------------
# Wrapper-side parameter prep: transpose + pad each gate block to 128 lanes.
# PyTorch stacked gate order is [r, z, n]:  w (3H, in) -> wT (in_p, 3*Hp).
# Weights are stored bf16 (MXU operands); biases stay f32.
# ----------------------------------------------------------------------------
def _pad_gate_weight_T(w, H, Hp, in_dim, in_p):
    out = jnp.zeros((in_p, 3 * Hp), jnp.float32)
    for g in range(3):
        out = out.at[:in_dim, g * Hp:g * Hp + H].set(w[g * H:(g + 1) * H, :].T)
    return out.astype(jnp.bfloat16)


def _make_biases(b_ih, b_hh, H, Hp):
    # r/z parts of b_hh sit outside the r-multiplication, so they fold into the
    # hoisted input-side bias; only the n part of b_hh stays on the recurrent
    # path (inside r * (W_hn h + b_hn)).
    b_i = jnp.zeros((1, 3 * Hp), jnp.float32)
    for g in range(3):
        b_i = b_i.at[0, g * Hp:g * Hp + H].set(b_ih[g * H:(g + 1) * H])
    for g in range(2):                                    # r, z from b_hh
        b_i = b_i.at[0, g * Hp:g * Hp + H].add(b_hh[g * H:(g + 1) * H])
    b_hn = jnp.zeros((1, Hp), jnp.float32).at[0, :H].set(b_hh[2 * H:3 * H])
    return b_i, b_hn


# ----------------------------------------------------------------------------
# Fused kernel: one grid step = one batch tile of B_TILE rows.
#   refs after the scalar-prefetched ids:
#     [table(HBM), (w_ihT, w_hhT, b_i, b_hn) * num_layers, fc_wT, fc_b,
#      out, x_scr, gi_scr, sem]
# ----------------------------------------------------------------------------
def _make_fused_kernel(num_layers, B_TILE, T, V, Ep, Hp, Lp, F):
    def kernel(ids_ref, *refs):
        table_ref = refs[0]                            # (Vp, Ep) f32, HBM
        fc_wT_ref = refs[1 + 4 * num_layers]           # (Hp, Lp) bf16
        fc_b_ref = refs[2 + 4 * num_layers]            # (1, Lp)  f32
        out_ref = refs[3 + 4 * num_layers]             # (B_TILE, Lp) f32
        x_scr = refs[4 + 4 * num_layers]               # (T*B_TILE, F) f32
        gi_scr = refs[5 + 4 * num_layers]              # (T*B_TILE, 3Hp) f32
        sem = refs[6 + 4 * num_layers]                 # DMA semaphore

        bt = pl.program_id(0)

        # ---- embedding gather: burst of async row DMAs from the HBM table ----
        copies = []
        for i in range(B_TILE):
            for t in range(T):
                idx = jnp.clip(ids_ref[bt * B_TILE + i, t], 0, V - 1)
                row = t * B_TILE + i                   # time-major rows
                cp = pltpu.make_async_copy(
                    table_ref.at[pl.ds(idx, 1), :],
                    x_scr.at[row:row + 1, 0:Ep],
                    sem)
                cp.start()
                copies.append(cp)
        for cp in copies:
            cp.wait()

        h = jnp.zeros((B_TILE, Hp), jnp.float32)
        for l in range(num_layers):
            w_ih_ref = refs[1 + 4 * l]                 # (in_p, 3Hp) bf16
            w_hh_ref = refs[2 + 4 * l]                 # (Hp,  3Hp)  bf16
            b_i = refs[3 + 4 * l][...]                 # (1, 3Hp) f32
            b_hn = refs[4 + 4 * l][...]                # (1, Hp)  f32
            in_p = Ep if l == 0 else Hp

            # Hoisted non-recurrent projection: one big bf16 MXU matmul with
            # f32 accumulation, written to VMEM scratch (bounds live ranges).
            x_bf = x_scr[:, 0:in_p].astype(jnp.bfloat16)
            gi_scr[...] = jnp.dot(x_bf, w_ih_ref[...],
                                  preferred_element_type=jnp.float32) + b_i

            # Sequential recurrence over T on a (B_TILE, Hp) batch tile.
            h = jnp.zeros((B_TILE, Hp), jnp.float32)
            for t in range(T):                         # static -> fully unrolled
                gi = gi_scr[t * B_TILE:(t + 1) * B_TILE, :]
                gh = jnp.dot(h.astype(jnp.bfloat16), w_hh_ref[...],
                             preferred_element_type=jnp.float32)
                rz = jax.nn.sigmoid(gi[:, 0:2 * Hp] + gh[:, 0:2 * Hp])
                z = rz[:, Hp:2 * Hp]
                n = jnp.tanh(gi[:, 2 * Hp:3 * Hp]
                             + rz[:, 0:Hp] * (gh[:, 2 * Hp:3 * Hp] + b_hn))
                h = n + z * (h - n)                    # == (1-z)*n + z*h
                if l < num_layers - 1:
                    # time-major, sublane/lane-dense store for the next layer
                    x_scr[t * B_TILE:(t + 1) * B_TILE, 0:Hp] = h

        # Fused last-timestep classifier: logits = h_T @ fc_wT + fc_b
        out_ref[...] = (jnp.dot(h.astype(jnp.bfloat16), fc_wT_ref[...],
                                preferred_element_type=jnp.float32)
                        + fc_b_ref[...])

    return kernel


# ----------------------------------------------------------------------------
# Forward pass wrapper (single pallas_call).
# ----------------------------------------------------------------------------
def gru_classifier_forward(ids, params, batch_tile=None):
    B, T = ids.shape
    table = params["embedding"]
    V, E = table.shape
    H = params["hidden_dim"]
    L = params["fc_w"].shape[0]
    num_layers = params["num_layers"]

    Ep = _round_up(E, 128)
    Hp = _round_up(H, 128)
    Lp = _round_up(L, 128)
    F = max(Ep, Hp)

    # Batch tile: >= 8 (f32 sublanes); larger tiles fill more MXU rows.
    if batch_tile is None:
        batch_tile = min(_round_up(B, 8), 64)
    B_TILE = _round_up(batch_tile, 8)
    num_tiles = -(-B // B_TILE)
    B_pad = num_tiles * B_TILE

    ids_p = jnp.zeros((B_pad, T), jnp.int32).at[:B, :].set(ids.astype(jnp.int32))

    # Embedding table stays in HBM (pl.ANY); only needed rows are DMA-gathered.
    table_p = jnp.zeros((_round_up(V, 8), Ep), jnp.float32).at[:V, :E].set(table)

    flat_w = []
    for l in range(num_layers):
        in_dim = E if l == 0 else H
        in_p = Ep if l == 0 else Hp
        flat_w.append(_pad_gate_weight_T(params[f"w_ih_l{l}"], H, Hp, in_dim, in_p))
        flat_w.append(_pad_gate_weight_T(params[f"w_hh_l{l}"], H, Hp, H, Hp))
        b_i, b_hn = _make_biases(params[f"b_ih_l{l}"], params[f"b_hh_l{l}"], H, Hp)
        flat_w.append(b_i)
        flat_w.append(b_hn)
    fc_wT_p = (jnp.zeros((Hp, Lp), jnp.float32)
               .at[:H, :L].set(params["fc_w"].T).astype(jnp.bfloat16))
    fc_b_p = jnp.zeros((1, Lp), jnp.float32).at[0, :L].set(params["fc_b"])

    kernel = _make_fused_kernel(num_layers, B_TILE, T, V, Ep, Hp, Lp, F)

    in_specs = [pl.BlockSpec(memory_space=pl.ANY)]      # table: raw HBM ref
    for w in flat_w:
        in_specs.append(pl.BlockSpec(w.shape, lambda bt, ids_s: (0, 0)))
    in_specs.append(pl.BlockSpec(fc_wT_p.shape, lambda bt, ids_s: (0, 0)))
    in_specs.append(pl.BlockSpec(fc_b_p.shape, lambda bt, ids_s: (0, 0)))

    scratch_shapes = [
        pltpu.VMEM((T * B_TILE, F), jnp.float32),       # activations (time-major)
        pltpu.VMEM((T * B_TILE, 3 * Hp), jnp.float32),  # hoisted input projection
        pltpu.SemaphoreType.DMA(()),                    # embedding-gather sem
    ]

    # Arch-aware VMEM budget derived from the actual padded working set.
    def _nbytes(a):
        return int(math.prod(a.shape)) * a.dtype.itemsize
    weight_bytes = sum(_nbytes(w) for w in flat_w) + _nbytes(fc_wT_p) + _nbytes(fc_b_p)
    scratch_bytes = (T * B_TILE * F + T * B_TILE * 3 * Hp) * 4
    out_block_bytes = B_TILE * Lp * 4
    vmem_needed = 2 * weight_bytes + scratch_bytes + 2 * out_block_bytes + (2 << 20)
    try:
        cap = int(pltpu.get_tpu_info().vmem_capacity_bytes)
    except Exception:
        cap = 64 * 1024 * 1024                          # conservative (v7x) fallback
    vmem_limit = int(min(max(vmem_needed, 32 * 1024 * 1024), cap * 3 // 4))

    out = pl.pallas_call(
        kernel,
        out_shape=jax.ShapeDtypeStruct((B_pad, Lp), jnp.float32),
        grid_spec=pltpu.PrefetchScalarGridSpec(
            num_scalar_prefetch=1,                      # ids -> SMEM
            grid=(num_tiles,),                          # one batch tile per program
            in_specs=in_specs,
            out_specs=pl.BlockSpec((B_TILE, Lp), lambda bt, ids_s: (bt, 0)),
            scratch_shapes=scratch_shapes,
        ),
        compiler_params=pltpu.CompilerParams(
            dimension_semantics=("parallel",),          # independent batch tiles
            vmem_limit_bytes=vmem_limit,
        ),
    )(ids_p, table_p, *flat_w, fc_wT_p, fc_b_p)

    return out[:B, :L]


# ----------------------------------------------------------------------------
# Parameter init (PyTorch-shaped) and a pure-JAX f32 reference for validation.
# ----------------------------------------------------------------------------
def init_params(key, vocab_size, embedding_dim, hidden_dim, label_size, num_layers):
    params = {"num_layers": num_layers, "hidden_dim": hidden_dim}
    k = 1.0 / jnp.sqrt(hidden_dim)
    keys = jax.random.split(key, 2 + 4 * num_layers + 2)
    params["embedding"] = jax.random.normal(
        keys[0], (vocab_size, embedding_dim), jnp.float32)
    idx = 1
    for l in range(num_layers):
        in_dim = embedding_dim if l == 0 else hidden_dim
        params[f"w_ih_l{l}"] = jax.random.uniform(
            keys[idx], (3 * hidden_dim, in_dim), jnp.float32, -k, k); idx += 1
        params[f"w_hh_l{l}"] = jax.random.uniform(
            keys[idx], (3 * hidden_dim, hidden_dim), jnp.float32, -k, k); idx += 1
        params[f"b_ih_l{l}"] = jax.random.uniform(
            keys[idx], (3 * hidden_dim,), jnp.float32, -k, k); idx += 1
        params[f"b_hh_l{l}"] = jax.random.uniform(
            keys[idx], (3 * hidden_dim,), jnp.float32, -k, k); idx += 1
    params["fc_w"] = jax.random.uniform(
        keys[idx], (label_size, hidden_dim), jnp.float32, -k, k); idx += 1
    params["fc_b"] = jax.random.uniform(
        keys[idx], (label_size,), jnp.float32, -k, k)
    return params


def _reference_forward(ids, params):
    table = params["embedding"]
    H = params["hidden_dim"]
    x = table[ids]                                      # (B, T, E)
    B, T, _ = x.shape
    for l in range(params["num_layers"]):
        w_ih = params[f"w_ih_l{l}"]; w_hh = params[f"w_hh_l{l}"]
        b_ih = params[f"b_ih_l{l}"]; b_hh = params[f"b_hh_l{l}"]
        h = jnp.zeros((B, H), jnp.float32)
        ys = []
        for t in range(T):
            gi = x[:, t, :] @ w_ih.T + b_ih
            gh = h @ w_hh.T + b_hh
            r = jax.nn.sigmoid(gi[:, :H] + gh[:, :H])
            z = jax.nn.sigmoid(gi[:, H:2 * H] + gh[:, H:2 * H])
            n = jnp.tanh(gi[:, 2 * H:] + r * gh[:, 2 * H:])
            h = (1.0 - z) * n + z * h
            ys.append(h)
        x = jnp.stack(ys, axis=1)
    return x[:, -1, :] @ params["fc_w"].T + params["fc_b"]


if __name__ == "__main__":
    vocab_size, embedding_dim, hidden_dim = 50, 32, 32
    label_size, num_layers = 4, 2
    batch, seq = 2, 8

    key = jax.random.PRNGKey(0)
    k_ids, k_params = jax.random.split(key)
    ids = jax.random.randint(k_ids, (batch, seq), 0, vocab_size, jnp.int32)
    params = init_params(k_params, vocab_size, embedding_dim, hidden_dim,
                         label_size, num_layers)

    logits = gru_classifier_forward(ids, params)
    jax.block_until_ready(logits)
    assert logits.shape == (batch, label_size)

    ref = _reference_forward(ids, params)
    max_diff = float(jnp.max(jnp.abs(logits - ref)))
    # bf16 MXU operands (f32 accumulation / f32 gate math) -> slightly looser tol.
    assert bool(jnp.allclose(logits, ref, atol=5e-2, rtol=5e-2)), (
        "max abs diff = %f" % max_diff)

    print("KERNEL_OK")
</pallas_src>

<mosaic_0001>
module attributes {stable_mosaic.version = 11 : i64} {
  func.func @kernel(%arg0: i32, %arg1: memref<8x8xi32, #tpu.memory_space<smem>>, %arg2: memref<56x128xf32, #tpu.memory_space<any>>, %arg3: memref<128x384xbf16, #tpu.memory_space<vmem>>, %arg4: memref<128x384xbf16, #tpu.memory_space<vmem>>, %arg5: memref<1x384xf32, #tpu.memory_space<vmem>>, %arg6: memref<1x128xf32, #tpu.memory_space<vmem>>, %arg7: memref<128x384xbf16, #tpu.memory_space<vmem>>, %arg8: memref<128x384xbf16, #tpu.memory_space<vmem>>, %arg9: memref<1x384xf32, #tpu.memory_space<vmem>>, %arg10: memref<1x128xf32, #tpu.memory_space<vmem>>, %arg11: memref<128x128xbf16, #tpu.memory_space<vmem>>, %arg12: memref<1x128xf32, #tpu.memory_space<vmem>>, %arg13: memref<8x128xf32, #tpu.memory_space<vmem>>, %arg14: memref<64x128xf32, #tpu.memory_space<vmem>>, %arg15: memref<64x384xf32, #tpu.memory_space<vmem>>, %arg16: memref<!tpu.dma_semaphore, #tpu.memory_space<semaphore_mem>>) attributes {dimension_semantics = [#tpu.dimension_semantics<parallel>], iteration_bounds = array<i64: 1>, scalar_prefetch = 1 : i64, scratch_operands = 3 : i64, tpu.core_type = #tpu.core_type<tc>, window_params = [{}, {pipeline_mode = #tpu.pipeline_mode<synchronous>, transform_indices = @transform_1, window_bounds = array<i64: 128, 384>}, {pipeline_mode = #tpu.pipeline_mode<synchronous>, transform_indices = @transform_2, window_bounds = array<i64: 128, 384>}, {pipeline_mode = #tpu.pipeline_mode<synchronous>, transform_indices = @transform_3, window_bounds = array<i64: 1, 384>}, {pipeline_mode = #tpu.pipeline_mode<synchronous>, transform_indices = @transform_4, window_bounds = array<i64: 1, 128>}, {pipeline_mode = #tpu.pipeline_mode<synchronous>, transform_indices = @transform_5, window_bounds = array<i64: 128, 384>}, {pipeline_mode = #tpu.pipeline_mode<synchronous>, transform_indices = @transform_6, window_bounds = array<i64: 128, 384>}, {pipeline_mode = #tpu.pipeline_mode<synchronous>, transform_indices = @transform_7, window_bounds = array<i64: 1, 384>}, {pipeline_mode = #tpu.pipeline_mode<synchronous>, transform_indices = @transform_8, window_bounds = array<i64: 1, 128>}, {pipeline_mode = #tpu.pipeline_mode<synchronous>, transform_indices = @transform_9, window_bounds = array<i64: 128, 128>}, {pipeline_mode = #tpu.pipeline_mode<synchronous>, transform_indices = @transform_10, window_bounds = array<i64: 1, 128>}, {transform_indices = @transform_11, window_bounds = array<i64: 8, 128>}]} {
    %c8_i32 = arith.constant 8 : i32
    %0 = arith.muli %arg0, %c8_i32 : i32
    %c0_i32 = arith.constant 0 : i32
    %1 = arith.addi %0, %c0_i32 : i32
    %2 = arith.index_cast %1 : i32 to index
    %c0 = arith.constant 0 : index
    %3 = memref.load %arg1[%2, %c0] : memref<8x8xi32, #tpu.memory_space<smem>>
    %c0_i32_0 = arith.constant 0 : i32
    %c49_i32 = arith.constant 49 : i32
    %4 = arith.maxsi %c0_i32_0, %3 : i32
    %5 = arith.minsi %c49_i32, %4 : i32
    %c0_i32_1 = arith.constant 0 : i32
    %6 = tpu.memref_slice %arg2[%5, %c0_i32_1] : memref<56x128xf32, #tpu.memory_space<any>> -> memref<1x128xf32, #tpu.memory_space<any>>
    %c0_i32_2 = arith.constant 0 : i32
    %c0_i32_3 = arith.constant 0 : i32
    %7 = tpu.memref_slice %arg14[%c0_i32_2, %c0_i32_3] : memref<64x128xf32, #tpu.memory_space<vmem>> -> memref<1x128xf32, #tpu.memory_space<vmem>>
    tpu.enqueue_dma source(%6 : memref<1x128xf32, #tpu.memory_space<any>>) target(%7 : memref<1x128xf32, #tpu.memory_space<vmem>>) target_semaphore(%arg16 : memref<!tpu.dma_semaphore, #tpu.memory_space<semaphore_mem>>)
    %c8_i32_4 = arith.constant 8 : i32
    %8 = arith.muli %arg0, %c8_i32_4 : i32
    %c0_i32_5 = arith.constant 0 : i32
    %9 = arith.addi %8, %c0_i32_5 : i32
    %10 = arith.index_cast %9 : i32 to index
    %c1 = arith.constant 1 : index
    %11 = memref.load %arg1[%10, %c1] : memref<8x8xi32, #tpu.memory_space<smem>>
    %c0_i32_6 = arith.constant 0 : i32
    %c49_i32_7 = arith.constant 49 : i32
    %12 = arith.maxsi %c0_i32_6, %11 : i32
    %13 = arith.minsi %c49_i32_7, %12 : i32
    %c0_i32_8 = arith.constant 0 : i32
    %14 = tpu.memref_slice %arg2[%13, %c0_i32_8] : memref<56x128xf32, #tpu.memory_space<any>> -> memref<1x128xf32, #tpu.memory_space<any>>
    %c8_i32_9 = arith.constant 8 : i32
    %c0_i32_10 = arith.constant 0 : i32
    %15 = tpu.memref_slice %arg14[%c8_i32_9, %c0_i32_10] : memref<64x128xf32, #tpu.memory_space<vmem>> -> memref<1x128xf32, #tpu.memory_space<vmem>>
    tpu.enqueue_dma source(%14 : memref<1x128xf32, #tpu.memory_space<any>>) target(%15 : memref<1x128xf32, #tpu.memory_space<vmem>>) target_semaphore(%arg16 : memref<!tpu.dma_semaphore, #tpu.memory_space<semaphore_mem>>)
    %c8_i32_11 = arith.constant 8 : i32
    %16 = arith.muli %arg0, %c8_i32_11 : i32
    %c0_i32_12 = arith.constant 0 : i32
    %17 = arith.addi %16, %c0_i32_12 : i32
    %18 = arith.index_cast %17 : i32 to index
    %c2 = arith.constant 2 : index
    %19 = memref.load %arg1[%18, %c2] : memref<8x8xi32, #tpu.memory_space<smem>>
    %c0_i32_13 = arith.constant 0 : i32
    %c49_i32_14 = arith.constant 49 : i32
    %20 = arith.maxsi %c0_i32_13, %19 : i32
    %21 = arith.minsi %c49_i32_14, %20 : i32
    %c0_i32_15 = arith.constant 0 : i32
    %22 = tpu.memref_slice %arg2[%21, %c0_i32_15] : memref<56x128xf32, #tpu.memory_space<any>> -> memref<1x128xf32, #tpu.memory_space<any>>
    %c16_i32 = arith.constant 16 : i32
    %c0_i32_16 = arith.constant 0 : i32
    %23 = tpu.memref_slice %arg14[%c16_i32, %c0_i32_16] : memref<64x128xf32, #tpu.memory_space<vmem>> -> memref<1x128xf32, #tpu.memory_space<vmem>>
    tpu.enqueue_dma source(%22 : memref<1x128xf32, #tpu.memory_space<any>>) target(%23 : memref<1x128xf32, #tpu.memory_space<vmem>>) target_semaphore(%arg16 : memref<!tpu.dma_semaphore, #tpu.memory_space<semaphore_mem>>)
    %c8_i32_17 = arith.constant 8 : i32
    %24 = arith.muli %arg0, %c8_i32_17 : i32
    %c0_i32_18 = arith.constant 0 : i32
    %25 = arith.addi %24, %c0_i32_18 : i32
    %26 = arith.index_cast %25 : i32 to index
    %c3 = arith.constant 3 : index
    %27 = memref.load %arg1[%26, %c3] : memref<8x8xi32, #tpu.memory_space<smem>>
    %c0_i32_19 = arith.constant 0 : i32
    %c49_i32_20 = arith.constant 49 : i32
    %28 = arith.maxsi %c0_i32_19, %27 : i32
    %29 = arith.minsi %c49_i32_20, %28 : i32
    %c0_i32_21 = arith.constant 0 : i32
    %30 = tpu.memref_slice %arg2[%29, %c0_i32_21] : memref<56x128xf32, #tpu.memory_space<any>> -> memref<1x128xf32, #tpu.memory_space<any>>
    %c24_i32 = arith.constant 24 : i32
    %c0_i32_22 = arith.constant 0 : i32
    %31 = tpu.memref_slice %arg14[%c24_i32, %c0_i32_22] : memref<64x128xf32, #tpu.memory_space<vmem>> -> memref<1x128xf32, #tpu.memory_space<vmem>>
    tpu.enqueue_dma source(%30 : memref<1x128xf32, #tpu.memory_space<any>>) target(%31 : memref<1x128xf32, #tpu.memory_space<vmem>>) target_semaphore(%arg16 : memref<!tpu.dma_semaphore, #tpu.memory_space<semaphore_mem>>)
    %c8_i32_23 = arith.constant 8 : i32
    %32 = arith.muli %arg0, %c8_i32_23 : i32
    %c0_i32_24 = arith.constant 0 : i32
    %33 = arith.addi %32, %c0_i32_24 : i32
    %34 = arith.index_cast %33 : i32 to index
    %c4 = arith.constant 4 : index
    %35 = memref.load %arg1[%34, %c4] : memref<8x8xi32, #tpu.memory_space<smem>>
    %c0_i32_25 = arith.constant 0 : i32
    %c49_i32_26 = arith.constant 49 : i32
    %36 = arith.maxsi %c0_i32_25, %35 : i32
    %37 = arith.minsi %c49_i32_26, %36 : i32
    %c0_i32_27 = arith.constant 0 : i32
    %38 = tpu.memref_slice %arg2[%37, %c0_i32_27] : memref<56x128xf32, #tpu.memory_space<any>> -> memref<1x128xf32, #tpu.memory_space<any>>
    %c32_i32 = arith.constant 32 : i32
    %c0_i32_28 = arith.constant 0 : i32
    %39 = tpu.memref_slice %arg14[%c32_i32, %c0_i32_28] : memref<64x128xf32, #tpu.memory_space<vmem>> -> memref<1x128xf32, #tpu.memory_space<vmem>>
    tpu.enqueue_dma source(%38 : memref<1x128xf32, #tpu.memory_space<any>>) target(%39 : memref<1x128xf32, #tpu.memory_space<vmem>>) target_semaphore(%arg16 : memref<!tpu.dma_semaphore, #tpu.memory_space<semaphore_mem>>)
    %c8_i32_29 = arith.constant 8 : i32
    %40 = arith.muli %arg0, %c8_i32_29 : i32
    %c0_i32_30 = arith.constant 0 : i32
    %41 = arith.addi %40, %c0_i32_30 : i32
    %42 = arith.index_cast %41 : i32 to index
    %c5 = arith.constant 5 : index
    %43 = memref.load %arg1[%42, %c5] : memref<8x8xi32, #tpu.memory_space<smem>>
    %c0_i32_31 = arith.constant 0 : i32
    %c49_i32_32 = arith.constant 49 : i32
    %44 = arith.maxsi %c0_i32_31, %43 : i32
    %45 = arith.minsi %c49_i32_32, %44 : i32
    %c0_i32_33 = arith.constant 0 : i32
    %46 = tpu.memref_slice %arg2[%45, %c0_i32_33] : memref<56x128xf32, #tpu.memory_space<any>> -> memref<1x128xf32, #tpu.memory_space<any>>
    %c40_i32 = arith.constant 40 : i32
    %c0_i32_34 = arith.constant 0 : i32
    %47 = tpu.memref_slice %arg14[%c40_i32, %c0_i32_34] : memref<64x128xf32, #tpu.memory_space<vmem>> -> memref<1x128xf32, #tpu.memory_space<vmem>>
    tpu.enqueue_dma source(%46 : memref<1x128xf32, #tpu.memory_space<any>>) target(%47 : memref<1x128xf32, #tpu.memory_space<vmem>>) target_semaphore(%arg16 : memref<!tpu.dma_semaphore, #tpu.memory_space<semaphore_mem>>)
    %c8_i32_35 = arith.constant 8 : i32
    %48 = arith.muli %arg0, %c8_i32_35 : i32
    %c0_i32_36 = arith.constant 0 : i32
    %49 = arith.addi %48, %c0_i32_36 : i32
    %50 = arith.index_cast %49 : i32 to index
    %c6 = arith.constant 6 : index
    %51 = memref.load %arg1[%50, %c6] : memref<8x8xi32, #tpu.memory_space<smem>>
    %c0_i32_37 = arith.constant 0 : i32
    %c49_i32_38 = arith.constant 49 : i32
    %52 = arith.maxsi %c0_i32_37, %51 : i32
    %53 = arith.minsi %c49_i32_38, %52 : i32
    %c0_i32_39 = arith.constant 0 : i32
    %54 = tpu.memref_slice %arg2[%53, %c0_i32_39] : memref<56x128xf32, #tpu.memory_space<any>> -> memref<1x128xf32, #tpu.memory_space<any>>
    %c48_i32 = arith.constant 48 : i32
    %c0_i32_40 = arith.constant 0 : i32
    %55 = tpu.memref_slice %arg14[%c48_i32, %c0_i32_40] : memref<64x128xf32, #tpu.memory_space<vmem>> -> memref<1x128xf32, #tpu.memory_space<vmem>>
    tpu.enqueue_dma source(%54 : memref<1x128xf32, #tpu.memory_space<any>>) target(%55 : memref<1x128xf32, #tpu.memory_space<vmem>>) target_semaphore(%arg16 : memref<!tpu.dma_semaphore, #tpu.memory_space<semaphore_mem>>)
    %c8_i32_41 = arith.constant 8 : i32
    %56 = arith.muli %arg0, %c8_i32_41 : i32
    %c0_i32_42 = arith.constant 0 : i32
    %57 = arith.addi %56, %c0_i32_42 : i32
    %58 = arith.index_cast %57 : i32 to index
    %c7 = arith.constant 7 : index
    %59 = memref.load %arg1[%58, %c7] : memref<8x8xi32, #tpu.memory_space<smem>>
    %c0_i32_43 = arith.constant 0 : i32
    %c49_i32_44 = arith.constant 49 : i32
    %60 = arith.maxsi %c0_i32_43, %59 : i32
    %61 = arith.minsi %c49_i32_44, %60 : i32
    %c0_i32_45 = arith.constant 0 : i32
    %62 = tpu.memref_slice %arg2[%61, %c0_i32_45] : memref<56x128xf32, #tpu.memory_space<any>> -> memref<1x128xf32, #tpu.memory_space<any>>
    %c56_i32 = arith.constant 56 : i32
    %c0_i32_46 = arith.constant 0 : i32
    %63 = tpu.memref_slice %arg14[%c56_i32, %c0_i32_46] : memref<64x128xf32, #tpu.memory_space<vmem>> -> memref<1x128xf32, #tpu.memory_space<vmem>>
    tpu.enqueue_dma source(%62 : memref<1x128xf32, #tpu.memory_space<any>>) target(%63 : memref<1x128xf32, #tpu.memory_space<vmem>>) target_semaphore(%arg16 : memref<!tpu.dma_semaphore, #tpu.memory_space<semaphore_mem>>)
    %c8_i32_47 = arith.constant 8 : i32
    %64 = arith.muli %arg0, %c8_i32_47 : i32
    %c1_i32 = arith.constant 1 : i32
    %65 = arith.addi %64, %c1_i32 : i32
    %66 = arith.index_cast %65 : i32 to index
    %c0_48 = arith.constant 0 : index
    %67 = memref.load %arg1[%66, %c0_48] : memref<8x8xi32, #tpu.memory_space<smem>>
    %c0_i32_49 = arith.constant 0 : i32
    %c49_i32_50 = arith.constant 49 : i32
    %68 = arith.maxsi %c0_i32_49, %67 : i32
    %69 = arith.minsi %c49_i32_50, %68 : i32
    %c0_i32_51 = arith.constant 0 : i32
    %70 = tpu.memref_slice %arg2[%69, %c0_i32_51] : memref<56x128xf32, #tpu.memory_space<any>> -> memref<1x128xf32, #tpu.memory_space<any>>
    %c1_i32_52 = arith.constant 1 : i32
    %c0_i32_53 = arith.constant 0 : i32
    %71 = tpu.memref_slice %arg14[%c1_i32_52, %c0_i32_53] : memref<64x128xf32, #tpu.memory_space<vmem>> -> memref<1x128xf32, #tpu.memory_space<vmem>>
    tpu.enqueue_dma source(%70 : memref<1x128xf32, #tpu.memory_space<any>>) target(%71 : memref<1x128xf32, #tpu.memory_space<vmem>>) target_semaphore(%arg16 : memref<!tpu.dma_semaphore, #tpu.memory_space<semaphore_mem>>)
    %c8_i32_54 = arith.constant 8 : i32
    %72 = arith.muli %arg0, %c8_i32_54 : i32
    %c1_i32_55 = arith.constant 1 : i32
    %73 = arith.addi %72, %c1_i32_55 : i32
    %74 = arith.index_cast %73 : i32 to index
    %c1_56 = arith.constant 1 : index
    %75 = memref.load %arg1[%74, %c1_56] : memref<8x8xi32, #tpu.memory_space<smem>>
    %c0_i32_57 = arith.constant 0 : i32
    %c49_i32_58 = arith.constant 49 : i32
    %76 = arith.maxsi %c0_i32_57, %75 : i32
    %77 = arith.minsi %c49_i32_58, %76 : i32
    %c0_i32_59 = arith.constant 0 : i32
    %78 = tpu.memref_slice %arg2[%77, %c0_i32_59] : memref<56x128xf32, #tpu.memory_space<any>> -> memref<1x128xf32, #tpu.memory_space<any>>
    %c9_i32 = arith.constant 9 : i32
    %c0_i32_60 = arith.constant 0 : i32
    %79 = tpu.memref_slice %arg14[%c9_i32, %c0_i32_60] : memref<64x128xf32, #tpu.memory_space<vmem>> -> memref<1x128xf32, #tpu.memory_space<vmem>>
    tpu.enqueue_dma source(%78 : memref<1x128xf32, #tpu.memory_space<any>>) target(%79 : memref<1x128xf32, #tpu.memory_space<vmem>>) target_semaphore(%arg16 : memref<!tpu.dma_semaphore, #tpu.memory_space<semaphore_mem>>)
    %c8_i32_61 = arith.constant 8 : i32
    %80 = arith.muli %arg0, %c8_i32_61 : i32
    %c1_i32_62 = arith.constant 1 : i32
    %81 = arith.addi %80, %c1_i32_62 : i32
    %82 = arith.index_cast %81 : i32 to index
    %c2_63 = arith.constant 2 : index
    %83 = memref.load %arg1[%82, %c2_63] : memref<8x8xi32, #tpu.memory_space<smem>>
    %c0_i32_64 = arith.constant 0 : i32
    %c49_i32_65 = arith.constant 49 : i32
    %84 = arith.maxsi %c0_i32_64, %83 : i32
    %85 = arith.minsi %c49_i32_65, %84 : i32
    %c0_i32_66 = arith.constant 0 : i32
    %86 = tpu.memref_slice %arg2[%85, %c0_i32_66] : memref<56x128xf32, #tpu.memory_space<any>> -> memref<1x128xf32, #tpu.memory_space<any>>
    %c17_i32 = arith.constant 17 : i32
    %c0_i32_67 = arith.constant 0 : i32
    %87 = tpu.memref_slice %arg14[%c17_i32, %c0_i32_67] : memref<64x128xf32, #tpu.memory_space<vmem>> -> memref<1x128xf32, #tpu.memory_space<vmem>>
    tpu.enqueue_dma source(%86 : memref<1x128xf32, #tpu.memory_space<any>>) target(%87 : memref<1x128xf32, #tpu.memory_space<vmem>>) target_semaphore(%arg16 : memref<!tpu.dma_semaphore, #tpu.memory_space<semaphore_mem>>)
    %c8_i32_68 = arith.constant 8 : i32
    %88 = arith.muli %arg0, %c8_i32_68 : i32
    %c1_i32_69 = arith.constant 1 : i32
    %89 = arith.addi %88, %c1_i32_69 : i32
    %90 = arith.index_cast %89 : i32 to index
    %c3_70 = arith.constant 3 : index
    %91 = memref.load %arg1[%90, %c3_70] : memref<8x8xi32, #tpu.memory_space<smem>>
    %c0_i32_71 = arith.constant 0 : i32
    %c49_i32_72 = arith.constant 49 : i32
    %92 = arith.maxsi %c0_i32_71, %91 : i32
    %93 = arith.minsi %c49_i32_72, %92 : i32
    %c0_i32_73 = arith.constant 0 : i32
    %94 = tpu.memref_slice %arg2[%93, %c0_i32_73] : memref<56x128xf32, #tpu.memory_space<any>> -> memref<1x128xf32, #tpu.memory_space<any>>
    %c25_i32 = arith.constant 25 : i32
    %c0_i32_74 = arith.constant 0 : i32
    %95 = tpu.memref_slice %arg14[%c25_i32, %c0_i32_74] : memref<64x128xf32, #tpu.memory_space<vmem>> -> memref<1x128xf32, #tpu.memory_space<vmem>>
    tpu.enqueue_dma source(%94 : memref<1x128xf32, #tpu.memory_space<any>>) target(%95 : memref<1x128xf32, #tpu.memory_space<vmem>>) target_semaphore(%arg16 : memref<!tpu.dma_semaphore, #tpu.memory_space<semaphore_mem>>)
    %c8_i32_75 = arith.constant 8 : i32
    %96 = arith.muli %arg0, %c8_i32_75 : i32
    %c1_i32_76 = arith.constant 1 : i32
    %97 = arith.addi %96, %c1_i32_76 : i32
    %98 = arith.index_cast %97 : i32 to index
    %c4_77 = arith.constant 4 : index
    %99 = memref.load %arg1[%98, %c4_77] : memref<8x8xi32, #tpu.memory_space<smem>>
    %c0_i32_78 = arith.constant 0 : i32
    %c49_i32_79 = arith.constant 49 : i32
    %100 = arith.maxsi %c0_i32_78, %99 : i32
    %101 = arith.minsi %c49_i32_79, %100 : i32
    %c0_i32_80 = arith.constant 0 : i32
    %102 = tpu.memref_slice %arg2[%101, %c0_i32_80] : memref<56x128xf32, #tpu.memory_space<any>> -> memref<1x128xf32, #tpu.memory_space<any>>
    %c33_i32 = arith.constant 33 : i32
    %c0_i32_81 = arith.constant 0 : i32
    %103 = tpu.memref_slice %arg14[%c33_i32, %c0_i32_81] : memref<64x128xf32, #tpu.memory_space<vmem>> -> memref<1x128xf32, #tpu.memory_space<vmem>>
    tpu.enqueue_dma source(%102 : memref<1x128xf32, #tpu.memory_space<any>>) target(%103 : memref<1x128xf32, #tpu.memory_space<vmem>>) target_semaphore(%arg16 : memref<!tpu.dma_semaphore, #tpu.memory_space<semaphore_mem>>)
    %c8_i32_82 = arith.constant 8 : i32
    %104 = arith.muli %arg0, %c8_i32_82 : i32
    %c1_i32_83 = arith.constant 1 : i32
    %105 = arith.addi %104, %c1_i32_83 : i32
    %106 = arith.index_cast %105 : i32 to index
    %c5_84 = arith.constant 5 : index
    %107 = memref.load %arg1[%106, %c5_84] : memref<8x8xi32, #tpu.memory_space<smem>>
    %c0_i32_85 = arith.constant 0 : i32
    %c49_i32_86 = arith.constant 49 : i32
    %108 = arith.maxsi %c0_i32_85, %107 : i32
    %109 = arith.minsi %c49_i32_86, %108 : i32
    %c0_i32_87 = arith.constant 0 : i32
    %110 = tpu.memref_slice %arg2[%109, %c0_i32_87] : memref<56x128xf32, #tpu.memory_space<any>> -> memref<1x128xf32, #tpu.memory_space<any>>
    %c41_i32 = arith.constant 41 : i32
    %c0_i32_88 = arith.constant 0 : i32
    %111 = tpu.memref_slice %arg14[%c41_i32, %c0_i32_88] : memref<64x128xf32, #tpu.memory_space<vmem>> -> memref<1x128xf32, #tpu.memory_space<vmem>>
    tpu.enqueue_dma source(%110 : memref<1x128xf32, #tpu.memory_space<any>>) target(%111 : memref<1x128xf32, #tpu.memory_space<vmem>>) target_semaphore(%arg16 : memref<!tpu.dma_semaphore, #tpu.memory_space<semaphore_mem>>)
    %c8_i32_89 = arith.constant 8 : i32
    %112 = arith.muli %arg0, %c8_i32_89 : i32
    %c1_i32_90 = arith.constant 1 : i32
    %113 = arith.addi %112, %c1_i32_90 : i32
    %114 = arith.index_cast %113 : i32 to index
    %c6_91 = arith.constant 6 : index
    %115 = memref.load %arg1[%114, %c6_91] : memref<8x8xi32, #tpu.memory_space<smem>>
    %c0_i32_92 = arith.constant 0 : i32
    %c49_i32_93 = arith.constant 49 : i32
    %116 = arith.maxsi %c0_i32_92, %115 : i32
    %117 = arith.minsi %c49_i32_93, %116 : i32
    %c0_i32_94 = arith.constant 0 : i32
    %118 = tpu.memref_slice %arg2[%117, %c0_i32_94] : memref<56x128xf32, #tpu.memory_space<any>> -> memref<1x128xf32, #tpu.memory_space<any>>
    %c49_i32_95 = arith.constant 49 : i32
    %c0_i32_96 = arith.constant 0 : i32
    %119 = tpu.memref_slice %arg14[%c49_i32_95, %c0_i32_96] : memref<64x128xf32, #tpu.memory_space<vmem>> -> memref<1x128xf32, #tpu.memory_space<vmem>>
    tpu.enqueue_dma source(%118 : memref<1x128xf32, #tpu.memory_space<any>>) target(%119 : memref<1x128xf32, #tpu.memory_space<vmem>>) target_semaphore(%arg16 : memref<!tpu.dma_semaphore, #tpu.memory_space<semaphore_mem>>)
    %c8_i32_97 = arith.constant 8 : i32
    %120 = arith.muli %arg0, %c8_i32_97 : i32
    %c1_i32_98 = arith.constant 1 : i32
    %121 = arith.addi %120, %c1_i32_98 : i32
    %122 = arith.index_cast %121 : i32 to index
    %c7_99 = arith.constant 7 : index
    %123 = memref.load %arg1[%122, %c7_99] : memref<8x8xi32, #tpu.memory_space<smem>>
    %c0_i32_100 = arith.constant 0 : i32
    %c49_i32_101 = arith.constant 49 : i32
    %124 = arith.maxsi %c0_i32_100, %123 : i32
    %125 = arith.minsi %c49_i32_101, %124 : i32
    %c0_i32_102 = arith.constant 0 : i32
    %126 = tpu.memref_slice %arg2[%125, %c0_i32_102] : memref<56x128xf32, #tpu.memory_space<any>> -> memref<1x128xf32, #tpu.memory_space<any>>
    %c57_i32 = arith.constant 57 : i32
    %c0_i32_103 = arith.constant 0 : i32
    %127 = tpu.memref_slice %arg14[%c57_i32, %c0_i32_103] : memref<64x128xf32, #tpu.memory_space<vmem>> -> memref<1x128xf32, #tpu.memory_space<vmem>>
    tpu.enqueue_dma source(%126 : memref<1x128xf32, #tpu.memory_space<any>>) target(%127 : memref<1x128xf32, #tpu.memory_space<vmem>>) target_semaphore(%arg16 : memref<!tpu.dma_semaphore, #tpu.memory_space<semaphore_mem>>)
    %c8_i32_104 = arith.constant 8 : i32
    %128 = arith.muli %arg0, %c8_i32_104 : i32
    %c2_i32 = arith.constant 2 : i32
    %129 = arith.addi %128, %c2_i32 : i32
    %130 = arith.index_cast %129 : i32 to index
    %c0_105 = arith.constant 0 : index
    %131 = memref.load %arg1[%130, %c0_105] : memref<8x8xi32, #tpu.memory_space<smem>>
    %c0_i32_106 = arith.constant 0 : i32
    %c49_i32_107 = arith.constant 49 : i32
    %132 = arith.maxsi %c0_i32_106, %131 : i32
    %133 = arith.minsi %c49_i32_107, %132 : i32
    %c0_i32_108 = arith.constant 0 : i32
    %134 = tpu.memref_slice %arg2[%133, %c0_i32_108] : memref<56x128xf32, #tpu.memory_space<any>> -> memref<1x128xf32, #tpu.memory_space<any>>
    %c2_i32_109 = arith.constant 2 : i32
    %c0_i32_110 = arith.constant 0 : i32
    %135 = tpu.memref_slice %arg14[%c2_i32_109, %c0_i32_110] : memref<64x128xf32, #tpu.memory_space<vmem>> -> memref<1x128xf32, #tpu.memory_space<vmem>>
    tpu.enqueue_dma source(%134 : memref<1x128xf32, #tpu.memory_space<any>>) target(%135 : memref<1x128xf32, #tpu.memory_space<vmem>>) target_semaphore(%arg16 : memref<!tpu.dma_semaphore, #tpu.memory_space<semaphore_mem>>)
    %c8_i32_111 = arith.constant 8 : i32
    %136 = arith.muli %arg0, %c8_i32_111 : i32
    %c2_i32_112 = arith.constant 2 : i32
    %137 = arith.addi %136, %c2_i32_112 : i32
    %138 = arith.index_cast %137 : i32 to index
    %c1_113 = arith.constant 1 : index
    %139 = memref.load %arg1[%138, %c1_113] : memref<8x8xi32, #tpu.memory_space<smem>>
    %c0_i32_114 = arith.constant 0 : i32
    %c49_i32_115 = arith.constant 49 : i32
    %140 = arith.maxsi %c0_i32_114, %139 : i32
    %141 = arith.minsi %c49_i32_115, %140 : i32
    %c0_i32_116 = arith.constant 0 : i32
    %142 = tpu.memref_slice %arg2[%141, %c0_i32_116] : memref<56x128xf32, #tpu.memory_space<any>> -> memref<1x128xf32, #tpu.memory_space<any>>
    %c10_i32 = arith.constant 10 : i32
    %c0_i32_117 = arith.constant 0 : i32
    %143 = tpu.memref_slice %arg14[%c10_i32, %c0_i32_117] : memref<64x128xf32, #tpu.memory_space<vmem>> -> memref<1x128xf32, #tpu.memory_space<vmem>>
    tpu.enqueue_dma source(%142 : memref<1x128xf32, #tpu.memory_space<any>>) target(%143 : memref<1x128xf32, #tpu.memory_space<vmem>>) target_semaphore(%arg16 : memref<!tpu.dma_semaphore, #tpu.memory_space<semaphore_mem>>)
    %c8_i32_118 = arith.constant 8 : i32
    %144 = arith.muli %arg0, %c8_i32_118 : i32
    %c2_i32_119 = arith.constant 2 : i32
    %145 = arith.addi %144, %c2_i32_119 : i32
    %146 = arith.index_cast %145 : i32 to index
    %c2_120 = arith.constant 2 : index
    %147 = memref.load %arg1[%146, %c2_120] : memref<8x8xi32, #tpu.memory_space<smem>>
    %c0_i32_121 = arith.constant 0 : i32
    %c49_i32_122 = arith.constant 49 : i32
    %148 = arith.maxsi %c0_i32_121, %147 : i32
    %149 = arith.minsi %c49_i32_122, %148 : i32
    %c0_i32_123 = arith.constant 0 : i32
    %150 = tpu.memref_slice %arg2[%149, %c0_i32_123] : memref<56x128xf32, #tpu.memory_space<any>> -> memref<1x128xf32, #tpu.memory_space<any>>
    %c18_i32 = arith.constant 18 : i32
    %c0_i32_124 = arith.constant 0 : i32
    %151 = tpu.memref_slice %arg14[%c18_i32, %c0_i32_124] : memref<64x128xf32, #tpu.memory_space<vmem>> -> memref<1x128xf32, #tpu.memory_space<vmem>>
    tpu.enqueue_dma source(%150 : memref<1x128xf32, #tpu.memory_space<any>>) target(%151 : memref<1x128xf32, #tpu.memory_space<vmem>>) target_semaphore(%arg16 : memref<!tpu.dma_semaphore, #tpu.memory_space<semaphore_mem>>)
    %c8_i32_125 = arith.constant 8 : i32
    %152 = arith.muli %arg0, %c8_i32_125 : i32
    %c2_i32_126 = arith.constant 2 : i32
    %153 = arith.addi %152, %c2_i32_126 : i32
    %154 = arith.index_cast %153 : i32 to index
    %c3_127 = arith.constant 3 : index
    %155 = memref.load %arg1[%154, %c3_127] : memref<8x8xi32, #tpu.memory_space<smem>>
    %c0_i32_128 = arith.constant 0 : i32
    %c49_i32_129 = arith.constant 49 : i32
    %156 = arith.maxsi %c0_i32_128, %155 : i32
    %157 = arith.minsi %c49_i32_129, %156 : i32
    %c0_i32_130 = arith.constant 0 : i32
    %158 = tpu.memref_slice %arg2[%157, %c0_i32_130] : memref<56x128xf32, #tpu.memory_space<any>> -> memref<1x128xf32, #tpu.memory_space<any>>
    %c26_i32 = arith.constant 26 : i32
    %c0_i32_131 = arith.constant 0 : i32
    %159 = tpu.memref_slice %arg14[%c26_i32, %c0_i32_131] : memref<64x128xf32, #tpu.memory_space<vmem>> -> memref<1x128xf32, #tpu.memory_space<vmem>>
    tpu.enqueue_dma source(%158 : memref<1x128xf32, #tpu.memory_space<any>>) target(%159 : memref<1x128xf32, #tpu.memory_space<vmem>>) target_semaphore(%arg16 : memref<!tpu.dma_semaphore, #tpu.memory_space<semaphore_mem>>)
    %c8_i32_132 = arith.constant 8 : i32
    %160 = arith.muli %arg0, %c8_i32_132 : i32
    %c2_i32_133 = arith.constant 2 : i32
    %161 = arith.addi %160, %c2_i32_133 : i32
    %162 = arith.index_cast %161 : i32 to index
    %c4_134 = arith.constant 4 : index
    %163 = memref.load %arg1[%162, %c4_134] : memref<8x8xi32, #tpu.memory_space<smem>>
    %c0_i32_135 = arith.constant 0 : i32
    %c49_i32_136 = arith.constant 49 : i32
    %164 = arith.maxsi %c0_i32_135, %163 : i32
    %165 = arith.minsi %c49_i32_136, %164 : i32
    %c0_i32_137 = arith.constant 0 : i32
    %166 = tpu.memref_slice %arg2[%165, %c0_i32_137] : memref<56x128xf32, #tpu.memory_space<any>> -> memref<1x128xf32, #tpu.memory_space<any>>
    %c34_i32 = arith.constant 34 : i32
    %c0_i32_138 = arith.constant 0 : i32
    %167 = tpu.memref_slice %arg14[%c34_i32, %c0_i32_138] : memref<64x128xf32, #tpu.memory_space<vmem>> -> memref<1x128xf32, #tpu.memory_space<vmem>>
    tpu.enqueue_dma source(%166 : memref<1x128xf32, #tpu.memory_space<any>>) target(%167 : memref<1x128xf32, #tpu.memory_space<vmem>>) target_semaphore(%arg16 : memref<!tpu.dma_semaphore, #tpu.memory_space<semaphore_mem>>)
    %c8_i32_139 = arith.constant 8 : i32
    %168 = arith.muli %arg0, %c8_i32_139 : i32
    %c2_i32_140 = arith.constant 2 : i32
    %169 = arith.addi %168, %c2_i32_140 : i32
    %170 = arith.index_cast %169 : i32 to index
    %c5_141 = arith.constant 5 : index
    %171 = memref.load %arg1[%170, %c5_141] : memref<8x8xi32, #tpu.memory_space<smem>>
    %c0_i32_142 = arith.constant 0 : i32
    %c49_i32_143 = arith.constant 49 : i32
    %172 = arith.maxsi %c0_i32_142, %171 : i32
    %173 = arith.minsi %c49_i32_143, %172 : i32
    %c0_i32_144 = arith.constant 0 : i32
    %174 = tpu.memref_slice %arg2[%173, %c0_i32_144] : memref<56x128xf32, #tpu.memory_space<any>> -> memref<1x128xf32, #tpu.memory_space<any>>
    %c42_i32 = arith.constant 42 : i32
    %c0_i32_145 = arith.constant 0 : i32
    %175 = tpu.memref_slice %arg14[%c42_i32, %c0_i32_145] : memref<64x128xf32, #tpu.memory_space<vmem>> -> memref<1x128xf32, #tpu.memory_space<vmem>>
    tpu.enqueue_dma source(%174 : memref<1x128xf32, #tpu.memory_space<any>>) target(%175 : memref<1x128xf32, #tpu.memory_space<vmem>>) target_semaphore(%arg16 : memref<!tpu.dma_semaphore, #tpu.memory_space<semaphore_mem>>)
    %c8_i32_146 = arith.constant 8 : i32
    %176 = arith.muli %arg0, %c8_i32_146 : i32
    %c2_i32_147 = arith.constant 2 : i32
    %177 = arith.addi %176, %c2_i32_147 : i32
    %178 = arith.index_cast %177 : i32 to index
    %c6_148 = arith.constant 6 : index
    %179 = memref.load %arg1[%178, %c6_148] : memref<8x8xi32, #tpu.memory_space<smem>>
    %c0_i32_149 = arith.constant 0 : i32
    %c49_i32_150 = arith.constant 49 : i32
    %180 = arith.maxsi %c0_i32_149, %179 : i32
    %181 = arith.minsi %c49_i32_150, %180 : i32
    %c0_i32_151 = arith.constant 0 : i32
    %182 = tpu.memref_slice %arg2[%181, %c0_i32_151] : memref<56x128xf32, #tpu.memory_space<any>> -> memref<1x128xf32, #tpu.memory_space<any>>
    %c50_i32 = arith.constant 50 : i32
    %c0_i32_152 = arith.constant 0 : i32
    %183 = tpu.memref_slice %arg14[%c50_i32, %c0_i32_152] : memref<64x128xf32, #tpu.memory_space<vmem>> -> memref<1x128xf32, #tpu.memory_space<vmem>>
    tpu.enqueue_dma source(%182 : memref<1x128xf32, #tpu.memory_space<any>>) target(%183 : memref<1x128xf32, #tpu.memory_space<vmem>>) target_semaphore(%arg16 : memref<!tpu.dma_semaphore, #tpu.memory_space<semaphore_mem>>)
    %c8_i32_153 = arith.constant 8 : i32
    %184 = arith.muli %arg0, %c8_i32_153 : i32
    %c2_i32_154 = arith.constant 2 : i32
    %185 = arith.addi %184, %c2_i32_154 : i32
    %186 = arith.index_cast %185 : i32 to index
    %c7_155 = arith.constant 7 : index
    %187 = memref.load %arg1[%186, %c7_155] : memref<8x8xi32, #tpu.memory_space<smem>>
    %c0_i32_156 = arith.constant 0 : i32
    %c49_i32_157 = arith.constant 49 : i32
    %188 = arith.maxsi %c0_i32_156, %187 : i32
    %189 = arith.minsi %c49_i32_157, %188 : i32
    %c0_i32_158 = arith.constant 0 : i32
    %190 = tpu.memref_slice %arg2[%189, %c0_i32_158] : memref<56x128xf32, #tpu.memory_space<any>> -> memref<1x128xf32, #tpu.memory_space<any>>
    %c58_i32 = arith.constant 58 : i32
    %c0_i32_159 = arith.constant 0 : i32
    %191 = tpu.memref_slice %arg14[%c58_i32, %c0_i32_159] : memref<64x128xf32, #tpu.memory_space<vmem>> -> memref<1x128xf32, #tpu.memory_space<vmem>>
    tpu.enqueue_dma source(%190 : memref<1x128xf32, #tpu.memory_space<any>>) target(%191 : memref<1x128xf32, #tpu.memory_space<vmem>>) target_semaphore(%arg16 : memref<!tpu.dma_semaphore, #tpu.memory_space<semaphore_mem>>)
    %c8_i32_160 = arith.constant 8 : i32
    %192 = arith.muli %arg0, %c8_i32_160 : i32
    %c3_i32 = arith.constant 3 : i32
    %193 = arith.addi %192, %c3_i32 : i32
    %194 = arith.index_cast %193 : i32 to index
    %c0_161 = arith.constant 0 : index
    %195 = memref.load %arg1[%194, %c0_161] : memref<8x8xi32, #tpu.memory_space<smem>>
    %c0_i32_162 = arith.constant 0 : i32
    %c49_i32_163 = arith.constant 49 : i32
    %196 = arith.maxsi %c0_i32_162, %195 : i32
    %197 = arith.minsi %c49_i32_163, %196 : i32
    %c0_i32_164 = arith.constant 0 : i32
    %198 = tpu.memref_slice %arg2[%197, %c0_i32_164] : memref<56x128xf32, #tpu.memory_space<any>> -> memref<1x128xf32, #tpu.memory_space<any>>
    %c3_i32_165 = arith.constant 3 : i32
    %c0_i32_166 = arith.constant 0 : i32
    %199 = tpu.memref_slice %arg14[%c3_i32_165, %c0_i32_166] : memref<64x128xf32, #tpu.memory_space<vmem>> -> memref<1x128xf32, #tpu.memory_space<vmem>>
    tpu.enqueue_dma source(%198 : memref<1x128xf32, #tpu.memory_space<any>>) target(%199 : memref<1x128xf32, #tpu.memory_space<vmem>>) target_semaphore(%arg16 : memref<!tpu.dma_semaphore, #tpu.memory_space<semaphore_mem>>)
    %c8_i32_167 = arith.constant 8 : i32
    %200 = arith.muli %arg0, %c8_i32_167 : i32
    %c3_i32_168 = arith.constant 3 : i32
    %201 = arith.addi %200, %c3_i32_168 : i32
    %202 = arith.index_cast %201 : i32 to index
    %c1_169 = arith.constant 1 : index
    %203 = memref.load %arg1[%202, %c1_169] : memref<8x8xi32, #tpu.memory_space<smem>>
    %c0_i32_170 = arith.constant 0 : i32
    %c49_i32_171 = arith.constant 49 : i32
    %204 = arith.maxsi %c0_i32_170, %203 : i32
    %205 = arith.minsi %c49_i32_171, %204 : i32
    %c0_i32_172 = arith.constant 0 : i32
    %206 = tpu.memref_slice %arg2[%205, %c0_i32_172] : memref<56x128xf32, #tpu.memory_space<any>> -> memref<1x128xf32, #tpu.memory_space<any>>
    %c11_i32 = arith.constant 11 : i32
    %c0_i32_173 = arith.constant 0 : i32
    %207 = tpu.memref_slice %arg14[%c11_i32, %c0_i32_173] : memref<64x128xf32, #tpu.memory_space<vmem>> -> memref<1x128xf32, #tpu.memory_space<vmem>>
    tpu.enqueue_dma source(%206 : memref<1x128xf32, #tpu.memory_space<any>>) target(%207 : memref<1x128xf32, #tpu.memory_space<vmem>>) target_semaphore(%arg16 : memref<!tpu.dma_semaphore, #tpu.memory_space<semaphore_mem>>)
    %c8_i32_174 = arith.constant 8 : i32
    %208 = arith.muli %arg0, %c8_i32_174 : i32
    %c3_i32_175 = arith.constant 3 : i32
    %209 = arith.addi %208, %c3_i32_175 : i32
    %210 = arith.index_cast %209 : i32 to index
    %c2_176 = arith.constant 2 : index
    %211 = memref.load %arg1[%210, %c2_176] : memref<8x8xi32, #tpu.memory_space<smem>>
    %c0_i32_177 = arith.constant 0 : i32
    %c49_i32_178 = arith.constant 49 : i32
    %212 = arith.maxsi %c0_i32_177, %211 : i32
    %213 = arith.minsi %c49_i32_178, %212 : i32
    %c0_i32_179 = arith.constant 0 : i32
    %214 = tpu.memref_slice %arg2[%213, %c0_i32_179] : memref<56x128xf32, #tpu.memory_space<any>> -> memref<1x128xf32, #tpu.memory_space<any>>
    %c19_i32 = arith.constant 19 : i32
    %c0_i32_180 = arith.constant 0 : i32
    %215 = tpu.memref_slice %arg14[%c19_i32, %c0_i32_180] : memref<64x128xf32, #tpu.memory_space<vmem>> -> memref<1x128xf32, #tpu.memory_space<vmem>>
    tpu.enqueue_dma source(%214 : memref<1x128xf32, #tpu.memory_space<any>>) target(%215 : memref<1x128xf32, #tpu.memory_space<vmem>>) target_semaphore(%arg16 : memref<!tpu.dma_semaphore, #tpu.memory_space<semaphore_mem>>)
    %c8_i32_181 = arith.constant 8 : i32
    %216 = arith.muli %arg0, %c8_i32_181 : i32
    %c3_i32_182 = arith.constant 3 : i32
    %217 = arith.addi %216, %c3_i32_182 : i32
    %218 = arith.index_cast %217 : i32 to index
    %c3_183 = arith.constant 3 : index
    %219 = memref.load %arg1[%218, %c3_183] : memref<8x8xi32, #tpu.memory_space<smem>>
    %c0_i32_184 = arith.constant 0 : i32
    %c49_i32_185 = arith.constant 49 : i32
    %220 = arith.maxsi %c0_i32_184, %219 : i32
    %221 = arith.minsi %c49_i32_185, %220 : i32
    %c0_i32_186 = arith.constant 0 : i32
    %222 = tpu.memref_slice %arg2[%221, %c0_i32_186] : memref<56x128xf32, #tpu.memory_space<any>> -> memref<1x128xf32, #tpu.memory_space<any>>
    %c27_i32 = arith.constant 27 : i32
    %c0_i32_187 = arith.constant 0 : i32
    %223 = tpu.memref_slice %arg14[%c27_i32, %c0_i32_187] : memref<64x128xf32, #tpu.memory_space<vmem>> -> memref<1x128xf32, #tpu.memory_space<vmem>>
    tpu.enqueue_dma source(%222 : memref<1x128xf32, #tpu.memory_space<any>>) target(%223 : memref<1x128xf32, #tpu.memory_space<vmem>>) target_semaphore(%arg16 : memref<!tpu.dma_semaphore, #tpu.memory_space<semaphore_mem>>)
    %c8_i32_188 = arith.constant 8 : i32
    %224 = arith.muli %arg0, %c8_i32_188 : i32
    %c3_i32_189 = arith.constant 3 : i32
    %225 = arith.addi %224, %c3_i32_189 : i32
    %226 = arith.index_cast %225 : i32 to index
    %c4_190 = arith.constant 4 : index
    %227 = memref.load %arg1[%226, %c4_190] : memref<8x8xi32, #tpu.memory_space<smem>>
    %c0_i32_191 = arith.constant 0 : i32
    %c49_i32_192 = arith.constant 49 : i32
    %228 = arith.maxsi %c0_i32_191, %227 : i32
    %229 = arith.minsi %c49_i32_192, %228 : i32
    %c0_i32_193 = arith.constant 0 : i32
    %230 = tpu.memref_slice %arg2[%229, %c0_i32_193] : memref<56x128xf32, #tpu.memory_space<any>> -> memref<1x128xf32, #tpu.memory_space<any>>
    %c35_i32 = arith.constant 35 : i32
    %c0_i32_194 = arith.constant 0 : i32
    %231 = tpu.memref_slice %arg14[%c35_i32, %c0_i32_194] : memref<64x128xf32, #tpu.memory_space<vmem>> -> memref<1x128xf32, #tpu.memory_space<vmem>>
    tpu.enqueue_dma source(%230 : memref<1x128xf32, #tpu.memory_space<any>>) target(%231 : memref<1x128xf32, #tpu.memory_space<vmem>>) target_semaphore(%arg16 : memref<!tpu.dma_semaphore, #tpu.memory_space<semaphore_mem>>)
    %c8_i32_195 = arith.constant 8 : i32
    %232 = arith.muli %arg0, %c8_i32_195 : i32
    %c3_i32_196 = arith.constant 3 : i32
    %233 = arith.addi %232, %c3_i32_196 : i32
    %234 = arith.index_cast %233 : i32 to index
    %c5_197 = arith.constant 5 : index
    %235 = memref.load %arg1[%234, %c5_197] : memref<8x8xi32, #tpu.memory_space<smem>>
    %c0_i32_198 = arith.constant 0 : i32
    %c49_i32_199 = arith.constant 49 : i32
    %236 = arith.maxsi %c0_i32_198, %235 : i32
    %237 = arith.minsi %c49_i32_199, %236 : i32
    %c0_i32_200 = arith.constant 0 : i32
    %238 = tpu.memref_slice %arg2[%237, %c0_i32_200] : memref<56x128xf32, #tpu.memory_space<any>> -> memref<1x128xf32, #tpu.memory_space<any>>
    %c43_i32 = arith.constant 43 : i32
    %c0_i32_201 = arith.constant 0 : i32
    %239 = tpu.memref_slice %arg14[%c43_i32, %c0_i32_201] : memref<64x128xf32, #tpu.memory_space<vmem>> -> memref<1x128xf32, #tpu.memory_space<vmem>>
    tpu.enqueue_dma source(%238 : memref<1x128xf32, #tpu.memory_space<any>>) target(%239 : memref<1x128xf32, #tpu.memory_space<vmem>>) target_semaphore(%arg16 : memref<!tpu.dma_semaphore, #tpu.memory_space<semaphore_mem>>)
    %c8_i32_202 = arith.constant 8 : i32
    %240 = arith.muli %arg0, %c8_i32_202 : i32
    %c3_i32_203 = arith.constant 3 : i32
    %241 = arith.addi %240, %c3_i32_203 : i32
    %242 = arith.index_cast %241 : i32 to index
    %c6_204 = arith.constant 6 : index
    %243 = memref.load %arg1[%242, %c6_204] : memref<8x8xi32, #tpu.memory_space<smem>>
    %c0_i32_205 = arith.constant 0 : i32
    %c49_i32_206 = arith.constant 49 : i32
    %244 = arith.maxsi %c0_i32_205, %243 : i32
    %245 = arith.minsi %c49_i32_206, %244 : i32
    %c0_i32_207 = arith.constant 0 : i32
    %246 = tpu.memref_slice %arg2[%245, %c0_i32_207] : memref<56x128xf32, #tpu.memory_space<any>> -> memref<1x128xf32, #tpu.memory_space<any>>
    %c51_i32 = arith.constant 51 : i32
    %c0_i32_208 = arith.constant 0 : i32
    %247 = tpu.memref_slice %arg14[%c51_i32, %c0_i32_208] : memref<64x128xf32, #tpu.memory_space<vmem>> -> memref<1x128xf32, #tpu.memory_space<vmem>>
    tpu.enqueue_dma source(%246 : memref<1x128xf32, #tpu.memory_space<any>>) target(%247 : memref<1x128xf32, #tpu.memory_space<vmem>>) target_semaphore(%arg16 : memref<!tpu.dma_semaphore, #tpu.memory_space<semaphore_mem>>)
    %c8_i32_209 = arith.constant 8 : i32
    %248 = arith.muli %arg0, %c8_i32_209 : i32
    %c3_i32_210 = arith.constant 3 : i32
    %249 = arith.addi %248, %c3_i32_210 : i32
    %250 = arith.index_cast %249 : i32 to index
    %c7_211 = arith.constant 7 : index
    %251 = memref.load %arg1[%250, %c7_211] : memref<8x8xi32, #tpu.memory_space<smem>>
    %c0_i32_212 = arith.constant 0 : i32
    %c49_i32_213 = arith.constant 49 : i32
    %252 = arith.maxsi %c0_i32_212, %251 : i32
    %253 = arith.minsi %c49_i32_213, %252 : i32
    %c0_i32_214 = arith.constant 0 : i32
    %254 = tpu.memref_slice %arg2[%253, %c0_i32_214] : memref<56x128xf32, #tpu.memory_space<any>> -> memref<1x128xf32, #tpu.memory_space<any>>
    %c59_i32 = arith.constant 59 : i32
    %c0_i32_215 = arith.constant 0 : i32
    %255 = tpu.memref_slice %arg14[%c59_i32, %c0_i32_215] : memref<64x128xf32, #tpu.memory_space<vmem>> -> memref<1x128xf32, #tpu.memory_space<vmem>>
    tpu.enqueue_dma source(%254 : memref<1x128xf32, #tpu.memory_space<any>>) target(%255 : memref<1x128xf32, #tpu.memory_space<vmem>>) target_semaphore(%arg16 : memref<!tpu.dma_semaphore, #tpu.memory_space<semaphore_mem>>)
    %c8_i32_216 = arith.constant 8 : i32
    %256 = arith.muli %arg0, %c8_i32_216 : i32
    %c4_i32 = arith.constant 4 : i32
    %257 = arith.addi %256, %c4_i32 : i32
    %258 = arith.index_cast %257 : i32 to index
    %c0_217 = arith.constant 0 : index
    %259 = memref.load %arg1[%258, %c0_217] : memref<8x8xi32, #tpu.memory_space<smem>>
    %c0_i32_218 = arith.constant 0 : i32
    %c49_i32_219 = arith.constant 49 : i32
    %260 = arith.maxsi %c0_i32_218, %259 : i32
    %261 = arith.minsi %c49_i32_219, %260 : i32
    %c0_i32_220 = arith.constant 0 : i32
    %262 = tpu.memref_slice %arg2[%261, %c0_i32_220] : memref<56x128xf32, #tpu.memory_space<any>> -> memref<1x128xf32, #tpu.memory_space<any>>
    %c4_i32_221 = arith.constant 4 : i32
    %c0_i32_222 = arith.constant 0 : i32
    %263 = tpu.memref_slice %arg14[%c4_i32_221, %c0_i32_222] : memref<64x128xf32, #tpu.memory_space<vmem>> -> memref<1x128xf32, #tpu.memory_space<vmem>>
    tpu.enqueue_dma source(%262 : memref<1x128xf32, #tpu.memory_space<any>>) target(%263 : memref<1x128xf32, #tpu.memory_space<vmem>>) target_semaphore(%arg16 : memref<!tpu.dma_semaphore, #tpu.memory_space<semaphore_mem>>)
    %c8_i32_223 = arith.constant 8 : i32
    %264 = arith.muli %arg0, %c8_i32_223 : i32
    %c4_i32_224 = arith.constant 4 : i32
    %265 = arith.addi %264, %c4_i32_224 : i32
    %266 = arith.index_cast %265 : i32 to index
    %c1_225 = arith.constant 1 : index
    %267 = memref.load %arg1[%266, %c1_225] : memref<8x8xi32, #tpu.memory_space<smem>>
    %c0_i32_226 = arith.constant 0 : i32
    %c49_i32_227 = arith.constant 49 : i32
    %268 = arith.maxsi %c0_i32_226, %267 : i32
    %269 = arith.minsi %c49_i32_227, %268 : i32
    %c0_i32_228 = arith.constant 0 : i32
    %270 = tpu.memref_slice %arg2[%269, %c0_i32_228] : memref<56x128xf32, #tpu.memory_space<any>> -> memref<1x128xf32, #tpu.memory_space<any>>
    %c12_i32 = arith.constant 12 : i32
    %c0_i32_229 = arith.constant 0 : i32
    %271 = tpu.memref_slice %arg14[%c12_i32, %c0_i32_229] : memref<64x128xf32, #tpu.memory_space<vmem>> -> memref<1x128xf32, #tpu.memory_space<vmem>>
    tpu.enqueue_dma source(%270 : memref<1x128xf32, #tpu.memory_space<any>>) target(%271 : memref<1x128xf32, #tpu.memory_space<vmem>>) target_semaphore(%arg16 : memref<!tpu.dma_semaphore, #tpu.memory_space<semaphore_mem>>)
    %c8_i32_230 = arith.constant 8 : i32
    %272 = arith.muli %arg0, %c8_i32_230 : i32
    %c4_i32_231 = arith.constant 4 : i32
    %273 = arith.addi %272, %c4_i32_231 : i32
    %274 = arith.index_cast %273 : i32 to index
    %c2_232 = arith.constant 2 : index
    %275 = memref.load %arg1[%274, %c2_232] : memref<8x8xi32, #tpu.memory_space<smem>>
    %c0_i32_233 = arith.constant 0 : i32
    %c49_i32_234 = arith.constant 49 : i32
    %276 = arith.maxsi %c0_i32_233, %275 : i32
    %277 = arith.minsi %c49_i32_234, %276 : i32
    %c0_i32_235 = arith.constant 0 : i32
    %278 = tpu.memref_slice %arg2[%277, %c0_i32_235] : memref<56x128xf32, #tpu.memory_space<any>> -> memref<1x128xf32, #tpu.memory_space<any>>
    %c20_i32 = arith.constant 20 : i32
    %c0_i32_236 = arith.constant 0 : i32
    %279 = tpu.memref_slice %arg14[%c20_i32, %c0_i32_236] : memref<64x128xf32, #tpu.memory_space<vmem>> -> memref<1x128xf32, #tpu.memory_space<vmem>>
    tpu.enqueue_dma source(%278 : memref<1x128xf32, #tpu.memory_space<any>>) target(%279 : memref<1x128xf32, #tpu.memory_space<vmem>>) target_semaphore(%arg16 : memref<!tpu.dma_semaphore, #tpu.memory_space<semaphore_mem>>)
    %c8_i32_237 = arith.constant 8 : i32
    %280 = arith.muli %arg0, %c8_i32_237 : i32
    %c4_i32_238 = arith.constant 4 : i32
    %281 = arith.addi %280, %c4_i32_238 : i32
    %282 = arith.index_cast %281 : i32 to index
    %c3_239 = arith.constant 3 : index
    %283 = memref.load %arg1[%282, %c3_239] : memref<8x8xi32, #tpu.memory_space<smem>>
    %c0_i32_240 = arith.constant 0 : i32
    %c49_i32_241 = arith.constant 49 : i32
    %284 = arith.maxsi %c0_i32_240, %283 : i32
    %285 = arith.minsi %c49_i32_241, %284 : i32
    %c0_i32_242 = arith.constant 0 : i32
    %286 = tpu.memref_slice %arg2[%285, %c0_i32_242] : memref<56x128xf32, #tpu.memory_space<any>> -> memref<1x128xf32, #tpu.memory_space<any>>
    %c28_i32 = arith.constant 28 : i32
    %c0_i32_243 = arith.constant 0 : i32
    %287 = tpu.memref_slice %arg14[%c28_i32, %c0_i32_243] : memref<64x128xf32, #tpu.memory_space<vmem>> -> memref<1x128xf32, #tpu.memory_space<vmem>>
    tpu.enqueue_dma source(%286 : memref<1x128xf32, #tpu.memory_space<any>>) target(%287 : memref<1x128xf32, #tpu.memory_space<vmem>>) target_semaphore(%arg16 : memref<!tpu.dma_semaphore, #tpu.memory_space<semaphore_mem>>)
    %c8_i32_244 = arith.constant 8 : i32
    %288 = arith.muli %arg0, %c8_i32_244 : i32
    %c4_i32_245 = arith.constant 4 : i32
    %289 = arith.addi %288, %c4_i32_245 : i32
    %290 = arith.index_cast %289 : i32 to index
    %c4_246 = arith.constant 4 : index
    %291 = memref.load %arg1[%290, %c4_246] : memref<8x8xi32, #tpu.memory_space<smem>>
    %c0_i32_247 = arith.constant 0 : i32
    %c49_i32_248 = arith.constant 49 : i32
    %292 = arith.maxsi %c0_i32_247, %291 : i32
    %293 = arith.minsi %c49_i32_248, %292 : i32
    %c0_i32_249 = arith.constant 0 : i32
    %294 = tpu.memref_slice %arg2[%293, %c0_i32_249] : memref<56x128xf32, #tpu.memory_space<any>> -> memref<1x128xf32, #tpu.memory_space<any>>
    %c36_i32 = arith.constant 36 : i32
    %c0_i32_250 = arith.constant 0 : i32
    %295 = tpu.memref_slice %arg14[%c36_i32, %c0_i32_250] : memref<64x128xf32, #tpu.memory_space<vmem>> -> memref<1x128xf32, #tpu.memory_space<vmem>>
    tpu.enqueue_dma source(%294 : memref<1x128xf32, #tpu.memory_space<any>>) target(%295 : memref<1x128xf32, #tpu.memory_space<vmem>>) target_semaphore(%arg16 : memref<!tpu.dma_semaphore, #tpu.memory_space<semaphore_mem>>)
    %c8_i32_251 = arith.constant 8 : i32
    %296 = arith.muli %arg0, %c8_i32_251 : i32
    %c4_i32_252 = arith.constant 4 : i32
    %297 = arith.addi %296, %c4_i32_252 : i32
    %298 = arith.index_cast %297 : i32 to index
    %c5_253 = arith.constant 5 : index
    %299 = memref.load %arg1[%298, %c5_253] : memref<8x8xi32, #tpu.memory_space<smem>>
    %c0_i32_254 = arith.constant 0 : i32
    %c49_i32_255 = arith.constant 49 : i32
    %300 = arith.maxsi %c0_i32_254, %299 : i32
    %301 = arith.minsi %c49_i32_255, %300 : i32
    %c0_i32_256 = arith.constant 0 : i32
    %302 = tpu.memref_slice %arg2[%301, %c0_i32_256] : memref<56x128xf32, #tpu.memory_space<any>> -> memref<1x128xf32, #tpu.memory_space<any>>
    %c44_i32 = arith.constant 44 : i32
    %c0_i32_257 = arith.constant 0 : i32
    %303 = tpu.memref_slice %arg14[%c44_i32, %c0_i32_257] : memref<64x128xf32, #tpu.memory_space<vmem>> -> memref<1x128xf32, #tpu.memory_space<vmem>>
    tpu.enqueue_dma source(%302 : memref<1x128xf32, #tpu.memory_space<any>>) target(%303 : memref<1x128xf32, #tpu.memory_space<vmem>>) target_semaphore(%arg16 : memref<!tpu.dma_semaphore, #tpu.memory_space<semaphore_mem>>)
    %c8_i32_258 = arith.constant 8 : i32
    %304 = arith.muli %arg0, %c8_i32_258 : i32
    %c4_i32_259 = arith.constant 4 : i32
    %305 = arith.addi %304, %c4_i32_259 : i32
    %306 = arith.index_cast %305 : i32 to index
    %c6_260 = arith.constant 6 : index
    %307 = memref.load %arg1[%306, %c6_260] : memref<8x8xi32, #tpu.memory_space<smem>>
    %c0_i32_261 = arith.constant 0 : i32
    %c49_i32_262 = arith.constant 49 : i32
    %308 = arith.maxsi %c0_i32_261, %307 : i32
    %309 = arith.minsi %c49_i32_262, %308 : i32
    %c0_i32_263 = arith.constant 0 : i32
    %310 = tpu.memref_slice %arg2[%309, %c0_i32_263] : memref<56x128xf32, #tpu.memory_space<any>> -> memref<1x128xf32, #tpu.memory_space<any>>
    %c52_i32 = arith.constant 52 : i32
    %c0_i32_264 = arith.constant 0 : i32
    %311 = tpu.memref_slice %arg14[%c52_i32, %c0_i32_264] : memref<64x128xf32, #tpu.memory_space<vmem>> -> memref<1x128xf32, #tpu.memory_space<vmem>>
    tpu.enqueue_dma source(%310 : memref<1x128xf32, #tpu.memory_space<any>>) target(%311 : memref<1x128xf32, #tpu.memory_space<vmem>>) target_semaphore(%arg16 : memref<!tpu.dma_semaphore, #tpu.memory_space<semaphore_mem>>)
    %c8_i32_265 = arith.constant 8 : i32
    %312 = arith.muli %arg0, %c8_i32_265 : i32
    %c4_i32_266 = arith.constant 4 : i32
    %313 = arith.addi %312, %c4_i32_266 : i32
    %314 = arith.index_cast %313 : i32 to index
    %c7_267 = arith.constant 7 : index
    %315 = memref.load %arg1[%314, %c7_267] : memref<8x8xi32, #tpu.memory_space<smem>>
    %c0_i32_268 = arith.constant 0 : i32
    %c49_i32_269 = arith.constant 49 : i32
    %316 = arith.maxsi %c0_i32_268, %315 : i32
    %317 = arith.minsi %c49_i32_269, %316 : i32
    %c0_i32_270 = arith.constant 0 : i32
    %318 = tpu.memref_slice %arg2[%317, %c0_i32_270] : memref<56x128xf32, #tpu.memory_space<any>> -> memref<1x128xf32, #tpu.memory_space<any>>
    %c60_i32 = arith.constant 60 : i32
    %c0_i32_271 = arith.constant 0 : i32
    %319 = tpu.memref_slice %arg14[%c60_i32, %c0_i32_271] : memref<64x128xf32, #tpu.memory_space<vmem>> -> memref<1x128xf32, #tpu.memory_space<vmem>>
    tpu.enqueue_dma source(%318 : memref<1x128xf32, #tpu.memory_space<any>>) target(%319 : memref<1x128xf32, #tpu.memory_space<vmem>>) target_semaphore(%arg16 : memref<!tpu.dma_semaphore, #tpu.memory_space<semaphore_mem>>)
    %c8_i32_272 = arith.constant 8 : i32
    %320 = arith.muli %arg0, %c8_i32_272 : i32
    %c5_i32 = arith.constant 5 : i32
    %321 = arith.addi %320, %c5_i32 : i32
    %322 = arith.index_cast %321 : i32 to index
    %c0_273 = arith.constant 0 : index
    %323 = memref.load %arg1[%322, %c0_273] : memref<8x8xi32, #tpu.memory_space<smem>>
    %c0_i32_274 = arith.constant 0 : i32
    %c49_i32_275 = arith.constant 49 : i32
    %324 = arith.maxsi %c0_i32_274, %323 : i32
    %325 = arith.minsi %c49_i32_275, %324 : i32
    %c0_i32_276 = arith.constant 0 : i32
    %326 = tpu.memref_slice %arg2[%325, %c0_i32_276] : memref<56x128xf32, #tpu.memory_space<any>> -> memref<1x128xf32, #tpu.memory_space<any>>
    %c5_i32_277 = arith.constant 5 : i32
    %c0_i32_278 = arith.constant 0 : i32
    %327 = tpu.memref_slice %arg14[%c5_i32_277, %c0_i32_278] : memref<64x128xf32, #tpu.memory_space<vmem>> -> memref<1x128xf32, #tpu.memory_space<vmem>>
    tpu.enqueue_dma source(%326 : memref<1x128xf32, #tpu.memory_space<any>>) target(%327 : memref<1x128xf32, #tpu.memory_space<vmem>>) target_semaphore(%arg16 : memref<!tpu.dma_semaphore, #tpu.memory_space<semaphore_mem>>)
    %c8_i32_279 = arith.constant 8 : i32
    %328 = arith.muli %arg0, %c8_i32_279 : i32
    %c5_i32_280 = arith.constant 5 : i32
    %329 = arith.addi %328, %c5_i32_280 : i32
    %330 = arith.index_cast %329 : i32 to index
    %c1_281 = arith.constant 1 : index
    %331 = memref.load %arg1[%330, %c1_281] : memref<8x8xi32, #tpu.memory_space<smem>>
    %c0_i32_282 = arith.constant 0 : i32
    %c49_i32_283 = arith.constant 49 : i32
    %332 = arith.maxsi %c0_i32_282, %331 : i32
    %333 = arith.minsi %c49_i32_283, %332 : i32
    %c0_i32_284 = arith.constant 0 : i32
    %334 = tpu.memref_slice %arg2[%333, %c0_i32_284] : memref<56x128xf32, #tpu.memory_space<any>> -> memref<1x128xf32, #tpu.memory_space<any>>
    %c13_i32 = arith.constant 13 : i32
    %c0_i32_285 = arith.constant 0 : i32
    %335 = tpu.memref_slice %arg14[%c13_i32, %c0_i32_285] : memref<64x128xf32, #tpu.memory_space<vmem>> -> memref<1x128xf32, #tpu.memory_space<vmem>>
    tpu.enqueue_dma source(%334 : memref<1x128xf32, #tpu.memory_space<any>>) target(%335 : memref<1x128xf32, #tpu.memory_space<vmem>>) target_semaphore(%arg16 : memref<!tpu.dma_semaphore, #tpu.memory_space<semaphore_mem>>)
    %c8_i32_286 = arith.constant 8 : i32
    %336 = arith.muli %arg0, %c8_i32_286 : i32
    %c5_i32_287 = arith.constant 5 : i32
    %337 = arith.addi %336, %c5_i32_287 : i32
    %338 = arith.index_cast %337 : i32 to index
    %c2_288 = arith.constant 2 : index
    %339 = memref.load %arg1[%338, %c2_288] : memref<8x8xi32, #tpu.memory_space<smem>>
    %c0_i32_289 = arith.constant 0 : i32
    %c49_i32_290 = arith.constant 49 : i32
    %340 = arith.maxsi %c0_i32_289, %339 : i32
    %341 = arith.minsi %c49_i32_290, %340 : i32
    %c0_i32_291 = arith.constant 0 : i32
    %342 = tpu.memref_slice %arg2[%341, %c0_i32_291] : memref<56x128xf32, #tpu.memory_space<any>> -> memref<1x128xf32, #tpu.memory_space<any>>
    %c21_i32 = arith.constant 21 : i32
    %c0_i32_292 = arith.constant 0 : i32
    %343 = tpu.memref_slice %arg14[%c21_i32, %c0_i32_292] : memref<64x128xf32, #tpu.memory_space<vmem>> -> memref<1x128xf32, #tpu.memory_space<vmem>>
    tpu.enqueue_dma source(%342 : memref<1x128xf32, #tpu.memory_space<any>>) target(%343 : memref<1x128xf32, #tpu.memory_space<vmem>>) target_semaphore(%arg16 : memref<!tpu.dma_semaphore, #tpu.memory_space<semaphore_mem>>)
    %c8_i32_293 = arith.constant 8 : i32
    %344 = arith.muli %arg0, %c8_i32_293 : i32
    %c5_i32_294 = arith.constant 5 : i32
    %345 = arith.addi %344, %c5_i32_294 : i32
    %346 = arith.index_cast %345 : i32 to index
    %c3_295 = arith.constant 3 : index
    %347 = memref.load %arg1[%346, %c3_295] : memref<8x8xi32, #tpu.memory_space<smem>>
    %c0_i32_296 = arith.constant 0 : i32
    %c49_i32_297 = arith.constant 49 : i32
    %348 = arith.maxsi %c0_i32_296, %347 : i32
    %349 = arith.minsi %c49_i32_297, %348 : i32
    %c0_i32_298 = arith.constant 0 : i32
    %350 = tpu.memref_slice %arg2[%349, %c0_i32_298] : memref<56x128xf32, #tpu.memory_space<any>> -> memref<1x128xf32, #tpu.memory_space<any>>
    %c29_i32 = arith.constant 29 : i32
    %c0_i32_299 = arith.constant 0 : i32
    %351 = tpu.memref_slice %arg14[%c29_i32, %c0_i32_299] : memref<64x128xf32, #tpu.memory_space<vmem>> -> memref<1x128xf32, #tpu.memory_space<vmem>>
    tpu.enqueue_dma source(%350 : memref<1x128xf32, #tpu.memory_space<any>>) target(%351 : memref<1x128xf32, #tpu.memory_space<vmem>>) target_semaphore(%arg16 : memref<!tpu.dma_semaphore, #tpu.memory_space<semaphore_mem>>)
    %c8_i32_300 = arith.constant 8 : i32
    %352 = arith.muli %arg0, %c8_i32_300 : i32
    %c5_i32_301 = arith.constant 5 : i32
    %353 = arith.addi %352, %c5_i32_301 : i32
    %354 = arith.index_cast %353 : i32 to index
    %c4_302 = arith.constant 4 : index
    %355 = memref.load %arg1[%354, %c4_302] : memref<8x8xi32, #tpu.memory_space<smem>>
    %c0_i32_303 = arith.constant 0 : i32
    %c49_i32_304 = arith.constant 49 : i32
    %356 = arith.maxsi %c0_i32_303, %355 : i32
    %357 = arith.minsi %c49_i32_304, %356 : i32
    %c0_i32_305 = arith.constant 0 : i32
    %358 = tpu.memref_slice %arg2[%357, %c0_i32_305] : memref<56x128xf32, #tpu.memory_space<any>> -> memref<1x128xf32, #tpu.memory_space<any>>
    %c37_i32 = arith.constant 37 : i32
    %c0_i32_306 = arith.constant 0 : i32
    %359 = tpu.memref_slice %arg14[%c37_i32, %c0_i32_306] : memref<64x128xf32, #tpu.memory_space<vmem>> -> memref<1x128xf32, #tpu.memory_space<vmem>>
    tpu.enqueue_dma source(%358 : memref<1x128xf32, #tpu.memory_space<any>>) target(%359 : memref<1x128xf32, #tpu.memory_space<vmem>>) target_semaphore(%arg16 : memref<!tpu.dma_semaphore, #tpu.memory_space<semaphore_mem>>)
    %c8_i32_307 = arith.constant 8 : i32
    %360 = arith.muli %arg0, %c8_i32_307 : i32
    %c5_i32_308 = arith.constant 5 : i32
    %361 = arith.addi %360, %c5_i32_308 : i32
    %362 = arith.index_cast %361 : i32 to index
    %c5_309 = arith.constant 5 : index
    %363 = memref.load %arg1[%362, %c5_309] : memref<8x8xi32, #tpu.memory_space<smem>>
    %c0_i32_310 = arith.constant 0 : i32
    %c49_i32_311 = arith.constant 49 : i32
    %364 = arith.maxsi %c0_i32_310, %363 : i32
    %365 = arith.minsi %c49_i32_311, %364 : i32
    %c0_i32_312 = arith.constant 0 : i32
    %366 = tpu.memref_slice %arg2[%365, %c0_i32_312] : memref<56x128xf32, #tpu.memory_space<any>> -> memref<1x128xf32, #tpu.memory_space<any>>
    %c45_i32 = arith.constant 45 : i32
    %c0_i32_313 = arith.constant 0 : i32
    %367 = tpu.memref_slice %arg14[%c45_i32, %c0_i32_313] : memref<64x128xf32, #tpu.memory_space<vmem>> -> memref<1x128xf32, #tpu.memory_space<vmem>>
    tpu.enqueue_dma source(%366 : memref<1x128xf32, #tpu.memory_space<any>>) target(%367 : memref<1x128xf32, #tpu.memory_space<vmem>>) target_semaphore(%arg16 : memref<!tpu.dma_semaphore, #tpu.memory_space<semaphore_mem>>)
    %c8_i32_314 = arith.constant 8 : i32
    %368 = arith.muli %arg0, %c8_i32_314 : i32
    %c5_i32_315 = arith.constant 5 : i32
    %369 = arith.addi %368, %c5_i32_315 : i32
    %370 = arith.index_cast %369 : i32 to index
    %c6_316 = arith.constant 6 : index
    %371 = memref.load %arg1[%370, %c6_316] : memref<8x8xi32, #tpu.memory_space<smem>>
    %c0_i32_317 = arith.constant 0 : i32
    %c49_i32_318 = arith.constant 49 : i32
    %372 = arith.maxsi %c0_i32_317, %371 : i32
    %373 = arith.minsi %c49_i32_318, %372 : i32
    %c0_i32_319 = arith.constant 0 : i32
    %374 = tpu.memref_slice %arg2[%373, %c0_i32_319] : memref<56x128xf32, #tpu.memory_space<any>> -> memref<1x128xf32, #tpu.memory_space<any>>
    %c53_i32 = arith.constant 53 : i32
    %c0_i32_320 = arith.constant 0 : i32
    %375 = tpu.memref_slice %arg14[%c53_i32, %c0_i32_320] : memref<64x128xf32, #tpu.memory_space<vmem>> -> memref<1x128xf32, #tpu.memory_space<vmem>>
    tpu.enqueue_dma source(%374 : memref<1x128xf32, #tpu.memory_space<any>>) target(%375 : memref<1x128xf32, #tpu.memory_space<vmem>>) target_semaphore(%arg16 : memref<!tpu.dma_semaphore, #tpu.memory_space<semaphore_mem>>)
    %c8_i32_321 = arith.constant 8 : i32
    %376 = arith.muli %arg0, %c8_i32_321 : i32
    %c5_i32_322 = arith.constant 5 : i32
    %377 = arith.addi %376, %c5_i32_322 : i32
    %378 = arith.index_cast %377 : i32 to index
    %c7_323 = arith.constant 7 : index
    %379 = memref.load %arg1[%378, %c7_323] : memref<8x8xi32, #tpu.memory_space<smem>>
    %c0_i32_324 = arith.constant 0 : i32
    %c49_i32_325 = arith.constant 49 : i32
    %380 = arith.maxsi %c0_i32_324, %379 : i32
    %381 = arith.minsi %c49_i32_325, %380 : i32
    %c0_i32_326 = arith.constant 0 : i32
    %382 = tpu.memref_slice %arg2[%381, %c0_i32_326] : memref<56x128xf32, #tpu.memory_space<any>> -> memref<1x128xf32, #tpu.memory_space<any>>
    %c61_i32 = arith.constant 61 : i32
    %c0_i32_327 = arith.constant 0 : i32
    %383 = tpu.memref_slice %arg14[%c61_i32, %c0_i32_327] : memref<64x128xf32, #tpu.memory_space<vmem>> -> memref<1x128xf32, #tpu.memory_space<vmem>>
    tpu.enqueue_dma source(%382 : memref<1x128xf32, #tpu.memory_space<any>>) target(%383 : memref<1x128xf32, #tpu.memory_space<vmem>>) target_semaphore(%arg16 : memref<!tpu.dma_semaphore, #tpu.memory_space<semaphore_mem>>)
    %c8_i32_328 = arith.constant 8 : i32
    %384 = arith.muli %arg0, %c8_i32_328 : i32
    %c6_i32 = arith.constant 6 : i32
    %385 = arith.addi %384, %c6_i32 : i32
    %386 = arith.index_cast %385 : i32 to index
    %c0_329 = arith.constant 0 : index
    %387 = memref.load %arg1[%386, %c0_329] : memref<8x8xi32, #tpu.memory_space<smem>>
    %c0_i32_330 = arith.constant 0 : i32
    %c49_i32_331 = arith.constant 49 : i32
    %388 = arith.maxsi %c0_i32_330, %387 : i32
    %389 = arith.minsi %c49_i32_331, %388 : i32
    %c0_i32_332 = arith.constant 0 : i32
    %390 = tpu.memref_slice %arg2[%389, %c0_i32_332] : memref<56x128xf32, #tpu.memory_space<any>> -> memref<1x128xf32, #tpu.memory_space<any>>
    %c6_i32_333 = arith.constant 6 : i32
    %c0_i32_334 = arith.constant 0 : i32
    %391 = tpu.memref_slice %arg14[%c6_i32_333, %c0_i32_334] : memref<64x128xf32, #tpu.memory_space<vmem>> -> memref<1x128xf32, #tpu.memory_space<vmem>>
    tpu.enqueue_dma source(%390 : memref<1x128xf32, #tpu.memory_space<any>>) target(%391 : memref<1x128xf32, #tpu.memory_space<vmem>>) target_semaphore(%arg16 : memref<!tpu.dma_semaphore, #tpu.memory_space<semaphore_mem>>)
    %c8_i32_335 = arith.constant 8 : i32
    %392 = arith.muli %arg0, %c8_i32_335 : i32
    %c6_i32_336 = arith.constant 6 : i32
    %393 = arith.addi %392, %c6_i32_336 : i32
    %394 = arith.index_cast %393 : i32 to index
    %c1_337 = arith.constant 1 : index
    %395 = memref.load %arg1[%394, %c1_337] : memref<8x8xi32, #tpu.memory_space<smem>>
    %c0_i32_338 = arith.constant 0 : i32
    %c49_i32_339 = arith.constant 49 : i32
    %396 = arith.maxsi %c0_i32_338, %395 : i32
    %397 = arith.minsi %c49_i32_339, %396 : i32
    %c0_i32_340 = arith.constant 0 : i32
    %398 = tpu.memref_slice %arg2[%397, %c0_i32_340] : memref<56x128xf32, #tpu.memory_space<any>> -> memref<1x128xf32, #tpu.memory_space<any>>
    %c14_i32 = arith.constant 14 : i32
    %c0_i32_341 = arith.constant 0 : i32
    %399 = tpu.memref_slice %arg14[%c14_i32, %c0_i32_341] : memref<64x128xf32, #tpu.memory_space<vmem>> -> memref<1x128xf32, #tpu.memory_space<vmem>>
    tpu.enqueue_dma source(%398 : memref<1x128xf32, #tpu.memory_space<any>>) target(%399 : memref<1x128xf32, #tpu.memory_space<vmem>>) target_semaphore(%arg16 : memref<!tpu.dma_semaphore, #tpu.memory_space<semaphore_mem>>)
    %c8_i32_342 = arith.constant 8 : i32
    %400 = arith.muli %arg0, %c8_i32_342 : i32
    %c6_i32_343 = arith.constant 6 : i32
    %401 = arith.addi %400, %c6_i32_343 : i32
    %402 = arith.index_cast %401 : i32 to index
    %c2_344 = arith.constant 2 : index
    %403 = memref.load %arg1[%402, %c2_344] : memref<8x8xi32, #tpu.memory_space<smem>>
    %c0_i32_345 = arith.constant 0 : i32
    %c49_i32_346 = arith.constant 49 : i32
    %404 = arith.maxsi %c0_i32_345, %403 : i32
    %405 = arith.minsi %c49_i32_346, %404 : i32
    %c0_i32_347 = arith.constant 0 : i32
    %406 = tpu.memref_slice %arg2[%405, %c0_i32_347] : memref<56x128xf32, #tpu.memory_space<any>> -> memref<1x128xf32, #tpu.memory_space<any>>
    %c22_i32 = arith.constant 22 : i32
    %c0_i32_348 = arith.constant 0 : i32
    %407 = tpu.memref_slice %arg14[%c22_i32, %c0_i32_348] : memref<64x128xf32, #tpu.memory_space<vmem>> -> memref<1x128xf32, #tpu.memory_space<vmem>>
    tpu.enqueue_dma source(%406 : memref<1x128xf32, #tpu.memory_space<any>>) target(%407 : memref<1x128xf32, #tpu.memory_space<vmem>>) target_semaphore(%arg16 : memref<!tpu.dma_semaphore, #tpu.memory_space<semaphore_mem>>)
    %c8_i32_349 = arith.constant 8 : i32
    %408 = arith.muli %arg0, %c8_i32_349 : i32
    %c6_i32_350 = arith.constant 6 : i32
    %409 = arith.addi %408, %c6_i32_350 : i32
    %410 = arith.index_cast %409 : i32 to index
    %c3_351 = arith.constant 3 : index
    %411 = memref.load %arg1[%410, %c3_351] : memref<8x8xi32, #tpu.memory_space<smem>>
    %c0_i32_352 = arith.constant 0 : i32
    %c49_i32_353 = arith.constant 49 : i32
    %412 = arith.maxsi %c0_i32_352, %411 : i32
    %413 = arith.minsi %c49_i32_353, %412 : i32
    %c0_i32_354 = arith.constant 0 : i32
    %414 = tpu.memref_slice %arg2[%413, %c0_i32_354] : memref<56x128xf32, #tpu.memory_space<any>> -> memref<1x128xf32, #tpu.memory_space<any>>
    %c30_i32 = arith.constant 30 : i32
    %c0_i32_355 = arith.constant 0 : i32
    %415 = tpu.memref_slice %arg14[%c30_i32, %c0_i32_355] : memref<64x128xf32, #tpu.memory_space<vmem>> -> memref<1x128xf32, #tpu.memory_space<vmem>>
    tpu.enqueue_dma source(%414 : memref<1x128xf32, #tpu.memory_space<any>>) target(%415 : memref<1x128xf32, #tpu.memory_space<vmem>>) target_semaphore(%arg16 : memref<!tpu.dma_semaphore, #tpu.memory_space<semaphore_mem>>)
    %c8_i32_356 = arith.constant 8 : i32
    %416 = arith.muli %arg0, %c8_i32_356 : i32
    %c6_i32_357 = arith.constant 6 : i32
    %417 = arith.addi %416, %c6_i32_357 : i32
    %418 = arith.index_cast %417 : i32 to index
    %c4_358 = arith.constant 4 : index
    %419 = memref.load %arg1[%418, %c4_358] : memref<8x8xi32, #tpu.memory_space<smem>>
    %c0_i32_359 = arith.constant 0 : i32
    %c49_i32_360 = arith.constant 49 : i32
    %420 = arith.maxsi %c0_i32_359, %419 : i32
    %421 = arith.minsi %c49_i32_360, %420 : i32
    %c0_i32_361 = arith.constant 0 : i32
    %422 = tpu.memref_slice %arg2[%421, %c0_i32_361] : memref<56x128xf32, #tpu.memory_space<any>> -> memref<1x128xf32, #tpu.memory_space<any>>
    %c38_i32 = arith.constant 38 : i32
    %c0_i32_362 = arith.constant 0 : i32
    %423 = tpu.memref_slice %arg14[%c38_i32, %c0_i32_362] : memref<64x128xf32, #tpu.memory_space<vmem>> -> memref<1x128xf32, #tpu.memory_space<vmem>>
    tpu.enqueue_dma source(%422 : memref<1x128xf32, #tpu.memory_space<any>>) target(%423 : memref<1x128xf32, #tpu.memory_space<vmem>>) target_semaphore(%arg16 : memref<!tpu.dma_semaphore, #tpu.memory_space<semaphore_mem>>)
    %c8_i32_363 = arith.constant 8 : i32
    %424 = arith.muli %arg0, %c8_i32_363 : i32
    %c6_i32_364 = arith.constant 6 : i32
    %425 = arith.addi %424, %c6_i32_364 : i32
    %426 = arith.index_cast %425 : i32 to index
    %c5_365 = arith.constant 5 : index
    %427 = memref.load %arg1[%426, %c5_365] : memref<8x8xi32, #tpu.memory_space<smem>>
    %c0_i32_366 = arith.constant 0 : i32
    %c49_i32_367 = arith.constant 49 : i32
    %428 = arith.maxsi %c0_i32_366, %427 : i32
    %429 = arith.minsi %c49_i32_367, %428 : i32
    %c0_i32_368 = arith.constant 0 : i32
    %430 = tpu.memref_slice %arg2[%429, %c0_i32_368] : memref<56x128xf32, #tpu.memory_space<any>> -> memref<1x128xf32, #tpu.memory_space<any>>
    %c46_i32 = arith.constant 46 : i32
    %c0_i32_369 = arith.constant 0 : i32
    %431 = tpu.memref_slice %arg14[%c46_i32, %c0_i32_369] : memref<64x128xf32, #tpu.memory_space<vmem>> -> memref<1x128xf32, #tpu.memory_space<vmem>>
    tpu.enqueue_dma source(%430 : memref<1x128xf32, #tpu.memory_space<any>>) target(%431 : memref<1x128xf32, #tpu.memory_space<vmem>>) target_semaphore(%arg16 : memref<!tpu.dma_semaphore, #tpu.memory_space<semaphore_mem>>)
    %c8_i32_370 = arith.constant 8 : i32
    %432 = arith.muli %arg0, %c8_i32_370 : i32
    %c6_i32_371 = arith.constant 6 : i32
    %433 = arith.addi %432, %c6_i32_371 : i32
    %434 = arith.index_cast %433 : i32 to index
    %c6_372 = arith.constant 6 : index
    %435 = memref.load %arg1[%434, %c6_372] : memref<8x8xi32, #tpu.memory_space<smem>>
    %c0_i32_373 = arith.constant 0 : i32
    %c49_i32_374 = arith.constant 49 : i32
    %436 = arith.maxsi %c0_i32_373, %435 : i32
    %437 = arith.minsi %c49_i32_374, %436 : i32
    %c0_i32_375 = arith.constant 0 : i32
    %438 = tpu.memref_slice %arg2[%437, %c0_i32_375] : memref<56x128xf32, #tpu.memory_space<any>> -> memref<1x128xf32, #tpu.memory_space<any>>
    %c54_i32 = arith.constant 54 : i32
    %c0_i32_376 = arith.constant 0 : i32
    %439 = tpu.memref_slice %arg14[%c54_i32, %c0_i32_376] : memref<64x128xf32, #tpu.memory_space<vmem>> -> memref<1x128xf32, #tpu.memory_space<vmem>>
    tpu.enqueue_dma source(%438 : memref<1x128xf32, #tpu.memory_space<any>>) target(%439 : memref<1x128xf32, #tpu.memory_space<vmem>>) target_semaphore(%arg16 : memref<!tpu.dma_semaphore, #tpu.memory_space<semaphore_mem>>)
    %c8_i32_377 = arith.constant 8 : i32
    %440 = arith.muli %arg0, %c8_i32_377 : i32
    %c6_i32_378 = arith.constant 6 : i32
    %441 = arith.addi %440, %c6_i32_378 : i32
    %442 = arith.index_cast %441 : i32 to index
    %c7_379 = arith.constant 7 : index
    %443 = memref.load %arg1[%442, %c7_379] : memref<8x8xi32, #tpu.memory_space<smem>>
    %c0_i32_380 = arith.constant 0 : i32
    %c49_i32_381 = arith.constant 49 : i32
    %444 = arith.maxsi %c0_i32_380, %443 : i32
    %445 = arith.minsi %c49_i32_381, %444 : i32
    %c0_i32_382 = arith.constant 0 : i32
    %446 = tpu.memref_slice %arg2[%445, %c0_i32_382] : memref<56x128xf32, #tpu.memory_space<any>> -> memref<1x128xf32, #tpu.memory_space<any>>
    %c62_i32 = arith.constant 62 : i32
    %c0_i32_383 = arith.constant 0 : i32
    %447 = tpu.memref_slice %arg14[%c62_i32, %c0_i32_383] : memref<64x128xf32, #tpu.memory_space<vmem>> -> memref<1x128xf32, #tpu.memory_space<vmem>>
    tpu.enqueue_dma source(%446 : memref<1x128xf32, #tpu.memory_space<any>>) target(%447 : memref<1x128xf32, #tpu.memory_space<vmem>>) target_semaphore(%arg16 : memref<!tpu.dma_semaphore, #tpu.memory_space<semaphore_mem>>)
    %c8_i32_384 = arith.constant 8 : i32
    %448 = arith.muli %arg0, %c8_i32_384 : i32
    %c7_i32 = arith.constant 7 : i32
    %449 = arith.addi %448, %c7_i32 : i32
    %450 = arith.index_cast %449 : i32 to index
    %c0_385 = arith.constant 0 : index
    %451 = memref.load %arg1[%450, %c0_385] : memref<8x8xi32, #tpu.memory_space<smem>>
    %c0_i32_386 = arith.constant 0 : i32
    %c49_i32_387 = arith.constant 49 : i32
    %452 = arith.maxsi %c0_i32_386, %451 : i32
    %453 = arith.minsi %c49_i32_387, %452 : i32
    %c0_i32_388 = arith.constant 0 : i32
    %454 = tpu.memref_slice %arg2[%453, %c0_i32_388] : memref<56x128xf32, #tpu.memory_space<any>> -> memref<1x128xf32, #tpu.memory_space<any>>
    %c7_i32_389 = arith.constant 7 : i32
    %c0_i32_390 = arith.constant 0 : i32
    %455 = tpu.memref_slice %arg14[%c7_i32_389, %c0_i32_390] : memref<64x128xf32, #tpu.memory_space<vmem>> -> memref<1x128xf32, #tpu.memory_space<vmem>>
    tpu.enqueue_dma source(%454 : memref<1x128xf32, #tpu.memory_space<any>>) target(%455 : memref<1x128xf32, #tpu.memory_space<vmem>>) target_semaphore(%arg16 : memref<!tpu.dma_semaphore, #tpu.memory_space<semaphore_mem>>)
    %c8_i32_391 = arith.constant 8 : i32
    %456 = arith.muli %arg0, %c8_i32_391 : i32
    %c7_i32_392 = arith.constant 7 : i32
    %457 = arith.addi %456, %c7_i32_392 : i32
    %458 = arith.index_cast %457 : i32 to index
    %c1_393 = arith.constant 1 : index
    %459 = memref.load %arg1[%458, %c1_393] : memref<8x8xi32, #tpu.memory_space<smem>>
    %c0_i32_394 = arith.constant 0 : i32
    %c49_i32_395 = arith.constant 49 : i32
    %460 = arith.maxsi %c0_i32_394, %459 : i32
    %461 = arith.minsi %c49_i32_395, %460 : i32
    %c0_i32_396 = arith.constant 0 : i32
    %462 = tpu.memref_slice %arg2[%461, %c0_i32_396] : memref<56x128xf32, #tpu.memory_space<any>> -> memref<1x128xf32, #tpu.memory_space<any>>
    %c15_i32 = arith.constant 15 : i32
    %c0_i32_397 = arith.constant 0 : i32
    %463 = tpu.memref_slice %arg14[%c15_i32, %c0_i32_397] : memref<64x128xf32, #tpu.memory_space<vmem>> -> memref<1x128xf32, #tpu.memory_space<vmem>>
    tpu.enqueue_dma source(%462 : memref<1x128xf32, #tpu.memory_space<any>>) target(%463 : memref<1x128xf32, #tpu.memory_space<vmem>>) target_semaphore(%arg16 : memref<!tpu.dma_semaphore, #tpu.memory_space<semaphore_mem>>)
    %c8_i32_398 = arith.constant 8 : i32
    %464 = arith.muli %arg0, %c8_i32_398 : i32
    %c7_i32_399 = arith.constant 7 : i32
    %465 = arith.addi %464, %c7_i32_399 : i32
    %466 = arith.index_cast %465 : i32 to index
    %c2_400 = arith.constant 2 : index
    %467 = memref.load %arg1[%466, %c2_400] : memref<8x8xi32, #tpu.memory_space<smem>>
    %c0_i32_401 = arith.constant 0 : i32
    %c49_i32_402 = arith.constant 49 : i32
    %468 = arith.maxsi %c0_i32_401, %467 : i32
    %469 = arith.minsi %c49_i32_402, %468 : i32
    %c0_i32_403 = arith.constant 0 : i32
    %470 = tpu.memref_slice %arg2[%469, %c0_i32_403] : memref<56x128xf32, #tpu.memory_space<any>> -> memref<1x128xf32, #tpu.memory_space<any>>
    %c23_i32 = arith.constant 23 : i32
    %c0_i32_404 = arith.constant 0 : i32
    %471 = tpu.memref_slice %arg14[%c23_i32, %c0_i32_404] : memref<64x128xf32, #tpu.memory_space<vmem>> -> memref<1x128xf32, #tpu.memory_space<vmem>>
    tpu.enqueue_dma source(%470 : memref<1x128xf32, #tpu.memory_space<any>>) target(%471 : memref<1x128xf32, #tpu.memory_space<vmem>>) target_semaphore(%arg16 : memref<!tpu.dma_semaphore, #tpu.memory_space<semaphore_mem>>)
    %c8_i32_405 = arith.constant 8 : i32
    %472 = arith.muli %arg0, %c8_i32_405 : i32
    %c7_i32_406 = arith.constant 7 : i32
    %473 = arith.addi %472, %c7_i32_406 : i32
    %474 = arith.index_cast %473 : i32 to index
    %c3_407 = arith.constant 3 : index
    %475 = memref.load %arg1[%474, %c3_407] : memref<8x8xi32, #tpu.memory_space<smem>>
    %c0_i32_408 = arith.constant 0 : i32
    %c49_i32_409 = arith.constant 49 : i32
    %476 = arith.maxsi %c0_i32_408, %475 : i32
    %477 = arith.minsi %c49_i32_409, %476 : i32
    %c0_i32_410 = arith.constant 0 : i32
    %478 = tpu.memref_slice %arg2[%477, %c0_i32_410] : memref<56x128xf32, #tpu.memory_space<any>> -> memref<1x128xf32, #tpu.memory_space<any>>
    %c31_i32 = arith.constant 31 : i32
    %c0_i32_411 = arith.constant 0 : i32
    %479 = tpu.memref_slice %arg14[%c31_i32, %c0_i32_411] : memref<64x128xf32, #tpu.memory_space<vmem>> -> memref<1x128xf32, #tpu.memory_space<vmem>>
    tpu.enqueue_dma source(%478 : memref<1x128xf32, #tpu.memory_space<any>>) target(%479 : memref<1x128xf32, #tpu.memory_space<vmem>>) target_semaphore(%arg16 : memref<!tpu.dma_semaphore, #tpu.memory_space<semaphore_mem>>)
    %c8_i32_412 = arith.constant 8 : i32
    %480 = arith.muli %arg0, %c8_i32_412 : i32
    %c7_i32_413 = arith.constant 7 : i32
    %481 = arith.addi %480, %c7_i32_413 : i32
    %482 = arith.index_cast %481 : i32 to index
    %c4_414 = arith.constant 4 : index
    %483 = memref.load %arg1[%482, %c4_414] : memref<8x8xi32, #tpu.memory_space<smem>>
    %c0_i32_415 = arith.constant 0 : i32
    %c49_i32_416 = arith.constant 49 : i32
    %484 = arith.maxsi %c0_i32_415, %483 : i32
    %485 = arith.minsi %c49_i32_416, %484 : i32
    %c0_i32_417 = arith.constant 0 : i32
    %486 = tpu.memref_slice %arg2[%485, %c0_i32_417] : memref<56x128xf32, #tpu.memory_space<any>> -> memref<1x128xf32, #tpu.memory_space<any>>
    %c39_i32 = arith.constant 39 : i32
    %c0_i32_418 = arith.constant 0 : i32
    %487 = tpu.memref_slice %arg14[%c39_i32, %c0_i32_418] : memref<64x128xf32, #tpu.memory_space<vmem>> -> memref<1x128xf32, #tpu.memory_space<vmem>>
    tpu.enqueue_dma source(%486 : memref<1x128xf32, #tpu.memory_space<any>>) target(%487 : memref<1x128xf32, #tpu.memory_space<vmem>>) target_semaphore(%arg16 : memref<!tpu.dma_semaphore, #tpu.memory_space<semaphore_mem>>)
    %c8_i32_419 = arith.constant 8 : i32
    %488 = arith.muli %arg0, %c8_i32_419 : i32
    %c7_i32_420 = arith.constant 7 : i32
    %489 = arith.addi %488, %c7_i32_420 : i32
    %490 = arith.index_cast %489 : i32 to index
    %c5_421 = arith.constant 5 : index
    %491 = memref.load %arg1[%490, %c5_421] : memref<8x8xi32, #tpu.memory_space<smem>>
    %c0_i32_422 = arith.constant 0 : i32
    %c49_i32_423 = arith.constant 49 : i32
    %492 = arith.maxsi %c0_i32_422, %491 : i32
    %493 = arith.minsi %c49_i32_423, %492 : i32
    %c0_i32_424 = arith.constant 0 : i32
    %494 = tpu.memref_slice %arg2[%493, %c0_i32_424] : memref<56x128xf32, #tpu.memory_space<any>> -> memref<1x128xf32, #tpu.memory_space<any>>
    %c47_i32 = arith.constant 47 : i32
    %c0_i32_425 = arith.constant 0 : i32
    %495 = tpu.memref_slice %arg14[%c47_i32, %c0_i32_425] : memref<64x128xf32, #tpu.memory_space<vmem>> -> memref<1x128xf32, #tpu.memory_space<vmem>>
    tpu.enqueue_dma source(%494 : memref<1x128xf32, #tpu.memory_space<any>>) target(%495 : memref<1x128xf32, #tpu.memory_space<vmem>>) target_semaphore(%arg16 : memref<!tpu.dma_semaphore, #tpu.memory_space<semaphore_mem>>)
    %c8_i32_426 = arith.constant 8 : i32
    %496 = arith.muli %arg0, %c8_i32_426 : i32
    %c7_i32_427 = arith.constant 7 : i32
    %497 = arith.addi %496, %c7_i32_427 : i32
    %498 = arith.index_cast %497 : i32 to index
    %c6_428 = arith.constant 6 : index
    %499 = memref.load %arg1[%498, %c6_428] : memref<8x8xi32, #tpu.memory_space<smem>>
    %c0_i32_429 = arith.constant 0 : i32
    %c49_i32_430 = arith.constant 49 : i32
    %500 = arith.maxsi %c0_i32_429, %499 : i32
    %501 = arith.minsi %c49_i32_430, %500 : i32
    %c0_i32_431 = arith.constant 0 : i32
    %502 = tpu.memref_slice %arg2[%501, %c0_i32_431] : memref<56x128xf32, #tpu.memory_space<any>> -> memref<1x128xf32, #tpu.memory_space<any>>
    %c55_i32 = arith.constant 55 : i32
    %c0_i32_432 = arith.constant 0 : i32
    %503 = tpu.memref_slice %arg14[%c55_i32, %c0_i32_432] : memref<64x128xf32, #tpu.memory_space<vmem>> -> memref<1x128xf32, #tpu.memory_space<vmem>>
    tpu.enqueue_dma source(%502 : memref<1x128xf32, #tpu.memory_space<any>>) target(%503 : memref<1x128xf32, #tpu.memory_space<vmem>>) target_semaphore(%arg16 : memref<!tpu.dma_semaphore, #tpu.memory_space<semaphore_mem>>)
    %c8_i32_433 = arith.constant 8 : i32
    %504 = arith.muli %arg0, %c8_i32_433 : i32
    %c7_i32_434 = arith.constant 7 : i32
    %505 = arith.addi %504, %c7_i32_434 : i32
    %506 = arith.index_cast %505 : i32 to index
    %c7_435 = arith.constant 7 : index
    %507 = memref.load %arg1[%506, %c7_435] : memref<8x8xi32, #tpu.memory_space<smem>>
    %c0_i32_436 = arith.constant 0 : i32
    %c49_i32_437 = arith.constant 49 : i32
    %508 = arith.maxsi %c0_i32_436, %507 : i32
    %509 = arith.minsi %c49_i32_437, %508 : i32
    %c0_i32_438 = arith.constant 0 : i32
    %510 = tpu.memref_slice %arg2[%509, %c0_i32_438] : memref<56x128xf32, #tpu.memory_space<any>> -> memref<1x128xf32, #tpu.memory_space<any>>
    %c63_i32 = arith.constant 63 : i32
    %c0_i32_439 = arith.constant 0 : i32
    %511 = tpu.memref_slice %arg14[%c63_i32, %c0_i32_439] : memref<64x128xf32, #tpu.memory_space<vmem>> -> memref<1x128xf32, #tpu.memory_space<vmem>>
    tpu.enqueue_dma source(%510 : memref<1x128xf32, #tpu.memory_space<any>>) target(%511 : memref<1x128xf32, #tpu.memory_space<vmem>>) target_semaphore(%arg16 : memref<!tpu.dma_semaphore, #tpu.memory_space<semaphore_mem>>)
    %c0_i32_440 = arith.constant 0 : i32
    %512 = tpu.memref_slice %arg2[%5, %c0_i32_440] : memref<56x128xf32, #tpu.memory_space<any>> -> memref<1x128xf32, #tpu.memory_space<any>>
    %c0_i32_441 = arith.constant 0 : i32
    %c0_i32_442 = arith.constant 0 : i32
    %513 = tpu.memref_slice %arg14[%c0_i32_441, %c0_i32_442] : memref<64x128xf32, #tpu.memory_space<vmem>> -> memref<1x128xf32, #tpu.memory_space<vmem>>
    tpu.wait_dma2 semaphore(%arg16 : memref<!tpu.dma_semaphore, #tpu.memory_space<semaphore_mem>>) src(%512 : memref<1x128xf32, #tpu.memory_space<any>>) dst(%513 : memref<1x128xf32, #tpu.memory_space<vmem>>)
    %c0_i32_443 = arith.constant 0 : i32
    %514 = tpu.memref_slice %arg2[%13, %c0_i32_443] : memref<56x128xf32, #tpu.memory_space<any>> -> memref<1x128xf32, #tpu.memory_space<any>>
    %c8_i32_444 = arith.constant 8 : i32
    %c0_i32_445 = arith.constant 0 : i32
    %515 = tpu.memref_slice %arg14[%c8_i32_444, %c0_i32_445] : memref<64x128xf32, #tpu.memory_space<vmem>> -> memref<1x128xf32, #tpu.memory_space<vmem>>
    tpu.wait_dma2 semaphore(%arg16 : memref<!tpu.dma_semaphore, #tpu.memory_space<semaphore_mem>>) src(%514 : memref<1x128xf32, #tpu.memory_space<any>>) dst(%515 : memref<1x128xf32, #tpu.memory_space<vmem>>)
    %c0_i32_446 = arith.constant 0 : i32
    %516 = tpu.memref_slice %arg2[%21, %c0_i32_446] : memref<56x128xf32, #tpu.memory_space<any>> -> memref<1x128xf32, #tpu.memory_space<any>>
    %c16_i32_447 = arith.constant 16 : i32
    %c0_i32_448 = arith.constant 0 : i32
    %517 = tpu.memref_slice %arg14[%c16_i32_447, %c0_i32_448] : memref<64x128xf32, #tpu.memory_space<vmem>> -> memref<1x128xf32, #tpu.memory_space<vmem>>
    tpu.wait_dma2 semaphore(%arg16 : memref<!tpu.dma_semaphore, #tpu.memory_space<semaphore_mem>>) src(%516 : memref<1x128xf32, #tpu.memory_space<any>>) dst(%517 : memref<1x128xf32, #tpu.memory_space<vmem>>)
    %c0_i32_449 = arith.constant 0 : i32
    %518 = tpu.memref_slice %arg2[%29, %c0_i32_449] : memref<56x128xf32, #tpu.memory_space<any>> -> memref<1x128xf32, #tpu.memory_space<any>>
    %c24_i32_450 = arith.constant 24 : i32
    %c0_i32_451 = arith.constant 0 : i32
    %519 = tpu.memref_slice %arg14[%c24_i32_450, %c0_i32_451] : memref<64x128xf32, #tpu.memory_space<vmem>> -> memref<1x128xf32, #tpu.memory_space<vmem>>
    tpu.wait_dma2 semaphore(%arg16 : memref<!tpu.dma_semaphore, #tpu.memory_space<semaphore_mem>>) src(%518 : memref<1x128xf32, #tpu.memory_space<any>>) dst(%519 : memref<1x128xf32, #tpu.memory_space<vmem>>)
    %c0_i32_452 = arith.constant 0 : i32
    %520 = tpu.memref_slice %arg2[%37, %c0_i32_452] : memref<56x128xf32, #tpu.memory_space<any>> -> memref<1x128xf32, #tpu.memory_space<any>>
    %c32_i32_453 = arith.constant 32 : i32
    %c0_i32_454 = arith.constant 0 : i32
    %521 = tpu.memref_slice %arg14[%c32_i32_453, %c0_i32_454] : memref<64x128xf32, #tpu.memory_space<vmem>> -> memref<1x128xf32, #tpu.memory_space<vmem>>
    tpu.wait_dma2 semaphore(%arg16 : memref<!tpu.dma_semaphore, #tpu.memory_space<semaphore_mem>>) src(%520 : memref<1x128xf32, #tpu.memory_space<any>>) dst(%521 : memref<1x128xf32, #tpu.memory_space<vmem>>)
    %c0_i32_455 = arith.constant 0 : i32
    %522 = tpu.memref_slice %arg2[%45, %c0_i32_455] : memref<56x128xf32, #tpu.memory_space<any>> -> memref<1x128xf32, #tpu.memory_space<any>>
    %c40_i32_456 = arith.constant 40 : i32
    %c0_i32_457 = arith.constant 0 : i32
    %523 = tpu.memref_slice %arg14[%c40_i32_456, %c0_i32_457] : memref<64x128xf32, #tpu.memory_space<vmem>> -> memref<1x128xf32, #tpu.memory_space<vmem>>
    tpu.wait_dma2 semaphore(%arg16 : memref<!tpu.dma_semaphore, #tpu.memory_space<semaphore_mem>>) src(%522 : memref<1x128xf32, #tpu.memory_space<any>>) dst(%523 : memref<1x128xf32, #tpu.memory_space<vmem>>)
    %c0_i32_458 = arith.constant 0 : i32
    %524 = tpu.memref_slice %arg2[%53, %c0_i32_458] : memref<56x128xf32, #tpu.memory_space<any>> -> memref<1x128xf32, #tpu.memory_space<any>>
    %c48_i32_459 = arith.constant 48 : i32
    %c0_i32_460 = arith.constant 0 : i32
    %525 = tpu.memref_slice %arg14[%c48_i32_459, %c0_i32_460] : memref<64x128xf32, #tpu.memory_space<vmem>> -> memref<1x128xf32, #tpu.memory_space<vmem>>
    tpu.wait_dma2 semaphore(%arg16 : memref<!tpu.dma_semaphore, #tpu.memory_space<semaphore_mem>>) src(%524 : memref<1x128xf32, #tpu.memory_space<any>>) dst(%525 : memref<1x128xf32, #tpu.memory_space<vmem>>)
    %c0_i32_461 = arith.constant 0 : i32
    %526 = tpu.memref_slice %arg2[%61, %c0_i32_461] : memref<56x128xf32, #tpu.memory_space<any>> -> memref<1x128xf32, #tpu.memory_space<any>>
    %c56_i32_462 = arith.constant 56 : i32
    %c0_i32_463 = arith.constant 0 : i32
    %527 = tpu.memref_slice %arg14[%c56_i32_462, %c0_i32_463] : memref<64x128xf32, #tpu.memory_space<vmem>> -> memref<1x128xf32, #tpu.memory_space<vmem>>
    tpu.wait_dma2 semaphore(%arg16 : memref<!tpu.dma_semaphore, #tpu.memory_space<semaphore_mem>>) src(%526 : memref<1x128xf32, #tpu.memory_space<any>>) dst(%527 : memref<1x128xf32, #tpu.memory_space<vmem>>)
    %c0_i32_464 = arith.constant 0 : i32
    %528 = tpu.memref_slice %arg2[%69, %c0_i32_464] : memref<56x128xf32, #tpu.memory_space<any>> -> memref<1x128xf32, #tpu.memory_space<any>>
    %c1_i32_465 = arith.constant 1 : i32
    %c0_i32_466 = arith.constant 0 : i32
    %529 = tpu.memref_slice %arg14[%c1_i32_465, %c0_i32_466] : memref<64x128xf32, #tpu.memory_space<vmem>> -> memref<1x128xf32, #tpu.memory_space<vmem>>
    tpu.wait_dma2 semaphore(%arg16 : memref<!tpu.dma_semaphore, #tpu.memory_space<semaphore_mem>>) src(%528 : memref<1x128xf32, #tpu.memory_space<any>>) dst(%529 : memref<1x128xf32, #tpu.memory_space<vmem>>)
    %c0_i32_467 = arith.constant 0 : i32
    %530 = tpu.memref_slice %arg2[%77, %c0_i32_467] : memref<56x128xf32, #tpu.memory_space<any>> -> memref<1x128xf32, #tpu.memory_space<any>>
    %c9_i32_468 = arith.constant 9 : i32
    %c0_i32_469 = arith.constant 0 : i32
    %531 = tpu.memref_slice %arg14[%c9_i32_468, %c0_i32_469] : memref<64x128xf32, #tpu.memory_space<vmem>> -> memref<1x128xf32, #tpu.memory_space<vmem>>
    tpu.wait_dma2 semaphore(%arg16 : memref<!tpu.dma_semaphore, #tpu.memory_space<semaphore_mem>>) src(%530 : memref<1x128xf32, #tpu.memory_space<any>>) dst(%531 : memref<1x128xf32, #tpu.memory_space<vmem>>)
    %c0_i32_470 = arith.constant 0 : i32
    %532 = tpu.memref_slice %arg2[%85, %c0_i32_470] : memref<56x128xf32, #tpu.memory_space<any>> -> memref<1x128xf32, #tpu.memory_space<any>>
    %c17_i32_471 = arith.constant 17 : i32
    %c0_i32_472 = arith.constant 0 : i32
    %533 = tpu.memref_slice %arg14[%c17_i32_471, %c0_i32_472] : memref<64x128xf32, #tpu.memory_space<vmem>> -> memref<1x128xf32, #tpu.memory_space<vmem>>
    tpu.wait_dma2 semaphore(%arg16 : memref<!tpu.dma_semaphore, #tpu.memory_space<semaphore_mem>>) src(%532 : memref<1x128xf32, #tpu.memory_space<any>>) dst(%533 : memref<1x128xf32, #tpu.memory_space<vmem>>)
    %c0_i32_473 = arith.constant 0 : i32
    %534 = tpu.memref_slice %arg2[%93, %c0_i32_473] : memref<56x128xf32, #tpu.memory_space<any>> -> memref<1x128xf32, #tpu.memory_space<any>>
    %c25_i32_474 = arith.constant 25 : i32
    %c0_i32_475 = arith.constant 0 : i32
    %535 = tpu.memref_slice %arg14[%c25_i32_474, %c0_i32_475] : memref<64x128xf32, #tpu.memory_space<vmem>> -> memref<1x128xf32, #tpu.memory_space<vmem>>
    tpu.wait_dma2 semaphore(%arg16 : memref<!tpu.dma_semaphore, #tpu.memory_space<semaphore_mem>>) src(%534 : memref<1x128xf32, #tpu.memory_space<any>>) dst(%535 : memref<1x128xf32, #tpu.memory_space<vmem>>)
    %c0_i32_476 = arith.constant 0 : i32
    %536 = tpu.memref_slice %arg2[%101, %c0_i32_476] : memref<56x128xf32, #tpu.memory_space<any>> -> memref<1x128xf32, #tpu.memory_space<any>>
    %c33_i32_477 = arith.constant 33 : i32
    %c0_i32_478 = arith.constant 0 : i32
    %537 = tpu.memref_slice %arg14[%c33_i32_477, %c0_i32_478] : memref<64x128xf32, #tpu.memory_space<vmem>> -> memref<1x128xf32, #tpu.memory_space<vmem>>
    tpu.wait_dma2 semaphore(%arg16 : memref<!tpu.dma_semaphore, #tpu.memory_space<semaphore_mem>>) src(%536 : memref<1x128xf32, #tpu.memory_space<any>>) dst(%537 : memref<1x128xf32, #tpu.memory_space<vmem>>)
    %c0_i32_479 = arith.constant 0 : i32
    %538 = tpu.memref_slice %arg2[%109, %c0_i32_479] : memref<56x128xf32, #tpu.memory_space<any>> -> memref<1x128xf32, #tpu.memory_space<any>>
    %c41_i32_480 = arith.constant 41 : i32
    %c0_i32_481 = arith.constant 0 : i32
    %539 = tpu.memref_slice %arg14[%c41_i32_480, %c0_i32_481] : memref<64x128xf32, #tpu.memory_space<vmem>> -> memref<1x128xf32, #tpu.memory_space<vmem>>
    tpu.wait_dma2 semaphore(%arg16 : memref<!tpu.dma_semaphore, #tpu.memory_space<semaphore_mem>>) src(%538 : memref<1x128xf32, #tpu.memory_space<any>>) dst(%539 : memref<1x128xf32, #tpu.memory_space<vmem>>)
    %c0_i32_482 = arith.constant 0 : i32
    %540 = tpu.memref_slice %arg2[%117, %c0_i32_482] : memref<56x128xf32, #tpu.memory_space<any>> -> memref<1x128xf32, #tpu.memory_space<any>>
    %c49_i32_483 = arith.constant 49 : i32
    %c0_i32_484 = arith.constant 0 : i32
    %541 = tpu.memref_slice %arg14[%c49_i32_483, %c0_i32_484] : memref<64x128xf32, #tpu.memory_space<vmem>> -> memref<1x128xf32, #tpu.memory_space<vmem>>
    tpu.wait_dma2 semaphore(%arg16 : memref<!tpu.dma_semaphore, #tpu.memory_space<semaphore_mem>>) src(%540 : memref<1x128xf32, #tpu.memory_space<any>>) dst(%541 : memref<1x128xf32, #tpu.memory_space<vmem>>)
    %c0_i32_485 = arith.constant 0 : i32
    %542 = tpu.memref_slice %arg2[%125, %c0_i32_485] : memref<56x128xf32, #tpu.memory_space<any>> -> memref<1x128xf32, #tpu.memory_space<any>>
    %c57_i32_486 = arith.constant 57 : i32
    %c0_i32_487 = arith.constant 0 : i32
    %543 = tpu.memref_slice %arg14[%c57_i32_486, %c0_i32_487] : memref<64x128xf32, #tpu.memory_space<vmem>> -> memref<1x128xf32, #tpu.memory_space<vmem>>
    tpu.wait_dma2 semaphore(%arg16 : memref<!tpu.dma_semaphore, #tpu.memory_space<semaphore_mem>>) src(%542 : memref<1x128xf32, #tpu.memory_space<any>>) dst(%543 : memref<1x128xf32, #tpu.memory_space<vmem>>)
    %c0_i32_488 = arith.constant 0 : i32
    %544 = tpu.memref_slice %arg2[%133, %c0_i32_488] : memref<56x128xf32, #tpu.memory_space<any>> -> memref<1x128xf32, #tpu.memory_space<any>>
    %c2_i32_489 = arith.constant 2 : i32
    %c0_i32_490 = arith.constant 0 : i32
    %545 = tpu.memref_slice %arg14[%c2_i32_489, %c0_i32_490] : memref<64x128xf32, #tpu.memory_space<vmem>> -> memref<1x128xf32, #tpu.memory_space<vmem>>
    tpu.wait_dma2 semaphore(%arg16 : memref<!tpu.dma_semaphore, #tpu.memory_space<semaphore_mem>>) src(%544 : memref<1x128xf32, #tpu.memory_space<any>>) dst(%545 : memref<1x128xf32, #tpu.memory_space<vmem>>)
    %c0_i32_491 = arith.constant 0 : i32
    %546 = tpu.memref_slice %arg2[%141, %c0_i32_491] : memref<56x128xf32, #tpu.memory_space<any>> -> memref<1x128xf32, #tpu.memory_space<any>>
    %c10_i32_492 = arith.constant 10 : i32
    %c0_i32_493 = arith.constant 0 : i32
    %547 = tpu.memref_slice %arg14[%c10_i32_492, %c0_i32_493] : memref<64x128xf32, #tpu.memory_space<vmem>> -> memref<1x128xf32, #tpu.memory_space<vmem>>
    tpu.wait_dma2 semaphore(%arg16 : memref<!tpu.dma_semaphore, #tpu.memory_space<semaphore_mem>>) src(%546 : memref<1x128xf32, #tpu.memory_space<any>>) dst(%547 : memref<1x128xf32, #tpu.memory_space<vmem>>)
    %c0_i32_494 = arith.constant 0 : i32
    %548 = tpu.memref_slice %arg2[%149, %c0_i32_494] : memref<56x128xf32, #tpu.memory_space<any>> -> memref<1x128xf32, #tpu.memory_space<any>>
    %c18_i32_495 = arith.constant 18 : i32
    %c0_i32_496 = arith.constant 0 : i32
    %549 = tpu.memref_slice %arg14[%c18_i32_495, %c0_i32_496] : memref<64x128xf32, #tpu.memory_space<vmem>> -> memref<1x128xf32, #tpu.memory_space<vmem>>
    tpu.wait_dma2 semaphore(%arg16 : memref<!tpu.dma_semaphore, #tpu.memory_space<semaphore_mem>>) src(%548 : memref<1x128xf32, #tpu.memory_space<any>>) dst(%549 : memref<1x128xf32, #tpu.memory_space<vmem>>)
    %c0_i32_497 = arith.constant 0 : i32
    %550 = tpu.memref_slice %arg2[%157, %c0_i32_497] : memref<56x128xf32, #tpu.memory_space<any>> -> memref<1x128xf32, #tpu.memory_space<any>>
    %c26_i32_498 = arith.constant 26 : i32
    %c0_i32_499 = arith.constant 0 : i32
    %551 = tpu.memref_slice %arg14[%c26_i32_498, %c0_i32_499] : memref<64x128xf32, #tpu.memory_space<vmem>> -> memref<1x128xf32, #tpu.memory_space<vmem>>
    tpu.wait_dma2 semaphore(%arg16 : memref<!tpu.dma_semaphore, #tpu.memory_space<semaphore_mem>>) src(%550 : memref<1x128xf32, #tpu.memory_space<any>>) dst(%551 : memref<1x128xf32, #tpu.memory_space<vmem>>)
    %c0_i32_500 = arith.constant 0 : i32
    %552 = tpu.memref_slice %arg2[%165, %c0_i32_500] : memref<56x128xf32, #tpu.memory_space<any>> -> memref<1x128xf32, #tpu.memory_space<any>>
    %c34_i32_501 = arith.constant 34 : i32
    %c0_i32_502 = arith.constant 0 : i32
    %553 = tpu.memref_slice %arg14[%c34_i32_501, %c0_i32_502] : memref<64x128xf32, #tpu.memory_space<vmem>> -> memref<1x128xf32, #tpu.memory_space<vmem>>
    tpu.wait_dma2 semaphore(%arg16 : memref<!tpu.dma_semaphore, #tpu.memory_space<semaphore_mem>>) src(%552 : memref<1x128xf32, #tpu.memory_space<any>>) dst(%553 : memref<1x128xf32, #tpu.memory_space<vmem>>)
    %c0_i32_503 = arith.constant 0 : i32
    %554 = tpu.memref_slice %arg2[%173, %c0_i32_503] : memref<56x128xf32, #tpu.memory_space<any>> -> memref<1x128xf32, #tpu.memory_space<any>>
    %c42_i32_504 = arith.constant 42 : i32
    %c0_i32_505 = arith.constant 0 : i32
    %555 = tpu.memref_slice %arg14[%c42_i32_504, %c0_i32_505] : memref<64x128xf32, #tpu.memory_space<vmem>> -> memref<1x128xf32, #tpu.memory_space<vmem>>
    tpu.wait_dma2 semaphore(%arg16 : memref<!tpu.dma_semaphore, #tpu.memory_space<semaphore_mem>>) src(%554 : memref<1x128xf32, #tpu.memory_space<any>>) dst(%555 : memref<1x128xf32, #tpu.memory_space<vmem>>)
    %c0_i32_506 = arith.constant 0 : i32
    %556 = tpu.memref_slice %arg2[%181, %c0_i32_506] : memref<56x128xf32, #tpu.memory_space<any>> -> memref<1x128xf32, #tpu.memory_space<any>>
    %c50_i32_507 = arith.constant 50 : i32
    %c0_i32_508 = arith.constant 0 : i32
    %557 = tpu.memref_slice %arg14[%c50_i32_507, %c0_i32_508] : memref<64x128xf32, #tpu.memory_space<vmem>> -> memref<1x128xf32, #tpu.memory_space<vmem>>
    tpu.wait_dma2 semaphore(%arg16 : memref<!tpu.dma_semaphore, #tpu.memory_space<semaphore_mem>>) src(%556 : memref<1x128xf32, #tpu.memory_space<any>>) dst(%557 : memref<1x128xf32, #tpu.memory_space<vmem>>)
    %c0_i32_509 = arith.constant 0 : i32
    %558 = tpu.memref_slice %arg2[%189, %c0_i32_509] : memref<56x128xf32, #tpu.memory_space<any>> -> memref<1x128xf32, #tpu.memory_space<any>>
    %c58_i32_510 = arith.constant 58 : i32
    %c0_i32_511 = arith.constant 0 : i32
    %559 = tpu.memref_slice %arg14[%c58_i32_510, %c0_i32_511] : memref<64x128xf32, #tpu.memory_space<vmem>> -> memref<1x128xf32, #tpu.memory_space<vmem>>
    tpu.wait_dma2 semaphore(%arg16 : memref<!tpu.dma_semaphore, #tpu.memory_space<semaphore_mem>>) src(%558 : memref<1x128xf32, #tpu.memory_space<any>>) dst(%559 : memref<1x128xf32, #tpu.memory_space<vmem>>)
    %c0_i32_512 = arith.constant 0 : i32
    %560 = tpu.memref_slice %arg2[%197, %c0_i32_512] : memref<56x128xf32, #tpu.memory_space<any>> -> memref<1x128xf32, #tpu.memory_space<any>>
    %c3_i32_513 = arith.constant 3 : i32
    %c0_i32_514 = arith.constant 0 : i32
    %561 = tpu.memref_slice %arg14[%c3_i32_513, %c0_i32_514] : memref<64x128xf32, #tpu.memory_space<vmem>> -> memref<1x128xf32, #tpu.memory_space<vmem>>
    tpu.wait_dma2 semaphore(%arg16 : memref<!tpu.dma_semaphore, #tpu.memory_space<semaphore_mem>>) src(%560 : memref<1x128xf32, #tpu.memory_space<any>>) dst(%561 : memref<1x128xf32, #tpu.memory_space<vmem>>)
    %c0_i32_515 = arith.constant 0 : i32
    %562 = tpu.memref_slice %arg2[%205, %c0_i32_515] : memref<56x128xf32, #tpu.memory_space<any>> -> memref<1x128xf32, #tpu.memory_space<any>>
    %c11_i32_516 = arith.constant 11 : i32
    %c0_i32_517 = arith.constant 0 : i32
    %563 = tpu.memref_slice %arg14[%c11_i32_516, %c0_i32_517] : memref<64x128xf32, #tpu.memory_space<vmem>> -> memref<1x128xf32, #tpu.memory_space<vmem>>
    tpu.wait_dma2 semaphore(%arg16 : memref<!tpu.dma_semaphore, #tpu.memory_space<semaphore_mem>>) src(%562 : memref<1x128xf32, #tpu.memory_space<any>>) dst(%563 : memref<1x128xf32, #tpu.memory_space<vmem>>)
    %c0_i32_518 = arith.constant 0 : i32
    %564 = tpu.memref_slice %arg2[%213, %c0_i32_518] : memref<56x128xf32, #tpu.memory_space<any>> -> memref<1x128xf32, #tpu.memory_space<any>>
    %c19_i32_519 = arith.constant 19 : i32
    %c0_i32_520 = arith.constant 0 : i32
    %565 = tpu.memref_slice %arg14[%c19_i32_519, %c0_i32_520] : memref<64x128xf32, #tpu.memory_space<vmem>> -> memref<1x128xf32, #tpu.memory_space<vmem>>
    tpu.wait_dma2 semaphore(%arg16 : memref<!tpu.dma_semaphore, #tpu.memory_space<semaphore_mem>>) src(%564 : memref<1x128xf32, #tpu.memory_space<any>>) dst(%565 : memref<1x128xf32, #tpu.memory_space<vmem>>)
    %c0_i32_521 = arith.constant 0 : i32
    %566 = tpu.memref_slice %arg2[%221, %c0_i32_521] : memref<56x128xf32, #tpu.memory_space<any>> -> memref<1x128xf32, #tpu.memory_space<any>>
    %c27_i32_522 = arith.constant 27 : i32
    %c0_i32_523 = arith.constant 0 : i32
    %567 = tpu.memref_slice %arg14[%c27_i32_522, %c0_i32_523] : memref<64x128xf32, #tpu.memory_space<vmem>> -> memref<1x128xf32, #tpu.memory_space<vmem>>
    tpu.wait_dma2 semaphore(%arg16 : memref<!tpu.dma_semaphore, #tpu.memory_space<semaphore_mem>>) src(%566 : memref<1x128xf32, #tpu.memory_space<any>>) dst(%567 : memref<1x128xf32, #tpu.memory_space<vmem>>)
    %c0_i32_524 = arith.constant 0 : i32
    %568 = tpu.memref_slice %arg2[%229, %c0_i32_524] : memref<56x128xf32, #tpu.memory_space<any>> -> memref<1x128xf32, #tpu.memory_space<any>>
    %c35_i32_525 = arith.constant 35 : i32
    %c0_i32_526 = arith.constant 0 : i32
    %569 = tpu.memref_slice %arg14[%c35_i32_525, %c0_i32_526] : memref<64x128xf32, #tpu.memory_space<vmem>> -> memref<1x128xf32, #tpu.memory_space<vmem>>
    tpu.wait_dma2 semaphore(%arg16 : memref<!tpu.dma_semaphore, #tpu.memory_space<semaphore_mem>>) src(%568 : memref<1x128xf32, #tpu.memory_space<any>>) dst(%569 : memref<1x128xf32, #tpu.memory_space<vmem>>)
    %c0_i32_527 = arith.constant 0 : i32
    %570 = tpu.memref_slice %arg2[%237, %c0_i32_527] : memref<56x128xf32, #tpu.memory_space<any>> -> memref<1x128xf32, #tpu.memory_space<any>>
    %c43_i32_528 = arith.constant 43 : i32
    %c0_i32_529 = arith.constant 0 : i32
    %571 = tpu.memref_slice %arg14[%c43_i32_528, %c0_i32_529] : memref<64x128xf32, #tpu.memory_space<vmem>> -> memref<1x128xf32, #tpu.memory_space<vmem>>
    tpu.wait_dma2 semaphore(%arg16 : memref<!tpu.dma_semaphore, #tpu.memory_space<semaphore_mem>>) src(%570 : memref<1x128xf32, #tpu.memory_space<any>>) dst(%571 : memref<1x128xf32, #tpu.memory_space<vmem>>)
    %c0_i32_530 = arith.constant 0 : i32
    %572 = tpu.memref_slice %arg2[%245, %c0_i32_530] : memref<56x128xf32, #tpu.memory_space<any>> -> memref<1x128xf32, #tpu.memory_space<any>>
    %c51_i32_531 = arith.constant 51 : i32
    %c0_i32_532 = arith.constant 0 : i32
    %573 = tpu.memref_slice %arg14[%c51_i32_531, %c0_i32_532] : memref<64x128xf32, #tpu.memory_space<vmem>> -> memref<1x128xf32, #tpu.memory_space<vmem>>
    tpu.wait_dma2 semaphore(%arg16 : memref<!tpu.dma_semaphore, #tpu.memory_space<semaphore_mem>>) src(%572 : memref<1x128xf32, #tpu.memory_space<any>>) dst(%573 : memref<1x128xf32, #tpu.memory_space<vmem>>)
    %c0_i32_533 = arith.constant 0 : i32
    %574 = tpu.memref_slice %arg2[%253, %c0_i32_533] : memref<56x128xf32, #tpu.memory_space<any>> -> memref<1x128xf32, #tpu.memory_space<any>>
    %c59_i32_534 = arith.constant 59 : i32
    %c0_i32_535 = arith.constant 0 : i32
    %575 = tpu.memref_slice %arg14[%c59_i32_534, %c0_i32_535] : memref<64x128xf32, #tpu.memory_space<vmem>> -> memref<1x128xf32, #tpu.memory_space<vmem>>
    tpu.wait_dma2 semaphore(%arg16 : memref<!tpu.dma_semaphore, #tpu.memory_space<semaphore_mem>>) src(%574 : memref<1x128xf32, #tpu.memory_space<any>>) dst(%575 : memref<1x128xf32, #tpu.memory_space<vmem>>)
    %c0_i32_536 = arith.constant 0 : i32
    %576 = tpu.memref_slice %arg2[%261, %c0_i32_536] : memref<56x128xf32, #tpu.memory_space<any>> -> memref<1x128xf32, #tpu.memory_space<any>>
    %c4_i32_537 = arith.constant 4 : i32
    %c0_i32_538 = arith.constant 0 : i32
    %577 = tpu.memref_slice %arg14[%c4_i32_537, %c0_i32_538] : memref<64x128xf32, #tpu.memory_space<vmem>> -> memref<1x128xf32, #tpu.memory_space<vmem>>
    tpu.wait_dma2 semaphore(%arg16 : memref<!tpu.dma_semaphore, #tpu.memory_space<semaphore_mem>>) src(%576 : memref<1x128xf32, #tpu.memory_space<any>>) dst(%577 : memref<1x128xf32, #tpu.memory_space<vmem>>)
    %c0_i32_539 = arith.constant 0 : i32
    %578 = tpu.memref_slice %arg2[%269, %c0_i32_539] : memref<56x128xf32, #tpu.memory_space<any>> -> memref<1x128xf32, #tpu.memory_space<any>>
    %c12_i32_540 = arith.constant 12 : i32
    %c0_i32_541 = arith.constant 0 : i32
    %579 = tpu.memref_slice %arg14[%c12_i32_540, %c0_i32_541] : memref<64x128xf32, #tpu.memory_space<vmem>> -> memref<1x128xf32, #tpu.memory_space<vmem>>
    tpu.wait_dma2 semaphore(%arg16 : memref<!tpu.dma_semaphore, #tpu.memory_space<semaphore_mem>>) src(%578 : memref<1x128xf32, #tpu.memory_space<any>>) dst(%579 : memref<1x128xf32, #tpu.memory_space<vmem>>)
    %c0_i32_542 = arith.constant 0 : i32
    %580 = tpu.memref_slice %arg2[%277, %c0_i32_542] : memref<56x128xf32, #tpu.memory_space<any>> -> memref<1x128xf32, #tpu.memory_space<any>>
    %c20_i32_543 = arith.constant 20 : i32
    %c0_i32_544 = arith.constant 0 : i32
    %581 = tpu.memref_slice %arg14[%c20_i32_543, %c0_i32_544] : memref<64x128xf32, #tpu.memory_space<vmem>> -> memref<1x128xf32, #tpu.memory_space<vmem>>
    tpu.wait_dma2 semaphore(%arg16 : memref<!tpu.dma_semaphore, #tpu.memory_space<semaphore_mem>>) src(%580 : memref<1x128xf32, #tpu.memory_space<any>>) dst(%581 : memref<1x128xf32, #tpu.memory_space<vmem>>)
    %c0_i32_545 = arith.constant 0 : i32
    %582 = tpu.memref_slice %arg2[%285, %c0_i32_545] : memref<56x128xf32, #tpu.memory_space<any>> -> memref<1x128xf32, #tpu.memory_space<any>>
    %c28_i32_546 = arith.constant 28 : i32
    %c0_i32_547 = arith.constant 0 : i32
    %583 = tpu.memref_slice %arg14[%c28_i32_546, %c0_i32_547] : memref<64x128xf32, #tpu.memory_space<vmem>> -> memref<1x128xf32, #tpu.memory_space<vmem>>
    tpu.wait_dma2 semaphore(%arg16 : memref<!tpu.dma_semaphore, #tpu.memory_space<semaphore_mem>>) src(%582 : memref<1x128xf32, #tpu.memory_space<any>>) dst(%583 : memref<1x128xf32, #tpu.memory_space<vmem>>)
    %c0_i32_548 = arith.constant 0 : i32
    %584 = tpu.memref_slice %arg2[%293, %c0_i32_548] : memref<56x128xf32, #tpu.memory_space<any>> -> memref<1x128xf32, #tpu.memory_space<any>>
    %c36_i32_549 = arith.constant 36 : i32
    %c0_i32_550 = arith.constant 0 : i32
    %585 = tpu.memref_slice %arg14[%c36_i32_549, %c0_i32_550] : memref<64x128xf32, #tpu.memory_space<vmem>> -> memref<1x128xf32, #tpu.memory_space<vmem>>
    tpu.wait_dma2 semaphore(%arg16 : memref<!tpu.dma_semaphore, #tpu.memory_space<semaphore_mem>>) src(%584 : memref<1x128xf32, #tpu.memory_space<any>>) dst(%585 : memref<1x128xf32, #tpu.memory_space<vmem>>)
    %c0_i32_551 = arith.constant 0 : i32
    %586 = tpu.memref_slice %arg2[%301, %c0_i32_551] : memref<56x128xf32, #tpu.memory_space<any>> -> memref<1x128xf32, #tpu.memory_space<any>>
    %c44_i32_552 = arith.constant 44 : i32
    %c0_i32_553 = arith.constant 0 : i32
    %587 = tpu.memref_slice %arg14[%c44_i32_552, %c0_i32_553] : memref<64x128xf32, #tpu.memory_space<vmem>> -> memref<1x128xf32, #tpu.memory_space<vmem>>
    tpu.wait_dma2 semaphore(%arg16 : memref<!tpu.dma_semaphore, #tpu.memory_space<semaphore_mem>>) src(%586 : memref<1x128xf32, #tpu.memory_space<any>>) dst(%587 : memref<1x128xf32, #tpu.memory_space<vmem>>)
    %c0_i32_554 = arith.constant 0 : i32
    %588 = tpu.memref_slice %arg2[%309, %c0_i32_554] : memref<56x128xf32, #tpu.memory_space<any>> -> memref<1x128xf32, #tpu.memory_space<any>>
    %c52_i32_555 = arith.constant 52 : i32
    %c0_i32_556 = arith.constant 0 : i32
    %589 = tpu.memref_slice %arg14[%c52_i32_555, %c0_i32_556] : memref<64x128xf32, #tpu.memory_space<vmem>> -> memref<1x128xf32, #tpu.memory_space<vmem>>
    tpu.wait_dma2 semaphore(%arg16 : memref<!tpu.dma_semaphore, #tpu.memory_space<semaphore_mem>>) src(%588 : memref<1x128xf32, #tpu.memory_space<any>>) dst(%589 : memref<1x128xf32, #tpu.memory_space<vmem>>)
    %c0_i32_557 = arith.constant 0 : i32
    %590 = tpu.memref_slice %arg2[%317, %c0_i32_557] : memref<56x128xf32, #tpu.memory_space<any>> -> memref<1x128xf32, #tpu.memory_space<any>>
    %c60_i32_558 = arith.constant 60 : i32
    %c0_i32_559 = arith.constant 0 : i32
    %591 = tpu.memref_slice %arg14[%c60_i32_558, %c0_i32_559] : memref<64x128xf32, #tpu.memory_space<vmem>> -> memref<1x128xf32, #tpu.memory_space<vmem>>
    tpu.wait_dma2 semaphore(%arg16 : memref<!tpu.dma_semaphore, #tpu.memory_space<semaphore_mem>>) src(%590 : memref<1x128xf32, #tpu.memory_space<any>>) dst(%591 : memref<1x128xf32, #tpu.memory_space<vmem>>)
    %c0_i32_560 = arith.constant 0 : i32
    %592 = tpu.memref_slice %arg2[%325, %c0_i32_560] : memref<56x128xf32, #tpu.memory_space<any>> -> memref<1x128xf32, #tpu.memory_space<any>>
    %c5_i32_561 = arith.constant 5 : i32
    %c0_i32_562 = arith.constant 0 : i32
    %593 = tpu.memref_slice %arg14[%c5_i32_561, %c0_i32_562] : memref<64x128xf32, #tpu.memory_space<vmem>> -> memref<1x128xf32, #tpu.memory_space<vmem>>
    tpu.wait_dma2 semaphore(%arg16 : memref<!tpu.dma_semaphore, #tpu.memory_space<semaphore_mem>>) src(%592 : memref<1x128xf32, #tpu.memory_space<any>>) dst(%593 : memref<1x128xf32, #tpu.memory_space<vmem>>)
    %c0_i32_563 = arith.constant 0 : i32
    %594 = tpu.memref_slice %arg2[%333, %c0_i32_563] : memref<56x128xf32, #tpu.memory_space<any>> -> memref<1x128xf32, #tpu.memory_space<any>>
    %c13_i32_564 = arith.constant 13 : i32
    %c0_i32_565 = arith.constant 0 : i32
    %595 = tpu.memref_slice %arg14[%c13_i32_564, %c0_i32_565] : memref<64x128xf32, #tpu.memory_space<vmem>> -> memref<1x128xf32, #tpu.memory_space<vmem>>
    tpu.wait_dma2 semaphore(%arg16 : memref<!tpu.dma_semaphore, #tpu.memory_space<semaphore_mem>>) src(%594 : memref<1x128xf32, #tpu.memory_space<any>>) dst(%595 : memref<1x128xf32, #tpu.memory_space<vmem>>)
    %c0_i32_566 = arith.constant 0 : i32
    %596 = tpu.memref_slice %arg2[%341, %c0_i32_566] : memref<56x128xf32, #tpu.memory_space<any>> -> memref<1x128xf32, #tpu.memory_space<any>>
    %c21_i32_567 = arith.constant 21 : i32
    %c0_i32_568 = arith.constant 0 : i32
    %597 = tpu.memref_slice %arg14[%c21_i32_567, %c0_i32_568] : memref<64x128xf32, #tpu.memory_space<vmem>> -> memref<1x128xf32, #tpu.memory_space<vmem>>
    tpu.wait_dma2 semaphore(%arg16 : memref<!tpu.dma_semaphore, #tpu.memory_space<semaphore_mem>>) src(%596 : memref<1x128xf32, #tpu.memory_space<any>>) dst(%597 : memref<1x128xf32, #tpu.memory_space<vmem>>)
    %c0_i32_569 = arith.constant 0 : i32
    %598 = tpu.memref_slice %arg2[%349, %c0_i32_569] : memref<56x128xf32, #tpu.memory_space<any>> -> memref<1x128xf32, #tpu.memory_space<any>>
    %c29_i32_570 = arith.constant 29 : i32
    %c0_i32_571 = arith.constant 0 : i32
    %599 = tpu.memref_slice %arg14[%c29_i32_570, %c0_i32_571] : memref<64x128xf32, #tpu.memory_space<vmem>> -> memref<1x128xf32, #tpu.memory_space<vmem>>
    tpu.wait_dma2 semaphore(%arg16 : memref<!tpu.dma_semaphore, #tpu.memory_space<semaphore_mem>>) src(%598 : memref<1x128xf32, #tpu.memory_space<any>>) dst(%599 : memref<1x128xf32, #tpu.memory_space<vmem>>)
    %c0_i32_572 = arith.constant 0 : i32
    %600 = tpu.memref_slice %arg2[%357, %c0_i32_572] : memref<56x128xf32, #tpu.memory_space<any>> -> memref<1x128xf32, #tpu.memory_space<any>>
    %c37_i32_573 = arith.constant 37 : i32
    %c0_i32_574 = arith.constant 0 : i32
    %601 = tpu.memref_slice %arg14[%c37_i32_573, %c0_i32_574] : memref<64x128xf32, #tpu.memory_space<vmem>> -> memref<1x128xf32, #tpu.memory_space<vmem>>
    tpu.wait_dma2 semaphore(%arg16 : memref<!tpu.dma_semaphore, #tpu.memory_space<semaphore_mem>>) src(%600 : memref<1x128xf32, #tpu.memory_space<any>>) dst(%601 : memref<1x128xf32, #tpu.memory_space<vmem>>)
    %c0_i32_575 = arith.constant 0 : i32
    %602 = tpu.memref_slice %arg2[%365, %c0_i32_575] : memref<56x128xf32, #tpu.memory_space<any>> -> memref<1x128xf32, #tpu.memory_space<any>>
    %c45_i32_576 = arith.constant 45 : i32
    %c0_i32_577 = arith.constant 0 : i32
    %603 = tpu.memref_slice %arg14[%c45_i32_576, %c0_i32_577] : memref<64x128xf32, #tpu.memory_space<vmem>> -> memref<1x128xf32, #tpu.memory_space<vmem>>
    tpu.wait_dma2 semaphore(%arg16 : memref<!tpu.dma_semaphore, #tpu.memory_space<semaphore_mem>>) src(%602 : memref<1x128xf32, #tpu.memory_space<any>>) dst(%603 : memref<1x128xf32, #tpu.memory_space<vmem>>)
    %c0_i32_578 = arith.constant 0 : i32
    %604 = tpu.memref_slice %arg2[%373, %c0_i32_578] : memref<56x128xf32, #tpu.memory_space<any>> -> memref<1x128xf32, #tpu.memory_space<any>>
    %c53_i32_579 = arith.constant 53 : i32
    %c0_i32_580 = arith.constant 0 : i32
    %605 = tpu.memref_slice %arg14[%c53_i32_579, %c0_i32_580] : memref<64x128xf32, #tpu.memory_space<vmem>> -> memref<1x128xf32, #tpu.memory_space<vmem>>
    tpu.wait_dma2 semaphore(%arg16 : memref<!tpu.dma_semaphore, #tpu.memory_space<semaphore_mem>>) src(%604 : memref<1x128xf32, #tpu.memory_space<any>>) dst(%605 : memref<1x128xf32, #tpu.memory_space<vmem>>)
    %c0_i32_581 = arith.constant 0 : i32
    %606 = tpu.memref_slice %arg2[%381, %c0_i32_581] : memref<56x128xf32, #tpu.memory_space<any>> -> memref<1x128xf32, #tpu.memory_space<any>>
    %c61_i32_582 = arith.constant 61 : i32
    %c0_i32_583 = arith.constant 0 : i32
    %607 = tpu.memref_slice %arg14[%c61_i32_582, %c0_i32_583] : memref<64x128xf32, #tpu.memory_space<vmem>> -> memref<1x128xf32, #tpu.memory_space<vmem>>
    tpu.wait_dma2 semaphore(%arg16 : memref<!tpu.dma_semaphore, #tpu.memory_space<semaphore_mem>>) src(%606 : memref<1x128xf32, #tpu.memory_space<any>>) dst(%607 : memref<1x128xf32, #tpu.memory_space<vmem>>)
    %c0_i32_584 = arith.constant 0 : i32
    %608 = tpu.memref_slice %arg2[%389, %c0_i32_584] : memref<56x128xf32, #tpu.memory_space<any>> -> memref<1x128xf32, #tpu.memory_space<any>>
    %c6_i32_585 = arith.constant 6 : i32
    %c0_i32_586 = arith.constant 0 : i32
    %609 = tpu.memref_slice %arg14[%c6_i32_585, %c0_i32_586] : memref<64x128xf32, #tpu.memory_space<vmem>> -> memref<1x128xf32, #tpu.memory_space<vmem>>
    tpu.wait_dma2 semaphore(%arg16 : memref<!tpu.dma_semaphore, #tpu.memory_space<semaphore_mem>>) src(%608 : memref<1x128xf32, #tpu.memory_space<any>>) dst(%609 : memref<1x128xf32, #tpu.memory_space<vmem>>)
    %c0_i32_587 = arith.constant 0 : i32
    %610 = tpu.memref_slice %arg2[%397, %c0_i32_587] : memref<56x128xf32, #tpu.memory_space<any>> -> memref<1x128xf32, #tpu.memory_space<any>>
    %c14_i32_588 = arith.constant 14 : i32
    %c0_i32_589 = arith.constant 0 : i32
    %611 = tpu.memref_slice %arg14[%c14_i32_588, %c0_i32_589] : memref<64x128xf32, #tpu.memory_space<vmem>> -> memref<1x128xf32, #tpu.memory_space<vmem>>
    tpu.wait_dma2 semaphore(%arg16 : memref<!tpu.dma_semaphore, #tpu.memory_space<semaphore_mem>>) src(%610 : memref<1x128xf32, #tpu.memory_space<any>>) dst(%611 : memref<1x128xf32, #tpu.memory_space<vmem>>)
    %c0_i32_590 = arith.constant 0 : i32
    %612 = tpu.memref_slice %arg2[%405, %c0_i32_590] : memref<56x128xf32, #tpu.memory_space<any>> -> memref<1x128xf32, #tpu.memory_space<any>>
    %c22_i32_591 = arith.constant 22 : i32
    %c0_i32_592 = arith.constant 0 : i32
    %613 = tpu.memref_slice %arg14[%c22_i32_591, %c0_i32_592] : memref<64x128xf32, #tpu.memory_space<vmem>> -> memref<1x128xf32, #tpu.memory_space<vmem>>
    tpu.wait_dma2 semaphore(%arg16 : memref<!tpu.dma_semaphore, #tpu.memory_space<semaphore_mem>>) src(%612 : memref<1x128xf32, #tpu.memory_space<any>>) dst(%613 : memref<1x128xf32, #tpu.memory_space<vmem>>)
    %c0_i32_593 = arith.constant 0 : i32
    %614 = tpu.memref_slice %arg2[%413, %c0_i32_593] : memref<56x128xf32, #tpu.memory_space<any>> -> memref<1x128xf32, #tpu.memory_space<any>>
    %c30_i32_594 = arith.constant 30 : i32
    %c0_i32_595 = arith.constant 0 : i32
    %615 = tpu.memref_slice %arg14[%c30_i32_594, %c0_i32_595] : memref<64x128xf32, #tpu.memory_space<vmem>> -> memref<1x128xf32, #tpu.memory_space<vmem>>
    tpu.wait_dma2 semaphore(%arg16 : memref<!tpu.dma_semaphore, #tpu.memory_space<semaphore_mem>>) src(%614 : memref<1x128xf32, #tpu.memory_space<any>>) dst(%615 : memref<1x128xf32, #tpu.memory_space<vmem>>)
    %c0_i32_596 = arith.constant 0 : i32
    %616 = tpu.memref_slice %arg2[%421, %c0_i32_596] : memref<56x128xf32, #tpu.memory_space<any>> -> memref<1x128xf32, #tpu.memory_space<any>>
    %c38_i32_597 = arith.constant 38 : i32
    %c0_i32_598 = arith.constant 0 : i32
    %617 = tpu.memref_slice %arg14[%c38_i32_597, %c0_i32_598] : memref<64x128xf32, #tpu.memory_space<vmem>> -> memref<1x128xf32, #tpu.memory_space<vmem>>
    tpu.wait_dma2 semaphore(%arg16 : memref<!tpu.dma_semaphore, #tpu.memory_space<semaphore_mem>>) src(%616 : memref<1x128xf32, #tpu.memory_space<any>>) dst(%617 : memref<1x128xf32, #tpu.memory_space<vmem>>)
    %c0_i32_599 = arith.constant 0 : i32
    %618 = tpu.memref_slice %arg2[%429, %c0_i32_599] : memref<56x128xf32, #tpu.memory_space<any>> -> memref<1x128xf32, #tpu.memory_space<any>>
    %c46_i32_600 = arith.constant 46 : i32
    %c0_i32_601 = arith.constant 0 : i32
    %619 = tpu.memref_slice %arg14[%c46_i32_600, %c0_i32_601] : memref<64x128xf32, #tpu.memory_space<vmem>> -> memref<1x128xf32, #tpu.memory_space<vmem>>
    tpu.wait_dma2 semaphore(%arg16 : memref<!tpu.dma_semaphore, #tpu.memory_space<semaphore_mem>>) src(%618 : memref<1x128xf32, #tpu.memory_space<any>>) dst(%619 : memref<1x128xf32, #tpu.memory_space<vmem>>)
    %c0_i32_602 = arith.constant 0 : i32
    %620 = tpu.memref_slice %arg2[%437, %c0_i32_602] : memref<56x128xf32, #tpu.memory_space<any>> -> memref<1x128xf32, #tpu.memory_space<any>>
    %c54_i32_603 = arith.constant 54 : i32
    %c0_i32_604 = arith.constant 0 : i32
    %621 = tpu.memref_slice %arg14[%c54_i32_603, %c0_i32_604] : memref<64x128xf32, #tpu.memory_space<vmem>> -> memref<1x128xf32, #tpu.memory_space<vmem>>
    tpu.wait_dma2 semaphore(%arg16 : memref<!tpu.dma_semaphore, #tpu.memory_space<semaphore_mem>>) src(%620 : memref<1x128xf32, #tpu.memory_space<any>>) dst(%621 : memref<1x128xf32, #tpu.memory_space<vmem>>)
    %c0_i32_605 = arith.constant 0 : i32
    %622 = tpu.memref_slice %arg2[%445, %c0_i32_605] : memref<56x128xf32, #tpu.memory_space<any>> -> memref<1x128xf32, #tpu.memory_space<any>>
    %c62_i32_606 = arith.constant 62 : i32
    %c0_i32_607 = arith.constant 0 : i32
    %623 = tpu.memref_slice %arg14[%c62_i32_606, %c0_i32_607] : memref<64x128xf32, #tpu.memory_space<vmem>> -> memref<1x128xf32, #tpu.memory_space<vmem>>
    tpu.wait_dma2 semaphore(%arg16 : memref<!tpu.dma_semaphore, #tpu.memory_space<semaphore_mem>>) src(%622 : memref<1x128xf32, #tpu.memory_space<any>>) dst(%623 : memref<1x128xf32, #tpu.memory_space<vmem>>)
    %c0_i32_608 = arith.constant 0 : i32
    %624 = tpu.memref_slice %arg2[%453, %c0_i32_608] : memref<56x128xf32, #tpu.memory_space<any>> -> memref<1x128xf32, #tpu.memory_space<any>>
    %c7_i32_609 = arith.constant 7 : i32
    %c0_i32_610 = arith.constant 0 : i32
    %625 = tpu.memref_slice %arg14[%c7_i32_609, %c0_i32_610] : memref<64x128xf32, #tpu.memory_space<vmem>> -> memref<1x128xf32, #tpu.memory_space<vmem>>
    tpu.wait_dma2 semaphore(%arg16 : memref<!tpu.dma_semaphore, #tpu.memory_space<semaphore_mem>>) src(%624 : memref<1x128xf32, #tpu.memory_space<any>>) dst(%625 : memref<1x128xf32, #tpu.memory_space<vmem>>)
    %c0_i32_611 = arith.constant 0 : i32
    %626 = tpu.memref_slice %arg2[%461, %c0_i32_611] : memref<56x128xf32, #tpu.memory_space<any>> -> memref<1x128xf32, #tpu.memory_space<any>>
    %c15_i32_612 = arith.constant 15 : i32
    %c0_i32_613 = arith.constant 0 : i32
    %627 = tpu.memref_slice %arg14[%c15_i32_612, %c0_i32_613] : memref<64x128xf32, #tpu.memory_space<vmem>> -> memref<1x128xf32, #tpu.memory_space<vmem>>
    tpu.wait_dma2 semaphore(%arg16 : memref<!tpu.dma_semaphore, #tpu.memory_space<semaphore_mem>>) src(%626 : memref<1x128xf32, #tpu.memory_space<any>>) dst(%627 : memref<1x128xf32, #tpu.memory_space<vmem>>)
    %c0_i32_614 = arith.constant 0 : i32
    %628 = tpu.memref_slice %arg2[%469, %c0_i32_614] : memref<56x128xf32, #tpu.memory_space<any>> -> memref<1x128xf32, #tpu.memory_space<any>>
    %c23_i32_615 = arith.constant 23 : i32
    %c0_i32_616 = arith.constant 0 : i32
    %629 = tpu.memref_slice %arg14[%c23_i32_615, %c0_i32_616] : memref<64x128xf32, #tpu.memory_space<vmem>> -> memref<1x128xf32, #tpu.memory_space<vmem>>
    tpu.wait_dma2 semaphore(%arg16 : memref<!tpu.dma_semaphore, #tpu.memory_space<semaphore_mem>>) src(%628 : memref<1x128xf32, #tpu.memory_space<any>>) dst(%629 : memref<1x128xf32, #tpu.memory_space<vmem>>)
    %c0_i32_617 = arith.constant 0 : i32
    %630 = tpu.memref_slice %arg2[%477, %c0_i32_617] : memref<56x128xf32, #tpu.memory_space<any>> -> memref<1x128xf32, #tpu.memory_space<any>>
    %c31_i32_618 = arith.constant 31 : i32
    %c0_i32_619 = arith.constant 0 : i32
    %631 = tpu.memref_slice %arg14[%c31_i32_618, %c0_i32_619] : memref<64x128xf32, #tpu.memory_space<vmem>> -> memref<1x128xf32, #tpu.memory_space<vmem>>
    tpu.wait_dma2 semaphore(%arg16 : memref<!tpu.dma_semaphore, #tpu.memory_space<semaphore_mem>>) src(%630 : memref<1x128xf32, #tpu.memory_space<any>>) dst(%631 : memref<1x128xf32, #tpu.memory_space<vmem>>)
    %c0_i32_620 = arith.constant 0 : i32
    %632 = tpu.memref_slice %arg2[%485, %c0_i32_620] : memref<56x128xf32, #tpu.memory_space<any>> -> memref<1x128xf32, #tpu.memory_space<any>>
    %c39_i32_621 = arith.constant 39 : i32
    %c0_i32_622 = arith.constant 0 : i32
    %633 = tpu.memref_slice %arg14[%c39_i32_621, %c0_i32_622] : memref<64x128xf32, #tpu.memory_space<vmem>> -> memref<1x128xf32, #tpu.memory_space<vmem>>
    tpu.wait_dma2 semaphore(%arg16 : memref<!tpu.dma_semaphore, #tpu.memory_space<semaphore_mem>>) src(%632 : memref<1x128xf32, #tpu.memory_space<any>>) dst(%633 : memref<1x128xf32, #tpu.memory_space<vmem>>)
    %c0_i32_623 = arith.constant 0 : i32
    %634 = tpu.memref_slice %arg2[%493, %c0_i32_623] : memref<56x128xf32, #tpu.memory_space<any>> -> memref<1x128xf32, #tpu.memory_space<any>>
    %c47_i32_624 = arith.constant 47 : i32
    %c0_i32_625 = arith.constant 0 : i32
    %635 = tpu.memref_slice %arg14[%c47_i32_624, %c0_i32_625] : memref<64x128xf32, #tpu.memory_space<vmem>> -> memref<1x128xf32, #tpu.memory_space<vmem>>
    tpu.wait_dma2 semaphore(%arg16 : memref<!tpu.dma_semaphore, #tpu.memory_space<semaphore_mem>>) src(%634 : memref<1x128xf32, #tpu.memory_space<any>>) dst(%635 : memref<1x128xf32, #tpu.memory_space<vmem>>)
    %c0_i32_626 = arith.constant 0 : i32
    %636 = tpu.memref_slice %arg2[%501, %c0_i32_626] : memref<56x128xf32, #tpu.memory_space<any>> -> memref<1x128xf32, #tpu.memory_space<any>>
    %c55_i32_627 = arith.constant 55 : i32
    %c0_i32_628 = arith.constant 0 : i32
    %637 = tpu.memref_slice %arg14[%c55_i32_627, %c0_i32_628] : memref<64x128xf32, #tpu.memory_space<vmem>> -> memref<1x128xf32, #tpu.memory_space<vmem>>
    tpu.wait_dma2 semaphore(%arg16 : memref<!tpu.dma_semaphore, #tpu.memory_space<semaphore_mem>>) src(%636 : memref<1x128xf32, #tpu.memory_space<any>>) dst(%637 : memref<1x128xf32, #tpu.memory_space<vmem>>)
    %c0_i32_629 = arith.constant 0 : i32
    %638 = tpu.memref_slice %arg2[%509, %c0_i32_629] : memref<56x128xf32, #tpu.memory_space<any>> -> memref<1x128xf32, #tpu.memory_space<any>>
    %c63_i32_630 = arith.constant 63 : i32
    %c0_i32_631 = arith.constant 0 : i32
    %639 = tpu.memref_slice %arg14[%c63_i32_630, %c0_i32_631] : memref<64x128xf32, #tpu.memory_space<vmem>> -> memref<1x128xf32, #tpu.memory_space<vmem>>
    tpu.wait_dma2 semaphore(%arg16 : memref<!tpu.dma_semaphore, #tpu.memory_space<semaphore_mem>>) src(%638 : memref<1x128xf32, #tpu.memory_space<any>>) dst(%639 : memref<1x128xf32, #tpu.memory_space<vmem>>)
    %c0_632 = arith.constant 0 : index
    %c0_633 = arith.constant 0 : index
    %640 = vector.load %arg5[%c0_632, %c0_633] : memref<1x384xf32, #tpu.memory_space<vmem>>, vector<1x384xf32>
    %c0_634 = arith.constant 0 : index
    %c0_635 = arith.constant 0 : index
    %641 = vector.load %arg6[%c0_634, %c0_635] : memref<1x128xf32, #tpu.memory_space<vmem>>, vector<1x128xf32>
    %c0_636 = arith.constant 0 : index
    %c0_637 = arith.constant 0 : index
    %642 = vector.load %arg14[%c0_636, %c0_637] : memref<64x128xf32, #tpu.memory_space<vmem>>, vector<64x128xf32>
    %643 = arith.truncf %642 : vector<64x128xf32> to vector<64x128xbf16>
    %c0_638 = arith.constant 0 : index
    %c0_639 = arith.constant 0 : index
    %644 = vector.load %arg3[%c0_638, %c0_639] : memref<128x384xbf16, #tpu.memory_space<vmem>>, vector<128x384xbf16>
    %cst = arith.constant dense<0.000000e+00> : vector<64x384xf32>
    %645 = tpu.matmul %643, %644, %cst {dimension_numbers = #tpu.dot_dimension_numbers<[1], [0], [0], [1], [0, 0, 1, 1], [], []>} : vector<64x128xbf16>, vector<128x384xbf16>, vector<64x384xf32> -> vector<64x384xf32>
    %646 = vector.broadcast %640 : vector<1x384xf32> to vector<64x384xf32>
    %647 = arith.addf %645, %646 : vector<64x384xf32>
    %c0_640 = arith.constant 0 : index
    %c0_641 = arith.constant 0 : index
    %648 = vector.load %arg15[%c0_640, %c0_641] : memref<64x384xf32, #tpu.memory_space<vmem>>, vector<64x384xf32>
    tpu.vector_store %arg15[%c0_640, %c0_641], %647 {strides = array<i32>} : memref<64x384xf32, #tpu.memory_space<vmem>>, vector<64x384xf32>,
    %cst_642 = arith.constant 0.000000e+00 : f32
    %649 = vector.broadcast %cst_642 : f32 to vector<8x128xf32>
    %c0_643 = arith.constant 0 : index
    %c0_644 = arith.constant 0 : index
    %650 = vector.load %arg15[%c0_643, %c0_644] : memref<64x384xf32, #tpu.memory_space<vmem>>, vector<8x384xf32>
    %651 = arith.truncf %649 : vector<8x128xf32> to vector<8x128xbf16>
    %c0_645 = arith.constant 0 : index
    %c0_646 = arith.constant 0 : index
    %652 = vector.load %arg4[%c0_645, %c0_646] : memref<128x384xbf16, #tpu.memory_space<vmem>>, vector<128x384xbf16>
    %cst_647 = arith.constant dense<0.000000e+00> : vector<8x384xf32>
    %653 = tpu.matmul %651, %652, %cst_647 {dimension_numbers = #tpu.dot_dimension_numbers<[1], [0], [0], [1], [0, 0, 1, 1], [], []>} : vector<8x128xbf16>, vector<128x384xbf16>, vector<8x384xf32> -> vector<8x384xf32>
    %654 = vector.extract_strided_slice %650 {offsets = [0, 0], sizes = [8, 256], strides = [1, 1]} : vector<8x384xf32> to vector<8x256xf32>
    %655 = vector.extract_strided_slice %653 {offsets = [0, 0], sizes = [8, 256], strides = [1, 1]} : vector<8x384xf32> to vector<8x256xf32>
    %656 = arith.addf %654, %655 : vector<8x256xf32>
    %657 = arith.negf %656 : vector<8x256xf32>
    %658 = math.exp %657 : vector<8x256xf32>
    %cst_648 = arith.constant 1.000000e+00 : f32
    %659 = vector.broadcast %cst_648 : f32 to vector<8x256xf32>
    %660 = arith.addf %659, %658 : vector<8x256xf32>
    %661 = arith.divf %659, %660 : vector<8x256xf32>
    %662 = vector.extract_strided_slice %661 {offsets = [0, 128], sizes = [8, 128], strides = [1, 1]} : vector<8x256xf32> to vector<8x128xf32>
    %663 = vector.extract_strided_slice %650 {offsets = [0, 256], sizes = [8, 128], strides = [1, 1]} : vector<8x384xf32> to vector<8x128xf32>
    %664 = vector.extract_strided_slice %661 {offsets = [0, 0], sizes = [8, 128], strides = [1, 1]} : vector<8x256xf32> to vector<8x128xf32>
    %665 = vector.extract_strided_slice %653 {offsets = [0, 256], sizes = [8, 128], strides = [1, 1]} : vector<8x384xf32> to vector<8x128xf32>
    %666 = vector.broadcast %641 : vector<1x128xf32> to vector<8x128xf32>
    %667 = arith.addf %665, %666 : vector<8x128xf32>
    %668 = arith.mulf %664, %667 : vector<8x128xf32>
    %669 = arith.addf %663, %668 : vector<8x128xf32>
    %670 = math.tanh %669 : vector<8x128xf32>
    %671 = arith.subf %649, %670 : vector<8x128xf32>
    %672 = arith.mulf %662, %671 : vector<8x128xf32>
    %673 = arith.addf %670, %672 : vector<8x128xf32>
    %c0_649 = arith.constant 0 : index
    %c0_650 = arith.constant 0 : index
    %674 = vector.load %arg14[%c0_649, %c0_650] : memref<64x128xf32, #tpu.memory_space<vmem>>, vector<8x128xf32>
    tpu.vector_store %arg14[%c0_649, %c0_650], %673 {strides = array<i32>} : memref<64x128xf32, #tpu.memory_space<vmem>>, vector<8x128xf32>,
    %c8 = arith.constant 8 : index
    %c0_651 = arith.constant 0 : index
    %675 = vector.load %arg15[%c8, %c0_651] : memref<64x384xf32, #tpu.memory_space<vmem>>, vector<8x384xf32>
    %676 = arith.truncf %673 : vector<8x128xf32> to vector<8x128xbf16>
    %c0_652 = arith.constant 0 : index
    %c0_653 = arith.constant 0 : index
    %677 = vector.load %arg4[%c0_652, %c0_653] : memref<128x384xbf16, #tpu.memory_space<vmem>>, vector<128x384xbf16>
    %cst_654 = arith.constant dense<0.000000e+00> : vector<8x384xf32>
    %678 = tpu.matmul %676, %677, %cst_654 {dimension_numbers = #tpu.dot_dimension_numbers<[1], [0], [0], [1], [0, 0, 1, 1], [], []>} : vector<8x128xbf16>, vector<128x384xbf16>, vector<8x384xf32> -> vector<8x384xf32>
    %679 = vector.extract_strided_slice %675 {offsets = [0, 0], sizes = [8, 256], strides = [1, 1]} : vector<8x384xf32> to vector<8x256xf32>
    %680 = vector.extract_strided_slice %678 {offsets = [0, 0], sizes = [8, 256], strides = [1, 1]} : vector<8x384xf32> to vector<8x256xf32>
    %681 = arith.addf %679, %680 : vector<8x256xf32>
    %682 = arith.negf %681 : vector<8x256xf32>
    %683 = math.exp %682 : vector<8x256xf32>
    %cst_655 = arith.constant 1.000000e+00 : f32
    %684 = vector.broadcast %cst_655 : f32 to vector<8x256xf32>
    %685 = arith.addf %684, %683 : vector<8x256xf32>
    %686 = arith.divf %684, %685 : vector<8x256xf32>
    %687 = vector.extract_strided_slice %686 {offsets = [0, 128], sizes = [8, 128], strides = [1, 1]} : vector<8x256xf32> to vector<8x128xf32>
    %688 = vector.extract_strided_slice %675 {offsets = [0, 256], sizes = [8, 128], strides = [1, 1]} : vector<8x384xf32> to vector<8x128xf32>
    %689 = vector.extract_strided_slice %686 {offsets = [0, 0], sizes = [8, 128], strides = [1, 1]} : vector<8x256xf32> to vector<8x128xf32>
    %690 = vector.extract_strided_slice %678 {offsets = [0, 256], sizes = [8, 128], strides = [1, 1]} : vector<8x384xf32> to vector<8x128xf32>
    %691 = vector.broadcast %641 : vector<1x128xf32> to vector<8x128xf32>
    %692 = arith.addf %690, %691 : vector<8x128xf32>
    %693 = arith.mulf %689, %692 : vector<8x128xf32>
    %694 = arith.addf %688, %693 : vector<8x128xf32>
    %695 = math.tanh %694 : vector<8x128xf32>
    %696 = arith.subf %673, %695 : vector<8x128xf32>
    %697 = arith.mulf %687, %696 : vector<8x128xf32>
    %698 = arith.addf %695, %697 : vector<8x128xf32>
    %c8_656 = arith.constant 8 : index
    %c0_657 = arith.constant 0 : index
    %699 = vector.load %arg14[%c8_656, %c0_657] : memref<64x128xf32, #tpu.memory_space<vmem>>, vector<8x128xf32>
    tpu.vector_store %arg14[%c8_656, %c0_657], %698 {strides = array<i32>} : memref<64x128xf32, #tpu.memory_space<vmem>>, vector<8x128xf32>,
    %c16 = arith.constant 16 : index
    %c0_658 = arith.constant 0 : index
    %700 = vector.load %arg15[%c16, %c0_658] : memref<64x384xf32, #tpu.memory_space<vmem>>, vector<8x384xf32>
    %701 = arith.truncf %698 : vector<8x128xf32> to vector<8x128xbf16>
    %c0_659 = arith.constant 0 : index
    %c0_660 = arith.constant 0 : index
    %702 = vector.load %arg4[%c0_659, %c0_660] : memref<128x384xbf16, #tpu.memory_space<vmem>>, vector<128x384xbf16>
    %cst_661 = arith.constant dense<0.000000e+00> : vector<8x384xf32>
    %703 = tpu.matmul %701, %702, %cst_661 {dimension_numbers = #tpu.dot_dimension_numbers<[1], [0], [0], [1], [0, 0, 1, 1], [], []>} : vector<8x128xbf16>, vector<128x384xbf16>, vector<8x384xf32> -> vector<8x384xf32>
    %704 = vector.extract_strided_slice %700 {offsets = [0, 0], sizes = [8, 256], strides = [1, 1]} : vector<8x384xf32> to vector<8x256xf32>
    %705 = vector.extract_strided_slice %703 {offsets = [0, 0], sizes = [8, 256], strides = [1, 1]} : vector<8x384xf32> to vector<8x256xf32>
    %706 = arith.addf %704, %705 : vector<8x256xf32>
    %707 = arith.negf %706 : vector<8x256xf32>
    %708 = math.exp %707 : vector<8x256xf32>
    %cst_662 = arith.constant 1.000000e+00 : f32
    %709 = vector.broadcast %cst_662 : f32 to vector<8x256xf32>
    %710 = arith.addf %709, %708 : vector<8x256xf32>
    %711 = arith.divf %709, %710 : vector<8x256xf32>
    %712 = vector.extract_strided_slice %711 {offsets = [0, 128], sizes = [8, 128], strides = [1, 1]} : vector<8x256xf32> to vector<8x128xf32>
    %713 = vector.extract_strided_slice %700 {offsets = [0, 256], sizes = [8, 128], strides = [1, 1]} : vector<8x384xf32> to vector<8x128xf32>
    %714 = vector.extract_strided_slice %711 {offsets = [0, 0], sizes = [8, 128], strides = [1, 1]} : vector<8x256xf32> to vector<8x128xf32>
    %715 = vector.extract_strided_slice %703 {offsets = [0, 256], sizes = [8, 128], strides = [1, 1]} : vector<8x384xf32> to vector<8x128xf32>
    %716 = vector.broadcast %641 : vector<1x128xf32> to vector<8x128xf32>
    %717 = arith.addf %715, %716 : vector<8x128xf32>
    %718 = arith.mulf %714, %717 : vector<8x128xf32>
    %719 = arith.addf %713, %718 : vector<8x128xf32>
    %720 = math.tanh %719 : vector<8x128xf32>
    %721 = arith.subf %698, %720 : vector<8x128xf32>
    %722 = arith.mulf %712, %721 : vector<8x128xf32>
    %723 = arith.addf %720, %722 : vector<8x128xf32>
    %c16_663 = arith.constant 16 : index
    %c0_664 = arith.constant 0 : index
    %724 = vector.load %arg14[%c16_663, %c0_664] : memref<64x128xf32, #tpu.memory_space<vmem>>, vector<8x128xf32>
    tpu.vector_store %arg14[%c16_663, %c0_664], %723 {strides = array<i32>} : memref<64x128xf32, #tpu.memory_space<vmem>>, vector<8x128xf32>,
    %c24 = arith.constant 24 : index
    %c0_665 = arith.constant 0 : index
    %725 = vector.load %arg15[%c24, %c0_665] : memref<64x384xf32, #tpu.memory_space<vmem>>, vector<8x384xf32>
    %726 = arith.truncf %723 : vector<8x128xf32> to vector<8x128xbf16>
    %c0_666 = arith.constant 0 : index
    %c0_667 = arith.constant 0 : index
    %727 = vector.load %arg4[%c0_666, %c0_667] : memref<128x384xbf16, #tpu.memory_space<vmem>>, vector<128x384xbf16>
    %cst_668 = arith.constant dense<0.000000e+00> : vector<8x384xf32>
    %728 = tpu.matmul %726, %727, %cst_668 {dimension_numbers = #tpu.dot_dimension_numbers<[1], [0], [0], [1], [0, 0, 1, 1], [], []>} : vector<8x128xbf16>, vector<128x384xbf16>, vector<8x384xf32> -> vector<8x384xf32>
    %729 = vector.extract_strided_slice %725 {offsets = [0, 0], sizes = [8, 256], strides = [1, 1]} : vector<8x384xf32> to vector<8x256xf32>
    %730 = vector.extract_strided_slice %728 {offsets = [0, 0], sizes = [8, 256], strides = [1, 1]} : vector<8x384xf32> to vector<8x256xf32>
    %731 = arith.addf %729, %730 : vector<8x256xf32>
    %732 = arith.negf %731 : vector<8x256xf32>
    %733 = math.exp %732 : vector<8x256xf32>
    %cst_669 = arith.constant 1.000000e+00 : f32
    %734 = vector.broadcast %cst_669 : f32 to vector<8x256xf32>
    %735 = arith.addf %734, %733 : vector<8x256xf32>
    %736 = arith.divf %734, %735 : vector<8x256xf32>
    %737 = vector.extract_strided_slice %736 {offsets = [0, 128], sizes = [8, 128], strides = [1, 1]} : vector<8x256xf32> to vector<8x128xf32>
    %738 = vector.extract_strided_slice %725 {offsets = [0, 256], sizes = [8, 128], strides = [1, 1]} : vector<8x384xf32> to vector<8x128xf32>
    %739 = vector.extract_strided_slice %736 {offsets = [0, 0], sizes = [8, 128], strides = [1, 1]} : vector<8x256xf32> to vector<8x128xf32>
    %740 = vector.extract_strided_slice %728 {offsets = [0, 256], sizes = [8, 128], strides = [1, 1]} : vector<8x384xf32> to vector<8x128xf32>
    %741 = vector.broadcast %641 : vector<1x128xf32> to vector<8x128xf32>
    %742 = arith.addf %740, %741 : vector<8x128xf32>
    %743 = arith.mulf %739, %742 : vector<8x128xf32>
    %744 = arith.addf %738, %743 : vector<8x128xf32>
    %745 = math.tanh %744 : vector<8x128xf32>
    %746 = arith.subf %723, %745 : vector<8x128xf32>
    %747 = arith.mulf %737, %746 : vector<8x128xf32>
    %748 = arith.addf %745, %747 : vector<8x128xf32>
    %c24_670 = arith.constant 24 : index
    %c0_671 = arith.constant 0 : index
    %749 = vector.load %arg14[%c24_670, %c0_671] : memref<64x128xf32, #tpu.memory_space<vmem>>, vector<8x128xf32>
    tpu.vector_store %arg14[%c24_670, %c0_671], %748 {strides = array<i32>} : memref<64x128xf32, #tpu.memory_space<vmem>>, vector<8x128xf32>,
    %c32 = arith.constant 32 : index
    %c0_672 = arith.constant 0 : index
    %750 = vector.load %arg15[%c32, %c0_672] : memref<64x384xf32, #tpu.memory_space<vmem>>, vector<8x384xf32>
    %751 = arith.truncf %748 : vector<8x128xf32> to vector<8x128xbf16>
    %c0_673 = arith.constant 0 : index
    %c0_674 = arith.constant 0 : index
    %752 = vector.load %arg4[%c0_673, %c0_674] : memref<128x384xbf16, #tpu.memory_space<vmem>>, vector<128x384xbf16>
    %cst_675 = arith.constant dense<0.000000e+00> : vector<8x384xf32>
    %753 = tpu.matmul %751, %752, %cst_675 {dimension_numbers = #tpu.dot_dimension_numbers<[1], [0], [0], [1], [0, 0, 1, 1], [], []>} : vector<8x128xbf16>, vector<128x384xbf16>, vector<8x384xf32> -> vector<8x384xf32>
    %754 = vector.extract_strided_slice %750 {offsets = [0, 0], sizes = [8, 256], strides = [1, 1]} : vector<8x384xf32> to vector<8x256xf32>
    %755 = vector.extract_strided_slice %753 {offsets = [0, 0], sizes = [8, 256], strides = [1, 1]} : vector<8x384xf32> to vector<8x256xf32>
    %756 = arith.addf %754, %755 : vector<8x256xf32>
    %757 = arith.negf %756 : vector<8x256xf32>
    %758 = math.exp %757 : vector<8x256xf32>
    %cst_676 = arith.constant 1.000000e+00 : f32
    %759 = vector.broadcast %cst_676 : f32 to vector<8x256xf32>
    %760 = arith.addf %759, %758 : vector<8x256xf32>
    %761 = arith.divf %759, %760 : vector<8x256xf32>
    %762 = vector.extract_strided_slice %761 {offsets = [0, 128], sizes = [8, 128], strides = [1, 1]} : vector<8x256xf32> to vector<8x128xf32>
    %763 = vector.extract_strided_slice %750 {offsets = [0, 256], sizes = [8, 128], strides = [1, 1]} : vector<8x384xf32> to vector<8x128xf32>
    %764 = vector.extract_strided_slice %761 {offsets = [0, 0], sizes = [8, 128], strides = [1, 1]} : vector<8x256xf32> to vector<8x128xf32>
    %765 = vector.extract_strided_slice %753 {offsets = [0, 256], sizes = [8, 128], strides = [1, 1]} : vector<8x384xf32> to vector<8x128xf32>
    %766 = vector.broadcast %641 : vector<1x128xf32> to vector<8x128xf32>
    %767 = arith.addf %765, %766 : vector<8x128xf32>
    %768 = arith.mulf %764, %767 : vector<8x128xf32>
    %769 = arith.addf %763, %768 : vector<8x128xf32>
    %770 = math.tanh %769 : vector<8x128xf32>
    %771 = arith.subf %748, %770 : vector<8x128xf32>
    %772 = arith.mulf %762, %771 : vector<8x128xf32>
    %773 = arith.addf %770, %772 : vector<8x128xf32>
    %c32_677 = arith.constant 32 : index
    %c0_678 = arith.constant 0 : index
    %774 = vector.load %arg14[%c32_677, %c0_678] : memref<64x128xf32, #tpu.memory_space<vmem>>, vector<8x128xf32>
    tpu.vector_store %arg14[%c32_677, %c0_678], %773 {strides = array<i32>} : memref<64x128xf32, #tpu.memory_space<vmem>>, vector<8x128xf32>,
    %c40 = arith.constant 40 : index
    %c0_679 = arith.constant 0 : index
    %775 = vector.load %arg15[%c40, %c0_679] : memref<64x384xf32, #tpu.memory_space<vmem>>, vector<8x384xf32>
    %776 = arith.truncf %773 : vector<8x128xf32> to vector<8x128xbf16>
    %c0_680 = arith.constant 0 : index
    %c0_681 = arith.constant 0 : index
    %777 = vector.load %arg4[%c0_680, %c0_681] : memref<128x384xbf16, #tpu.memory_space<vmem>>, vector<128x384xbf16>
    %cst_682 = arith.constant dense<0.000000e+00> : vector<8x384xf32>
    %778 = tpu.matmul %776, %777, %cst_682 {dimension_numbers = #tpu.dot_dimension_numbers<[1], [0], [0], [1], [0, 0, 1, 1], [], []>} : vector<8x128xbf16>, vector<128x384xbf16>, vector<8x384xf32> -> vector<8x384xf32>
    %779 = vector.extract_strided_slice %775 {offsets = [0, 0], sizes = [8, 256], strides = [1, 1]} : vector<8x384xf32> to vector<8x256xf32>
    %780 = vector.extract_strided_slice %778 {offsets = [0, 0], sizes = [8, 256], strides = [1, 1]} : vector<8x384xf32> to vector<8x256xf32>
    %781 = arith.addf %779, %780 : vector<8x256xf32>
    %782 = arith.negf %781 : vector<8x256xf32>
    %783 = math.exp %782 : vector<8x256xf32>
    %cst_683 = arith.constant 1.000000e+00 : f32
    %784 = vector.broadcast %cst_683 : f32 to vector<8x256xf32>
    %785 = arith.addf %784, %783 : vector<8x256xf32>
    %786 = arith.divf %784, %785 : vector<8x256xf32>
    %787 = vector.extract_strided_slice %786 {offsets = [0, 128], sizes = [8, 128], strides = [1, 1]} : vector<8x256xf32> to vector<8x128xf32>
    %788 = vector.extract_strided_slice %775 {offsets = [0, 256], sizes = [8, 128], strides = [1, 1]} : vector<8x384xf32> to vector<8x128xf32>
    %789 = vector.extract_strided_slice %786 {offsets = [0, 0], sizes = [8, 128], strides = [1, 1]} : vector<8x256xf32> to vector<8x128xf32>
    %790 = vector.extract_strided_slice %778 {offsets = [0, 256], sizes = [8, 128], strides = [1, 1]} : vector<8x384xf32> to vector<8x128xf32>
    %791 = vector.broadcast %641 : vector<1x128xf32> to vector<8x128xf32>
    %792 = arith.addf %790, %791 : vector<8x128xf32>
    %793 = arith.mulf %789, %792 : vector<8x128xf32>
    %794 = arith.addf %788, %793 : vector<8x128xf32>
    %795 = math.tanh %794 : vector<8x128xf32>
    %796 = arith.subf %773, %795 : vector<8x128xf32>
    %797 = arith.mulf %787, %796 : vector<8x128xf32>
    %798 = arith.addf %795, %797 : vector<8x128xf32>
    %c40_684 = arith.constant 40 : index
    %c0_685 = arith.constant 0 : index
    %799 = vector.load %arg14[%c40_684, %c0_685] : memref<64x128xf32, #tpu.memory_space<vmem>>, vector<8x128xf32>
    tpu.vector_store %arg14[%c40_684, %c0_685], %798 {strides = array<i32>} : memref<64x128xf32, #tpu.memory_space<vmem>>, vector<8x128xf32>,
    %c48 = arith.constant 48 : index
    %c0_686 = arith.constant 0 : index
    %800 = vector.load %arg15[%c48, %c0_686] : memref<64x384xf32, #tpu.memory_space<vmem>>, vector<8x384xf32>
    %801 = arith.truncf %798 : vector<8x128xf32> to vector<8x128xbf16>
    %c0_687 = arith.constant 0 : index
    %c0_688 = arith.constant 0 : index
    %802 = vector.load %arg4[%c0_687, %c0_688] : memref<128x384xbf16, #tpu.memory_space<vmem>>, vector<128x384xbf16>
    %cst_689 = arith.constant dense<0.000000e+00> : vector<8x384xf32>
    %803 = tpu.matmul %801, %802, %cst_689 {dimension_numbers = #tpu.dot_dimension_numbers<[1], [0], [0], [1], [0, 0, 1, 1], [], []>} : vector<8x128xbf16>, vector<128x384xbf16>, vector<8x384xf32> -> vector<8x384xf32>
    %804 = vector.extract_strided_slice %800 {offsets = [0, 0], sizes = [8, 256], strides = [1, 1]} : vector<8x384xf32> to vector<8x256xf32>
    %805 = vector.extract_strided_slice %803 {offsets = [0, 0], sizes = [8, 256], strides = [1, 1]} : vector<8x384xf32> to vector<8x256xf32>
    %806 = arith.addf %804, %805 : vector<8x256xf32>
    %807 = arith.negf %806 : vector<8x256xf32>
    %808 = math.exp %807 : vector<8x256xf32>
    %cst_690 = arith.constant 1.000000e+00 : f32
    %809 = vector.broadcast %cst_690 : f32 to vector<8x256xf32>
    %810 = arith.addf %809, %808 : vector<8x256xf32>
    %811 = arith.divf %809, %810 : vector<8x256xf32>
    %812 = vector.extract_strided_slice %811 {offsets = [0, 128], sizes = [8, 128], strides = [1, 1]} : vector<8x256xf32> to vector<8x128xf32>
    %813 = vector.extract_strided_slice %800 {offsets = [0, 256], sizes = [8, 128], strides = [1, 1]} : vector<8x384xf32> to vector<8x128xf32>
    %814 = vector.extract_strided_slice %811 {offsets = [0, 0], sizes = [8, 128], strides = [1, 1]} : vector<8x256xf32> to vector<8x128xf32>
    %815 = vector.extract_strided_slice %803 {offsets = [0, 256], sizes = [8, 128], strides = [1, 1]} : vector<8x384xf32> to vector<8x128xf32>
    %816 = vector.broadcast %641 : vector<1x128xf32> to vector<8x128xf32>
    %817 = arith.addf %815, %816 : vector<8x128xf32>
    %818 = arith.mulf %814, %817 : vector<8x128xf32>
    %819 = arith.addf %813, %818 : vector<8x128xf32>
    %820 = math.tanh %819 : vector<8x128xf32>
    %821 = arith.subf %798, %820 : vector<8x128xf32>
    %822 = arith.mulf %812, %821 : vector<8x128xf32>
    %823 = arith.addf %820, %822 : vector<8x128xf32>
    %c48_691 = arith.constant 48 : index
    %c0_692 = arith.constant 0 : index
    %824 = vector.load %arg14[%c48_691, %c0_692] : memref<64x128xf32, #tpu.memory_space<vmem>>, vector<8x128xf32>
    tpu.vector_store %arg14[%c48_691, %c0_692], %823 {strides = array<i32>} : memref<64x128xf32, #tpu.memory_space<vmem>>, vector<8x128xf32>,
    %c56 = arith.constant 56 : index
    %c0_693 = arith.constant 0 : index
    %825 = vector.load %arg15[%c56, %c0_693] : memref<64x384xf32, #tpu.memory_space<vmem>>, vector<8x384xf32>
    %826 = arith.truncf %823 : vector<8x128xf32> to vector<8x128xbf16>
    %c0_694 = arith.constant 0 : index
    %c0_695 = arith.constant 0 : index
    %827 = vector.load %arg4[%c0_694, %c0_695] : memref<128x384xbf16, #tpu.memory_space<vmem>>, vector<128x384xbf16>
    %cst_696 = arith.constant dense<0.000000e+00> : vector<8x384xf32>
    %828 = tpu.matmul %826, %827, %cst_696 {dimension_numbers = #tpu.dot_dimension_numbers<[1], [0], [0], [1], [0, 0, 1, 1], [], []>} : vector<8x128xbf16>, vector<128x384xbf16>, vector<8x384xf32> -> vector<8x384xf32>
    %829 = vector.extract_strided_slice %825 {offsets = [0, 0], sizes = [8, 256], strides = [1, 1]} : vector<8x384xf32> to vector<8x256xf32>
    %830 = vector.extract_strided_slice %828 {offsets = [0, 0], sizes = [8, 256], strides = [1, 1]} : vector<8x384xf32> to vector<8x256xf32>
    %831 = arith.addf %829, %830 : vector<8x256xf32>
    %832 = arith.negf %831 : vector<8x256xf32>
    %833 = math.exp %832 : vector<8x256xf32>
    %cst_697 = arith.constant 1.000000e+00 : f32
    %834 = vector.broadcast %cst_697 : f32 to vector<8x256xf32>
    %835 = arith.addf %834, %833 : vector<8x256xf32>
    %836 = arith.divf %834, %835 : vector<8x256xf32>
    %837 = vector.extract_strided_slice %836 {offsets = [0, 128], sizes = [8, 128], strides = [1, 1]} : vector<8x256xf32> to vector<8x128xf32>
    %838 = vector.extract_strided_slice %825 {offsets = [0, 256], sizes = [8, 128], strides = [1, 1]} : vector<8x384xf32> to vector<8x128xf32>
    %839 = vector.extract_strided_slice %836 {offsets = [0, 0], sizes = [8, 128], strides = [1, 1]} : vector<8x256xf32> to vector<8x128xf32>
    %840 = vector.extract_strided_slice %828 {offsets = [0, 256], sizes = [8, 128], strides = [1, 1]} : vector<8x384xf32> to vector<8x128xf32>
    %841 = vector.broadcast %641 : vector<1x128xf32> to vector<8x128xf32>
    %842 = arith.addf %840, %841 : vector<8x128xf32>
    %843 = arith.mulf %839, %842 : vector<8x128xf32>
    %844 = arith.addf %838, %843 : vector<8x128xf32>
    %845 = math.tanh %844 : vector<8x128xf32>
    %846 = arith.subf %823, %845 : vector<8x128xf32>
    %847 = arith.mulf %837, %846 : vector<8x128xf32>
    %848 = arith.addf %845, %847 : vector<8x128xf32>
    %c56_698 = arith.constant 56 : index
    %c0_699 = arith.constant 0 : index
    %849 = vector.load %arg14[%c56_698, %c0_699] : memref<64x128xf32, #tpu.memory_space<vmem>>, vector<8x128xf32>
    tpu.vector_store %arg14[%c56_698, %c0_699], %848 {strides = array<i32>} : memref<64x128xf32, #tpu.memory_space<vmem>>, vector<8x128xf32>,
    %c0_700 = arith.constant 0 : index
    %c0_701 = arith.constant 0 : index
    %850 = vector.load %arg9[%c0_700, %c0_701] : memref<1x384xf32, #tpu.memory_space<vmem>>, vector<1x384xf32>
    %c0_702 = arith.constant 0 : index
    %c0_703 = arith.constant 0 : index
    %851 = vector.load %arg10[%c0_702, %c0_703] : memref<1x128xf32, #tpu.memory_space<vmem>>, vector<1x128xf32>
    %c0_704 = arith.constant 0 : index
    %c0_705 = arith.constant 0 : index
    %852 = vector.load %arg14[%c0_704, %c0_705] : memref<64x128xf32, #tpu.memory_space<vmem>>, vector<64x128xf32>
    %853 = arith.truncf %852 : vector<64x128xf32> to vector<64x128xbf16>
    %c0_706 = arith.constant 0 : index
    %c0_707 = arith.constant 0 : index
    %854 = vector.load %arg7[%c0_706, %c0_707] : memref<128x384xbf16, #tpu.memory_space<vmem>>, vector<128x384xbf16>
    %cst_708 = arith.constant dense<0.000000e+00> : vector<64x384xf32>
    %855 = tpu.matmul %853, %854, %cst_708 {dimension_numbers = #tpu.dot_dimension_numbers<[1], [0], [0], [1], [0, 0, 1, 1], [], []>} : vector<64x128xbf16>, vector<128x384xbf16>, vector<64x384xf32> -> vector<64x384xf32>
    %856 = vector.broadcast %850 : vector<1x384xf32> to vector<64x384xf32>
    %857 = arith.addf %855, %856 : vector<64x384xf32>
    %c0_709 = arith.constant 0 : index
    %c0_710 = arith.constant 0 : index
    %858 = vector.load %arg15[%c0_709, %c0_710] : memref<64x384xf32, #tpu.memory_space<vmem>>, vector<64x384xf32>
    tpu.vector_store %arg15[%c0_709, %c0_710], %857 {strides = array<i32>} : memref<64x384xf32, #tpu.memory_space<vmem>>, vector<64x384xf32>,
    %cst_711 = arith.constant 0.000000e+00 : f32
    %859 = vector.broadcast %cst_711 : f32 to vector<8x128xf32>
    %c0_712 = arith.constant 0 : index
    %c0_713 = arith.constant 0 : index
    %860 = vector.load %arg15[%c0_712, %c0_713] : memref<64x384xf32, #tpu.memory_space<vmem>>, vector<8x384xf32>
    %861 = arith.truncf %859 : vector<8x128xf32> to vector<8x128xbf16>
    %c0_714 = arith.constant 0 : index
    %c0_715 = arith.constant 0 : index
    %862 = vector.load %arg8[%c0_714, %c0_715] : memref<128x384xbf16, #tpu.memory_space<vmem>>, vector<128x384xbf16>
    %cst_716 = arith.constant dense<0.000000e+00> : vector<8x384xf32>
    %863 = tpu.matmul %861, %862, %cst_716 {dimension_numbers = #tpu.dot_dimension_numbers<[1], [0], [0], [1], [0, 0, 1, 1], [], []>} : vector<8x128xbf16>, vector<128x384xbf16>, vector<8x384xf32> -> vector<8x384xf32>
    %864 = vector.extract_strided_slice %860 {offsets = [0, 0], sizes = [8, 256], strides = [1, 1]} : vector<8x384xf32> to vector<8x256xf32>
    %865 = vector.extract_strided_slice %863 {offsets = [0, 0], sizes = [8, 256], strides = [1, 1]} : vector<8x384xf32> to vector<8x256xf32>
    %866 = arith.addf %864, %865 : vector<8x256xf32>
    %867 = arith.negf %866 : vector<8x256xf32>
    %868 = math.exp %867 : vector<8x256xf32>
    %cst_717 = arith.constant 1.000000e+00 : f32
    %869 = vector.broadcast %cst_717 : f32 to vector<8x256xf32>
    %870 = arith.addf %869, %868 : vector<8x256xf32>
    %871 = arith.divf %869, %870 : vector<8x256xf32>
    %872 = vector.extract_strided_slice %871 {offsets = [0, 128], sizes = [8, 128], strides = [1, 1]} : vector<8x256xf32> to vector<8x128xf32>
    %873 = vector.extract_strided_slice %860 {offsets = [0, 256], sizes = [8, 128], strides = [1, 1]} : vector<8x384xf32> to vector<8x128xf32>
    %874 = vector.extract_strided_slice %871 {offsets = [0, 0], sizes = [8, 128], strides = [1, 1]} : vector<8x256xf32> to vector<8x128xf32>
    %875 = vector.extract_strided_slice %863 {offsets = [0, 256], sizes = [8, 128], strides = [1, 1]} : vector<8x384xf32> to vector<8x128xf32>
    %876 = vector.broadcast %851 : vector<1x128xf32> to vector<8x128xf32>
    %877 = arith.addf %875, %876 : vector<8x128xf32>
    %878 = arith.mulf %874, %877 : vector<8x128xf32>
    %879 = arith.addf %873, %878 : vector<8x128xf32>
    %880 = math.tanh %879 : vector<8x128xf32>
    %881 = arith.subf %859, %880 : vector<8x128xf32>
    %882 = arith.mulf %872, %881 : vector<8x128xf32>
    %883 = arith.addf %880, %882 : vector<8x128xf32>
    %c8_718 = arith.constant 8 : index
    %c0_719 = arith.constant 0 : index
    %884 = vector.load %arg15[%c8_718, %c0_719] : memref<64x384xf32, #tpu.memory_space<vmem>>, vector<8x384xf32>
    %885 = arith.truncf %883 : vector<8x128xf32> to vector<8x128xbf16>
    %c0_720 = arith.constant 0 : index
    %c0_721 = arith.constant 0 : index
    %886 = vector.load %arg8[%c0_720, %c0_721] : memref<128x384xbf16, #tpu.memory_space<vmem>>, vector<128x384xbf16>
    %cst_722 = arith.constant dense<0.000000e+00> : vector<8x384xf32>
    %887 = tpu.matmul %885, %886, %cst_722 {dimension_numbers = #tpu.dot_dimension_numbers<[1], [0], [0], [1], [0, 0, 1, 1], [], []>} : vector<8x128xbf16>, vector<128x384xbf16>, vector<8x384xf32> -> vector<8x384xf32>
    %888 = vector.extract_strided_slice %884 {offsets = [0, 0], sizes = [8, 256], strides = [1, 1]} : vector<8x384xf32> to vector<8x256xf32>
    %889 = vector.extract_strided_slice %887 {offsets = [0, 0], sizes = [8, 256], strides = [1, 1]} : vector<8x384xf32> to vector<8x256xf32>
    %890 = arith.addf %888, %889 : vector<8x256xf32>
    %891 = arith.negf %890 : vector<8x256xf32>
    %892 = math.exp %891 : vector<8x256xf32>
    %cst_723 = arith.constant 1.000000e+00 : f32
    %893 = vector.broadcast %cst_723 : f32 to vector<8x256xf32>
    %894 = arith.addf %893, %892 : vector<8x256xf32>
    %895 = arith.divf %893, %894 : vector<8x256xf32>
    %896 = vector.extract_strided_slice %895 {offsets = [0, 128], sizes = [8, 128], strides = [1, 1]} : vector<8x256xf32> to vector<8x128xf32>
    %897 = vector.extract_strided_slice %884 {offsets = [0, 256], sizes = [8, 128], strides = [1, 1]} : vector<8x384xf32> to vector<8x128xf32>
    %898 = vector.extract_strided_slice %895 {offsets = [0, 0], sizes = [8, 128], strides = [1, 1]} : vector<8x256xf32> to vector<8x128xf32>
    %899 = vector.extract_strided_slice %887 {offsets = [0, 256], sizes = [8, 128], strides = [1, 1]} : vector<8x384xf32> to vector<8x128xf32>
    %900 = vector.broadcast %851 : vector<1x128xf32> to vector<8x128xf32>
    %901 = arith.addf %899, %900 : vector<8x128xf32>
    %902 = arith.mulf %898, %901 : vector<8x128xf32>
    %903 = arith.addf %897, %902 : vector<8x128xf32>
    %904 = math.tanh %903 : vector<8x128xf32>
    %905 = arith.subf %883, %904 : vector<8x128xf32>
    %906 = arith.mulf %896, %905 : vector<8x128xf32>
    %907 = arith.addf %904, %906 : vector<8x128xf32>
    %c16_724 = arith.constant 16 : index
    %c0_725 = arith.constant 0 : index
    %908 = vector.load %arg15[%c16_724, %c0_725] : memref<64x384xf32, #tpu.memory_space<vmem>>, vector<8x384xf32>
    %909 = arith.truncf %907 : vector<8x128xf32> to vector<8x128xbf16>
    %c0_726 = arith.constant 0 : index
    %c0_727 = arith.constant 0 : index
    %910 = vector.load %arg8[%c0_726, %c0_727] : memref<128x384xbf16, #tpu.memory_space<vmem>>, vector<128x384xbf16>
    %cst_728 = arith.constant dense<0.000000e+00> : vector<8x384xf32>
    %911 = tpu.matmul %909, %910, %cst_728 {dimension_numbers = #tpu.dot_dimension_numbers<[1], [0], [0], [1], [0, 0, 1, 1], [], []>} : vector<8x128xbf16>, vector<128x384xbf16>, vector<8x384xf32> -> vector<8x384xf32>
    %912 = vector.extract_strided_slice %908 {offsets = [0, 0], sizes = [8, 256], strides = [1, 1]} : vector<8x384xf32> to vector<8x256xf32>
    %913 = vector.extract_strided_slice %911 {offsets = [0, 0], sizes = [8, 256], strides = [1, 1]} : vector<8x384xf32> to vector<8x256xf32>
    %914 = arith.addf %912, %913 : vector<8x256xf32>
    %915 = arith.negf %914 : vector<8x256xf32>
    %916 = math.exp %915 : vector<8x256xf32>
    %cst_729 = arith.constant 1.000000e+00 : f32
    %917 = vector.broadcast %cst_729 : f32 to vector<8x256xf32>
    %918 = arith.addf %917, %916 : vector<8x256xf32>
    %919 = arith.divf %917, %918 : vector<8x256xf32>
    %920 = vector.extract_strided_slice %919 {offsets = [0, 128], sizes = [8, 128], strides = [1, 1]} : vector<8x256xf32> to vector<8x128xf32>
    %921 = vector.extract_strided_slice %908 {offsets = [0, 256], sizes = [8, 128], strides = [1, 1]} : vector<8x384xf32> to vector<8x128xf32>
    %922 = vector.extract_strided_slice %919 {offsets = [0, 0], sizes = [8, 128], strides = [1, 1]} : vector<8x256xf32> to vector<8x128xf32>
    %923 = vector.extract_strided_slice %911 {offsets = [0, 256], sizes = [8, 128], strides = [1, 1]} : vector<8x384xf32> to vector<8x128xf32>
    %924 = vector.broadcast %851 : vector<1x128xf32> to vector<8x128xf32>
    %925 = arith.addf %923, %924 : vector<8x128xf32>
    %926 = arith.mulf %922, %925 : vector<8x128xf32>
    %927 = arith.addf %921, %926 : vector<8x128xf32>
    %928 = math.tanh %927 : vector<8x128xf32>
    %929 = arith.subf %907, %928 : vector<8x128xf32>
    %930 = arith.mulf %920, %929 : vector<8x128xf32>
    %931 = arith.addf %928, %930 : vector<8x128xf32>
    %c24_730 = arith.constant 24 : index
    %c0_731 = arith.constant 0 : index
    %932 = vector.load %arg15[%c24_730, %c0_731] : memref<64x384xf32, #tpu.memory_space<vmem>>, vector<8x384xf32>
    %933 = arith.truncf %931 : vector<8x128xf32> to vector<8x128xbf16>
    %c0_732 = arith.constant 0 : index
    %c0_733 = arith.constant 0 : index
    %934 = vector.load %arg8[%c0_732, %c0_733] : memref<128x384xbf16, #tpu.memory_space<vmem>>, vector<128x384xbf16>
    %cst_734 = arith.constant dense<0.000000e+00> : vector<8x384xf32>
    %935 = tpu.matmul %933, %934, %cst_734 {dimension_numbers = #tpu.dot_dimension_numbers<[1], [0], [0], [1], [0, 0, 1, 1], [], []>} : vector<8x128xbf16>, vector<128x384xbf16>, vector<8x384xf32> -> vector<8x384xf32>
    %936 = vector.extract_strided_slice %932 {offsets = [0, 0], sizes = [8, 256], strides = [1, 1]} : vector<8x384xf32> to vector<8x256xf32>
    %937 = vector.extract_strided_slice %935 {offsets = [0, 0], sizes = [8, 256], strides = [1, 1]} : vector<8x384xf32> to vector<8x256xf32>
    %938 = arith.addf %936, %937 : vector<8x256xf32>
    %939 = arith.negf %938 : vector<8x256xf32>
    %940 = math.exp %939 : vector<8x256xf32>
    %cst_735 = arith.constant 1.000000e+00 : f32
    %941 = vector.broadcast %cst_735 : f32 to vector<8x256xf32>
    %942 = arith.addf %941, %940 : vector<8x256xf32>
    %943 = arith.divf %941, %942 : vector<8x256xf32>
    %944 = vector.extract_strided_slice %943 {offsets = [0, 128], sizes = [8, 128], strides = [1, 1]} : vector<8x256xf32> to vector<8x128xf32>
    %945 = vector.extract_strided_slice %932 {offsets = [0, 256], sizes = [8, 128], strides = [1, 1]} : vector<8x384xf32> to vector<8x128xf32>
    %946 = vector.extract_strided_slice %943 {offsets = [0, 0], sizes = [8, 128], strides = [1, 1]} : vector<8x256xf32> to vector<8x128xf32>
    %947 = vector.extract_strided_slice %935 {offsets = [0, 256], sizes = [8, 128], strides = [1, 1]} : vector<8x384xf32> to vector<8x128xf32>
    %948 = vector.broadcast %851 : vector<1x128xf32> to vector<8x128xf32>
    %949 = arith.addf %947, %948 : vector<8x128xf32>
    %950 = arith.mulf %946, %949 : vector<8x128xf32>
    %951 = arith.addf %945, %950 : vector<8x128xf32>
    %952 = math.tanh %951 : vector<8x128xf32>
    %953 = arith.subf %931, %952 : vector<8x128xf32>
    %954 = arith.mulf %944, %953 : vector<8x128xf32>
    %955 = arith.addf %952, %954 : vector<8x128xf32>
    %c32_736 = arith.constant 32 : index
    %c0_737 = arith.constant 0 : index
    %956 = vector.load %arg15[%c32_736, %c0_737] : memref<64x384xf32, #tpu.memory_space<vmem>>, vector<8x384xf32>
    %957 = arith.truncf %955 : vector<8x128xf32> to vector<8x128xbf16>
    %c0_738 = arith.constant 0 : index
    %c0_739 = arith.constant 0 : index
    %958 = vector.load %arg8[%c0_738, %c0_739] : memref<128x384xbf16, #tpu.memory_space<vmem>>, vector<128x384xbf16>
    %cst_740 = arith.constant dense<0.000000e+00> : vector<8x384xf32>
    %959 = tpu.matmul %957, %958, %cst_740 {dimension_numbers = #tpu.dot_dimension_numbers<[1], [0], [0], [1], [0, 0, 1, 1], [], []>} : vector<8x128xbf16>, vector<128x384xbf16>, vector<8x384xf32> -> vector<8x384xf32>
    %960 = vector.extract_strided_slice %956 {offsets = [0, 0], sizes = [8, 256], strides = [1, 1]} : vector<8x384xf32> to vector<8x256xf32>
    %961 = vector.extract_strided_slice %959 {offsets = [0, 0], sizes = [8, 256], strides = [1, 1]} : vector<8x384xf32> to vector<8x256xf32>
    %962 = arith.addf %960, %961 : vector<8x256xf32>
    %963 = arith.negf %962 : vector<8x256xf32>
    %964 = math.exp %963 : vector<8x256xf32>
    %cst_741 = arith.constant 1.000000e+00 : f32
    %965 = vector.broadcast %cst_741 : f32 to vector<8x256xf32>
    %966 = arith.addf %965, %964 : vector<8x256xf32>
    %967 = arith.divf %965, %966 : vector<8x256xf32>
    %968 = vector.extract_strided_slice %967 {offsets = [0, 128], sizes = [8, 128], strides = [1, 1]} : vector<8x256xf32> to vector<8x128xf32>
    %969 = vector.extract_strided_slice %956 {offsets = [0, 256], sizes = [8, 128], strides = [1, 1]} : vector<8x384xf32> to vector<8x128xf32>
    %970 = vector.extract_strided_slice %967 {offsets = [0, 0], sizes = [8, 128], strides = [1, 1]} : vector<8x256xf32> to vector<8x128xf32>
    %971 = vector.extract_strided_slice %959 {offsets = [0, 256], sizes = [8, 128], strides = [1, 1]} : vector<8x384xf32> to vector<8x128xf32>
    %972 = vector.broadcast %851 : vector<1x128xf32> to vector<8x128xf32>
    %973 = arith.addf %971, %972 : vector<8x128xf32>
    %974 = arith.mulf %970, %973 : vector<8x128xf32>
    %975 = arith.addf %969, %974 : vector<8x128xf32>
    %976 = math.tanh %975 : vector<8x128xf32>
    %977 = arith.subf %955, %976 : vector<8x128xf32>
    %978 = arith.mulf %968, %977 : vector<8x128xf32>
    %979 = arith.addf %976, %978 : vector<8x128xf32>
    %c40_742 = arith.constant 40 : index
    %c0_743 = arith.constant 0 : index
    %980 = vector.load %arg15[%c40_742, %c0_743] : memref<64x384xf32, #tpu.memory_space<vmem>>, vector<8x384xf32>
    %981 = arith.truncf %979 : vector<8x128xf32> to vector<8x128xbf16>
    %c0_744 = arith.constant 0 : index
    %c0_745 = arith.constant 0 : index
    %982 = vector.load %arg8[%c0_744, %c0_745] : memref<128x384xbf16, #tpu.memory_space<vmem>>, vector<128x384xbf16>
    %cst_746 = arith.constant dense<0.000000e+00> : vector<8x384xf32>
    %983 = tpu.matmul %981, %982, %cst_746 {dimension_numbers = #tpu.dot_dimension_numbers<[1], [0], [0], [1], [0, 0, 1, 1], [], []>} : vector<8x128xbf16>, vector<128x384xbf16>, vector<8x384xf32> -> vector<8x384xf32>
    %984 = vector.extract_strided_slice %980 {offsets = [0, 0], sizes = [8, 256], strides = [1, 1]} : vector<8x384xf32> to vector<8x256xf32>
    %985 = vector.extract_strided_slice %983 {offsets = [0, 0], sizes = [8, 256], strides = [1, 1]} : vector<8x384xf32> to vector<8x256xf32>
    %986 = arith.addf %984, %985 : vector<8x256xf32>
    %987 = arith.negf %986 : vector<8x256xf32>
    %988 = math.exp %987 : vector<8x256xf32>
    %cst_747 = arith.constant 1.000000e+00 : f32
    %989 = vector.broadcast %cst_747 : f32 to vector<8x256xf32>
    %990 = arith.addf %989, %988 : vector<8x256xf32>
    %991 = arith.divf %989, %990 : vector<8x256xf32>
    %992 = vector.extract_strided_slice %991 {offsets = [0, 128], sizes = [8, 128], strides = [1, 1]} : vector<8x256xf32> to vector<8x128xf32>
    %993 = vector.extract_strided_slice %980 {offsets = [0, 256], sizes = [8, 128], strides = [1, 1]} : vector<8x384xf32> to vector<8x128xf32>
    %994 = vector.extract_strided_slice %991 {offsets = [0, 0], sizes = [8, 128], strides = [1, 1]} : vector<8x256xf32> to vector<8x128xf32>
    %995 = vector.extract_strided_slice %983 {offsets = [0, 256], sizes = [8, 128], strides = [1, 1]} : vector<8x384xf32> to vector<8x128xf32>
    %996 = vector.broadcast %851 : vector<1x128xf32> to vector<8x128xf32>
    %997 = arith.addf %995, %996 : vector<8x128xf32>
    %998 = arith.mulf %994, %997 : vector<8x128xf32>
    %999 = arith.addf %993, %998 : vector<8x128xf32>
    %1000 = math.tanh %999 : vector<8x128xf32>
    %1001 = arith.subf %979, %1000 : vector<8x128xf32>
    %1002 = arith.mulf %992, %1001 : vector<8x128xf32>
    %1003 = arith.addf %1000, %1002 : vector<8x128xf32>
    %c48_748 = arith.constant 48 : index
    %c0_749 = arith.constant 0 : index
    %1004 = vector.load %arg15[%c48_748, %c0_749] : memref<64x384xf32, #tpu.memory_space<vmem>>, vector<8x384xf32>
    %1005 = arith.truncf %1003 : vector<8x128xf32> to vector<8x128xbf16>
    %c0_750 = arith.constant 0 : index
    %c0_751 = arith.constant 0 : index
    %1006 = vector.load %arg8[%c0_750, %c0_751] : memref<128x384xbf16, #tpu.memory_space<vmem>>, vector<128x384xbf16>
    %cst_752 = arith.constant dense<0.000000e+00> : vector<8x384xf32>
    %1007 = tpu.matmul %1005, %1006, %cst_752 {dimension_numbers = #tpu.dot_dimension_numbers<[1], [0], [0], [1], [0, 0, 1, 1], [], []>} : vector<8x128xbf16>, vector<128x384xbf16>, vector<8x384xf32> -> vector<8x384xf32>
    %1008 = vector.extract_strided_slice %1004 {offsets = [0, 0], sizes = [8, 256], strides = [1, 1]} : vector<8x384xf32> to vector<8x256xf32>
    %1009 = vector.extract_strided_slice %1007 {offsets = [0, 0], sizes = [8, 256], strides = [1, 1]} : vector<8x384xf32> to vector<8x256xf32>
    %1010 = arith.addf %1008, %1009 : vector<8x256xf32>
    %1011 = arith.negf %1010 : vector<8x256xf32>
    %1012 = math.exp %1011 : vector<8x256xf32>
    %cst_753 = arith.constant 1.000000e+00 : f32
    %1013 = vector.broadcast %cst_753 : f32 to vector<8x256xf32>
    %1014 = arith.addf %1013, %1012 : vector<8x256xf32>
    %1015 = arith.divf %1013, %1014 : vector<8x256xf32>
    %1016 = vector.extract_strided_slice %1015 {offsets = [0, 128], sizes = [8, 128], strides = [1, 1]} : vector<8x256xf32> to vector<8x128xf32>
    %1017 = vector.extract_strided_slice %1004 {offsets = [0, 256], sizes = [8, 128], strides = [1, 1]} : vector<8x384xf32> to vector<8x128xf32>
    %1018 = vector.extract_strided_slice %1015 {offsets = [0, 0], sizes = [8, 128], strides = [1, 1]} : vector<8x256xf32> to vector<8x128xf32>
    %1019 = vector.extract_strided_slice %1007 {offsets = [0, 256], sizes = [8, 128], strides = [1, 1]} : vector<8x384xf32> to vector<8x128xf32>
    %1020 = vector.broadcast %851 : vector<1x128xf32> to vector<8x128xf32>
    %1021 = arith.addf %1019, %1020 : vector<8x128xf32>
    %1022 = arith.mulf %1018, %1021 : vector<8x128xf32>
    %1023 = arith.addf %1017, %1022 : vector<8x128xf32>
    %1024 = math.tanh %1023 : vector<8x128xf32>
    %1025 = arith.subf %1003, %1024 : vector<8x128xf32>
    %1026 = arith.mulf %1016, %1025 : vector<8x128xf32>
    %1027 = arith.addf %1024, %1026 : vector<8x128xf32>
    %c56_754 = arith.constant 56 : index
    %c0_755 = arith.constant 0 : index
    %1028 = vector.load %arg15[%c56_754, %c0_755] : memref<64x384xf32, #tpu.memory_space<vmem>>, vector<8x384xf32>
    %1029 = arith.truncf %1027 : vector<8x128xf32> to vector<8x128xbf16>
    %c0_756 = arith.constant 0 : index
    %c0_757 = arith.constant 0 : index
    %1030 = vector.load %arg8[%c0_756, %c0_757] : memref<128x384xbf16, #tpu.memory_space<vmem>>, vector<128x384xbf16>
    %cst_758 = arith.constant dense<0.000000e+00> : vector<8x384xf32>
    %1031 = tpu.matmul %1029, %1030, %cst_758 {dimension_numbers = #tpu.dot_dimension_numbers<[1], [0], [0], [1], [0, 0, 1, 1], [], []>} : vector<8x128xbf16>, vector<128x384xbf16>, vector<8x384xf32> -> vector<8x384xf32>
    %1032 = vector.extract_strided_slice %1028 {offsets = [0, 0], sizes = [8, 256], strides = [1, 1]} : vector<8x384xf32> to vector<8x256xf32>
    %1033 = vector.extract_strided_slice %1031 {offsets = [0, 0], sizes = [8, 256], strides = [1, 1]} : vector<8x384xf32> to vector<8x256xf32>
    %1034 = arith.addf %1032, %1033 : vector<8x256xf32>
    %1035 = arith.negf %1034 : vector<8x256xf32>
    %1036 = math.exp %1035 : vector<8x256xf32>
    %cst_759 = arith.constant 1.000000e+00 : f32
    %1037 = vector.broadcast %cst_759 : f32 to vector<8x256xf32>
    %1038 = arith.addf %1037, %1036 : vector<8x256xf32>
    %1039 = arith.divf %1037, %1038 : vector<8x256xf32>
    %1040 = vector.extract_strided_slice %1039 {offsets = [0, 128], sizes = [8, 128], strides = [1, 1]} : vector<8x256xf32> to vector<8x128xf32>
    %1041 = vector.extract_strided_slice %1028 {offsets = [0, 256], sizes = [8, 128], strides = [1, 1]} : vector<8x384xf32> to vector<8x128xf32>
    %1042 = vector.extract_strided_slice %1039 {offsets = [0, 0], sizes = [8, 128], strides = [1, 1]} : vector<8x256xf32> to vector<8x128xf32>
    %1043 = vector.extract_strided_slice %1031 {offsets = [0, 256], sizes = [8, 128], strides = [1, 1]} : vector<8x384xf32> to vector<8x128xf32>
    %1044 = vector.broadcast %851 : vector<1x128xf32> to vector<8x128xf32>
    %1045 = arith.addf %1043, %1044 : vector<8x128xf32>
    %1046 = arith.mulf %1042, %1045 : vector<8x128xf32>
    %1047 = arith.addf %1041, %1046 : vector<8x128xf32>
    %1048 = math.tanh %1047 : vector<8x128xf32>
    %1049 = arith.subf %1027, %1048 : vector<8x128xf32>
    %1050 = arith.mulf %1040, %1049 : vector<8x128xf32>
    %1051 = arith.addf %1048, %1050 : vector<8x128xf32>
    %1052 = arith.truncf %1051 : vector<8x128xf32> to vector<8x128xbf16>
    %c0_760 = arith.constant 0 : index
    %c0_761 = arith.constant 0 : index
    %1053 = vector.load %arg11[%c0_760, %c0_761] : memref<128x128xbf16, #tpu.memory_space<vmem>>, vector<128x128xbf16>
    %cst_762 = arith.constant dense<0.000000e+00> : vector<8x128xf32>
    %1054 = tpu.matmul %1052, %1053, %cst_762 {dimension_numbers = #tpu.dot_dimension_numbers<[1], [0], [0], [1], [0, 0, 1, 1], [], []>} : vector<8x128xbf16>, vector<128x128xbf16>, vector<8x128xf32> -> vector<8x128xf32>
    %c0_763 = arith.constant 0 : index
    %c0_764 = arith.constant 0 : index
    %1055 = vector.load %arg12[%c0_763, %c0_764] : memref<1x128xf32, #tpu.memory_space<vmem>>, vector<1x128xf32>
    %1056 = vector.broadcast %1055 : vector<1x128xf32> to vector<8x128xf32>
    %1057 = arith.addf %1054, %1056 : vector<8x128xf32>
    %c0_765 = arith.constant 0 : index
    %c0_766 = arith.constant 0 : index
    %1058 = vector.load %arg13[%c0_765, %c0_766] : memref<8x128xf32, #tpu.memory_space<vmem>>, vector<8x128xf32>
    tpu.vector_store %arg13[%c0_765, %c0_766], %1057 {strides = array<i32>} : memref<8x128xf32, #tpu.memory_space<vmem>>, vector<8x128xf32>,
    return
  }
  func.func @transform_1(%arg0: i32, %arg1: memref<8x8xi32, #tpu.memory_space<smem>>) -> (i32, i32) {
    %c0_i32 = arith.constant 0 : i32
    %c0_i32_0 = arith.constant 0 : i32
    %c0_i32_1 = arith.constant 0 : i32
    return %c0_i32, %c0_i32_0 : i32, i32
  }
  func.func @transform_2(%arg0: i32, %arg1: memref<8x8xi32, #tpu.memory_space<smem>>) -> (i32, i32) {
    %c0_i32 = arith.constant 0 : i32
    %c0_i32_0 = arith.constant 0 : i32
    %c0_i32_1 = arith.constant 0 : i32
    return %c0_i32, %c0_i32_0 : i32, i32
  }
  func.func @transform_3(%arg0: i32, %arg1: memref<8x8xi32, #tpu.memory_space<smem>>) -> (i32, i32) {
    %c0_i32 = arith.constant 0 : i32
    %c0_i32_0 = arith.constant 0 : i32
    %c0_i32_1 = arith.constant 0 : i32
    return %c0_i32, %c0_i32_0 : i32, i32
  }
  func.func @transform_4(%arg0: i32, %arg1: memref<8x8xi32, #tpu.memory_space<smem>>) -> (i32, i32) {
    %c0_i32 = arith.constant 0 : i32
    %c0_i32_0 = arith.constant 0 : i32
    %c0_i32_1 = arith.constant 0 : i32
    return %c0_i32, %c0_i32_0 : i32, i32
  }
  func.func @transform_5(%arg0: i32, %arg1: memref<8x8xi32, #tpu.memory_space<smem>>) -> (i32, i32) {
    %c0_i32 = arith.constant 0 : i32
    %c0_i32_0 = arith.constant 0 : i32
    %c0_i32_1 = arith.constant 0 : i32
    return %c0_i32, %c0_i32_0 : i32, i32
  }
  func.func @transform_6(%arg0: i32, %arg1: memref<8x8xi32, #tpu.memory_space<smem>>) -> (i32, i32) {
    %c0_i32 = arith.constant 0 : i32
    %c0_i32_0 = arith.constant 0 : i32
    %c0_i32_1 = arith.constant 0 : i32
    return %c0_i32, %c0_i32_0 : i32, i32
  }
  func.func @transform_7(%arg0: i32, %arg1: memref<8x8xi32, #tpu.memory_space<smem>>) -> (i32, i32) {
    %c0_i32 = arith.constant 0 : i32
    %c0_i32_0 = arith.constant 0 : i32
    %c0_i32_1 = arith.constant 0 : i32
    return %c0_i32, %c0_i32_0 : i32, i32
  }
  func.func @transform_8(%arg0: i32, %arg1: memref<8x8xi32, #tpu.memory_space<smem>>) -> (i32, i32) {
    %c0_i32 = arith.constant 0 : i32
    %c0_i32_0 = arith.constant 0 : i32
    %c0_i32_1 = arith.constant 0 : i32
    return %c0_i32, %c0_i32_0 : i32, i32
  }
  func.func @transform_9(%arg0: i32, %arg1: memref<8x8xi32, #tpu.memory_space<smem>>) -> (i32, i32) {
    %c0_i32 = arith.constant 0 : i32
    %c0_i32_0 = arith.constant 0 : i32
    %c0_i32_1 = arith.constant 0 : i32
    return %c0_i32, %c0_i32_0 : i32, i32
  }
  func.func @transform_10(%arg0: i32, %arg1: memref<8x8xi32, #tpu.memory_space<smem>>) -> (i32, i32) {
    %c0_i32 = arith.constant 0 : i32
    %c0_i32_0 = arith.constant 0 : i32
    %c0_i32_1 = arith.constant 0 : i32
    return %c0_i32, %c0_i32_0 : i32, i32
  }
  func.func @transform_11(%arg0: i32, %arg1: memref<8x8xi32, #tpu.memory_space<smem>>) -> (i32, i32) {
    %c0_i32 = arith.constant 0 : i32
    %c0_i32_0 = arith.constant 0 : i32
    return %arg0, %c0_i32 : i32, i32
  }
}

</mosaic_0001>

<bundles_post_ra>
// kernel: tpu_custom_call.1
= control target key start
LH: loop header
LB: loop body
LE: loop exit
PB: predicated region body
PF: predicated region fallthrough
CT: control target
= control target key end

     0   :  { %s11790_s0 = inlined_call_operand.hbm [shape: s32[8,8], index: 0, kind: input, shape index: {}]   ;;  %s11791_s1 = inlined_call_operand.hbm [shape: f32[56,128], index: 1, kind: input, shape index: {}]   ;;  %s11792_s2 = inlined_call_operand.hbm [shape: bf16[128,384], index: 2, kind: input, shape index: {}]   ;;  %s11793_s3 = inlined_call_operand.hbm [shape: bf16[128,384], index: 3, kind: input, shape index: {}]   ;;  %s11794_s4 = inlined_call_operand.vmem [shape: f32[1,384], index: 4, kind: input, shape index: {}]   ;;  %s11795_s5 = inlined_call_operand.vmem [shape: f32[1,128], index: 5, kind: input, shape index: {}]   ;;  %s11796_s6 = inlined_call_operand.hbm [shape: bf16[128,384], index: 6, kind: input, shape index: {}]   ;;  %s11797_s7 = inlined_call_operand.hbm [shape: bf16[128,384], index: 7, kind: input, shape index: {}]   ;;  %s11798_s8 = inlined_call_operand.vmem [shape: f32[1,384], index: 8, kind: input, shape index: {}]   ;;  %s11799_s9 = inlined_call_operand.vmem [shape: f32[1,128], index: 9, kind: input, shape index: {}]   ;;  %s11800_s10 = inlined_call_operand.hbm [shape: bf16[128,128], index: 10, kind: input, shape index: {}]   ;;  %s11801_s11 = inlined_call_operand.vmem [shape: f32[1,128], index: 11, kind: input, shape index: {}]   ;;  %s11802_s12 = inlined_call_operand.hbm [shape: f32[8,128], index: 12, kind: output, shape index: {}]  }
   0x1   :  { %s7578_s23 = scalar_lea.hbm %s11790_s0, 128 }
   0x2   :  { %p7579_p0 = scmp.ne.s32.totalorder %s11790_s0, %s7578_s23  ;;  %p7582_p1 = scmp.lt.u32.totalorder %s7578_s23, %s11790_s0 }
   0x4   :  { %p7584_p2 = pnand %p7582_p1, %p7579_p0 }
   0x6   :  { %7587 = shalt.err (!%p7584_p2)  }
   0x7   :  { %s9268_s28 = smov [#allocation6]  }
   0x8   :  { %18 = dma.hbm_to_smem %s11790_s0, 128, %s9268_s28, [#allocation5] }
   0x9   :  { %9256 = dma.done.wait [#allocation5], 128 }
   0xa   :  { %9257 = vsyncadd [#allocation5], 4294967168 }
   0xb   :  { %20 = sfence }
   0xc   :  { %21 = vsyncpa [#allocation8], 0 }
   0xd   :  { %22 = vsyncpa [#allocation11], 0 }
   0xe   :  { %23 = vsyncpa [#allocation14], 0 }
   0xf   :  { %24 = vsyncpa [#allocation9], 0  ;;  %s9269_s13 = smov [#allocation10]   ;;  %s9270_s15 = smov [#allocation13]  }
  0x10   :  { %s42_s14 = sshll.u32 %s9269_s13, 4  ;;  %s70_s16 = sshll.u32 %s9270_s15, 4  ;;  %s43_s14 = int_to_ptr.vmem [resolvable:$true] %s42_s14  ;;  %s9423_s16 = int_to_ptr.vmem [resolvable:$true] %s70_s16 }
  0x11   :  { %s7588_s19 = scalar_lea.hbm %s11793_s3, 3072 }
  0x12   :  { %p7589_p3 = scmp.ne.s32.totalorder %s11793_s3, %s7588_s19  ;;  %p7592_p4 = scmp.lt.u32.totalorder %s7588_s19, %s11793_s3 }
  0x14   :  { %p7594_p5 = pnand %p7592_p4, %p7589_p3 }
  0x16   :  { %7597 = shalt.err (!%p7594_p5)
}
  0x17   :  { %s7598_s23 = scalar_lea.vmem %s43_s14, 3072  ;;  %p7603_p7 = scmp.lt.s32.totalorder %s43_s14, %s43_s14 }
  0x18   :  { %p7599_p6 = scmp.ne.s32.totalorder %s43_s14, %s7598_s23  ;;  %p7604_p8 = scmp.lt.s32.totalorder %s7598_s23, %s7598_s23 }
  0x1a   :  { %p7605_p9 = por %p7604_p8, %p7603_p7 }
  0x1c   :  { %p7606_p10 = pnand %p7605_p9, %p7599_p6 }
  0x1e   :  { %7609 = shalt.err (!%p7606_p10)
}
  0x1f   :  { %s9271_s24 = smov 192   ;;  %s9272_s25 = smov 12  }
  0x20   :  { %48 = dma.hbm_to_vmem [thread:$0]  %s11793_s3, 3072, %s43_s14, [#allocation11], %s9271_s24, %s9271_s24, %s9272_s25  }
  0x21   :  { %s7610_s30 = scalar_lea.hbm %s11797_s7, 3072 }
  0x22   :  { %p7611_p11 = scmp.ne.s32.totalorder %s11797_s7, %s7610_s30  ;;  %p7614_p12 = scmp.lt.u32.totalorder %s7610_s30, %s11797_s7 }
  0x24   :  { %p7616_p13 = pnand %p7614_p12, %p7611_p11 }
  0x26   :  { %7619 = shalt.err (!%p7616_p13)
}
  0x27   :  { %s7620_s19 = scalar_lea.vmem %s9423_s16, 3072  ;;  %p7625_p1 = scmp.lt.s32.totalorder %s9423_s16, %s9423_s16 }
  0x28   :  { %p7621_p0 = scmp.ne.s32.totalorder %s9423_s16, %s7620_s19  ;;  %p7626_p2 = scmp.lt.s32.totalorder %s7620_s19, %s7620_s19 }
  0x2a   :  { %p7627_p3 = por %p7626_p2, %p7625_p1 }
  0x2c   :  { %p7628_p4 = pnand %p7627_p3, %p7621_p0 }
  0x2e   :  { %7631 = shalt.err (!%p7628_p4)
}
  0x2f   :  { %76 = dma.hbm_to_vmem [thread:$0]  %s11797_s7, 3072, %s9423_s16, [#allocation14], %s9271_s24, %s9271_s24, %s9272_s25  }
  0x30   :  { %s9273_s20 = smov [#allocation7]   ;;  %s9274_s21 = smov [#allocation12]  }
  0x31   :  { %s30_s0 = sshll.u32 %s9273_s20, 4  ;;  %s58_s22 = sshll.u32 %s9274_s21, 4  ;;  %s31_s0 = int_to_ptr.vmem [resolvable:$true] %s30_s0  ;;  %s9460_s22 = int_to_ptr.vmem [resolvable:$true] %s58_s22 }
  0x32   :  { %s7632_s27 = scalar_lea.hbm %s11792_s2, 3072 }
  0x33   :  { %p7633_p5 = scmp.ne.s32.totalorder %s11792_s2, %s7632_s27  ;;  %p7636_p6 = scmp.lt.u32.totalorder %s7632_s27, %s11792_s2 }
  0x35   :  { %p7638_p7 = pnand %p7636_p6, %p7633_p5 }
  0x37   :  { %7641 = shalt.err (!%p7638_p7)
}
  0x38   :  { %s7642_s7 = scalar_lea.vmem %s31_s0, 3072  ;;  %p7647_p9 = scmp.lt.s32.totalorder %s31_s0, %s31_s0 }
  0x39   :  { %p7643_p8 = scmp.ne.s32.totalorder %s31_s0, %s7642_s7  ;;  %p7648_p10 = scmp.lt.s32.totalorder %s7642_s7, %s7642_s7 }
  0x3b   :  { %p7649_p11 = por %p7648_p10, %p7647_p9 }
  0x3d   :  { %p7650_p12 = pnand %p7649_p11, %p7643_p8 }
  0x3f   :  { %7653 = shalt.err (!%p7650_p12)
}
  0x40   :  { %36 = dma.hbm_to_vmem [thread:$0]  %s11792_s2, 3072, %s31_s0, [#allocation8], %s9271_s24, %s9271_s24, %s9272_s25  }
  0x41   :  { %s7654_s19 = scalar_lea.hbm %s11796_s6, 3072 }
  0x42   :  { %p7655_p13 = scmp.ne.s32.totalorder %s11796_s6, %s7654_s19  ;;  %p7658_p0 = scmp.lt.u32.totalorder %s7654_s19, %s11796_s6 }
  0x44   :  { %p7660_p1 = pnand %p7658_p0, %p7655_p13 }
  0x46   :  { %7663 = shalt.err (!%p7660_p1)
}
  0x47   :  { %s7664_s23 = scalar_lea.vmem %s9460_s22, 3072  ;;  %p7669_p3 = scmp.lt.s32.totalorder %s9460_s22, %s9460_s22 }
  0x48   :  { %p7665_p2 = scmp.ne.s32.totalorder %s9460_s22, %s7664_s23  ;;  %p7670_p4 = scmp.lt.s32.totalorder %s7664_s23, %s7664_s23 }
  0x4a   :  { %p7671_p5 = por %p7670_p4, %p7669_p3 }
  0x4c   :  { %p7672_p6 = pnand %p7671_p5, %p7665_p2 }
  0x4e   :  { %7675 = shalt.err (!%p7672_p6)
}
  0x4f   :  { %64 = dma.hbm_to_vmem [thread:$0]  %s11796_s6, 3072, %s9460_s22, [#allocation11], %s9271_s24, %s9271_s24, %s9272_s25  }
  0x50   :  { %s9275_s26 = smov [#allocation15]   ;;  %s7676_s30 = scalar_lea.hbm %s11800_s10, 1024 }
  0x51   :  { %s86_s27 = sshll.u32 %s9275_s26, 4  ;;  %p7677_p7 = scmp.ne.s32.totalorder %s11800_s10, %s7676_s30  ;;  %s87_s27 = int_to_ptr.vmem [resolvable:$true] %s86_s27 }
  0x52   :  { %p7680_p8 = scmp.lt.u32.totalorder %s7676_s30, %s11800_s10 }
  0x54   :  { %p7682_p9 = pnand %p7680_p8, %p7677_p7 }
  0x56   :  { %7685 = shalt.err (!%p7682_p9)
}
  0x57   :  { %s7686_s17 = scalar_lea.vmem %s87_s27, 1024  ;;  %p7691_p11 = scmp.lt.s32.totalorder %s87_s27, %s87_s27 }
  0x58   :  { %p7687_p10 = scmp.ne.s32.totalorder %s87_s27, %s7686_s17  ;;  %p7692_p12 = scmp.lt.s32.totalorder %s7686_s17, %s7686_s17 }
  0x5a   :  { %p7693_p13 = por %p7692_p12, %p7691_p11 }
  0x5c   :  { %p7694_p0 = pnand %p7693_p13, %p7687_p10 }
  0x5e   :  { %7697 = shalt.err (!%p7694_p0)
}
  0x5f   :  { %s9276_s6 = smov 64   ;;  %s9277_s24 = smov 4  }
  0x60   :  { %92 = dma.hbm_to_vmem [thread:$0]  %s11800_s10, 1024, %s87_s27, [#allocation14], %s9276_s6, %s9276_s6, %s9277_s24  }
  0x61   :  { %9258 = dma.done.wait [#allocation8], 3072  }
  0x62   :  { %9259 = vsyncadd [#allocation8], 4294964224 }
  0x63   :  { %9260 = dma.done.wait [#allocation11], 6144  }
  0x64   :  { %9261 = vsyncadd [#allocation11], 4294961152 }
  0x65   :  { %9262 = dma.done.wait [#allocation14], 4096  }
  0x66   :  { %9263 = vsyncadd [#allocation14], 4294963200  ;;  %s113_s18 = sld [smem:[#allocation6]]  ;;  %s9278_s19 = smov [#allocation2]  }
  0x67   :  { %s127_s3 = sshll.u32 %s9278_s19, 4  ;;  %s5655_s14 = sld [smem:[#allocation6 + $0x1]]  ;;  %s9509_s3 = int_to_ptr.vmem [resolvable:$true] %s127_s3 }
  0x68   :  { %s9279_s20 = smov [#allocation2 + $0x8]   ;;  %s9511_s23 = sld [smem:[#allocation6 + $0x2]] }
  0x69   :  { %s147_s21 = sshll.u32 %s9279_s20, 4  ;;  %s9280_s10 = smov [#allocation2 + $0x10]   ;;  %s9513_s21 = int_to_ptr.vmem [resolvable:$true] %s147_s21 }
  0x6a   :  { %s167_s2 = sshll.u32 %s9280_s10, 4  ;;  %s9515_s0 = sld [smem:[#allocation6 + $0x3]]  ;;  %s9517_s2 = int_to_ptr.vmem [resolvable:$true] %s167_s2 }
  0x6b   :  { %s9526_s15 = scalar_lea.hbm %s11791_s1, 896 }
  0x6c   :  { %p114_p1 = scmp.gt.s32.totalorder %s113_s18, 0  ;;  %p5649_p2 = scmp.lt.s32.totalorder %s113_s18, 49 }
  0x6d   :  { %p133_p3 = scmp.gt.s32.totalorder %s5655_s14, 0  ;;  %p5656_p4 = scmp.lt.s32.totalorder %s5655_s14, 49 }
  0x6e   :  { %s11838_s18 = smov (!%p114_p1, %s113_s18), 0  ;;  %p153_p5 = scmp.gt.s32.totalorder %s9511_s23, 0 }
  0x6f   :  { %s11840_s14 = smov (!%p133_p3, %s5655_s14), 0  ;;  %s11842_s18 = smov (!%p5649_p2, %s11838_s18), 49 }
  0x70   :  { %s11844_s14 = smov (!%p5656_p4, %s11840_s14), 49  ;;  %s5654_s26 = sshll.u32 %s11842_s18, 4 }
  0x71   :  { %s119_s29 = scalar_lea.hbm %s11791_s1, %s5654_s26  ;;  %s5661_s30 = sshll.u32 %s11844_s14, 4 }
  0x72   :  { %s7698_s13 = scalar_lea.hbm %s119_s29, 16  ;;  %p7701_p7 = scmp.lt.u32.totalorder %s119_s29, %s11791_s1 }
  0x73   :  { %p7699_p6 = scmp.ne.s32.totalorder %s119_s29, %s7698_s13  ;;  %p7702_p8 = scmp.lt.u32.totalorder %s9526_s15, %s7698_s13 }
  0x74   :  { %p7704_p10 = scmp.lt.u32.totalorder %s7698_s13, %s119_s29 }
  0x75   :  { %p7703_p9 = por %p7702_p8, %p7701_p7 }
  0x77   :  { %p7705_p11 = por %p7704_p10, %p7703_p9 }
  0x79   :  { %p7706_p12 = pnand %p7705_p11, %p7699_p6 }
  0x7b   :  { %7709 = shalt.err (!%p7706_p12)  }
  0x7c   :  { %s7710_s24 = scalar_lea.vmem %s9509_s3, 16  ;;  %s9535_s25 = scalar_lea.vmem %s9509_s3, 1024 }
  0x7d   :  { %p7711_p13 = scmp.ne.s32.totalorder %s9509_s3, %s7710_s24  ;;  %p7715_p0 = scmp.lt.s32.totalorder %s9509_s3, %s9509_s3 }
  0x7e   :  { %p7716_p1 = scmp.lt.s32.totalorder %s9535_s25, %s7710_s24 }
  0x80   :  { %p7717_p2 = por %p7716_p1, %p7715_p0 }
  0x82   :  { %p7718_p3 = pnand %p7717_p2, %p7711_p13 }
  0x84   :  { %7721 = shalt.err (!%p7718_p3)  }
  0x85   :  { %130 = dma.hbm_to_vmem [thread:$0]  %s119_s29, 16, %s9509_s3, [#allocation4] }
  0x86   :  { %s138_s19 = scalar_lea.hbm %s11791_s1, %s5661_s30  ;;  %p5663_p4 = scmp.lt.s32.totalorder %s9511_s23, 49 }
  0x87   :  { %s7722_s14 = scalar_lea.hbm %s138_s19, 16  ;;  %p7725_p7 = scmp.lt.u32.totalorder %s138_s19, %s11791_s1 }
  0x88   :  { %p7723_p6 = scmp.ne.s32.totalorder %s138_s19, %s7722_s14  ;;  %p7726_p8 = scmp.lt.u32.totalorder %s9526_s15, %s7722_s14 }
  0x89   :  { %p7728_p10 = scmp.lt.u32.totalorder %s7722_s14, %s138_s19 }
  0x8a   :  { %p7727_p9 = por %p7726_p8, %p7725_p7 }
  0x8c   :  { %p7729_p11 = por %p7728_p10, %p7727_p9 }
  0x8e   :  { %p7730_p12 = pnand %p7729_p11, %p7723_p6 }
  0x90   :  { %7733 = shalt.err (!%p7730_p12)  }
  0x91   :  { %s7734_s26 = scalar_lea.vmem %s9513_s21, 16  ;;  %p7739_p0 = scmp.lt.s32.totalorder %s9513_s21, %s9509_s3 }
  0x92   :  { %p7735_p13 = scmp.ne.s32.totalorder %s9513_s21, %s7734_s26  ;;  %p7740_p1 = scmp.lt.s32.totalorder %s9535_s25, %s7734_s26 }
  0x94   :  { %p7741_p2 = por %p7740_p1, %p7739_p0 }
  0x96   :  { %p7742_p3 = pnand %p7741_p2, %p7735_p13 }
  0x98   :  { %7745 = shalt.err (!%p7742_p3)  }
  0x99   :  { %150 = dma.hbm_to_vmem [thread:$0]  %s138_s19, 16, %s9513_s21, [#allocation4] }
  0x9a   :  { %s154_s27 = scalar_select %p153_p5, %s9511_s23, 0 }
  0x9b   :  { %p173_p6 = scmp.gt.s32.totalorder %s9515_s0, 0  ;;  %p5670_p7 = scmp.lt.s32.totalorder %s9515_s0, 49 }
  0x9c   :  { %s11846_s27 = smov (!%p5663_p4, %s154_s27), 49  ;;  %s9281_s30 = smov [#allocation2 + $0x18]  }
  0x9d   :  { %s174_s28 = scalar_select %p173_p6, %s9515_s0, 0 }
  0x9e   :  { %s5668_s29 = sshll.u32 %s11846_s27, 4  ;;  %s187_s13 = sshll.u32 %s9281_s30, 4  ;;  %s9566_s13 = int_to_ptr.vmem [resolvable:$true] %s187_s13 }
  0x9f   :  { %s158_s17 = scalar_lea.hbm %s11791_s1, %s5668_s29 }
  0xa0   :  { %s7746_s6 = scalar_lea.hbm %s158_s17, 16  ;;  %p7749_p5 = scmp.lt.u32.totalorder %s158_s17, %s11791_s1 }
  0xa1   :  { %p7747_p8 = scmp.ne.s32.totalorder %s158_s17, %s7746_s6  ;;  %p7750_p9 = scmp.lt.u32.totalorder %s9526_s15, %s7746_s6 }
  0xa2   :  { %p7752_p11 = scmp.lt.u32.totalorder %s7746_s6, %s158_s17 }
  0xa3   :  { %p7751_p10 = por %p7750_p9, %p7749_p5 }
  0xa5   :  { %p7753_p4 = por %p7752_p11, %p7751_p10 }
  0xa7   :  { %p7754_p12 = pnand %p7753_p4, %p7747_p8 }
  0xa9   :  { %7757 = shalt.err (!%p7754_p12)  }
  0xaa   :  { %s7758_s23 = scalar_lea.vmem %s9517_s2, 16  ;;  %p7763_p0 = scmp.lt.s32.totalorder %s9517_s2, %s9509_s3 }
  0xab   :  { %p7759_p13 = scmp.ne.s32.totalorder %s9517_s2, %s7758_s23  ;;  %p7764_p1 = scmp.lt.s32.totalorder %s9535_s25, %s7758_s23 }
  0xad   :  { %p7765_p2 = por %p7764_p1, %p7763_p0 }
  0xaf   :  { %p7766_p3 = pnand %p7765_p2, %p7759_p13 }
  0xb1   :  { %7769 = shalt.err (!%p7766_p3)  }
  0xb2   :  { %170 = dma.hbm_to_vmem [thread:$0]  %s158_s17, 16, %s9517_s2, [#allocation4] }
  0xb3   :  { %s11848_s28 = smov (!%p5670_p7, %s174_s28), 49  ;;  %s9580_s22 = sld [smem:[#allocation6 + $0x4]] }
  0xb4   :  { %s5675_s18 = sshll.u32 %s11848_s28, 4  ;;  %s9282_s19 = smov [#allocation2 + $0x20]  }
  0xb5   :  { %s207_s14 = sshll.u32 %s9282_s19, 4  ;;  %s178_s26 = scalar_lea.hbm %s11791_s1, %s5675_s18  ;;  %s9585_s14 = int_to_ptr.vmem [resolvable:$true] %s207_s14 }
  0xb6   :  { %s7770_s27 = scalar_lea.hbm %s178_s26, 16  ;;  %p7773_p8 = scmp.lt.u32.totalorder %s178_s26, %s11791_s1 }
  0xb7   :  { %p7771_p6 = scmp.ne.s32.totalorder %s178_s26, %s7770_s27  ;;  %p7774_p5 = scmp.lt.u32.totalorder %s9526_s15, %s7770_s27 }
  0xb8   :  { %p7776_p7 = scmp.lt.u32.totalorder %s7770_s27, %s178_s26 }
  0xb9   :  { %p7775_p9 = por %p7774_p5, %p7773_p8 }
  0xbb   :  { %p7777_p10 = por %p7776_p7, %p7775_p9 }
  0xbd   :  { %p7778_p11 = pnand %p7777_p10, %p7771_p6 }
  0xbf   :  { %7781 = shalt.err (!%p7778_p11)  }
  0xc0   :  { %s7782_s2 = scalar_lea.vmem %s9566_s13, 16  ;;  %p7787_p12 = scmp.lt.s32.totalorder %s9566_s13, %s9509_s3 }
  0xc1   :  { %p7783_p4 = scmp.ne.s32.totalorder %s9566_s13, %s7782_s2  ;;  %p7788_p13 = scmp.lt.s32.totalorder %s9535_s25, %s7782_s2 }
  0xc3   :  { %p7789_p0 = por %p7788_p13, %p7787_p12 }
  0xc5   :  { %p7790_p1 = pnand %p7789_p0, %p7783_p4 }
  0xc7   :  { %7793 = shalt.err (!%p7790_p1)  }
  0xc8   :  { %190 = dma.hbm_to_vmem [thread:$0]  %s178_s26, 16, %s9566_s13, [#allocation4] }
  0xc9   :  { %s9597_s0 = sld [smem:[#allocation6 + $0x5]]  ;;  %s9283_s28 = smov [#allocation2 + $0x28]  }
  0xca   :  { %s227_s7 = sshll.u32 %s9283_s28, 4  ;;  %s9599_s16 = sld [smem:[#allocation6 + $0x6]]  ;;  %s9603_s7 = int_to_ptr.vmem [resolvable:$true] %s227_s7 }
  0xcb   :  { %p193_p2 = scmp.gt.s32.totalorder %s9580_s22, 0  ;;  %p5677_p3 = scmp.lt.s32.totalorder %s9580_s22, 49 }
  0xcc   :  { %s9284_s17 = smov [#allocation2 + $0x30]   ;;  %s9608_s13 = sld [smem:[#allocation6 + $0x7]] }
  0xcd   :  { %s11850_s22 = smov (!%p193_p2, %s9580_s22), 0  ;;  %s9606_s6 = sshll.u32 %s9284_s17, 4  ;;  %s9638_s6 = int_to_ptr.vmem [resolvable:$true] %s9606_s6 }
  0xce   :  { %s11852_s22 = smov (!%p5677_p3, %s11850_s22), 49 }
  0xcf   :  { %p213_p6 = scmp.gt.s32.totalorder %s9597_s0, 0  ;;  %s5682_s24 = sshll.u32 %s11852_s22, 4 }
  0xd0   :  { %p233_p5 = scmp.gt.s32.totalorder %s9599_s16, 0  ;;  %s198_s18 = scalar_lea.hbm %s11791_s1, %s5682_s24 }
  0xd1   :  { %s7794_s19 = scalar_lea.hbm %s198_s18, 16  ;;  %p7797_p10 = scmp.lt.u32.totalorder %s198_s18, %s11791_s1 }
  0xd2   :  { %p7795_p7 = scmp.ne.s32.totalorder %s198_s18, %s7794_s19  ;;  %p7798_p11 = scmp.lt.u32.totalorder %s9526_s15, %s7794_s19 }
  0xd3   :  { %p7800_p12 = scmp.lt.u32.totalorder %s7794_s19, %s198_s18 }
  0xd4   :  { %p7799_p4 = por %p7798_p11, %p7797_p10 }
  0xd6   :  { %p7801_p13 = por %p7800_p12, %p7799_p4 }
  0xd8   :  { %p7802_p0 = pnand %p7801_p13, %p7795_p7 }
  0xda   :  { %7805 = shalt.err (!%p7802_p0)  }
  0xdb   :  { %s7806_s22 = scalar_lea.vmem %s9585_s14, 16  ;;  %p7811_p2 = scmp.lt.s32.totalorder %s9585_s14, %s9509_s3 }
  0xdc   :  { %p7807_p1 = scmp.ne.s32.totalorder %s9585_s14, %s7806_s22  ;;  %p7812_p3 = scmp.lt.s32.totalorder %s9535_s25, %s7806_s22 }
  0xde   :  { %p7813_p9 = por %p7812_p3, %p7811_p2 }
  0xe0   :  { %p7814_p8 = pnand %p7813_p9, %p7807_p1 }
  0xe2   :  { %7817 = shalt.err (!%p7814_p8)  }
  0xe3   :  { %210 = dma.hbm_to_vmem [thread:$0]  %s198_s18, 16, %s9585_s14, [#allocation4] }
  0xe4   :  { %s214_s26 = scalar_select %p213_p6, %s9597_s0, 0 }
  0xe5   :  { %s234_s27 = scalar_select %p233_p5, %s9599_s16, 0 }
  0xe6   :  { %p11809_p7 = scmp.lt.s32.totalorder %s9597_s0, 49  ;;  %p11810_p10 = scmp.lt.s32.totalorder %s9599_s16, 49 }
  0xe8   :  { %s11854_s26 = smov (!%p11809_p7, %s214_s26), 49  ;;  %s11856_s27 = smov (!%p11810_p10, %s234_s27), 49 }
  0xe9   :  { %s5689_s29 = sshll.u32 %s11854_s26, 4  ;;  %s5696_s17 = sshll.u32 %s11856_s27, 4 }
  0xea   :  { %s218_s28 = scalar_lea.hbm %s11791_s1, %s5689_s29 }
  0xeb   :  { %s7818_s24 = scalar_lea.hbm %s218_s28, 16  ;;  %p7821_p6 = scmp.lt.u32.totalorder %s218_s28, %s11791_s1 }
  0xec   :  { %p7819_p8 = scmp.ne.s32.totalorder %s218_s28, %s7818_s24  ;;  %p7822_p9 = scmp.lt.u32.totalorder %s9526_s15, %s7818_s24 }
  0xed   :  { %p7824_p11 = scmp.lt.u32.totalorder %s7818_s24, %s218_s28 }
  0xee   :  { %p7823_p5 = por %p7822_p9, %p7821_p6 }
  0xf0   :  { %p7825_p4 = por %p7824_p11, %p7823_p5 }
  0xf2   :  { %p7826_p12 = pnand %p7825_p4, %p7819_p8 }
  0xf4   :  { %7829 = shalt.err (!%p7826_p12)  }
  0xf5   :  { %s7830_s0 = scalar_lea.vmem %s9603_s7, 16  ;;  %p7835_p0 = scmp.lt.s32.totalorder %s9603_s7, %s9509_s3 }
  0xf6   :  { %p7831_p13 = scmp.ne.s32.totalorder %s9603_s7, %s7830_s0  ;;  %p7836_p1 = scmp.lt.s32.totalorder %s9535_s25, %s7830_s0 }
  0xf8   :  { %p7837_p2 = por %p7836_p1, %p7835_p0 }
  0xfa   :  { %p7838_p3 = pnand %p7837_p2, %p7831_p13 }
  0xfc   :  { %7841 = shalt.err (!%p7838_p3)  }
  0xfd   :  { %230 = dma.hbm_to_vmem [thread:$0]  %s218_s28, 16, %s9603_s7, [#allocation4] }
  0xfe   :  { %s238_s18 = scalar_lea.hbm %s11791_s1, %s5696_s17  ;;  %p253_p7 = scmp.gt.s32.totalorder %s9608_s13, 0 }
  0xff   :  { %s7842_s19 = scalar_lea.hbm %s238_s18, 16  ;;  %p7845_p8 = scmp.lt.u32.totalorder %s238_s18, %s11791_s1 }
 0x100   :  { %p7843_p10 = scmp.ne.s32.totalorder %s238_s18, %s7842_s19  ;;  %p7846_p6 = scmp.lt.u32.totalorder %s9526_s15, %s7842_s19 }
 0x101   :  { %p7848_p5 = scmp.lt.u32.totalorder %s7842_s19, %s238_s18 }
 0x102   :  { %p7847_p9 = por %p7846_p6, %p7845_p8 }
 0x104   :  { %p7849_p11 = por %p7848_p5, %p7847_p9 }
 0x106   :  { %p7850_p4 = pnand %p7849_p11, %p7843_p10 }
 0x108   :  { %7853 = shalt.err (!%p7850_p4)  }
 0x109   :  { %s7854_s7 = scalar_lea.vmem %s9638_s6, 16  ;;  %p7859_p13 = scmp.lt.s32.totalorder %s9638_s6, %s9509_s3 }
 0x10a   :  { %p7855_p12 = scmp.ne.s32.totalorder %s9638_s6, %s7854_s7  ;;  %p7860_p0 = scmp.lt.s32.totalorder %s9535_s25, %s7854_s7 }
 0x10c   :  { %p7861_p1 = por %p7860_p0, %p7859_p13 }
 0x10e   :  { %p7862_p2 = pnand %p7861_p1, %p7855_p12 }
 0x110   :  { %7865 = shalt.err (!%p7862_p2)  }
 0x111   :  { %250 = dma.hbm_to_vmem [thread:$0]  %s238_s18, 16, %s9638_s6, [#allocation4] }
 0x112   :  { %s254_s22 = scalar_select %p253_p7, %s9608_s13, 0 }
 0x113   :  { %p5698_p3 = scmp.lt.s32.totalorder %s9608_s13, 49  ;;  %s9285_s26 = smov [#allocation2 + $0x38]  }
 0x114   :  { %s267_s27 = sshll.u32 %s9285_s26, 4  ;;  %s9671_s29 = sld [smem:[#allocation6 + $0x80]]  ;;  %s268_s27 = int_to_ptr.vmem [resolvable:$true] %s267_s27 }
 0x115   :  { %s11858_s22 = smov (!%p5698_p3, %s254_s22), 49  ;;  %s9286_s2 = smov [#allocation2 + $0x1]  }
 0x116   :  { %s5703_s30 = sshll.u32 %s11858_s22, 4  ;;  %s288_s28 = sshll.u32 %s9286_s2, 4  ;;  %s9676_s28 = int_to_ptr.vmem [resolvable:$true] %s288_s28 }
 0x117   :  { %s258_s21 = scalar_lea.hbm %s11791_s1, %s5703_s30 }
 0x118   :  { %s7866_s6 = scalar_lea.hbm %s258_s21, 16  ;;  %p7869_p7 = scmp.lt.u32.totalorder %s258_s21, %s11791_s1 }
 0x119   :  { %p7867_p10 = scmp.ne.s32.totalorder %s258_s21, %s7866_s6  ;;  %p7870_p8 = scmp.lt.u32.totalorder %s9526_s15, %s7866_s6 }
 0x11a   :  { %p7872_p9 = scmp.lt.u32.totalorder %s7866_s6, %s258_s21 }
 0x11b   :  { %p7871_p6 = por %p7870_p8, %p7869_p7 }
 0x11d   :  { %p7873_p5 = por %p7872_p9, %p7871_p6 }
 0x11f   :  { %p7874_p11 = pnand %p7873_p5, %p7867_p10 }
 0x121   :  { %7877 = shalt.err (!%p7874_p11)  }
 0x122   :  { %s7878_s13 = scalar_lea.vmem %s268_s27, 16  ;;  %p7883_p12 = scmp.lt.s32.totalorder %s268_s27, %s9509_s3 }
 0x123   :  { %p7879_p4 = scmp.ne.s32.totalorder %s268_s27, %s7878_s13  ;;  %p7884_p13 = scmp.lt.s32.totalorder %s9535_s25, %s7878_s13 }
 0x125   :  { %p7885_p0 = por %p7884_p13, %p7883_p12 }
 0x127   :  { %p7886_p1 = pnand %p7885_p0, %p7879_p4 }
 0x129   :  { %7889 = shalt.err (!%p7886_p1)  }
 0x12a   :  { %270 = dma.hbm_to_vmem [thread:$0]  %s258_s21, 16, %s268_s27, [#allocation4] }
 0x12b   :  { %p274_p2 = scmp.gt.s32.totalorder %s9671_s29, 0  ;;  %p5705_p3 = scmp.lt.s32.totalorder %s9671_s29, 49 }
 0x12c   :  { %s9686_s16 = sld [smem:[#allocation6 + $0x81]]  ;;  %s9287_s23 = smov [#allocation2 + $0x9]  }
 0x12d   :  { %s11860_s29 = smov (!%p274_p2, %s9671_s29), 0  ;;  %s308_s18 = sshll.u32 %s9287_s23, 4  ;;  %s9691_s18 = int_to_ptr.vmem [resolvable:$true] %s308_s18 }
 0x12e   :  { %s9689_s19 = sld [smem:[#allocation6 + $0x82]]  ;;  %s11862_s29 = smov (!%p5705_p3, %s11860_s29), 49 }
 0x12f   :  { %s5710_s20 = sshll.u32 %s11862_s29, 4  ;;  %s9288_s10 = smov [#allocation2 + $0x11]  }
 0x130   :  { %s328_s7 = sshll.u32 %s9288_s10, 4  ;;  %s279_s27 = scalar_lea.hbm %s11791_s1, %s5710_s20  ;;  %s9713_s7 = int_to_ptr.vmem [resolvable:$true] %s328_s7 }
 0x131   :  { %s7890_s30 = scalar_lea.hbm %s279_s27, 16  ;;  %p7893_p8 = scmp.lt.u32.totalorder %s279_s27, %s11791_s1 }
 0x132   :  { %p294_p10 = scmp.gt.s32.totalorder %s9686_s16, 0  ;;  %p7891_p7 = scmp.ne.s32.totalorder %s279_s27, %s7890_s30 }
 0x133   :  { %p7894_p6 = scmp.lt.u32.totalorder %s9526_s15, %s7890_s30  ;;  %p7896_p5 = scmp.lt.u32.totalorder %s7890_s30, %s279_s27 }
 0x135   :  { %p7895_p9 = por %p7894_p6, %p7893_p8 }
 0x137   :  { %p7897_p11 = por %p7896_p5, %p7895_p9 }
 0x139   :  { %p7898_p4 = pnand %p7897_p11, %p7891_p7 }
 0x13b   :  { %7901 = shalt.err (!%p7898_p4)  }
 0x13c   :  { %s7902_s29 = scalar_lea.vmem %s9676_s28, 16  ;;  %p7907_p13 = scmp.lt.s32.totalorder %s9676_s28, %s9509_s3 }
 0x13d   :  { %p7903_p12 = scmp.ne.s32.totalorder %s9676_s28, %s7902_s29  ;;  %p7908_p0 = scmp.lt.s32.totalorder %s9535_s25, %s7902_s29 }
 0x13f   :  { %p7909_p1 = por %p7908_p0, %p7907_p13 }
 0x141   :  { %p7910_p2 = pnand %p7909_p1, %p7903_p12 }
 0x143   :  { %7913 = shalt.err (!%p7910_p2)  }
 0x144   :  { %291 = dma.hbm_to_vmem [thread:$0]  %s279_s27, 16, %s9676_s28, [#allocation4] }
 0x145   :  { %s295_s24 = scalar_select %p294_p10, %s9686_s16, 0 }
 0x146   :  { %p5712_p3 = scmp.lt.s32.totalorder %s9686_s16, 49  ;;  %p314_p7 = scmp.gt.s32.totalorder %s9689_s19, 0 }
 0x147   :  { %p5719_p8 = scmp.lt.s32.totalorder %s9689_s19, 49  ;;  %s9716_s14 = sld [smem:[#allocation6 + $0x83]] }
 0x148   :  { %s11864_s24 = smov (!%p5712_p3, %s295_s24), 49 }
 0x149   :  { %s315_s21 = scalar_select %p314_p7, %s9689_s19, 0 }
 0x14a   :  { %s5717_s6 = sshll.u32 %s11864_s24, 4 }
 0x14b   :  { %s299_s23 = scalar_lea.hbm %s11791_s1, %s5717_s6 }
 0x14c   :  { %s7914_s20 = scalar_lea.hbm %s299_s23, 16  ;;  %p7917_p10 = scmp.lt.u32.totalorder %s299_s23, %s11791_s1 }
 0x14d   :  { %p7915_p6 = scmp.ne.s32.totalorder %s299_s23, %s7914_s20  ;;  %p7918_p9 = scmp.lt.u32.totalorder %s9526_s15, %s7914_s20 }
 0x14e   :  { %p7920_p11 = scmp.lt.u32.totalorder %s7914_s20, %s299_s23 }
 0x14f   :  { %p7919_p5 = por %p7918_p9, %p7917_p10 }
 0x151   :  { %p7921_p4 = por %p7920_p11, %p7919_p5 }
 0x153   :  { %p7922_p12 = pnand %p7921_p4, %p7915_p6 }
 0x155   :  { %7925 = shalt.err (!%p7922_p12)  }
 0x156   :  { %s7926_s16 = scalar_lea.vmem %s9691_s18, 16  ;;  %p7931_p0 = scmp.lt.s32.totalorder %s9691_s18, %s9509_s3 }
 0x157   :  { %p7927_p13 = scmp.ne.s32.totalorder %s9691_s18, %s7926_s16  ;;  %p7932_p1 = scmp.lt.s32.totalorder %s9535_s25, %s7926_s16 }
 0x159   :  { %p7933_p2 = por %p7932_p1, %p7931_p0 }
 0x15b   :  { %p7934_p3 = pnand %p7933_p2, %p7927_p13 }
 0x15d   :  { %7937 = shalt.err (!%p7934_p3)  }
 0x15e   :  { %311 = dma.hbm_to_vmem [thread:$0]  %s299_s23, 16, %s9691_s18, [#allocation4] }
 0x15f   :  { %s11866_s21 = smov (!%p5719_p8, %s315_s21), 49  ;;  %s9289_s22 = smov [#allocation2 + $0x19]  }
 0x160   :  { %s348_s26 = sshll.u32 %s9289_s22, 4  ;;  %s9733_s27 = sld [smem:[#allocation6 + $0x84]]  ;;  %s9735_s26 = int_to_ptr.vmem [resolvable:$true] %s348_s26 }
 0x161   :  { %s5724_s30 = sshll.u32 %s11866_s21, 4  ;;  %p334_p7 = scmp.gt.s32.totalorder %s9716_s14, 0 }
 0x162   :  { %s319_s29 = scalar_lea.hbm %s11791_s1, %s5724_s30 }
 0x163   :  { %s7938_s24 = scalar_lea.hbm %s319_s29, 16  ;;  %p7941_p10 = scmp.lt.u32.totalorder %s319_s29, %s11791_s1 }
 0x164   :  { %p7939_p6 = scmp.ne.s32.totalorder %s319_s29, %s7938_s24  ;;  %p7942_p9 = scmp.lt.u32.totalorder %s9526_s15, %s7938_s24 }
 0x165   :  { %p7944_p5 = scmp.lt.u32.totalorder %s7938_s24, %s319_s29 }
 0x166   :  { %p7943_p8 = por %p7942_p9, %p7941_p10 }
 0x168   :  { %p7945_p11 = por %p7944_p5, %p7943_p8 }
 0x16a   :  { %p7946_p4 = pnand %p7945_p11, %p7939_p6 }
 0x16c   :  { %7949 = shalt.err (!%p7946_p4)  }
 0x16d   :  { %s7950_s18 = scalar_lea.vmem %s9713_s7, 16  ;;  %p7955_p13 = scmp.lt.s32.totalorder %s9713_s7, %s9509_s3 }
 0x16e   :  { %p7951_p12 = scmp.ne.s32.totalorder %s9713_s7, %s7950_s18  ;;  %p7956_p0 = scmp.lt.s32.totalorder %s9535_s25, %s7950_s18 }
 0x170   :  { %p7957_p1 = por %p7956_p0, %p7955_p13 }
 0x172   :  { %p7958_p2 = pnand %p7957_p1, %p7951_p12 }
 0x174   :  { %7961 = shalt.err (!%p7958_p2)  }
 0x175   :  { %331 = dma.hbm_to_vmem [thread:$0]  %s319_s29, 16, %s9713_s7, [#allocation4] }
 0x176   :  { %s335_s19 = scalar_select %p334_p7, %s9716_s14, 0 }
 0x177   :  { %p5726_p3 = scmp.lt.s32.totalorder %s9716_s14, 49  ;;  %p354_p6 = scmp.gt.s32.totalorder %s9733_s27, 0 }
 0x178   :  { %p5733_p10 = scmp.lt.s32.totalorder %s9733_s27, 49  ;;  %s9290_s23 = smov [#allocation2 + $0x21]  }
 0x179   :  { %s11868_s19 = smov (!%p5726_p3, %s335_s19), 49  ;;  %s368_s20 = sshll.u32 %s9290_s23, 4  ;;  %s9761_s20 = int_to_ptr.vmem [resolvable:$true] %s368_s20 }
 0x17a   :  { %s355_s21 = scalar_select %p354_p6, %s9733_s27, 0 }
 0x17b   :  { %s5731_s13 = sshll.u32 %s11868_s19, 4 }
 0x17c   :  { %s339_s16 = scalar_lea.hbm %s11791_s1, %s5731_s13 }
 0x17d   :  { %s7962_s22 = scalar_lea.hbm %s339_s16, 16  ;;  %p7965_p7 = scmp.lt.u32.totalorder %s339_s16, %s11791_s1 }
 0x17e   :  { %p7963_p9 = scmp.ne.s32.totalorder %s339_s16, %s7962_s22  ;;  %p7966_p8 = scmp.lt.u32.totalorder %s9526_s15, %s7962_s22 }
 0x17f   :  { %p7968_p11 = scmp.lt.u32.totalorder %s7962_s22, %s339_s16 }
 0x180   :  { %p7967_p5 = por %p7966_p8, %p7965_p7 }
 0x182   :  { %p7969_p4 = por %p7968_p11, %p7967_p5 }
 0x184   :  { %p7970_p12 = pnand %p7969_p4, %p7963_p9 }
 0x186   :  { %7973 = shalt.err (!%p7970_p12)  }
 0x187   :  { %s7974_s14 = scalar_lea.vmem %s9735_s26, 16  ;;  %p7979_p0 = scmp.lt.s32.totalorder %s9735_s26, %s9509_s3 }
 0x188   :  { %p7975_p13 = scmp.ne.s32.totalorder %s9735_s26, %s7974_s14  ;;  %p7980_p1 = scmp.lt.s32.totalorder %s9535_s25, %s7974_s14 }
 0x18a   :  { %p7981_p2 = por %p7980_p1, %p7979_p0 }
 0x18c   :  { %p7982_p3 = pnand %p7981_p2, %p7975_p13 }
 0x18e   :  { %7985 = shalt.err (!%p7982_p3)  }
 0x18f   :  { %351 = dma.hbm_to_vmem [thread:$0]  %s339_s16, 16, %s9735_s26, [#allocation4] }
 0x190   :  { %s11870_s21 = smov (!%p5733_p10, %s355_s21), 49  ;;  %s9775_s2 = sld [smem:[#allocation6 + $0x85]] }
 0x191   :  { %s5738_s17 = sshll.u32 %s11870_s21, 4  ;;  %s9291_s29 = smov [#allocation2 + $0x29]  }
 0x192   :  { %s388_s24 = sshll.u32 %s9291_s29, 4  ;;  %s359_s18 = scalar_lea.hbm %s11791_s1, %s5738_s17  ;;  %s9780_s24 = int_to_ptr.vmem [resolvable:$true] %s388_s24 }
 0x193   :  { %s7986_s19 = scalar_lea.hbm %s359_s18, 16  ;;  %p7989_p9 = scmp.lt.u32.totalorder %s359_s18, %s11791_s1 }
 0x194   :  { %p7987_p6 = scmp.ne.s32.totalorder %s359_s18, %s7986_s19  ;;  %p7990_p7 = scmp.lt.u32.totalorder %s9526_s15, %s7986_s19 }
 0x195   :  { %p7992_p10 = scmp.lt.u32.totalorder %s7986_s19, %s359_s18 }
 0x196   :  { %p7991_p8 = por %p7990_p7, %p7989_p9 }
 0x198   :  { %p7993_p5 = por %p7992_p10, %p7991_p8 }
 0x19a   :  { %p7994_p11 = pnand %p7993_p5, %p7987_p6 }
 0x19c   :  { %7997 = shalt.err (!%p7994_p11)  }
 0x19d   :  { %s7998_s26 = scalar_lea.vmem %s9761_s20, 16  ;;  %p8003_p12 = scmp.lt.s32.totalorder %s9761_s20, %s9509_s3 }
 0x19e   :  { %p7999_p4 = scmp.ne.s32.totalorder %s9761_s20, %s7998_s26  ;;  %p8004_p13 = scmp.lt.s32.totalorder %s9535_s25, %s7998_s26 }
 0x1a0   :  { %p8005_p0 = por %p8004_p13, %p8003_p12 }
 0x1a2   :  { %p8006_p1 = pnand %p8005_p0, %p7999_p4 }
 0x1a4   :  { %8009 = shalt.err (!%p8006_p1)  }
 0x1a5   :  { %371 = dma.hbm_to_vmem [thread:$0]  %s359_s18, 16, %s9761_s20, [#allocation4] }
 0x1a6   :  { %s9792_s27 = sld [smem:[#allocation6 + $0x86]]  ;;  %s9292_s21 = smov [#allocation2 + $0x31]  }
 0x1a7   :  { %s408_s10 = sshll.u32 %s9292_s21, 4  ;;  %s9794_s28 = sld [smem:[#allocation6 + $0x87]]  ;;  %s9798_s10 = int_to_ptr.vmem [resolvable:$true] %s408_s10 }
 0x1a8   :  { %p374_p2 = scmp.gt.s32.totalorder %s9775_s2, 0  ;;  %p5740_p3 = scmp.lt.s32.totalorder %s9775_s2, 49 }
 0x1a9   :  { %s9293_s16 = smov [#allocation2 + $0x39]   ;;  %s9803_s20 = sld [smem:[#allocation6 + $0x100]] }
 0x1aa   :  { %s11872_s2 = smov (!%p374_p2, %s9775_s2), 0  ;;  %s9801_s22 = sshll.u32 %s9293_s16, 4  ;;  %s9833_s22 = int_to_ptr.vmem [resolvable:$true] %s9801_s22 }
 0x1ab   :  { %s11874_s2 = smov (!%p5740_p3, %s11872_s2), 49 }
 0x1ac   :  { %p394_p6 = scmp.gt.s32.totalorder %s9792_s27, 0  ;;  %s5745_s30 = sshll.u32 %s11874_s2, 4 }
 0x1ad   :  { %p414_p7 = scmp.gt.s32.totalorder %s9794_s28, 0  ;;  %s379_s17 = scalar_lea.hbm %s11791_s1, %s5745_s30 }
 0x1ae   :  { %s8010_s29 = scalar_lea.hbm %s379_s17, 16  ;;  %p8013_p5 = scmp.lt.u32.totalorder %s379_s17, %s11791_s1 }
 0x1af   :  { %p8011_p10 = scmp.ne.s32.totalorder %s379_s17, %s8010_s29  ;;  %p8014_p11 = scmp.lt.u32.totalorder %s9526_s15, %s8010_s29 }
 0x1b0   :  { %p8016_p12 = scmp.lt.u32.totalorder %s8010_s29, %s379_s17 }
 0x1b1   :  { %p8015_p4 = por %p8014_p11, %p8013_p5 }
 0x1b3   :  { %p8017_p13 = por %p8016_p12, %p8015_p4 }
 0x1b5   :  { %p8018_p0 = pnand %p8017_p13, %p8011_p10 }
 0x1b7   :  { %8021 = shalt.err (!%p8018_p0)  }
 0x1b8   :  { %s8022_s2 = scalar_lea.vmem %s9780_s24, 16  ;;  %p8027_p2 = scmp.lt.s32.totalorder %s9780_s24, %s9509_s3 }
 0x1b9   :  { %p8023_p1 = scmp.ne.s32.totalorder %s9780_s24, %s8022_s2  ;;  %p8028_p3 = scmp.lt.s32.totalorder %s9535_s25, %s8022_s2 }
 0x1bb   :  { %p8029_p8 = por %p8028_p3, %p8027_p2 }
 0x1bd   :  { %p8030_p9 = pnand %p8029_p8, %p8023_p1 }
 0x1bf   :  { %8033 = shalt.err (!%p8030_p9)  }
 0x1c0   :  { %391 = dma.hbm_to_vmem [thread:$0]  %s379_s17, 16, %s9780_s24, [#allocation4] }
 0x1c1   :  { %s395_s18 = scalar_select %p394_p6, %s9792_s27, 0 }
 0x1c2   :  { %s415_s19 = scalar_select %p414_p7, %s9794_s28, 0 }
 0x1c3   :  { %p11811_p10 = scmp.lt.s32.totalorder %s9792_s27, 49  ;;  %p11812_p5 = scmp.lt.s32.totalorder %s9794_s28, 49 }
 0x1c5   :  { %s11876_s18 = smov (!%p11811_p10, %s395_s18), 49  ;;  %s11878_s19 = smov (!%p11812_p5, %s415_s19), 49 }
 0x1c6   :  { %s5752_s13 = sshll.u32 %s11876_s18, 4  ;;  %s5759_s16 = sshll.u32 %s11878_s19, 4 }
 0x1c7   :  { %s399_s21 = scalar_lea.hbm %s11791_s1, %s5752_s13 }
 0x1c8   :  { %s8034_s30 = scalar_lea.hbm %s399_s21, 16  ;;  %p8037_p6 = scmp.lt.u32.totalorder %s399_s21, %s11791_s1 }
 0x1c9   :  { %p8035_p9 = scmp.ne.s32.totalorder %s399_s21, %s8034_s30  ;;  %p8038_p8 = scmp.lt.u32.totalorder %s9526_s15, %s8034_s30 }
 0x1ca   :  { %p8040_p11 = scmp.lt.u32.totalorder %s8034_s30, %s399_s21 }
 0x1cb   :  { %p8039_p7 = por %p8038_p8, %p8037_p6 }
 0x1cd   :  { %p8041_p4 = por %p8040_p11, %p8039_p7 }
 0x1cf   :  { %p8042_p12 = pnand %p8041_p4, %p8035_p9 }
 0x1d1   :  { %8045 = shalt.err (!%p8042_p12)  }
 0x1d2   :  { %s8046_s27 = scalar_lea.vmem %s9798_s10, 16  ;;  %p8051_p0 = scmp.lt.s32.totalorder %s9798_s10, %s9509_s3 }
 0x1d3   :  { %p8047_p13 = scmp.ne.s32.totalorder %s9798_s10, %s8046_s27  ;;  %p8052_p1 = scmp.lt.s32.totalorder %s9535_s25, %s8046_s27 }
 0x1d5   :  { %p8053_p2 = por %p8052_p1, %p8051_p0 }
 0x1d7   :  { %p8054_p3 = pnand %p8053_p2, %p8047_p13 }
 0x1d9   :  { %8057 = shalt.err (!%p8054_p3)  }
 0x1da   :  { %411 = dma.hbm_to_vmem [thread:$0]  %s399_s21, 16, %s9798_s10, [#allocation4] }
 0x1db   :  { %s419_s17 = scalar_lea.hbm %s11791_s1, %s5759_s16  ;;  %p435_p10 = scmp.gt.s32.totalorder %s9803_s20, 0 }
 0x1dc   :  { %s8058_s29 = scalar_lea.hbm %s419_s17, 16  ;;  %p8061_p9 = scmp.lt.u32.totalorder %s419_s17, %s11791_s1 }
 0x1dd   :  { %p8059_p5 = scmp.ne.s32.totalorder %s419_s17, %s8058_s29  ;;  %p8062_p6 = scmp.lt.u32.totalorder %s9526_s15, %s8058_s29 }
 0x1de   :  { %p8064_p7 = scmp.lt.u32.totalorder %s8058_s29, %s419_s17 }
 0x1df   :  { %p8063_p8 = por %p8062_p6, %p8061_p9 }
 0x1e1   :  { %p8065_p11 = por %p8064_p7, %p8063_p8 }
 0x1e3   :  { %p8066_p4 = pnand %p8065_p11, %p8059_p5 }
 0x1e5   :  { %8069 = shalt.err (!%p8066_p4)  }
 0x1e6   :  { %s8070_s10 = scalar_lea.vmem %s9833_s22, 16  ;;  %p8075_p13 = scmp.lt.s32.totalorder %s9833_s22, %s9509_s3 }
 0x1e7   :  { %p8071_p12 = scmp.ne.s32.totalorder %s9833_s22, %s8070_s10  ;;  %p8076_p0 = scmp.lt.s32.totalorder %s9535_s25, %s8070_s10 }
 0x1e9   :  { %p8077_p1 = por %p8076_p0, %p8075_p13 }
 0x1eb   :  { %p8078_p2 = pnand %p8077_p1, %p8071_p12 }
 0x1ed   :  { %8081 = shalt.err (!%p8078_p2)  }
 0x1ee   :  { %431 = dma.hbm_to_vmem [thread:$0]  %s419_s17, 16, %s9833_s22, [#allocation4] }
 0x1ef   :  { %s436_s2 = scalar_select %p435_p10, %s9803_s20, 0 }
 0x1f0   :  { %p5761_p3 = scmp.lt.s32.totalorder %s9803_s20, 49  ;;  %s9294_s18 = smov [#allocation2 + $0x2]  }
 0x1f1   :  { %s449_s19 = sshll.u32 %s9294_s18, 4  ;;  %s9866_s13 = sld [smem:[#allocation6 + $0x101]]  ;;  %s450_s19 = int_to_ptr.vmem [resolvable:$true] %s449_s19 }
 0x1f2   :  { %s11880_s2 = smov (!%p5761_p3, %s436_s2), 49  ;;  %s9295_s26 = smov [#allocation2 + $0xa]  }
 0x1f3   :  { %s5766_s23 = sshll.u32 %s11880_s2, 4  ;;  %s469_s21 = sshll.u32 %s9295_s26, 4  ;;  %s9871_s21 = int_to_ptr.vmem [resolvable:$true] %s469_s21 }
 0x1f4   :  { %s440_s7 = scalar_lea.hbm %s11791_s1, %s5766_s23 }
 0x1f5   :  { %s8082_s22 = scalar_lea.hbm %s440_s7, 16  ;;  %p8085_p10 = scmp.lt.u32.totalorder %s440_s7, %s11791_s1 }
 0x1f6   :  { %p8083_p5 = scmp.ne.s32.totalorder %s440_s7, %s8082_s22  ;;  %p8086_p9 = scmp.lt.u32.totalorder %s9526_s15, %s8082_s22 }
 0x1f7   :  { %p8088_p8 = scmp.lt.u32.totalorder %s8082_s22, %s440_s7 }
 0x1f8   :  { %p8087_p6 = por %p8086_p9, %p8085_p10 }
 0x1fa   :  { %p8089_p7 = por %p8088_p8, %p8087_p6 }
 0x1fc   :  { %p8090_p11 = pnand %p8089_p7, %p8083_p5 }
 0x1fe   :  { %8093 = shalt.err (!%p8090_p11)  }
 0x1ff   :  { %s8094_s20 = scalar_lea.vmem %s450_s19, 16  ;;  %p8099_p12 = scmp.lt.s32.totalorder %s450_s19, %s9509_s3 }
 0x200   :  { %p8095_p4 = scmp.ne.s32.totalorder %s450_s19, %s8094_s20  ;;  %p8100_p13 = scmp.lt.s32.totalorder %s9535_s25, %s8094_s20 }
 0x202   :  { %p8101_p0 = por %p8100_p13, %p8099_p12 }
 0x204   :  { %p8102_p1 = pnand %p8101_p0, %p8095_p4 }
 0x206   :  { %8105 = shalt.err (!%p8102_p1)  }
 0x207   :  { %452 = dma.hbm_to_vmem [thread:$0]  %s440_s7, 16, %s450_s19, [#allocation4] }
 0x208   :  { %p455_p2 = scmp.gt.s32.totalorder %s9866_s13, 0  ;;  %p5768_p3 = scmp.lt.s32.totalorder %s9866_s13, 49 }
 0x209   :  { %s9881_s28 = sld [smem:[#allocation6 + $0x102]]  ;;  %s9296_s14 = smov [#allocation2 + $0x12]  }
 0x20a   :  { %s11882_s13 = smov (!%p455_p2, %s9866_s13), 0  ;;  %s489_s17 = sshll.u32 %s9296_s14, 4  ;;  %s9886_s17 = int_to_ptr.vmem [resolvable:$true] %s489_s17 }
 0x20b   :  { %s9884_s29 = sld [smem:[#allocation6 + $0x103]]  ;;  %s11884_s13 = smov (!%p5768_p3, %s11882_s13), 49 }
 0x20c   :  { %s5773_s6 = sshll.u32 %s11884_s13, 4  ;;  %s9297_s0 = smov [#allocation2 + $0x1a]  }
 0x20d   :  { %s509_s10 = sshll.u32 %s9297_s0, 4  ;;  %s460_s19 = scalar_lea.hbm %s11791_s1, %s5773_s6  ;;  %s9908_s10 = int_to_ptr.vmem [resolvable:$true] %s509_s10 }
 0x20e   :  { %s8106_s23 = scalar_lea.hbm %s460_s19, 16  ;;  %p8109_p9 = scmp.lt.u32.totalorder %s460_s19, %s11791_s1 }
 0x20f   :  { %p475_p5 = scmp.gt.s32.totalorder %s9881_s28, 0  ;;  %p8107_p10 = scmp.ne.s32.totalorder %s460_s19, %s8106_s23 }
 0x210   :  { %p8110_p6 = scmp.lt.u32.totalorder %s9526_s15, %s8106_s23  ;;  %p8112_p7 = scmp.lt.u32.totalorder %s8106_s23, %s460_s19 }
 0x212   :  { %p8111_p8 = por %p8110_p6, %p8109_p9 }
 0x214   :  { %p8113_p11 = por %p8112_p7, %p8111_p8 }
 0x216   :  { %p8114_p4 = pnand %p8113_p11, %p8107_p10 }
 0x218   :  { %8117 = shalt.err (!%p8114_p4)  }
 0x219   :  { %s8118_s13 = scalar_lea.vmem %s9871_s21, 16  ;;  %p8123_p13 = scmp.lt.s32.totalorder %s9871_s21, %s9509_s3 }
 0x21a   :  { %p8119_p12 = scmp.ne.s32.totalorder %s9871_s21, %s8118_s13  ;;  %p8124_p0 = scmp.lt.s32.totalorder %s9535_s25, %s8118_s13 }
 0x21c   :  { %p8125_p1 = por %p8124_p0, %p8123_p13 }
 0x21e   :  { %p8126_p2 = pnand %p8125_p1, %p8119_p12 }
 0x220   :  { %8129 = shalt.err (!%p8126_p2)  }
 0x221   :  { %472 = dma.hbm_to_vmem [thread:$0]  %s460_s19, 16, %s9871_s21, [#allocation4] }
 0x222   :  { %s476_s30 = scalar_select %p475_p5, %s9881_s28, 0 }
 0x223   :  { %p5775_p3 = scmp.lt.s32.totalorder %s9881_s28, 49  ;;  %p495_p10 = scmp.gt.s32.totalorder %s9884_s29, 0 }
 0x224   :  { %p5782_p9 = scmp.lt.s32.totalorder %s9884_s29, 49  ;;  %s9911_s24 = sld [smem:[#allocation6 + $0x104]] }
 0x225   :  { %s11886_s30 = smov (!%p5775_p3, %s476_s30), 49 }
 0x226   :  { %s496_s7 = scalar_select %p495_p10, %s9884_s29, 0 }
 0x227   :  { %s5780_s22 = sshll.u32 %s11886_s30, 4 }
 0x228   :  { %s480_s14 = scalar_lea.hbm %s11791_s1, %s5780_s22 }
 0x229   :  { %s8130_s6 = scalar_lea.hbm %s480_s14, 16  ;;  %p8133_p5 = scmp.lt.u32.totalorder %s480_s14, %s11791_s1 }
 0x22a   :  { %p8131_p6 = scmp.ne.s32.totalorder %s480_s14, %s8130_s6  ;;  %p8134_p8 = scmp.lt.u32.totalorder %s9526_s15, %s8130_s6 }
 0x22b   :  { %p8136_p11 = scmp.lt.u32.totalorder %s8130_s6, %s480_s14 }
 0x22c   :  { %p8135_p7 = por %p8134_p8, %p8133_p5 }
 0x22e   :  { %p8137_p4 = por %p8136_p11, %p8135_p7 }
 0x230   :  { %p8138_p12 = pnand %p8137_p4, %p8131_p6 }
 0x232   :  { %8141 = shalt.err (!%p8138_p12)  }
 0x233   :  { %s8142_s28 = scalar_lea.vmem %s9886_s17, 16  ;;  %p8147_p0 = scmp.lt.s32.totalorder %s9886_s17, %s9509_s3 }
 0x234   :  { %p8143_p13 = scmp.ne.s32.totalorder %s9886_s17, %s8142_s28  ;;  %p8148_p1 = scmp.lt.s32.totalorder %s9535_s25, %s8142_s28 }
 0x236   :  { %p8149_p2 = por %p8148_p1, %p8147_p0 }
 0x238   :  { %p8150_p3 = pnand %p8149_p2, %p8143_p13 }
 0x23a   :  { %8153 = shalt.err (!%p8150_p3)  }
 0x23b   :  { %492 = dma.hbm_to_vmem [thread:$0]  %s480_s14, 16, %s9886_s17, [#allocation4] }
 0x23c   :  { %s11888_s7 = smov (!%p5782_p9, %s496_s7), 49  ;;  %s9298_s2 = smov [#allocation2 + $0x22]  }
 0x23d   :  { %s529_s18 = sshll.u32 %s9298_s2, 4  ;;  %s9928_s19 = sld [smem:[#allocation6 + $0x105]]  ;;  %s9930_s18 = int_to_ptr.vmem [resolvable:$true] %s529_s18 }
 0x23e   :  { %s5787_s23 = sshll.u32 %s11888_s7, 4  ;;  %p515_p10 = scmp.gt.s32.totalorder %s9911_s24, 0 }
 0x23f   :  { %s500_s13 = scalar_lea.hbm %s11791_s1, %s5787_s23 }
 0x240   :  { %s8154_s30 = scalar_lea.hbm %s500_s13, 16  ;;  %p8157_p5 = scmp.lt.u32.totalorder %s500_s13, %s11791_s1 }
 0x241   :  { %p8155_p6 = scmp.ne.s32.totalorder %s500_s13, %s8154_s30  ;;  %p8158_p8 = scmp.lt.u32.totalorder %s9526_s15, %s8154_s30 }
 0x242   :  { %p8160_p7 = scmp.lt.u32.totalorder %s8154_s30, %s500_s13 }
 0x243   :  { %p8159_p9 = por %p8158_p8, %p8157_p5 }
 0x245   :  { %p8161_p11 = por %p8160_p7, %p8159_p9 }
 0x247   :  { %p8162_p4 = pnand %p8161_p11, %p8155_p6 }
 0x249   :  { %8165 = shalt.err (!%p8162_p4)  }
 0x24a   :  { %s8166_s17 = scalar_lea.vmem %s9908_s10, 16  ;;  %p8171_p13 = scmp.lt.s32.totalorder %s9908_s10, %s9509_s3 }
 0x24b   :  { %p8167_p12 = scmp.ne.s32.totalorder %s9908_s10, %s8166_s17  ;;  %p8172_p0 = scmp.lt.s32.totalorder %s9535_s25, %s8166_s17 }
 0x24d   :  { %p8173_p1 = por %p8172_p0, %p8171_p13 }
 0x24f   :  { %p8174_p2 = pnand %p8173_p1, %p8167_p12 }
 0x251   :  { %8177 = shalt.err (!%p8174_p2)  }
 0x252   :  { %512 = dma.hbm_to_vmem [thread:$0]  %s500_s13, 16, %s9908_s10, [#allocation4] }
 0x253   :  { %s516_s29 = scalar_select %p515_p10, %s9911_s24, 0 }
 0x254   :  { %p5789_p3 = scmp.lt.s32.totalorder %s9911_s24, 49  ;;  %p535_p6 = scmp.gt.s32.totalorder %s9928_s19, 0 }
 0x255   :  { %p5796_p5 = scmp.lt.s32.totalorder %s9928_s19, 49  ;;  %s9299_s14 = smov [#allocation2 + $0x2a]  }
 0x256   :  { %s11890_s29 = smov (!%p5789_p3, %s516_s29), 49  ;;  %s549_s6 = sshll.u32 %s9299_s14, 4  ;;  %s9956_s6 = int_to_ptr.vmem [resolvable:$true] %s549_s6 }
 0x257   :  { %s536_s7 = scalar_select %p535_p6, %s9928_s19, 0 }
 0x258   :  { %s5794_s20 = sshll.u32 %s11890_s29, 4 }
 0x259   :  { %s520_s28 = scalar_lea.hbm %s11791_s1, %s5794_s20 }
 0x25a   :  { %s8178_s2 = scalar_lea.hbm %s520_s28, 16  ;;  %p8181_p10 = scmp.lt.u32.totalorder %s520_s28, %s11791_s1 }
 0x25b   :  { %p8179_p8 = scmp.ne.s32.totalorder %s520_s28, %s8178_s2  ;;  %p8182_p9 = scmp.lt.u32.totalorder %s9526_s15, %s8178_s2 }
 0x25c   :  { %p8184_p11 = scmp.lt.u32.totalorder %s8178_s2, %s520_s28 }
 0x25d   :  { %p8183_p7 = por %p8182_p9, %p8181_p10 }
 0x25f   :  { %p8185_p4 = por %p8184_p11, %p8183_p7 }
 0x261   :  { %p8186_p12 = pnand %p8185_p4, %p8179_p8 }
 0x263   :  { %8189 = shalt.err (!%p8186_p12)  }
 0x264   :  { %s8190_s24 = scalar_lea.vmem %s9930_s18, 16  ;;  %p8195_p0 = scmp.lt.s32.totalorder %s9930_s18, %s9509_s3 }
 0x265   :  { %p8191_p13 = scmp.ne.s32.totalorder %s9930_s18, %s8190_s24  ;;  %p8196_p1 = scmp.lt.s32.totalorder %s9535_s25, %s8190_s24 }
 0x267   :  { %p8197_p2 = por %p8196_p1, %p8195_p0 }
 0x269   :  { %p8198_p3 = pnand %p8197_p2, %p8191_p13 }
 0x26b   :  { %8201 = shalt.err (!%p8198_p3)  }
 0x26c   :  { %532 = dma.hbm_to_vmem [thread:$0]  %s520_s28, 16, %s9930_s18, [#allocation4] }
 0x26d   :  { %s11892_s7 = smov (!%p5796_p5, %s536_s7), 49  ;;  %s9970_s26 = sld [smem:[#allocation6 + $0x106]] }
 0x26e   :  { %s5801_s16 = sshll.u32 %s11892_s7, 4  ;;  %s9300_s13 = smov [#allocation2 + $0x32]  }
 0x26f   :  { %s569_s30 = sshll.u32 %s9300_s13, 4  ;;  %s540_s17 = scalar_lea.hbm %s11791_s1, %s5801_s16  ;;  %s9975_s30 = int_to_ptr.vmem [resolvable:$true] %s569_s30 }
 0x270   :  { %s8202_s29 = scalar_lea.hbm %s540_s17, 16  ;;  %p8205_p8 = scmp.lt.u32.totalorder %s540_s17, %s11791_s1 }
 0x271   :  { %p8203_p6 = scmp.ne.s32.totalorder %s540_s17, %s8202_s29  ;;  %p8206_p10 = scmp.lt.u32.totalorder %s9526_s15, %s8202_s29 }
 0x272   :  { %p8208_p5 = scmp.lt.u32.totalorder %s8202_s29, %s540_s17 }
 0x273   :  { %p8207_p9 = por %p8206_p10, %p8205_p8 }
 0x275   :  { %p8209_p7 = por %p8208_p5, %p8207_p9 }
 0x277   :  { %p8210_p11 = pnand %p8209_p7, %p8203_p6 }
 0x279   :  { %8213 = shalt.err (!%p8210_p11)  }
 0x27a   :  { %s8214_s18 = scalar_lea.vmem %s9956_s6, 16  ;;  %p8219_p12 = scmp.lt.s32.totalorder %s9956_s6, %s9509_s3 }
 0x27b   :  { %p8215_p4 = scmp.ne.s32.totalorder %s9956_s6, %s8214_s18  ;;  %p8220_p13 = scmp.lt.s32.totalorder %s9535_s25, %s8214_s18 }
 0x27d   :  { %p8221_p0 = por %p8220_p13, %p8219_p12 }
 0x27f   :  { %p8222_p1 = pnand %p8221_p0, %p8215_p4 }
 0x281   :  { %8225 = shalt.err (!%p8222_p1)  }
 0x282   :  { %552 = dma.hbm_to_vmem [thread:$0]  %s540_s17, 16, %s9956_s6, [#allocation4] }
 0x283   :  { %s9987_s19 = sld [smem:[#allocation6 + $0x107]]  ;;  %s9301_s7 = smov [#allocation2 + $0x3a]  }
 0x284   :  { %s589_s0 = sshll.u32 %s9301_s7, 4  ;;  %s9989_s21 = sld [smem:[#allocation6 + $0x180]]  ;;  %s9993_s0 = int_to_ptr.vmem [resolvable:$true] %s589_s0 }
 0x285   :  { %p555_p2 = scmp.gt.s32.totalorder %s9970_s26, 0  ;;  %p5803_p3 = scmp.lt.s32.totalorder %s9970_s26, 49 }
 0x286   :  { %s9302_s28 = smov [#allocation2 + $0x3]   ;;  %s9998_s6 = sld [smem:[#allocation6 + $0x181]] }
 0x287   :  { %s11894_s26 = smov (!%p555_p2, %s9970_s26), 0  ;;  %s9996_s2 = sshll.u32 %s9302_s28, 4  ;;  %s10028_s2 = int_to_ptr.vmem [resolvable:$true] %s9996_s2 }
 0x288   :  { %s11896_s26 = smov (!%p5803_p3, %s11894_s26), 49 }
 0x289   :  { %p575_p6 = scmp.gt.s32.totalorder %s9987_s19, 0  ;;  %s5808_s23 = sshll.u32 %s11896_s26, 4 }
 0x28a   :  { %p596_p10 = scmp.gt.s32.totalorder %s9989_s21, 0  ;;  %s560_s16 = scalar_lea.hbm %s11791_s1, %s5808_s23 }
 0x28b   :  { %s8226_s13 = scalar_lea.hbm %s560_s16, 16  ;;  %p8229_p7 = scmp.lt.u32.totalorder %s560_s16, %s11791_s1 }
 0x28c   :  { %p8227_p5 = scmp.ne.s32.totalorder %s560_s16, %s8226_s13  ;;  %p8230_p11 = scmp.lt.u32.totalorder %s9526_s15, %s8226_s13 }
 0x28d   :  { %p8232_p12 = scmp.lt.u32.totalorder %s8226_s13, %s560_s16 }
 0x28e   :  { %p8231_p4 = por %p8230_p11, %p8229_p7 }
 0x290   :  { %p8233_p13 = por %p8232_p12, %p8231_p4 }
 0x292   :  { %p8234_p0 = pnand %p8233_p13, %p8227_p5 }
 0x294   :  { %8237 = shalt.err (!%p8234_p0)  }
 0x295   :  { %s8238_s26 = scalar_lea.vmem %s9975_s30, 16  ;;  %p8243_p2 = scmp.lt.s32.totalorder %s9975_s30, %s9509_s3 }
 0x296   :  { %p8239_p1 = scmp.ne.s32.totalorder %s9975_s30, %s8238_s26  ;;  %p8244_p3 = scmp.lt.s32.totalorder %s9535_s25, %s8238_s26 }
 0x298   :  { %p8245_p9 = por %p8244_p3, %p8243_p2 }
 0x29a   :  { %p8246_p8 = pnand %p8245_p9, %p8239_p1 }
 0x29c   :  { %8249 = shalt.err (!%p8246_p8)  }
 0x29d   :  { %572 = dma.hbm_to_vmem [thread:$0]  %s560_s16, 16, %s9975_s30, [#allocation4] }
 0x29e   :  { %s576_s17 = scalar_select %p575_p6, %s9987_s19, 0 }
 0x29f   :  { %s597_s29 = scalar_select %p596_p10, %s9989_s21, 0 }
 0x2a0   :  { %p11813_p5 = scmp.lt.s32.totalorder %s9987_s19, 49  ;;  %p11814_p7 = scmp.lt.s32.totalorder %s9989_s21, 49 }
 0x2a2   :  { %s11898_s17 = smov (!%p11813_p5, %s576_s17), 49  ;;  %s11900_s29 = smov (!%p11814_p7, %s597_s29), 49 }
 0x2a3   :  { %s5815_s20 = sshll.u32 %s11898_s17, 4  ;;  %s5822_s28 = sshll.u32 %s11900_s29, 4 }
 0x2a4   :  { %s580_s7 = scalar_lea.hbm %s11791_s1, %s5815_s20 }
 0x2a5   :  { %s8250_s23 = scalar_lea.hbm %s580_s7, 16  ;;  %p8253_p6 = scmp.lt.u32.totalorder %s580_s7, %s11791_s1 }
 0x2a6   :  { %p8251_p8 = scmp.ne.s32.totalorder %s580_s7, %s8250_s23  ;;  %p8254_p9 = scmp.lt.u32.totalorder %s9526_s15, %s8250_s23 }
 0x2a7   :  { %p8256_p11 = scmp.lt.u32.totalorder %s8250_s23, %s580_s7 }
 0x2a8   :  { %p8255_p10 = por %p8254_p9, %p8253_p6 }
 0x2aa   :  { %p8257_p4 = por %p8256_p11, %p8255_p10 }
 0x2ac   :  { %p8258_p12 = pnand %p8257_p4, %p8251_p8 }
 0x2ae   :  { %8261 = shalt.err (!%p8258_p12)  }
 0x2af   :  { %s8262_s19 = scalar_lea.vmem %s9993_s0, 16  ;;  %p8267_p0 = scmp.lt.s32.totalorder %s9993_s0, %s9509_s3 }
 0x2b0   :  { %p8263_p13 = scmp.ne.s32.totalorder %s9993_s0, %s8262_s19  ;;  %p8268_p1 = scmp.lt.s32.totalorder %s9535_s25, %s8262_s19 }
 0x2b2   :  { %p8269_p2 = por %p8268_p1, %p8267_p0 }
 0x2b4   :  { %p8270_p3 = pnand %p8269_p2, %p8263_p13 }
 0x2b6   :  { %8273 = shalt.err (!%p8270_p3)  }
 0x2b7   :  { %592 = dma.hbm_to_vmem [thread:$0]  %s580_s7, 16, %s9993_s0, [#allocation4] }
 0x2b8   :  { %s601_s16 = scalar_lea.hbm %s11791_s1, %s5822_s28  ;;  %p616_p5 = scmp.gt.s32.totalorder %s9998_s6, 0 }
 0x2b9   :  { %s8274_s13 = scalar_lea.hbm %s601_s16, 16  ;;  %p8277_p8 = scmp.lt.u32.totalorder %s601_s16, %s11791_s1 }
 0x2ba   :  { %p8275_p7 = scmp.ne.s32.totalorder %s601_s16, %s8274_s13  ;;  %p8278_p6 = scmp.lt.u32.totalorder %s9526_s15, %s8274_s13 }
 0x2bb   :  { %p8280_p10 = scmp.lt.u32.totalorder %s8274_s13, %s601_s16 }
 0x2bc   :  { %p8279_p9 = por %p8278_p6, %p8277_p8 }
 0x2be   :  { %p8281_p11 = por %p8280_p10, %p8279_p9 }
 0x2c0   :  { %p8282_p4 = pnand %p8281_p11, %p8275_p7 }
 0x2c2   :  { %8285 = shalt.err (!%p8282_p4)  }
 0x2c3   :  { %s8286_s0 = scalar_lea.vmem %s10028_s2, 16  ;;  %p8291_p13 = scmp.lt.s32.totalorder %s10028_s2, %s9509_s3 }
 0x2c4   :  { %p8287_p12 = scmp.ne.s32.totalorder %s10028_s2, %s8286_s0  ;;  %p8292_p0 = scmp.lt.s32.totalorder %s9535_s25, %s8286_s0 }
 0x2c6   :  { %p8293_p1 = por %p8292_p0, %p8291_p13 }
 0x2c8   :  { %p8294_p2 = pnand %p8293_p1, %p8287_p12 }
 0x2ca   :  { %8297 = shalt.err (!%p8294_p2)  }
 0x2cb   :  { %613 = dma.hbm_to_vmem [thread:$0]  %s601_s16, 16, %s10028_s2, [#allocation4] }
 0x2cc   :  { %s617_s26 = scalar_select %p616_p5, %s9998_s6, 0 }
 0x2cd   :  { %p5824_p3 = scmp.lt.s32.totalorder %s9998_s6, 49  ;;  %s9303_s17 = smov [#allocation2 + $0xb]  }
 0x2ce   :  { %s630_s29 = sshll.u32 %s9303_s17, 4  ;;  %s10061_s20 = sld [smem:[#allocation6 + $0x182]]  ;;  %s631_s29 = int_to_ptr.vmem [resolvable:$true] %s630_s29 }
 0x2cf   :  { %s11902_s26 = smov (!%p5824_p3, %s617_s26), 49  ;;  %s9304_s18 = smov [#allocation2 + $0x13]  }
 0x2d0   :  { %s5829_s14 = sshll.u32 %s11902_s26, 4  ;;  %s650_s7 = sshll.u32 %s9304_s18, 4  ;;  %s10066_s7 = int_to_ptr.vmem [resolvable:$true] %s650_s7 }
 0x2d1   :  { %s621_s10 = scalar_lea.hbm %s11791_s1, %s5829_s14 }
 0x2d2   :  { %s8298_s2 = scalar_lea.hbm %s621_s10, 16  ;;  %p8301_p5 = scmp.lt.u32.totalorder %s621_s10, %s11791_s1 }
 0x2d3   :  { %p8299_p7 = scmp.ne.s32.totalorder %s621_s10, %s8298_s2  ;;  %p8302_p8 = scmp.lt.u32.totalorder %s9526_s15, %s8298_s2 }
 0x2d4   :  { %p8304_p9 = scmp.lt.u32.totalorder %s8298_s2, %s621_s10 }
 0x2d5   :  { %p8303_p6 = por %p8302_p8, %p8301_p5 }
 0x2d7   :  { %p8305_p10 = por %p8304_p9, %p8303_p6 }
 0x2d9   :  { %p8306_p11 = pnand %p8305_p10, %p8299_p7 }
 0x2db   :  { %8309 = shalt.err (!%p8306_p11)  }
 0x2dc   :  { %s8310_s6 = scalar_lea.vmem %s631_s29, 16  ;;  %p8315_p12 = scmp.lt.s32.totalorder %s631_s29, %s9509_s3 }
 0x2dd   :  { %p8311_p4 = scmp.ne.s32.totalorder %s631_s29, %s8310_s6  ;;  %p8316_p13 = scmp.lt.s32.totalorder %s9535_s25, %s8310_s6 }
 0x2df   :  { %p8317_p0 = por %p8316_p13, %p8315_p12 }
 0x2e1   :  { %p8318_p1 = pnand %p8317_p0, %p8311_p4 }
 0x2e3   :  { %8321 = shalt.err (!%p8318_p1)  }
 0x2e4   :  { %633 = dma.hbm_to_vmem [thread:$0]  %s621_s10, 16, %s631_s29, [#allocation4] }
 0x2e5   :  { %p636_p2 = scmp.gt.s32.totalorder %s10061_s20, 0  ;;  %p5831_p3 = scmp.lt.s32.totalorder %s10061_s20, 49 }
 0x2e6   :  { %s10076_s21 = sld [smem:[#allocation6 + $0x183]]  ;;  %s9305_s24 = smov [#allocation2 + $0x1b]  }
 0x2e7   :  { %s11904_s20 = smov (!%p636_p2, %s10061_s20), 0  ;;  %s670_s16 = sshll.u32 %s9305_s24, 4  ;;  %s10081_s16 = int_to_ptr.vmem [resolvable:$true] %s670_s16 }
 0x2e8   :  { %s10079_s13 = sld [smem:[#allocation6 + $0x184]]  ;;  %s11906_s20 = smov (!%p5831_p3, %s11904_s20), 49 }
 0x2e9   :  { %s5836_s22 = sshll.u32 %s11906_s20, 4  ;;  %s9306_s27 = smov [#allocation2 + $0x23]  }
 0x2ea   :  { %s690_s0 = sshll.u32 %s9306_s27, 4  ;;  %s641_s29 = scalar_lea.hbm %s11791_s1, %s5836_s22  ;;  %s10103_s0 = int_to_ptr.vmem [resolvable:$true] %s690_s0 }
 0x2eb   :  { %s8322_s14 = scalar_lea.hbm %s641_s29, 16  ;;  %p8325_p8 = scmp.lt.u32.totalorder %s641_s29, %s11791_s1 }
 0x2ec   :  { %p656_p7 = scmp.gt.s32.totalorder %s10076_s21, 0  ;;  %p8323_p5 = scmp.ne.s32.totalorder %s641_s29, %s8322_s14 }
 0x2ed   :  { %p8326_p6 = scmp.lt.u32.totalorder %s9526_s15, %s8322_s14  ;;  %p8328_p10 = scmp.lt.u32.totalorder %s8322_s14, %s641_s29 }
 0x2ef   :  { %p8327_p9 = por %p8326_p6, %p8325_p8 }
 0x2f1   :  { %p8329_p11 = por %p8328_p10, %p8327_p9 }
 0x2f3   :  { %p8330_p4 = pnand %p8329_p11, %p8323_p5 }
 0x2f5   :  { %8333 = shalt.err (!%p8330_p4)  }
 0x2f6   :  { %s8334_s20 = scalar_lea.vmem %s10066_s7, 16  ;;  %p8339_p13 = scmp.lt.s32.totalorder %s10066_s7, %s9509_s3 }
 0x2f7   :  { %p8335_p12 = scmp.ne.s32.totalorder %s10066_s7, %s8334_s20  ;;  %p8340_p0 = scmp.lt.s32.totalorder %s9535_s25, %s8334_s20 }
 0x2f9   :  { %p8341_p1 = por %p8340_p0, %p8339_p13 }
 0x2fb   :  { %p8342_p2 = pnand %p8341_p1, %p8335_p12 }
 0x2fd   :  { %8345 = shalt.err (!%p8342_p2)  }
 0x2fe   :  { %653 = dma.hbm_to_vmem [thread:$0]  %s641_s29, 16, %s10066_s7, [#allocation4] }
 0x2ff   :  { %s657_s23 = scalar_select %p656_p7, %s10076_s21, 0 }
 0x300   :  { %p5838_p3 = scmp.lt.s32.totalorder %s10076_s21, 49  ;;  %p676_p5 = scmp.gt.s32.totalorder %s10079_s13, 0 }
 0x301   :  { %p5845_p8 = scmp.lt.s32.totalorder %s10079_s13, 49  ;;  %s10106_s30 = sld [smem:[#allocation6 + $0x185]] }
 0x302   :  { %s11908_s23 = smov (!%p5838_p3, %s657_s23), 49 }
 0x303   :  { %s677_s10 = scalar_select %p676_p5, %s10079_s13, 0 }
 0x304   :  { %s5843_s2 = sshll.u32 %s11908_s23, 4 }
 0x305   :  { %s661_s24 = scalar_lea.hbm %s11791_s1, %s5843_s2 }
 0x306   :  { %s8346_s22 = scalar_lea.hbm %s661_s24, 16  ;;  %p8349_p7 = scmp.lt.u32.totalorder %s661_s24, %s11791_s1 }
 0x307   :  { %p8347_p6 = scmp.ne.s32.totalorder %s661_s24, %s8346_s22  ;;  %p8350_p9 = scmp.lt.u32.totalorder %s9526_s15, %s8346_s22 }
 0x308   :  { %p8352_p11 = scmp.lt.u32.totalorder %s8346_s22, %s661_s24 }
 0x309   :  { %p8351_p10 = por %p8350_p9, %p8349_p7 }
 0x30b   :  { %p8353_p4 = por %p8352_p11, %p8351_p10 }
 0x30d   :  { %p8354_p12 = pnand %p8353_p4, %p8347_p6 }
 0x30f   :  { %8357 = shalt.err (!%p8354_p12)  }
 0x310   :  { %s8358_s21 = scalar_lea.vmem %s10081_s16, 16  ;;  %p8363_p0 = scmp.lt.s32.totalorder %s10081_s16, %s9509_s3 }
 0x311   :  { %p8359_p13 = scmp.ne.s32.totalorder %s10081_s16, %s8358_s21  ;;  %p8364_p1 = scmp.lt.s32.totalorder %s9535_s25, %s8358_s21 }
 0x313   :  { %p8365_p2 = por %p8364_p1, %p8363_p0 }
 0x315   :  { %p8366_p3 = pnand %p8365_p2, %p8359_p13 }
 0x317   :  { %8369 = shalt.err (!%p8366_p3)  }
 0x318   :  { %673 = dma.hbm_to_vmem [thread:$0]  %s661_s24, 16, %s10081_s16, [#allocation4] }
 0x319   :  { %s11910_s10 = smov (!%p5845_p8, %s677_s10), 49  ;;  %s9307_s26 = smov [#allocation2 + $0x2b]  }
 0x31a   :  { %s710_s17 = sshll.u32 %s9307_s26, 4  ;;  %s10123_s29 = sld [smem:[#allocation6 + $0x186]]  ;;  %s10125_s17 = int_to_ptr.vmem [resolvable:$true] %s710_s17 }
 0x31b   :  { %s5850_s14 = sshll.u32 %s11910_s10, 4  ;;  %p696_p5 = scmp.gt.s32.totalorder %s10106_s30, 0 }
 0x31c   :  { %s681_s20 = scalar_lea.hbm %s11791_s1, %s5850_s14 }
 0x31d   :  { %s8370_s23 = scalar_lea.hbm %s681_s20, 16  ;;  %p8373_p7 = scmp.lt.u32.totalorder %s681_s20, %s11791_s1 }
 0x31e   :  { %p8371_p6 = scmp.ne.s32.totalorder %s681_s20, %s8370_s23  ;;  %p8374_p9 = scmp.lt.u32.totalorder %s9526_s15, %s8370_s23 }
 0x31f   :  { %p8376_p10 = scmp.lt.u32.totalorder %s8370_s23, %s681_s20 }
 0x320   :  { %p8375_p8 = por %p8374_p9, %p8373_p7 }
 0x322   :  { %p8377_p11 = por %p8376_p10, %p8375_p8 }
 0x324   :  { %p8378_p4 = pnand %p8377_p11, %p8371_p6 }
 0x326   :  { %8381 = shalt.err (!%p8378_p4)  }
 0x327   :  { %s8382_s16 = scalar_lea.vmem %s10103_s0, 16  ;;  %p8387_p13 = scmp.lt.s32.totalorder %s10103_s0, %s9509_s3 }
 0x328   :  { %p8383_p12 = scmp.ne.s32.totalorder %s10103_s0, %s8382_s16  ;;  %p8388_p0 = scmp.lt.s32.totalorder %s9535_s25, %s8382_s16 }
 0x32a   :  { %p8389_p1 = por %p8388_p0, %p8387_p13 }
 0x32c   :  { %p8390_p2 = pnand %p8389_p1, %p8383_p12 }
 0x32e   :  { %8393 = shalt.err (!%p8390_p2)  }
 0x32f   :  { %693 = dma.hbm_to_vmem [thread:$0]  %s681_s20, 16, %s10103_s0, [#allocation4] }
 0x330   :  { %s697_s13 = scalar_select %p696_p5, %s10106_s30, 0 }
 0x331   :  { %p5852_p3 = scmp.lt.s32.totalorder %s10106_s30, 49  ;;  %p716_p6 = scmp.gt.s32.totalorder %s10123_s29, 0 }
 0x332   :  { %p5859_p7 = scmp.lt.s32.totalorder %s10123_s29, 49  ;;  %s9308_s24 = smov [#allocation2 + $0x33]  }
 0x333   :  { %s11912_s13 = smov (!%p5852_p3, %s697_s13), 49  ;;  %s730_s22 = sshll.u32 %s9308_s24, 4  ;;  %s10151_s22 = int_to_ptr.vmem [resolvable:$true] %s730_s22 }
 0x334   :  { %s717_s10 = scalar_select %p716_p6, %s10123_s29, 0 }
 0x335   :  { %s5857_s6 = sshll.u32 %s11912_s13, 4 }
 0x336   :  { %s701_s21 = scalar_lea.hbm %s11791_s1, %s5857_s6 }
 0x337   :  { %s8394_s26 = scalar_lea.hbm %s701_s21, 16  ;;  %p8397_p5 = scmp.lt.u32.totalorder %s701_s21, %s11791_s1 }
 0x338   :  { %p8395_p9 = scmp.ne.s32.totalorder %s701_s21, %s8394_s26  ;;  %p8398_p8 = scmp.lt.u32.totalorder %s9526_s15, %s8394_s26 }
 0x339   :  { %p8400_p11 = scmp.lt.u32.totalorder %s8394_s26, %s701_s21 }
 0x33a   :  { %p8399_p10 = por %p8398_p8, %p8397_p5 }
 0x33c   :  { %p8401_p4 = por %p8400_p11, %p8399_p10 }
 0x33e   :  { %p8402_p12 = pnand %p8401_p4, %p8395_p9 }
 0x340   :  { %8405 = shalt.err (!%p8402_p12)  }
 0x341   :  { %s8406_s30 = scalar_lea.vmem %s10125_s17, 16  ;;  %p8411_p0 = scmp.lt.s32.totalorder %s10125_s17, %s9509_s3 }
 0x342   :  { %p8407_p13 = scmp.ne.s32.totalorder %s10125_s17, %s8406_s30  ;;  %p8412_p1 = scmp.lt.s32.totalorder %s9535_s25, %s8406_s30 }
 0x344   :  { %p8413_p2 = por %p8412_p1, %p8411_p0 }
 0x346   :  { %p8414_p3 = pnand %p8413_p2, %p8407_p13 }
 0x348   :  { %8417 = shalt.err (!%p8414_p3)  }
 0x349   :  { %713 = dma.hbm_to_vmem [thread:$0]  %s701_s21, 16, %s10125_s17, [#allocation4] }
 0x34a   :  { %s11914_s10 = smov (!%p5859_p7, %s717_s10), 49  ;;  %s10165_s18 = sld [smem:[#allocation6 + $0x187]] }
 0x34b   :  { %s5864_s28 = sshll.u32 %s11914_s10, 4  ;;  %s9309_s20 = smov [#allocation2 + $0x3b]  }
 0x34c   :  { %s750_s23 = sshll.u32 %s9309_s20, 4  ;;  %s721_s16 = scalar_lea.hbm %s11791_s1, %s5864_s28  ;;  %s10170_s23 = int_to_ptr.vmem [resolvable:$true] %s750_s23 }
 0x34d   :  { %s8418_s13 = scalar_lea.hbm %s721_s16, 16  ;;  %p8421_p9 = scmp.lt.u32.totalorder %s721_s16, %s11791_s1 }
 0x34e   :  { %p8419_p6 = scmp.ne.s32.totalorder %s721_s16, %s8418_s13  ;;  %p8422_p5 = scmp.lt.u32.totalorder %s9526_s15, %s8418_s13 }
 0x34f   :  { %p8424_p7 = scmp.lt.u32.totalorder %s8418_s13, %s721_s16 }
 0x350   :  { %p8423_p8 = por %p8422_p5, %p8421_p9 }
 0x352   :  { %p8425_p10 = por %p8424_p7, %p8423_p8 }
 0x354   :  { %p8426_p11 = pnand %p8425_p10, %p8419_p6 }
 0x356   :  { %8429 = shalt.err (!%p8426_p11)  }
 0x357   :  { %s8430_s17 = scalar_lea.vmem %s10151_s22, 16  ;;  %p8435_p12 = scmp.lt.s32.totalorder %s10151_s22, %s9509_s3 }
 0x358   :  { %p8431_p4 = scmp.ne.s32.totalorder %s10151_s22, %s8430_s17  ;;  %p8436_p13 = scmp.lt.s32.totalorder %s9535_s25, %s8430_s17 }
 0x35a   :  { %p8437_p0 = por %p8436_p13, %p8435_p12 }
 0x35c   :  { %p8438_p1 = pnand %p8437_p0, %p8431_p4 }
 0x35e   :  { %8441 = shalt.err (!%p8438_p1)  }
 0x35f   :  { %733 = dma.hbm_to_vmem [thread:$0]  %s721_s16, 16, %s10151_s22, [#allocation4] }
 0x360   :  { %s10182_s29 = sld [smem:[#allocation6 + $0x200]]  ;;  %s9310_s10 = smov [#allocation2 + $0x4]  }
 0x361   :  { %s771_s27 = sshll.u32 %s9310_s10, 4  ;;  %s10184_s7 = sld [smem:[#allocation6 + $0x201]]  ;;  %s10188_s27 = int_to_ptr.vmem [resolvable:$true] %s771_s27 }
 0x362   :  { %p736_p2 = scmp.gt.s32.totalorder %s10165_s18, 0  ;;  %p5866_p3 = scmp.lt.s32.totalorder %s10165_s18, 49 }
 0x363   :  { %s9311_s21 = smov [#allocation2 + $0xc]   ;;  %s10193_s22 = sld [smem:[#allocation6 + $0x202]] }
 0x364   :  { %s11916_s18 = smov (!%p736_p2, %s10165_s18), 0  ;;  %s10191_s26 = sshll.u32 %s9311_s21, 4  ;;  %s10223_s26 = int_to_ptr.vmem [resolvable:$true] %s10191_s26 }
 0x365   :  { %s11918_s18 = smov (!%p5866_p3, %s11916_s18), 49 }
 0x366   :  { %p757_p6 = scmp.gt.s32.totalorder %s10182_s29, 0  ;;  %s5871_s14 = sshll.u32 %s11918_s18, 4 }
 0x367   :  { %p777_p5 = scmp.gt.s32.totalorder %s10184_s7, 0  ;;  %s741_s28 = scalar_lea.hbm %s11791_s1, %s5871_s14 }
 0x368   :  { %s8442_s20 = scalar_lea.hbm %s741_s28, 16  ;;  %p8445_p10 = scmp.lt.u32.totalorder %s741_s28, %s11791_s1 }
 0x369   :  { %p8443_p7 = scmp.ne.s32.totalorder %s741_s28, %s8442_s20  ;;  %p8446_p11 = scmp.lt.u32.totalorder %s9526_s15, %s8442_s20 }
 0x36a   :  { %p8448_p12 = scmp.lt.u32.totalorder %s8442_s20, %s741_s28 }
 0x36b   :  { %p8447_p4 = por %p8446_p11, %p8445_p10 }
 0x36d   :  { %p8449_p13 = por %p8448_p12, %p8447_p4 }
 0x36f   :  { %p8450_p0 = pnand %p8449_p13, %p8443_p7 }
 0x371   :  { %8453 = shalt.err (!%p8450_p0)  }
 0x372   :  { %s8454_s18 = scalar_lea.vmem %s10170_s23, 16  ;;  %p8459_p2 = scmp.lt.s32.totalorder %s10170_s23, %s9509_s3 }
 0x373   :  { %p8455_p1 = scmp.ne.s32.totalorder %s10170_s23, %s8454_s18  ;;  %p8460_p3 = scmp.lt.s32.totalorder %s9535_s25, %s8454_s18 }
 0x375   :  { %p8461_p8 = por %p8460_p3, %p8459_p2 }
 0x377   :  { %p8462_p9 = pnand %p8461_p8, %p8455_p1 }
 0x379   :  { %8465 = shalt.err (!%p8462_p9)  }
 0x37a   :  { %753 = dma.hbm_to_vmem [thread:$0]  %s741_s28, 16, %s10170_s23, [#allocation4] }
 0x37b   :  { %s758_s16 = scalar_select %p757_p6, %s10182_s29, 0 }
 0x37c   :  { %s778_s13 = scalar_select %p777_p5, %s10184_s7, 0 }
 0x37d   :  { %p11815_p7 = scmp.lt.s32.totalorder %s10182_s29, 49  ;;  %p11816_p10 = scmp.lt.s32.totalorder %s10184_s7, 49 }
 0x37f   :  { %s11920_s16 = smov (!%p11815_p7, %s758_s16), 49  ;;  %s11922_s13 = smov (!%p11816_p10, %s778_s13), 49 }
 0x380   :  { %s5878_s6 = sshll.u32 %s11920_s16, 4  ;;  %s5885_s21 = sshll.u32 %s11922_s13, 4 }
 0x381   :  { %s762_s10 = scalar_lea.hbm %s11791_s1, %s5878_s6 }
 0x382   :  { %s8466_s14 = scalar_lea.hbm %s762_s10, 16  ;;  %p8469_p6 = scmp.lt.u32.totalorder %s762_s10, %s11791_s1 }
 0x383   :  { %p8467_p9 = scmp.ne.s32.totalorder %s762_s10, %s8466_s14  ;;  %p8470_p8 = scmp.lt.u32.totalorder %s9526_s15, %s8466_s14 }
 0x384   :  { %p8472_p11 = scmp.lt.u32.totalorder %s8466_s14, %s762_s10 }
 0x385   :  { %p8471_p5 = por %p8470_p8, %p8469_p6 }
 0x387   :  { %p8473_p4 = por %p8472_p11, %p8471_p5 }
 0x389   :  { %p8474_p12 = pnand %p8473_p4, %p8467_p9 }
 0x38b   :  { %8477 = shalt.err (!%p8474_p12)  }
 0x38c   :  { %s8478_s29 = scalar_lea.vmem %s10188_s27, 16  ;;  %p8483_p0 = scmp.lt.s32.totalorder %s10188_s27, %s9509_s3 }
 0x38d   :  { %p8479_p13 = scmp.ne.s32.totalorder %s10188_s27, %s8478_s29  ;;  %p8484_p1 = scmp.lt.s32.totalorder %s9535_s25, %s8478_s29 }
 0x38f   :  { %p8485_p2 = por %p8484_p1, %p8483_p0 }
 0x391   :  { %p8486_p3 = pnand %p8485_p2, %p8479_p13 }
 0x393   :  { %8489 = shalt.err (!%p8486_p3)  }
 0x394   :  { %774 = dma.hbm_to_vmem [thread:$0]  %s762_s10, 16, %s10188_s27, [#allocation4] }
 0x395   :  { %s782_s28 = scalar_lea.hbm %s11791_s1, %s5885_s21  ;;  %p797_p7 = scmp.gt.s32.totalorder %s10193_s22, 0 }
 0x396   :  { %s8490_s20 = scalar_lea.hbm %s782_s28, 16  ;;  %p8493_p9 = scmp.lt.u32.totalorder %s782_s28, %s11791_s1 }
 0x397   :  { %p8491_p10 = scmp.ne.s32.totalorder %s782_s28, %s8490_s20  ;;  %p8494_p6 = scmp.lt.u32.totalorder %s9526_s15, %s8490_s20 }
 0x398   :  { %p8496_p5 = scmp.lt.u32.totalorder %s8490_s20, %s782_s28 }
 0x399   :  { %p8495_p8 = por %p8494_p6, %p8493_p9 }
 0x39b   :  { %p8497_p11 = por %p8496_p5, %p8495_p8 }
 0x39d   :  { %p8498_p4 = pnand %p8497_p11, %p8491_p10 }
 0x39f   :  { %8501 = shalt.err (!%p8498_p4)  }
 0x3a0   :  { %s8502_s27 = scalar_lea.vmem %s10223_s26, 16  ;;  %p8507_p13 = scmp.lt.s32.totalorder %s10223_s26, %s9509_s3 }
 0x3a1   :  { %p8503_p12 = scmp.ne.s32.totalorder %s10223_s26, %s8502_s27  ;;  %p8508_p0 = scmp.lt.s32.totalorder %s9535_s25, %s8502_s27 }
 0x3a3   :  { %p8509_p1 = por %p8508_p0, %p8507_p13 }
 0x3a5   :  { %p8510_p2 = pnand %p8509_p1, %p8503_p12 }
 0x3a7   :  { %8513 = shalt.err (!%p8510_p2)  }
 0x3a8   :  { %794 = dma.hbm_to_vmem [thread:$0]  %s782_s28, 16, %s10223_s26, [#allocation4] }
 0x3a9   :  { %s798_s18 = scalar_select %p797_p7, %s10193_s22, 0 }
 0x3aa   :  { %p5887_p3 = scmp.lt.s32.totalorder %s10193_s22, 49  ;;  %s9312_s16 = smov [#allocation2 + $0x14]  }
 0x3ab   :  { %s811_s13 = sshll.u32 %s9312_s16, 4  ;;  %s10256_s6 = sld [smem:[#allocation6 + $0x203]]  ;;  %s812_s13 = int_to_ptr.vmem [resolvable:$true] %s811_s13 }
 0x3ac   :  { %s11924_s18 = smov (!%p5887_p3, %s798_s18), 49  ;;  %s9313_s17 = smov [#allocation2 + $0x1c]  }
 0x3ad   :  { %s5892_s24 = sshll.u32 %s11924_s18, 4  ;;  %s831_s10 = sshll.u32 %s9313_s17, 4  ;;  %s10261_s10 = int_to_ptr.vmem [resolvable:$true] %s831_s10 }
 0x3ae   :  { %s802_s0 = scalar_lea.hbm %s11791_s1, %s5892_s24 }
 0x3af   :  { %s8514_s26 = scalar_lea.hbm %s802_s0, 16  ;;  %p8517_p7 = scmp.lt.u32.totalorder %s802_s0, %s11791_s1 }
 0x3b0   :  { %p8515_p10 = scmp.ne.s32.totalorder %s802_s0, %s8514_s26  ;;  %p8518_p9 = scmp.lt.u32.totalorder %s9526_s15, %s8514_s26 }
 0x3b1   :  { %p8520_p8 = scmp.lt.u32.totalorder %s8514_s26, %s802_s0 }
 0x3b2   :  { %p8519_p6 = por %p8518_p9, %p8517_p7 }
 0x3b4   :  { %p8521_p5 = por %p8520_p8, %p8519_p6 }
 0x3b6   :  { %p8522_p11 = pnand %p8521_p5, %p8515_p10 }
 0x3b8   :  { %8525 = shalt.err (!%p8522_p11)  }
 0x3b9   :  { %s8526_s22 = scalar_lea.vmem %s812_s13, 16  ;;  %p8531_p12 = scmp.lt.s32.totalorder %s812_s13, %s9509_s3 }
 0x3ba   :  { %p8527_p4 = scmp.ne.s32.totalorder %s812_s13, %s8526_s22  ;;  %p8532_p13 = scmp.lt.s32.totalorder %s9535_s25, %s8526_s22 }
 0x3bc   :  { %p8533_p0 = por %p8532_p13, %p8531_p12 }
 0x3be   :  { %p8534_p1 = pnand %p8533_p0, %p8527_p4 }
 0x3c0   :  { %8537 = shalt.err (!%p8534_p1)  }
 0x3c1   :  { %814 = dma.hbm_to_vmem [thread:$0]  %s802_s0, 16, %s812_s13, [#allocation4] }
 0x3c2   :  { %p817_p2 = scmp.gt.s32.totalorder %s10256_s6, 0  ;;  %p5894_p3 = scmp.lt.s32.totalorder %s10256_s6, 49 }
 0x3c3   :  { %s10271_s7 = sld [smem:[#allocation6 + $0x204]]  ;;  %s9314_s30 = smov [#allocation2 + $0x24]  }
 0x3c4   :  { %s11926_s6 = smov (!%p817_p2, %s10256_s6), 0  ;;  %s851_s28 = sshll.u32 %s9314_s30, 4  ;;  %s10276_s28 = int_to_ptr.vmem [resolvable:$true] %s851_s28 }
 0x3c5   :  { %s10274_s20 = sld [smem:[#allocation6 + $0x205]]  ;;  %s11928_s6 = smov (!%p5894_p3, %s11926_s6), 49 }
 0x3c6   :  { %s5899_s2 = sshll.u32 %s11928_s6, 4  ;;  %s9315_s19 = smov [#allocation2 + $0x2c]  }
 0x3c7   :  { %s871_s27 = sshll.u32 %s9315_s19, 4  ;;  %s822_s13 = scalar_lea.hbm %s11791_s1, %s5899_s2  ;;  %s10298_s27 = int_to_ptr.vmem [resolvable:$true] %s871_s27 }
 0x3c8   :  { %s8538_s24 = scalar_lea.hbm %s822_s13, 16  ;;  %p8541_p9 = scmp.lt.u32.totalorder %s822_s13, %s11791_s1 }
 0x3c9   :  { %p837_p10 = scmp.gt.s32.totalorder %s10271_s7, 0  ;;  %p8539_p7 = scmp.ne.s32.totalorder %s822_s13, %s8538_s24 }
 0x3ca   :  { %p8542_p6 = scmp.lt.u32.totalorder %s9526_s15, %s8538_s24  ;;  %p8544_p5 = scmp.lt.u32.totalorder %s8538_s24, %s822_s13 }
 0x3cc   :  { %p8543_p8 = por %p8542_p6, %p8541_p9 }
 0x3ce   :  { %p8545_p11 = por %p8544_p5, %p8543_p8 }
 0x3d0   :  { %p8546_p4 = pnand %p8545_p11, %p8539_p7 }
 0x3d2   :  { %8549 = shalt.err (!%p8546_p4)  }
 0x3d3   :  { %s8550_s6 = scalar_lea.vmem %s10261_s10, 16  ;;  %p8555_p13 = scmp.lt.s32.totalorder %s10261_s10, %s9509_s3 }
 0x3d4   :  { %p8551_p12 = scmp.ne.s32.totalorder %s10261_s10, %s8550_s6  ;;  %p8556_p0 = scmp.lt.s32.totalorder %s9535_s25, %s8550_s6 }
 0x3d6   :  { %p8557_p1 = por %p8556_p0, %p8555_p13 }
 0x3d8   :  { %p8558_p2 = pnand %p8557_p1, %p8551_p12 }
 0x3da   :  { %8561 = shalt.err (!%p8558_p2)  }
 0x3db   :  { %834 = dma.hbm_to_vmem [thread:$0]  %s822_s13, 16, %s10261_s10, [#allocation4] }
 0x3dc   :  { %s838_s14 = scalar_select %p837_p10, %s10271_s7, 0 }
 0x3dd   :  { %p5901_p3 = scmp.lt.s32.totalorder %s10271_s7, 49  ;;  %p857_p7 = scmp.gt.s32.totalorder %s10274_s20, 0 }
 0x3de   :  { %p5908_p9 = scmp.lt.s32.totalorder %s10274_s20, 49  ;;  %s10301_s23 = sld [smem:[#allocation6 + $0x206]] }
 0x3df   :  { %s11930_s14 = smov (!%p5901_p3, %s838_s14), 49 }
 0x3e0   :  { %s858_s0 = scalar_select %p857_p7, %s10274_s20, 0 }
 0x3e1   :  { %s5906_s26 = sshll.u32 %s11930_s14, 4 }
 0x3e2   :  { %s842_s30 = scalar_lea.hbm %s11791_s1, %s5906_s26 }
 0x3e3   :  { %s8562_s2 = scalar_lea.hbm %s842_s30, 16  ;;  %p8565_p10 = scmp.lt.u32.totalorder %s842_s30, %s11791_s1 }
 0x3e4   :  { %p8563_p6 = scmp.ne.s32.totalorder %s842_s30, %s8562_s2  ;;  %p8566_p8 = scmp.lt.u32.totalorder %s9526_s15, %s8562_s2 }
 0x3e5   :  { %p8568_p11 = scmp.lt.u32.totalorder %s8562_s2, %s842_s30 }
 0x3e6   :  { %p8567_p5 = por %p8566_p8, %p8565_p10 }
 0x3e8   :  { %p8569_p4 = por %p8568_p11, %p8567_p5 }
 0x3ea   :  { %p8570_p12 = pnand %p8569_p4, %p8563_p6 }
 0x3ec   :  { %8573 = shalt.err (!%p8570_p12)  }
 0x3ed   :  { %s8574_s7 = scalar_lea.vmem %s10276_s28, 16  ;;  %p8579_p0 = scmp.lt.s32.totalorder %s10276_s28, %s9509_s3 }
 0x3ee   :  { %p8575_p13 = scmp.ne.s32.totalorder %s10276_s28, %s8574_s7  ;;  %p8580_p1 = scmp.lt.s32.totalorder %s9535_s25, %s8574_s7 }
 0x3f0   :  { %p8581_p2 = por %p8580_p1, %p8579_p0 }
 0x3f2   :  { %p8582_p3 = pnand %p8581_p2, %p8575_p13 }
 0x3f4   :  { %8585 = shalt.err (!%p8582_p3)  }
 0x3f5   :  { %854 = dma.hbm_to_vmem [thread:$0]  %s842_s30, 16, %s10276_s28, [#allocation4] }
 0x3f6   :  { %s11932_s0 = smov (!%p5908_p9, %s858_s0), 49  ;;  %s9316_s18 = smov [#allocation2 + $0x34]  }
 0x3f7   :  { %s891_s16 = sshll.u32 %s9316_s18, 4  ;;  %s10318_s13 = sld [smem:[#allocation6 + $0x207]]  ;;  %s10320_s16 = int_to_ptr.vmem [resolvable:$true] %s891_s16 }
 0x3f8   :  { %s5913_s24 = sshll.u32 %s11932_s0, 4  ;;  %p877_p7 = scmp.gt.s32.totalorder %s10301_s23, 0 }
 0x3f9   :  { %s862_s6 = scalar_lea.hbm %s11791_s1, %s5913_s24 }
 0x3fa   :  { %s8586_s14 = scalar_lea.hbm %s862_s6, 16  ;;  %p8589_p10 = scmp.lt.u32.totalorder %s862_s6, %s11791_s1 }
 0x3fb   :  { %p8587_p6 = scmp.ne.s32.totalorder %s862_s6, %s8586_s14  ;;  %p8590_p8 = scmp.lt.u32.totalorder %s9526_s15, %s8586_s14 }
 0x3fc   :  { %p8592_p5 = scmp.lt.u32.totalorder %s8586_s14, %s862_s6 }
 0x3fd   :  { %p8591_p9 = por %p8590_p8, %p8589_p10 }
 0x3ff   :  { %p8593_p11 = por %p8592_p5, %p8591_p9 }
 0x401   :  { %p8594_p4 = pnand %p8593_p11, %p8587_p6 }
 0x403   :  { %8597 = shalt.err (!%p8594_p4)  }
 0x404   :  { %s8598_s28 = scalar_lea.vmem %s10298_s27, 16  ;;  %p8603_p13 = scmp.lt.s32.totalorder %s10298_s27, %s9509_s3 }
 0x405   :  { %p8599_p12 = scmp.ne.s32.totalorder %s10298_s27, %s8598_s28  ;;  %p8604_p0 = scmp.lt.s32.totalorder %s9535_s25, %s8598_s28 }
 0x407   :  { %p8605_p1 = por %p8604_p0, %p8603_p13 }
 0x409   :  { %p8606_p2 = pnand %p8605_p1, %p8599_p12 }
 0x40b   :  { %8609 = shalt.err (!%p8606_p2)  }
 0x40c   :  { %874 = dma.hbm_to_vmem [thread:$0]  %s862_s6, 16, %s10298_s27, [#allocation4] }
 0x40d   :  { %s878_s20 = scalar_select %p877_p7, %s10301_s23, 0 }
 0x40e   :  { %p5915_p3 = scmp.lt.s32.totalorder %s10301_s23, 49  ;;  %p897_p6 = scmp.gt.s32.totalorder %s10318_s13, 0 }
 0x40f   :  { %p5922_p10 = scmp.lt.s32.totalorder %s10318_s13, 49  ;;  %s9317_s30 = smov [#allocation2 + $0x3c]  }
 0x410   :  { %s11934_s20 = smov (!%p5915_p3, %s878_s20), 49  ;;  %s911_s2 = sshll.u32 %s9317_s30, 4  ;;  %s10346_s2 = int_to_ptr.vmem [resolvable:$true] %s911_s2 }
 0x411   :  { %s898_s0 = scalar_select %p897_p6, %s10318_s13, 0 }
 0x412   :  { %s5920_s22 = sshll.u32 %s11934_s20, 4 }
 0x413   :  { %s882_s7 = scalar_lea.hbm %s11791_s1, %s5920_s22 }
 0x414   :  { %s8610_s18 = scalar_lea.hbm %s882_s7, 16  ;;  %p8613_p7 = scmp.lt.u32.totalorder %s882_s7, %s11791_s1 }
 0x415   :  { %p8611_p8 = scmp.ne.s32.totalorder %s882_s7, %s8610_s18  ;;  %p8614_p9 = scmp.lt.u32.totalorder %s9526_s15, %s8610_s18 }
 0x416   :  { %p8616_p11 = scmp.lt.u32.totalorder %s8610_s18, %s882_s7 }
 0x417   :  { %p8615_p5 = por %p8614_p9, %p8613_p7 }
 0x419   :  { %p8617_p4 = por %p8616_p11, %p8615_p5 }
 0x41b   :  { %p8618_p12 = pnand %p8617_p4, %p8611_p8 }
 0x41d   :  { %8621 = shalt.err (!%p8618_p12)  }
 0x41e   :  { %s8622_s23 = scalar_lea.vmem %s10320_s16, 16  ;;  %p8627_p0 = scmp.lt.s32.totalorder %s10320_s16, %s9509_s3 }
 0x41f   :  { %p8623_p13 = scmp.ne.s32.totalorder %s10320_s16, %s8622_s23  ;;  %p8628_p1 = scmp.lt.s32.totalorder %s9535_s25, %s8622_s23 }
 0x421   :  { %p8629_p2 = por %p8628_p1, %p8627_p0 }
 0x423   :  { %p8630_p3 = pnand %p8629_p2, %p8623_p13 }
 0x425   :  { %8633 = shalt.err (!%p8630_p3)  }
 0x426   :  { %894 = dma.hbm_to_vmem [thread:$0]  %s882_s7, 16, %s10320_s16, [#allocation4] }
 0x427   :  { %s11936_s0 = smov (!%p5922_p10, %s898_s0), 49  ;;  %s10360_s17 = sld [smem:[#allocation6 + $0x280]] }
 0x428   :  { %s5927_s21 = sshll.u32 %s11936_s0, 4  ;;  %s9318_s6 = smov [#allocation2 + $0x5]  }
 0x429   :  { %s932_s14 = sshll.u32 %s9318_s6, 4  ;;  %s902_s28 = scalar_lea.hbm %s11791_s1, %s5927_s21  ;;  %s10365_s14 = int_to_ptr.vmem [resolvable:$true] %s932_s14 }
 0x42a   :  { %s8634_s20 = scalar_lea.hbm %s902_s28, 16  ;;  %p8637_p8 = scmp.lt.u32.totalorder %s902_s28, %s11791_s1 }
 0x42b   :  { %p8635_p6 = scmp.ne.s32.totalorder %s902_s28, %s8634_s20  ;;  %p8638_p7 = scmp.lt.u32.totalorder %s9526_s15, %s8634_s20 }
 0x42c   :  { %p8640_p10 = scmp.lt.u32.totalorder %s8634_s20, %s902_s28 }
 0x42d   :  { %p8639_p9 = por %p8638_p7, %p8637_p8 }
 0x42f   :  { %p8641_p5 = por %p8640_p10, %p8639_p9 }
 0x431   :  { %p8642_p11 = pnand %p8641_p5, %p8635_p6 }
 0x433   :  { %8645 = shalt.err (!%p8642_p11)  }
 0x434   :  { %s8646_s16 = scalar_lea.vmem %s10346_s2, 16  ;;  %p8651_p12 = scmp.lt.s32.totalorder %s10346_s2, %s9509_s3 }
 0x435   :  { %p8647_p4 = scmp.ne.s32.totalorder %s10346_s2, %s8646_s16  ;;  %p8652_p13 = scmp.lt.s32.totalorder %s9535_s25, %s8646_s16 }
 0x437   :  { %p8653_p0 = por %p8652_p13, %p8651_p12 }
 0x439   :  { %p8654_p1 = pnand %p8653_p0, %p8647_p4 }
 0x43b   :  { %8657 = shalt.err (!%p8654_p1)  }
 0x43c   :  { %914 = dma.hbm_to_vmem [thread:$0]  %s902_s28, 16, %s10346_s2, [#allocation4] }
 0x43d   :  { %s10377_s13 = sld [smem:[#allocation6 + $0x281]]  ;;  %s9319_s0 = smov [#allocation2 + $0xd]  }
 0x43e   :  { %s952_s19 = sshll.u32 %s9319_s0, 4  ;;  %s10379_s10 = sld [smem:[#allocation6 + $0x282]]  ;;  %s10383_s19 = int_to_ptr.vmem [resolvable:$true] %s952_s19 }
 0x43f   :  { %p918_p2 = scmp.gt.s32.totalorder %s10360_s17, 0  ;;  %p5929_p3 = scmp.lt.s32.totalorder %s10360_s17, 49 }
 0x440   :  { %s9320_s7 = smov [#allocation2 + $0x15]   ;;  %s10388_s2 = sld [smem:[#allocation6 + $0x283]] }
 0x441   :  { %s11938_s17 = smov (!%p918_p2, %s10360_s17), 0  ;;  %s10386_s18 = sshll.u32 %s9320_s7, 4  ;;  %s10418_s18 = int_to_ptr.vmem [resolvable:$true] %s10386_s18 }
 0x442   :  { %s11940_s17 = smov (!%p5929_p3, %s11938_s17), 49 }
 0x443   :  { %p938_p6 = scmp.gt.s32.totalorder %s10377_s13, 0  ;;  %s5934_s24 = sshll.u32 %s11940_s17, 4 }
 0x444   :  { %p958_p7 = scmp.gt.s32.totalorder %s10379_s10, 0  ;;  %s923_s21 = scalar_lea.hbm %s11791_s1, %s5934_s24 }
 0x445   :  { %s8658_s6 = scalar_lea.hbm %s923_s21, 16  ;;  %p8661_p5 = scmp.lt.u32.totalorder %s923_s21, %s11791_s1 }
 0x446   :  { %p8659_p10 = scmp.ne.s32.totalorder %s923_s21, %s8658_s6  ;;  %p8662_p11 = scmp.lt.u32.totalorder %s9526_s15, %s8658_s6 }
 0x447   :  { %p8664_p12 = scmp.lt.u32.totalorder %s8658_s6, %s923_s21 }
 0x448   :  { %p8663_p4 = por %p8662_p11, %p8661_p5 }
 0x44a   :  { %p8665_p13 = por %p8664_p12, %p8663_p4 }
 0x44c   :  { %p8666_p0 = pnand %p8665_p13, %p8659_p10 }
 0x44e   :  { %8669 = shalt.err (!%p8666_p0)  }
 0x44f   :  { %s8670_s17 = scalar_lea.vmem %s10365_s14, 16  ;;  %p8675_p2 = scmp.lt.s32.totalorder %s10365_s14, %s9509_s3 }
 0x450   :  { %p8671_p1 = scmp.ne.s32.totalorder %s10365_s14, %s8670_s17  ;;  %p8676_p3 = scmp.lt.s32.totalorder %s9535_s25, %s8670_s17 }
 0x452   :  { %p8677_p9 = por %p8676_p3, %p8675_p2 }
 0x454   :  { %p8678_p8 = pnand %p8677_p9, %p8671_p1 }
 0x456   :  { %8681 = shalt.err (!%p8678_p8)  }
 0x457   :  { %935 = dma.hbm_to_vmem [thread:$0]  %s923_s21, 16, %s10365_s14, [#allocation4] }
 0x458   :  { %s939_s28 = scalar_select %p938_p6, %s10377_s13, 0 }
 0x459   :  { %s959_s20 = scalar_select %p958_p7, %s10379_s10, 0 }
 0x45a   :  { %p11817_p10 = scmp.lt.s32.totalorder %s10377_s13, 49  ;;  %p11818_p5 = scmp.lt.s32.totalorder %s10379_s10, 49 }
 0x45c   :  { %s11942_s28 = smov (!%p11817_p10, %s939_s28), 49  ;;  %s11944_s20 = smov (!%p11818_p5, %s959_s20), 49 }
 0x45d   :  { %s5941_s22 = sshll.u32 %s11942_s28, 4  ;;  %s5948_s7 = sshll.u32 %s11944_s20, 4 }
 0x45e   :  { %s943_s0 = scalar_lea.hbm %s11791_s1, %s5941_s22 }
 0x45f   :  { %s8682_s24 = scalar_lea.hbm %s943_s0, 16  ;;  %p8685_p6 = scmp.lt.u32.totalorder %s943_s0, %s11791_s1 }
 0x460   :  { %p8683_p8 = scmp.ne.s32.totalorder %s943_s0, %s8682_s24  ;;  %p8686_p9 = scmp.lt.u32.totalorder %s9526_s15, %s8682_s24 }
 0x461   :  { %p8688_p11 = scmp.lt.u32.totalorder %s8682_s24, %s943_s0 }
 0x462   :  { %p8687_p7 = por %p8686_p9, %p8685_p6 }
 0x464   :  { %p8689_p4 = por %p8688_p11, %p8687_p7 }
 0x466   :  { %p8690_p12 = pnand %p8689_p4, %p8683_p8 }
 0x468   :  { %8693 = shalt.err (!%p8690_p12)  }
 0x469   :  { %s8694_s13 = scalar_lea.vmem %s10383_s19, 16  ;;  %p8699_p0 = scmp.lt.s32.totalorder %s10383_s19, %s9509_s3 }
 0x46a   :  { %p8695_p13 = scmp.ne.s32.totalorder %s10383_s19, %s8694_s13  ;;  %p8700_p1 = scmp.lt.s32.totalorder %s9535_s25, %s8694_s13 }
 0x46c   :  { %p8701_p2 = por %p8700_p1, %p8699_p0 }
 0x46e   :  { %p8702_p3 = pnand %p8701_p2, %p8695_p13 }
 0x470   :  { %8705 = shalt.err (!%p8702_p3)  }
 0x471   :  { %955 = dma.hbm_to_vmem [thread:$0]  %s943_s0, 16, %s10383_s19, [#allocation4] }
 0x472   :  { %s963_s21 = scalar_lea.hbm %s11791_s1, %s5948_s7  ;;  %p978_p10 = scmp.gt.s32.totalorder %s10388_s2, 0 }
 0x473   :  { %s8706_s6 = scalar_lea.hbm %s963_s21, 16  ;;  %p8709_p8 = scmp.lt.u32.totalorder %s963_s21, %s11791_s1 }
 0x474   :  { %p8707_p5 = scmp.ne.s32.totalorder %s963_s21, %s8706_s6  ;;  %p8710_p6 = scmp.lt.u32.totalorder %s9526_s15, %s8706_s6 }
 0x475   :  { %p8712_p7 = scmp.lt.u32.totalorder %s8706_s6, %s963_s21 }
 0x476   :  { %p8711_p9 = por %p8710_p6, %p8709_p8 }
 0x478   :  { %p8713_p11 = por %p8712_p7, %p8711_p9 }
 0x47a   :  { %p8714_p4 = pnand %p8713_p11, %p8707_p5 }
 0x47c   :  { %8717 = shalt.err (!%p8714_p4)  }
 0x47d   :  { %s8718_s19 = scalar_lea.vmem %s10418_s18, 16  ;;  %p8723_p13 = scmp.lt.s32.totalorder %s10418_s18, %s9509_s3 }
 0x47e   :  { %p8719_p12 = scmp.ne.s32.totalorder %s10418_s18, %s8718_s19  ;;  %p8724_p0 = scmp.lt.s32.totalorder %s9535_s25, %s8718_s19 }
 0x480   :  { %p8725_p1 = por %p8724_p0, %p8723_p13 }
 0x482   :  { %p8726_p2 = pnand %p8725_p1, %p8719_p12 }
 0x484   :  { %8729 = shalt.err (!%p8726_p2)  }
 0x485   :  { %975 = dma.hbm_to_vmem [thread:$0]  %s963_s21, 16, %s10418_s18, [#allocation4] }
 0x486   :  { %s979_s17 = scalar_select %p978_p10, %s10388_s2, 0 }
 0x487   :  { %p5950_p3 = scmp.lt.s32.totalorder %s10388_s2, 49  ;;  %s9321_s28 = smov [#allocation2 + $0x1d]  }
 0x488   :  { %s992_s20 = sshll.u32 %s9321_s28, 4  ;;  %s10451_s22 = sld [smem:[#allocation6 + $0x284]]  ;;  %s993_s20 = int_to_ptr.vmem [resolvable:$true] %s992_s20 }
 0x489   :  { %s11946_s17 = smov (!%p5950_p3, %s979_s17), 49  ;;  %s9322_s16 = smov [#allocation2 + $0x25]  }
 0x48a   :  { %s5955_s30 = sshll.u32 %s11946_s17, 4  ;;  %s1012_s0 = sshll.u32 %s9322_s16, 4  ;;  %s10456_s0 = int_to_ptr.vmem [resolvable:$true] %s1012_s0 }
 0x48b   :  { %s983_s27 = scalar_lea.hbm %s11791_s1, %s5955_s30 }
 0x48c   :  { %s8730_s18 = scalar_lea.hbm %s983_s27, 16  ;;  %p8733_p10 = scmp.lt.u32.totalorder %s983_s27, %s11791_s1 }
 0x48d   :  { %p8731_p5 = scmp.ne.s32.totalorder %s983_s27, %s8730_s18  ;;  %p8734_p8 = scmp.lt.u32.totalorder %s9526_s15, %s8730_s18 }
 0x48e   :  { %p8736_p9 = scmp.lt.u32.totalorder %s8730_s18, %s983_s27 }
 0x48f   :  { %p8735_p6 = por %p8734_p8, %p8733_p10 }
 0x491   :  { %p8737_p7 = por %p8736_p9, %p8735_p6 }
 0x493   :  { %p8738_p11 = pnand %p8737_p7, %p8731_p5 }
 0x495   :  { %8741 = shalt.err (!%p8738_p11)  }
 0x496   :  { %s8742_s2 = scalar_lea.vmem %s993_s20, 16  ;;  %p8747_p12 = scmp.lt.s32.totalorder %s993_s20, %s9509_s3 }
 0x497   :  { %p8743_p4 = scmp.ne.s32.totalorder %s993_s20, %s8742_s2  ;;  %p8748_p13 = scmp.lt.s32.totalorder %s9535_s25, %s8742_s2 }
 0x499   :  { %p8749_p0 = por %p8748_p13, %p8747_p12 }
 0x49b   :  { %p8750_p1 = pnand %p8749_p0, %p8743_p4 }
 0x49d   :  { %8753 = shalt.err (!%p8750_p1)  }
 0x49e   :  { %995 = dma.hbm_to_vmem [thread:$0]  %s983_s27, 16, %s993_s20, [#allocation4] }
 0x49f   :  { %p998_p2 = scmp.gt.s32.totalorder %s10451_s22, 0  ;;  %p5957_p3 = scmp.lt.s32.totalorder %s10451_s22, 49 }
 0x4a0   :  { %s10466_s10 = sld [smem:[#allocation6 + $0x285]]  ;;  %s9323_s23 = smov [#allocation2 + $0x2d]  }
 0x4a1   :  { %s11948_s22 = smov (!%p998_p2, %s10451_s22), 0  ;;  %s1032_s21 = sshll.u32 %s9323_s23, 4  ;;  %s10471_s21 = int_to_ptr.vmem [resolvable:$true] %s1032_s21 }
 0x4a2   :  { %s10469_s6 = sld [smem:[#allocation6 + $0x286]]  ;;  %s11950_s22 = smov (!%p5957_p3, %s11948_s22), 49 }
 0x4a3   :  { %s5962_s26 = sshll.u32 %s11950_s22, 4  ;;  %s9324_s29 = smov [#allocation2 + $0x35]  }
 0x4a4   :  { %s1052_s19 = sshll.u32 %s9324_s29, 4  ;;  %s1003_s20 = scalar_lea.hbm %s11791_s1, %s5962_s26  ;;  %s10493_s19 = int_to_ptr.vmem [resolvable:$true] %s1052_s19 }
 0x4a5   :  { %s8754_s30 = scalar_lea.hbm %s1003_s20, 16  ;;  %p8757_p8 = scmp.lt.u32.totalorder %s1003_s20, %s11791_s1 }
 0x4a6   :  { %p1018_p5 = scmp.gt.s32.totalorder %s10466_s10, 0  ;;  %p8755_p10 = scmp.ne.s32.totalorder %s1003_s20, %s8754_s30 }
 0x4a7   :  { %p8758_p6 = scmp.lt.u32.totalorder %s9526_s15, %s8754_s30  ;;  %p8760_p7 = scmp.lt.u32.totalorder %s8754_s30, %s1003_s20 }
 0x4a9   :  { %p8759_p9 = por %p8758_p6, %p8757_p8 }
 0x4ab   :  { %p8761_p11 = por %p8760_p7, %p8759_p9 }
 0x4ad   :  { %p8762_p4 = pnand %p8761_p11, %p8755_p10 }
 0x4af   :  { %8765 = shalt.err (!%p8762_p4)  }
 0x4b0   :  { %s8766_s22 = scalar_lea.vmem %s10456_s0, 16  ;;  %p8771_p13 = scmp.lt.s32.totalorder %s10456_s0, %s9509_s3 }
 0x4b1   :  { %p8767_p12 = scmp.ne.s32.totalorder %s10456_s0, %s8766_s22  ;;  %p8772_p0 = scmp.lt.s32.totalorder %s9535_s25, %s8766_s22 }
 0x4b3   :  { %p8773_p1 = por %p8772_p0, %p8771_p13 }
 0x4b5   :  { %p8774_p2 = pnand %p8773_p1, %p8767_p12 }
 0x4b7   :  { %8777 = shalt.err (!%p8774_p2)  }
 0x4b8   :  { %1015 = dma.hbm_to_vmem [thread:$0]  %s1003_s20, 16, %s10456_s0, [#allocation4] }
 0x4b9   :  { %s1019_s24 = scalar_select %p1018_p5, %s10466_s10, 0 }
 0x4ba   :  { %p5964_p3 = scmp.lt.s32.totalorder %s10466_s10, 49  ;;  %p1038_p10 = scmp.gt.s32.totalorder %s10469_s6, 0 }
 0x4bb   :  { %p5971_p8 = scmp.lt.s32.totalorder %s10469_s6, 49  ;;  %s10496_s14 = sld [smem:[#allocation6 + $0x287]] }
 0x4bc   :  { %s11952_s24 = smov (!%p5964_p3, %s1019_s24), 49 }
 0x4bd   :  { %s1039_s27 = scalar_select %p1038_p10, %s10469_s6, 0 }
 0x4be   :  { %s5969_s18 = sshll.u32 %s11952_s24, 4 }
 0x4bf   :  { %s1023_s23 = scalar_lea.hbm %s11791_s1, %s5969_s18 }
 0x4c0   :  { %s8778_s26 = scalar_lea.hbm %s1023_s23, 16  ;;  %p8781_p5 = scmp.lt.u32.totalorder %s1023_s23, %s11791_s1 }
 0x4c1   :  { %p8779_p6 = scmp.ne.s32.totalorder %s1023_s23, %s8778_s26  ;;  %p8782_p9 = scmp.lt.u32.totalorder %s9526_s15, %s8778_s26 }
 0x4c2   :  { %p8784_p11 = scmp.lt.u32.totalorder %s8778_s26, %s1023_s23 }
 0x4c3   :  { %p8783_p7 = por %p8782_p9, %p8781_p5 }
 0x4c5   :  { %p8785_p4 = por %p8784_p11, %p8783_p7 }
 0x4c7   :  { %p8786_p12 = pnand %p8785_p4, %p8779_p6 }
 0x4c9   :  { %8789 = shalt.err (!%p8786_p12)  }
 0x4ca   :  { %s8790_s10 = scalar_lea.vmem %s10471_s21, 16  ;;  %p8795_p0 = scmp.lt.s32.totalorder %s10471_s21, %s9509_s3 }
 0x4cb   :  { %p8791_p13 = scmp.ne.s32.totalorder %s10471_s21, %s8790_s10  ;;  %p8796_p1 = scmp.lt.s32.totalorder %s9535_s25, %s8790_s10 }
 0x4cd   :  { %p8797_p2 = por %p8796_p1, %p8795_p0 }
 0x4cf   :  { %p8798_p3 = pnand %p8797_p2, %p8791_p13 }
 0x4d1   :  { %8801 = shalt.err (!%p8798_p3)  }
 0x4d2   :  { %1035 = dma.hbm_to_vmem [thread:$0]  %s1023_s23, 16, %s10471_s21, [#allocation4] }
 0x4d3   :  { %s11954_s27 = smov (!%p5971_p8, %s1039_s27), 49  ;;  %s9325_s17 = smov [#allocation2 + $0x3d]  }
 0x4d4   :  { %s1072_s28 = sshll.u32 %s9325_s17, 4  ;;  %s10513_s20 = sld [smem:[#allocation6 + $0x300]]  ;;  %s10515_s28 = int_to_ptr.vmem [resolvable:$true] %s1072_s28 }
 0x4d5   :  { %s5976_s30 = sshll.u32 %s11954_s27, 4  ;;  %p1058_p10 = scmp.gt.s32.totalorder %s10496_s14, 0 }
 0x4d6   :  { %s1043_s22 = scalar_lea.hbm %s11791_s1, %s5976_s30 }
 0x4d7   :  { %s8802_s24 = scalar_lea.hbm %s1043_s22, 16  ;;  %p8805_p5 = scmp.lt.u32.totalorder %s1043_s22, %s11791_s1 }
 0x4d8   :  { %p8803_p6 = scmp.ne.s32.totalorder %s1043_s22, %s8802_s24  ;;  %p8806_p9 = scmp.lt.u32.totalorder %s9526_s15, %s8802_s24 }
 0x4d9   :  { %p8808_p7 = scmp.lt.u32.totalorder %s8802_s24, %s1043_s22 }
 0x4da   :  { %p8807_p8 = por %p8806_p9, %p8805_p5 }
 0x4dc   :  { %p8809_p11 = por %p8808_p7, %p8807_p8 }
 0x4de   :  { %p8810_p4 = pnand %p8809_p11, %p8803_p6 }
 0x4e0   :  { %8813 = shalt.err (!%p8810_p4)  }
 0x4e1   :  { %s8814_s21 = scalar_lea.vmem %s10493_s19, 16  ;;  %p8819_p13 = scmp.lt.s32.totalorder %s10493_s19, %s9509_s3 }
 0x4e2   :  { %p8815_p12 = scmp.ne.s32.totalorder %s10493_s19, %s8814_s21  ;;  %p8820_p0 = scmp.lt.s32.totalorder %s9535_s25, %s8814_s21 }
 0x4e4   :  { %p8821_p1 = por %p8820_p0, %p8819_p13 }
 0x4e6   :  { %p8822_p2 = pnand %p8821_p1, %p8815_p12 }
 0x4e8   :  { %8825 = shalt.err (!%p8822_p2)  }
 0x4e9   :  { %1055 = dma.hbm_to_vmem [thread:$0]  %s1043_s22, 16, %s10493_s19, [#allocation4] }
 0x4ea   :  { %s1059_s6 = scalar_select %p1058_p10, %s10496_s14, 0 }
 0x4eb   :  { %p5978_p3 = scmp.lt.s32.totalorder %s10496_s14, 49  ;;  %p1079_p6 = scmp.gt.s32.totalorder %s10513_s20, 0 }
 0x4ec   :  { %p5985_p5 = scmp.lt.s32.totalorder %s10513_s20, 49  ;;  %s9326_s23 = smov [#allocation2 + $0x6]  }
 0x4ed   :  { %s11956_s6 = smov (!%p5978_p3, %s1059_s6), 49  ;;  %s1093_s26 = sshll.u32 %s9326_s23, 4  ;;  %s10541_s26 = int_to_ptr.vmem [resolvable:$true] %s1093_s26 }
 0x4ee   :  { %s1080_s27 = scalar_select %p1079_p6, %s10513_s20, 0 }
 0x4ef   :  { %s5983_s2 = sshll.u32 %s11956_s6, 4 }
 0x4f0   :  { %s1063_s10 = scalar_lea.hbm %s11791_s1, %s5983_s2 }
 0x4f1   :  { %s8826_s17 = scalar_lea.hbm %s1063_s10, 16  ;;  %p8829_p10 = scmp.lt.u32.totalorder %s1063_s10, %s11791_s1 }
 0x4f2   :  { %p8827_p9 = scmp.ne.s32.totalorder %s1063_s10, %s8826_s17  ;;  %p8830_p8 = scmp.lt.u32.totalorder %s9526_s15, %s8826_s17 }
 0x4f3   :  { %p8832_p11 = scmp.lt.u32.totalorder %s8826_s17, %s1063_s10 }
 0x4f4   :  { %p8831_p7 = por %p8830_p8, %p8829_p10 }
 0x4f6   :  { %p8833_p4 = por %p8832_p11, %p8831_p7 }
 0x4f8   :  { %p8834_p12 = pnand %p8833_p4, %p8827_p9 }
 0x4fa   :  { %8837 = shalt.err (!%p8834_p12)  }
 0x4fb   :  { %s8838_s14 = scalar_lea.vmem %s10515_s28, 16  ;;  %p8843_p0 = scmp.lt.s32.totalorder %s10515_s28, %s9509_s3 }
 0x4fc   :  { %p8839_p13 = scmp.ne.s32.totalorder %s10515_s28, %s8838_s14  ;;  %p8844_p1 = scmp.lt.s32.totalorder %s9535_s25, %s8838_s14 }
 0x4fe   :  { %p8845_p2 = por %p8844_p1, %p8843_p0 }
 0x500   :  { %p8846_p3 = pnand %p8845_p2, %p8839_p13 }
 0x502   :  { %8849 = shalt.err (!%p8846_p3)  }
 0x503   :  { %1075 = dma.hbm_to_vmem [thread:$0]  %s1063_s10, 16, %s10515_s28, [#allocation4] }
 0x504   :  { %s11958_s27 = smov (!%p5985_p5, %s1080_s27), 49  ;;  %s10555_s16 = sld [smem:[#allocation6 + $0x301]] }
 0x505   :  { %s5990_s7 = sshll.u32 %s11958_s27, 4  ;;  %s9327_s22 = smov [#allocation2 + $0xe]  }
 0x506   :  { %s1113_s24 = sshll.u32 %s9327_s22, 4  ;;  %s1084_s21 = scalar_lea.hbm %s11791_s1, %s5990_s7  ;;  %s10560_s24 = int_to_ptr.vmem [resolvable:$true] %s1113_s24 }
 0x507   :  { %s8850_s6 = scalar_lea.hbm %s1084_s21, 16  ;;  %p8853_p9 = scmp.lt.u32.totalorder %s1084_s21, %s11791_s1 }
 0x508   :  { %p8851_p6 = scmp.ne.s32.totalorder %s1084_s21, %s8850_s6  ;;  %p8854_p10 = scmp.lt.u32.totalorder %s9526_s15, %s8850_s6 }
 0x509   :  { %p8856_p5 = scmp.lt.u32.totalorder %s8850_s6, %s1084_s21 }
 0x50a   :  { %p8855_p8 = por %p8854_p10, %p8853_p9 }
 0x50c   :  { %p8857_p7 = por %p8856_p5, %p8855_p8 }
 0x50e   :  { %p8858_p11 = pnand %p8857_p7, %p8851_p6 }
 0x510   :  { %8861 = shalt.err (!%p8858_p11)  }
 0x511   :  { %s8862_s28 = scalar_lea.vmem %s10541_s26, 16  ;;  %p8867_p12 = scmp.lt.s32.totalorder %s10541_s26, %s9509_s3 }
 0x512   :  { %p8863_p4 = scmp.ne.s32.totalorder %s10541_s26, %s8862_s28  ;;  %p8868_p13 = scmp.lt.s32.totalorder %s9535_s25, %s8862_s28 }
 0x514   :  { %p8869_p0 = por %p8868_p13, %p8867_p12 }
 0x516   :  { %p8870_p1 = pnand %p8869_p0, %p8863_p4 }
 0x518   :  { %8873 = shalt.err (!%p8870_p1)  }
 0x519   :  { %1096 = dma.hbm_to_vmem [thread:$0]  %s1084_s21, 16, %s10541_s26, [#allocation4] }
 0x51a   :  { %s10572_s20 = sld [smem:[#allocation6 + $0x302]]  ;;  %s9328_s27 = smov [#allocation2 + $0x16]  }
 0x51b   :  { %s1133_s29 = sshll.u32 %s9328_s27, 4  ;;  %s10574_s0 = sld [smem:[#allocation6 + $0x303]]  ;;  %s10578_s29 = int_to_ptr.vmem [resolvable:$true] %s1133_s29 }
 0x51c   :  { %p1099_p2 = scmp.gt.s32.totalorder %s10555_s16, 0  ;;  %p5992_p3 = scmp.lt.s32.totalorder %s10555_s16, 49 }
 0x51d   :  { %s9329_s10 = smov [#allocation2 + $0x1e]   ;;  %s10583_s26 = sld [smem:[#allocation6 + $0x304]] }
 0x51e   :  { %s11960_s16 = smov (!%p1099_p2, %s10555_s16), 0  ;;  %s10581_s17 = sshll.u32 %s9329_s10, 4  ;;  %s10613_s17 = int_to_ptr.vmem [resolvable:$true] %s10581_s17 }
 0x51f   :  { %s11962_s16 = smov (!%p5992_p3, %s11960_s16), 49 }
 0x520   :  { %p1119_p6 = scmp.gt.s32.totalorder %s10572_s20, 0  ;;  %s5997_s30 = sshll.u32 %s11962_s16, 4 }
 0x521   :  { %p1139_p10 = scmp.gt.s32.totalorder %s10574_s0, 0  ;;  %s1104_s7 = scalar_lea.hbm %s11791_s1, %s5997_s30 }
 0x522   :  { %s8874_s22 = scalar_lea.hbm %s1104_s7, 16  ;;  %p8877_p7 = scmp.lt.u32.totalorder %s1104_s7, %s11791_s1 }
 0x523   :  { %p8875_p5 = scmp.ne.s32.totalorder %s1104_s7, %s8874_s22  ;;  %p8878_p11 = scmp.lt.u32.totalorder %s9526_s15, %s8874_s22 }
 0x524   :  { %p8880_p12 = scmp.lt.u32.totalorder %s8874_s22, %s1104_s7 }
 0x525   :  { %p8879_p4 = por %p8878_p11, %p8877_p7 }
 0x527   :  { %p8881_p13 = por %p8880_p12, %p8879_p4 }
 0x529   :  { %p8882_p0 = pnand %p8881_p13, %p8875_p5 }
 0x52b   :  { %8885 = shalt.err (!%p8882_p0)  }
 0x52c   :  { %s8886_s16 = scalar_lea.vmem %s10560_s24, 16  ;;  %p8891_p2 = scmp.lt.s32.totalorder %s10560_s24, %s9509_s3 }
 0x52d   :  { %p8887_p1 = scmp.ne.s32.totalorder %s10560_s24, %s8886_s16  ;;  %p8892_p3 = scmp.lt.s32.totalorder %s9535_s25, %s8886_s16 }
 0x52f   :  { %p8893_p8 = por %p8892_p3, %p8891_p2 }
 0x531   :  { %p8894_p9 = pnand %p8893_p8, %p8887_p1 }
 0x533   :  { %8897 = shalt.err (!%p8894_p9)  }
 0x534   :  { %1116 = dma.hbm_to_vmem [thread:$0]  %s1104_s7, 16, %s10560_s24, [#allocation4] }
 0x535   :  { %s1120_s21 = scalar_select %p1119_p6, %s10572_s20, 0 }
 0x536   :  { %s1140_s6 = scalar_select %p1139_p10, %s10574_s0, 0 }
 0x537   :  { %p11819_p5 = scmp.lt.s32.totalorder %s10572_s20, 49  ;;  %p11820_p7 = scmp.lt.s32.totalorder %s10574_s0, 49 }
 0x539   :  { %s11964_s21 = smov (!%p11819_p5, %s1120_s21), 49  ;;  %s11966_s6 = smov (!%p11820_p7, %s1140_s6), 49 }
 0x53a   :  { %s6004_s2 = sshll.u32 %s11964_s21, 4  ;;  %s6011_s10 = sshll.u32 %s11966_s6, 4 }
 0x53b   :  { %s1124_s27 = scalar_lea.hbm %s11791_s1, %s6004_s2 }
 0x53c   :  { %s8898_s30 = scalar_lea.hbm %s1124_s27, 16  ;;  %p8901_p6 = scmp.lt.u32.totalorder %s1124_s27, %s11791_s1 }
 0x53d   :  { %p8899_p9 = scmp.ne.s32.totalorder %s1124_s27, %s8898_s30  ;;  %p8902_p8 = scmp.lt.u32.totalorder %s9526_s15, %s8898_s30 }
 0x53e   :  { %p8904_p11 = scmp.lt.u32.totalorder %s8898_s30, %s1124_s27 }
 0x53f   :  { %p8903_p10 = por %p8902_p8, %p8901_p6 }
 0x541   :  { %p8905_p4 = por %p8904_p11, %p8903_p10 }
 0x543   :  { %p8906_p12 = pnand %p8905_p4, %p8899_p9 }
 0x545   :  { %8909 = shalt.err (!%p8906_p12)  }
 0x546   :  { %s8910_s20 = scalar_lea.vmem %s10578_s29, 16  ;;  %p8915_p0 = scmp.lt.s32.totalorder %s10578_s29, %s9509_s3 }
 0x547   :  { %p8911_p13 = scmp.ne.s32.totalorder %s10578_s29, %s8910_s20  ;;  %p8916_p1 = scmp.lt.s32.totalorder %s9535_s25, %s8910_s20 }
 0x549   :  { %p8917_p2 = por %p8916_p1, %p8915_p0 }
 0x54b   :  { %p8918_p3 = pnand %p8917_p2, %p8911_p13 }
 0x54d   :  { %8921 = shalt.err (!%p8918_p3)  }
 0x54e   :  { %1136 = dma.hbm_to_vmem [thread:$0]  %s1124_s27, 16, %s10578_s29, [#allocation4] }
 0x54f   :  { %s1144_s7 = scalar_lea.hbm %s11791_s1, %s6011_s10  ;;  %p1159_p5 = scmp.gt.s32.totalorder %s10583_s26, 0 }
 0x550   :  { %s8922_s22 = scalar_lea.hbm %s1144_s7, 16  ;;  %p8925_p9 = scmp.lt.u32.totalorder %s1144_s7, %s11791_s1 }
 0x551   :  { %p8923_p7 = scmp.ne.s32.totalorder %s1144_s7, %s8922_s22  ;;  %p8926_p6 = scmp.lt.u32.totalorder %s9526_s15, %s8922_s22 }
 0x552   :  { %p8928_p10 = scmp.lt.u32.totalorder %s8922_s22, %s1144_s7 }
 0x553   :  { %p8927_p8 = por %p8926_p6, %p8925_p9 }
 0x555   :  { %p8929_p11 = por %p8928_p10, %p8927_p8 }
 0x557   :  { %p8930_p4 = pnand %p8929_p11, %p8923_p7 }
 0x559   :  { %8933 = shalt.err (!%p8930_p4)  }
 0x55a   :  { %s8934_s29 = scalar_lea.vmem %s10613_s17, 16  ;;  %p8939_p13 = scmp.lt.s32.totalorder %s10613_s17, %s9509_s3 }
 0x55b   :  { %p8935_p12 = scmp.ne.s32.totalorder %s10613_s17, %s8934_s29  ;;  %p8940_p0 = scmp.lt.s32.totalorder %s9535_s25, %s8934_s29 }
 0x55d   :  { %p8941_p1 = por %p8940_p0, %p8939_p13 }
 0x55f   :  { %p8942_p2 = pnand %p8941_p1, %p8935_p12 }
 0x561   :  { %8945 = shalt.err (!%p8942_p2)  }
 0x562   :  { %1156 = dma.hbm_to_vmem [thread:$0]  %s1144_s7, 16, %s10613_s17, [#allocation4] }
 0x563   :  { %s1160_s16 = scalar_select %p1159_p5, %s10583_s26, 0 }
 0x564   :  { %p6013_p3 = scmp.lt.s32.totalorder %s10583_s26, 49  ;;  %s9330_s21 = smov [#allocation2 + $0x26]  }
 0x565   :  { %s1173_s6 = sshll.u32 %s9330_s21, 4  ;;  %s10646_s2 = sld [smem:[#allocation6 + $0x305]]  ;;  %s1174_s6 = int_to_ptr.vmem [resolvable:$true] %s1173_s6 }
 0x566   :  { %s11968_s16 = smov (!%p6013_p3, %s1160_s16), 49  ;;  %s9331_s28 = smov [#allocation2 + $0x2e]  }
 0x567   :  { %s6018_s23 = sshll.u32 %s11968_s16, 4  ;;  %s1193_s27 = sshll.u32 %s9331_s28, 4  ;;  %s10651_s27 = int_to_ptr.vmem [resolvable:$true] %s1193_s27 }
 0x568   :  { %s1164_s19 = scalar_lea.hbm %s11791_s1, %s6018_s23 }
 0x569   :  { %s8946_s17 = scalar_lea.hbm %s1164_s19, 16  ;;  %p8949_p5 = scmp.lt.u32.totalorder %s1164_s19, %s11791_s1 }
 0x56a   :  { %p8947_p7 = scmp.ne.s32.totalorder %s1164_s19, %s8946_s17  ;;  %p8950_p9 = scmp.lt.u32.totalorder %s9526_s15, %s8946_s17 }
 0x56b   :  { %p8952_p8 = scmp.lt.u32.totalorder %s8946_s17, %s1164_s19 }
 0x56c   :  { %p8951_p6 = por %p8950_p9, %p8949_p5 }
 0x56e   :  { %p8953_p10 = por %p8952_p8, %p8951_p6 }
 0x570   :  { %p8954_p11 = pnand %p8953_p10, %p8947_p7 }
 0x572   :  { %8957 = shalt.err (!%p8954_p11)  }
 0x573   :  { %s8958_s26 = scalar_lea.vmem %s1174_s6, 16  ;;  %p8963_p12 = scmp.lt.s32.totalorder %s1174_s6, %s9509_s3 }
 0x574   :  { %p8959_p4 = scmp.ne.s32.totalorder %s1174_s6, %s8958_s26  ;;  %p8964_p13 = scmp.lt.s32.totalorder %s9535_s25, %s8958_s26 }
 0x576   :  { %p8965_p0 = por %p8964_p13, %p8963_p12 }
 0x578   :  { %p8966_p1 = pnand %p8965_p0, %p8959_p4 }
 0x57a   :  { %8969 = shalt.err (!%p8966_p1)  }
 0x57b   :  { %1176 = dma.hbm_to_vmem [thread:$0]  %s1164_s19, 16, %s1174_s6, [#allocation4] }
 0x57c   :  { %p1179_p2 = scmp.gt.s32.totalorder %s10646_s2, 0  ;;  %p6020_p3 = scmp.lt.s32.totalorder %s10646_s2, 49 }
 0x57d   :  { %s10661_s0 = sld [smem:[#allocation6 + $0x306]]  ;;  %s9332_s14 = smov [#allocation2 + $0x36]  }
 0x57e   :  { %s11970_s2 = smov (!%p1179_p2, %s10646_s2), 0  ;;  %s1213_s7 = sshll.u32 %s9332_s14, 4  ;;  %s10666_s7 = int_to_ptr.vmem [resolvable:$true] %s1213_s7 }
 0x57f   :  { %s10664_s22 = sld [smem:[#allocation6 + $0x307]]  ;;  %s11972_s2 = smov (!%p6020_p3, %s11970_s2), 49 }
 0x580   :  { %s6025_s18 = sshll.u32 %s11972_s2, 4  ;;  %s9333_s13 = smov [#allocation2 + $0x3e]  }
 0x581   :  { %s1233_s29 = sshll.u32 %s9333_s13, 4  ;;  %s1184_s6 = scalar_lea.hbm %s11791_s1, %s6025_s18  ;;  %s10688_s29 = int_to_ptr.vmem [resolvable:$true] %s1233_s29 }
 0x582   :  { %s8970_s23 = scalar_lea.hbm %s1184_s6, 16  ;;  %p8973_p9 = scmp.lt.u32.totalorder %s1184_s6, %s11791_s1 }
 0x583   :  { %p1199_p7 = scmp.gt.s32.totalorder %s10661_s0, 0  ;;  %p8971_p5 = scmp.ne.s32.totalorder %s1184_s6, %s8970_s23 }
 0x584   :  { %p8974_p6 = scmp.lt.u32.totalorder %s9526_s15, %s8970_s23  ;;  %p8976_p10 = scmp.lt.u32.totalorder %s8970_s23, %s1184_s6 }
 0x586   :  { %p8975_p8 = por %p8974_p6, %p8973_p9 }
 0x588   :  { %p8977_p11 = por %p8976_p10, %p8975_p8 }
 0x58a   :  { %p8978_p4 = pnand %p8977_p11, %p8971_p5 }
 0x58c   :  { %8981 = shalt.err (!%p8978_p4)  }
 0x58d   :  { %s8982_s2 = scalar_lea.vmem %s10651_s27, 16  ;;  %p8987_p13 = scmp.lt.s32.totalorder %s10651_s27, %s9509_s3 }
 0x58e   :  { %p8983_p12 = scmp.ne.s32.totalorder %s10651_s27, %s8982_s2  ;;  %p8988_p0 = scmp.lt.s32.totalorder %s9535_s25, %s8982_s2 }
 0x590   :  { %p8989_p1 = por %p8988_p0, %p8987_p13 }
 0x592   :  { %p8990_p2 = pnand %p8989_p1, %p8983_p12 }
 0x594   :  { %8993 = shalt.err (!%p8990_p2)  }
 0x595   :  { %1196 = dma.hbm_to_vmem [thread:$0]  %s1184_s6, 16, %s10651_s27, [#allocation4] }
 0x596   :  { %s1200_s30 = scalar_select %p1199_p7, %s10661_s0, 0 }
 0x597   :  { %p6027_p3 = scmp.lt.s32.totalorder %s10661_s0, 49  ;;  %p1219_p5 = scmp.gt.s32.totalorder %s10664_s22, 0 }
 0x598   :  { %p6034_p9 = scmp.lt.s32.totalorder %s10664_s22, 49  ;;  %s10691_s24 = sld [smem:[#allocation6 + $0x380]] }
 0x599   :  { %s11974_s30 = smov (!%p6027_p3, %s1200_s30), 49 }
 0x59a   :  { %s1220_s19 = scalar_select %p1219_p5, %s10664_s22, 0 }
 0x59b   :  { %s6032_s17 = sshll.u32 %s11974_s30, 4 }
 0x59c   :  { %s1204_s14 = scalar_lea.hbm %s11791_s1, %s6032_s17 }
 0x59d   :  { %s8994_s18 = scalar_lea.hbm %s1204_s14, 16  ;;  %p8997_p7 = scmp.lt.u32.totalorder %s1204_s14, %s11791_s1 }
 0x59e   :  { %p8995_p6 = scmp.ne.s32.totalorder %s1204_s14, %s8994_s18  ;;  %p8998_p8 = scmp.lt.u32.totalorder %s9526_s15, %s8994_s18 }
 0x59f   :  { %p9000_p11 = scmp.lt.u32.totalorder %s8994_s18, %s1204_s14 }
 0x5a0   :  { %p8999_p10 = por %p8998_p8, %p8997_p7 }
 0x5a2   :  { %p9001_p4 = por %p9000_p11, %p8999_p10 }
 0x5a4   :  { %p9002_p12 = pnand %p9001_p4, %p8995_p6 }
 0x5a6   :  { %9005 = shalt.err (!%p9002_p12)  }
 0x5a7   :  { %s9006_s0 = scalar_lea.vmem %s10666_s7, 16  ;;  %p9011_p0 = scmp.lt.s32.totalorder %s10666_s7, %s9509_s3 }
 0x5a8   :  { %p9007_p13 = scmp.ne.s32.totalorder %s10666_s7, %s9006_s0  ;;  %p9012_p1 = scmp.lt.s32.totalorder %s9535_s25, %s9006_s0 }
 0x5aa   :  { %p9013_p2 = por %p9012_p1, %p9011_p0 }
 0x5ac   :  { %p9014_p3 = pnand %p9013_p2, %p9007_p13 }
 0x5ae   :  { %9017 = shalt.err (!%p9014_p3)  }
 0x5af   :  { %1216 = dma.hbm_to_vmem [thread:$0]  %s1204_s14, 16, %s10666_s7, [#allocation4] }
 0x5b0   :  { %s11976_s19 = smov (!%p6034_p9, %s1220_s19), 49  ;;  %s9334_s16 = smov [#allocation2 + $0x7]  }
 0x5b1   :  { %s1254_s21 = sshll.u32 %s9334_s16, 4  ;;  %s10708_s6 = sld [smem:[#allocation6 + $0x381]]  ;;  %s10710_s21 = int_to_ptr.vmem [resolvable:$true] %s1254_s21 }
 0x5b2   :  { %s6039_s23 = sshll.u32 %s11976_s19, 4  ;;  %p1240_p5 = scmp.gt.s32.totalorder %s10691_s24, 0 }
 0x5b3   :  { %s1224_s2 = scalar_lea.hbm %s11791_s1, %s6039_s23 }
 0x5b4   :  { %s9018_s30 = scalar_lea.hbm %s1224_s2, 16  ;;  %p9021_p7 = scmp.lt.u32.totalorder %s1224_s2, %s11791_s1 }
 0x5b5   :  { %p9019_p6 = scmp.ne.s32.totalorder %s1224_s2, %s9018_s30  ;;  %p9022_p8 = scmp.lt.u32.totalorder %s9526_s15, %s9018_s30 }
 0x5b6   :  { %p9024_p10 = scmp.lt.u32.totalorder %s9018_s30, %s1224_s2 }
 0x5b7   :  { %p9023_p9 = por %p9022_p8, %p9021_p7 }
 0x5b9   :  { %p9025_p11 = por %p9024_p10, %p9023_p9 }
 0x5bb   :  { %p9026_p4 = pnand %p9025_p11, %p9019_p6 }
 0x5bd   :  { %9029 = shalt.err (!%p9026_p4)  }
 0x5be   :  { %s9030_s7 = scalar_lea.vmem %s10688_s29, 16  ;;  %p9035_p13 = scmp.lt.s32.totalorder %s10688_s29, %s9509_s3 }
 0x5bf   :  { %p9031_p12 = scmp.ne.s32.totalorder %s10688_s29, %s9030_s7  ;;  %p9036_p0 = scmp.lt.s32.totalorder %s9535_s25, %s9030_s7 }
 0x5c1   :  { %p9037_p1 = por %p9036_p0, %p9035_p13 }
 0x5c3   :  { %p9038_p2 = pnand %p9037_p1, %p9031_p12 }
 0x5c5   :  { %9041 = shalt.err (!%p9038_p2)  }
 0x5c6   :  { %1236 = dma.hbm_to_vmem [thread:$0]  %s1224_s2, 16, %s10688_s29, [#allocation4] }
 0x5c7   :  { %s1241_s22 = scalar_select %p1240_p5, %s10691_s24, 0 }
 0x5c8   :  { %p6041_p3 = scmp.lt.s32.totalorder %s10691_s24, 49  ;;  %p1260_p6 = scmp.gt.s32.totalorder %s10708_s6, 0 }
 0x5c9   :  { %p6048_p7 = scmp.lt.s32.totalorder %s10708_s6, 49  ;;  %s9335_s14 = smov [#allocation2 + $0xf]  }
 0x5ca   :  { %s11978_s22 = smov (!%p6041_p3, %s1241_s22), 49  ;;  %s1274_s18 = sshll.u32 %s9335_s14, 4  ;;  %s10736_s18 = int_to_ptr.vmem [resolvable:$true] %s1274_s18 }
 0x5cb   :  { %s1261_s19 = scalar_select %p1260_p6, %s10708_s6, 0 }
 0x5cc   :  { %s6046_s26 = sshll.u32 %s11978_s22, 4 }
 0x5cd   :  { %s1245_s0 = scalar_lea.hbm %s11791_s1, %s6046_s26 }
 0x5ce   :  { %s9042_s16 = scalar_lea.hbm %s1245_s0, 16  ;;  %p9045_p5 = scmp.lt.u32.totalorder %s1245_s0, %s11791_s1 }
 0x5cf   :  { %p9043_p8 = scmp.ne.s32.totalorder %s1245_s0, %s9042_s16  ;;  %p9046_p9 = scmp.lt.u32.totalorder %s9526_s15, %s9042_s16 }
 0x5d0   :  { %p9048_p11 = scmp.lt.u32.totalorder %s9042_s16, %s1245_s0 }
 0x5d1   :  { %p9047_p10 = por %p9046_p9, %p9045_p5 }
 0x5d3   :  { %p9049_p4 = por %p9048_p11, %p9047_p10 }
 0x5d5   :  { %p9050_p12 = pnand %p9049_p4, %p9043_p8 }
 0x5d7   :  { %9053 = shalt.err (!%p9050_p12)  }
 0x5d8   :  { %s9054_s24 = scalar_lea.vmem %s10710_s21, 16  ;;  %p9059_p0 = scmp.lt.s32.totalorder %s10710_s21, %s9509_s3 }
 0x5d9   :  { %p9055_p13 = scmp.ne.s32.totalorder %s10710_s21, %s9054_s24  ;;  %p9060_p1 = scmp.lt.s32.totalorder %s9535_s25, %s9054_s24 }
 0x5db   :  { %p9061_p2 = por %p9060_p1, %p9059_p0 }
 0x5dd   :  { %p9062_p3 = pnand %p9061_p2, %p9055_p13 }
 0x5df   :  { %9065 = shalt.err (!%p9062_p3)  }
 0x5e0   :  { %1257 = dma.hbm_to_vmem [thread:$0]  %s1245_s0, 16, %s10710_s21, [#allocation4] }
 0x5e1   :  { %s11980_s19 = smov (!%p6048_p7, %s1261_s19), 49  ;;  %s10750_s28 = sld [smem:[#allocation6 + $0x382]] }
 0x5e2   :  { %s6053_s10 = sshll.u32 %s11980_s19, 4  ;;  %s9336_s2 = smov [#allocation2 + $0x17]  }
 0x5e3   :  { %s1294_s30 = sshll.u32 %s9336_s2, 4  ;;  %s1265_s7 = scalar_lea.hbm %s11791_s1, %s6053_s10  ;;  %s10755_s30 = int_to_ptr.vmem [resolvable:$true] %s1294_s30 }
 0x5e4   :  { %s9066_s22 = scalar_lea.hbm %s1265_s7, 16  ;;  %p9069_p8 = scmp.lt.u32.totalorder %s1265_s7, %s11791_s1 }
 0x5e5   :  { %p9067_p6 = scmp.ne.s32.totalorder %s1265_s7, %s9066_s22  ;;  %p9070_p5 = scmp.lt.u32.totalorder %s9526_s15, %s9066_s22 }
 0x5e6   :  { %p9072_p7 = scmp.lt.u32.totalorder %s9066_s22, %s1265_s7 }
 0x5e7   :  { %p9071_p9 = por %p9070_p5, %p9069_p8 }
 0x5e9   :  { %p9073_p10 = por %p9072_p7, %p9071_p9 }
 0x5eb   :  { %p9074_p11 = pnand %p9073_p10, %p9067_p6 }
 0x5ed   :  { %9077 = shalt.err (!%p9074_p11)  }
 0x5ee   :  { %s9078_s21 = scalar_lea.vmem %s10736_s18, 16  ;;  %p9083_p12 = scmp.lt.s32.totalorder %s10736_s18, %s9509_s3 }
 0x5ef   :  { %p9079_p4 = scmp.ne.s32.totalorder %s10736_s18, %s9078_s21  ;;  %p9084_p13 = scmp.lt.s32.totalorder %s9535_s25, %s9078_s21 }
 0x5f1   :  { %p9085_p0 = por %p9084_p13, %p9083_p12 }
 0x5f3   :  { %p9086_p1 = pnand %p9085_p0, %p9079_p4 }
 0x5f5   :  { %9089 = shalt.err (!%p9086_p1)  }
 0x5f6   :  { %1277 = dma.hbm_to_vmem [thread:$0]  %s1265_s7, 16, %s10736_s18, [#allocation4] }
 0x5f7   :  { %s10767_s6 = sld [smem:[#allocation6 + $0x383]]  ;;  %s9337_s19 = smov [#allocation2 + $0x1f]  }
 0x5f8   :  { %s1314_s13 = sshll.u32 %s9337_s19, 4  ;;  %s10769_s27 = sld [smem:[#allocation6 + $0x384]]  ;;  %s10773_s13 = int_to_ptr.vmem [resolvable:$true] %s1314_s13 }
 0x5f9   :  { %p1280_p2 = scmp.gt.s32.totalorder %s10750_s28, 0  ;;  %p6055_p3 = scmp.lt.s32.totalorder %s10750_s28, 49 }
 0x5fa   :  { %s9338_s0 = smov [#allocation2 + $0x27]   ;;  %s10778_s18 = sld [smem:[#allocation6 + $0x385]] }
 0x5fb   :  { %s11982_s28 = smov (!%p1280_p2, %s10750_s28), 0  ;;  %s10776_s16 = sshll.u32 %s9338_s0, 4  ;;  %s10808_s16 = int_to_ptr.vmem [resolvable:$true] %s10776_s16 }
 0x5fc   :  { %s11984_s28 = smov (!%p6055_p3, %s11982_s28), 49 }
 0x5fd   :  { %p1300_p6 = scmp.gt.s32.totalorder %s10767_s6, 0  ;;  %s6060_s23 = sshll.u32 %s11984_s28, 4 }
 0x5fe   :  { %p1320_p5 = scmp.gt.s32.totalorder %s10769_s27, 0  ;;  %s1285_s10 = scalar_lea.hbm %s11791_s1, %s6060_s23 }
 0x5ff   :  { %s9090_s2 = scalar_lea.hbm %s1285_s10, 16  ;;  %p9093_p10 = scmp.lt.u32.totalorder %s1285_s10, %s11791_s1 }
 0x600   :  { %p9091_p7 = scmp.ne.s32.totalorder %s1285_s10, %s9090_s2  ;;  %p9094_p11 = scmp.lt.u32.totalorder %s9526_s15, %s9090_s2 }
 0x601   :  { %p9096_p12 = scmp.lt.u32.totalorder %s9090_s2, %s1285_s10 }
 0x602   :  { %p9095_p4 = por %p9094_p11, %p9093_p10 }
 0x604   :  { %p9097_p13 = por %p9096_p12, %p9095_p4 }
 0x606   :  { %p9098_p0 = pnand %p9097_p13, %p9091_p7 }
 0x608   :  { %9101 = shalt.err (!%p9098_p0)  }
 0x609   :  { %s9102_s28 = scalar_lea.vmem %s10755_s30, 16  ;;  %p9107_p2 = scmp.lt.s32.totalorder %s10755_s30, %s9509_s3 }
 0x60a   :  { %p9103_p1 = scmp.ne.s32.totalorder %s10755_s30, %s9102_s28  ;;  %p9108_p3 = scmp.lt.s32.totalorder %s9535_s25, %s9102_s28 }
 0x60c   :  { %p9109_p9 = por %p9108_p3, %p9107_p2 }
 0x60e   :  { %p9110_p8 = pnand %p9109_p9, %p9103_p1 }
 0x610   :  { %9113 = shalt.err (!%p9110_p8)  }
 0x611   :  { %1297 = dma.hbm_to_vmem [thread:$0]  %s1285_s10, 16, %s10755_s30, [#allocation4] }
 0x612   :  { %s1301_s7 = scalar_select %p1300_p6, %s10767_s6, 0 }
 0x613   :  { %s1321_s22 = scalar_select %p1320_p5, %s10769_s27, 0 }
 0x614   :  { %p11821_p7 = scmp.lt.s32.totalorder %s10767_s6, 49  ;;  %p11822_p10 = scmp.lt.s32.totalorder %s10769_s27, 49 }
 0x616   :  { %s11986_s7 = smov (!%p11821_p7, %s1301_s7), 49  ;;  %s11988_s22 = smov (!%p11822_p10, %s1321_s22), 49 }
 0x617   :  { %s6067_s26 = sshll.u32 %s11986_s7, 4  ;;  %s6074_s0 = sshll.u32 %s11988_s22, 4 }
 0x618   :  { %s1305_s19 = scalar_lea.hbm %s11791_s1, %s6067_s26 }
 0x619   :  { %s9114_s23 = scalar_lea.hbm %s1305_s19, 16  ;;  %p9117_p6 = scmp.lt.u32.totalorder %s1305_s19, %s11791_s1 }
 0x61a   :  { %p9115_p8 = scmp.ne.s32.totalorder %s1305_s19, %s9114_s23  ;;  %p9118_p9 = scmp.lt.u32.totalorder %s9526_s15, %s9114_s23 }
 0x61b   :  { %p9120_p11 = scmp.lt.u32.totalorder %s9114_s23, %s1305_s19 }
 0x61c   :  { %p9119_p5 = por %p9118_p9, %p9117_p6 }
 0x61e   :  { %p9121_p4 = por %p9120_p11, %p9119_p5 }
 0x620   :  { %p9122_p12 = pnand %p9121_p4, %p9115_p8 }
 0x622   :  { %9125 = shalt.err (!%p9122_p12)  }
 0x623   :  { %s9126_s6 = scalar_lea.vmem %s10773_s13, 16  ;;  %p9131_p0 = scmp.lt.s32.totalorder %s10773_s13, %s9509_s3 }
 0x624   :  { %p9127_p13 = scmp.ne.s32.totalorder %s10773_s13, %s9126_s6  ;;  %p9132_p1 = scmp.lt.s32.totalorder %s9535_s25, %s9126_s6 }
 0x626   :  { %p9133_p2 = por %p9132_p1, %p9131_p0 }
 0x628   :  { %p9134_p3 = pnand %p9133_p2, %p9127_p13 }
 0x62a   :  { %9137 = shalt.err (!%p9134_p3)  }
 0x62b   :  { %1317 = dma.hbm_to_vmem [thread:$0]  %s1305_s19, 16, %s10773_s13, [#allocation4] }
 0x62c   :  { %s1325_s10 = scalar_lea.hbm %s11791_s1, %s6074_s0  ;;  %p1340_p7 = scmp.gt.s32.totalorder %s10778_s18, 0 }
 0x62d   :  { %s9138_s2 = scalar_lea.hbm %s1325_s10, 16  ;;  %p9141_p8 = scmp.lt.u32.totalorder %s1325_s10, %s11791_s1 }
 0x62e   :  { %p9139_p10 = scmp.ne.s32.totalorder %s1325_s10, %s9138_s2  ;;  %p9142_p6 = scmp.lt.u32.totalorder %s9526_s15, %s9138_s2 }
 0x62f   :  { %p9144_p5 = scmp.lt.u32.totalorder %s9138_s2, %s1325_s10 }
 0x630   :  { %p9143_p9 = por %p9142_p6, %p9141_p8 }
 0x632   :  { %p9145_p11 = por %p9144_p5, %p9143_p9 }
 0x634   :  { %p9146_p4 = pnand %p9145_p11, %p9139_p10 }
 0x636   :  { %9149 = shalt.err (!%p9146_p4)  }
 0x637   :  { %s9150_s13 = scalar_lea.vmem %s10808_s16, 16  ;;  %p9155_p13 = scmp.lt.s32.totalorder %s10808_s16, %s9509_s3 }
 0x638   :  { %p9151_p12 = scmp.ne.s32.totalorder %s10808_s16, %s9150_s13  ;;  %p9156_p0 = scmp.lt.s32.totalorder %s9535_s25, %s9150_s13 }
 0x63a   :  { %p9157_p1 = por %p9156_p0, %p9155_p13 }
 0x63c   :  { %p9158_p2 = pnand %p9157_p1, %p9151_p12 }
 0x63e   :  { %9161 = shalt.err (!%p9158_p2)  }
 0x63f   :  { %1337 = dma.hbm_to_vmem [thread:$0]  %s1325_s10, 16, %s10808_s16, [#allocation4] }
 0x640   :  { %s1341_s28 = scalar_select %p1340_p7, %s10778_s18, 0 }
 0x641   :  { %p6076_p3 = scmp.lt.s32.totalorder %s10778_s18, 49  ;;  %s9339_s7 = smov [#allocation2 + $0x2f]  }
 0x642   :  { %s1354_s22 = sshll.u32 %s9339_s7, 4  ;;  %s6082_s26 = sld [smem:[#allocation6 + $0x386]]  ;;  %s1355_s22 = int_to_ptr.vmem [resolvable:$true] %s1354_s22 }
 0x643   :  { %s11990_s28 = smov (!%p6076_p3, %s1341_s28), 49 }
 0x644   :  { %s6081_s14 = sshll.u32 %s11990_s28, 4 }
 0x645   :  { %s1345_s0 = scalar_lea.hbm %s11791_s1, %s6081_s14 }
 0x646   :  { %s9162_s23 = scalar_lea.hbm %s1345_s0, 16  ;;  %p9165_p8 = scmp.lt.u32.totalorder %s1345_s0, %s11791_s1 }
 0x647   :  { %p9163_p10 = scmp.ne.s32.totalorder %s1345_s0, %s9162_s23  ;;  %p9166_p6 = scmp.lt.u32.totalorder %s9526_s15, %s9162_s23 }
 0x648   :  { %p9168_p7 = scmp.lt.u32.totalorder %s9162_s23, %s1345_s0 }
 0x649   :  { %p9167_p9 = por %p9166_p6, %p9165_p8 }
 0x64b   :  { %p9169_p5 = por %p9168_p7, %p9167_p9 }
 0x64d   :  { %p9170_p11 = pnand %p9169_p5, %p9163_p10 }
 0x64f   :  { %9173 = shalt.err (!%p9170_p11)  }
 0x650   :  { %s9174_s16 = scalar_lea.vmem %s1355_s22, 16  ;;  %p9179_p12 = scmp.lt.s32.totalorder %s1355_s22, %s9509_s3 }
 0x651   :  { %p9175_p4 = scmp.ne.s32.totalorder %s1355_s22, %s9174_s16  ;;  %p9180_p13 = scmp.lt.s32.totalorder %s9535_s25, %s9174_s16 }
 0x653   :  { %p9181_p0 = por %p9180_p13, %p9179_p12 }
 0x655   :  { %p9182_p1 = pnand %p9181_p0, %p9175_p4 }
 0x657   :  { %9185 = shalt.err (!%p9182_p1)  }
 0x658   :  { %1357 = dma.hbm_to_vmem [thread:$0]  %s1345_s0, 16, %s1355_s22, [#allocation4] }
 0x659   :  { %p1360_p2 = scmp.gt.s32.totalorder %s6082_s26, 0  ;;  %p6083_p3 = scmp.lt.s32.totalorder %s6082_s26, 49 }
 0x65a   :  { %s9340_s18 = smov [#allocation2 + $0x37]   ;;  %s6089_s27 = sld [smem:[#allocation6 + $0x387]] }
 0x65b   :  { %s1374_s6 = sshll.u32 %s9340_s18, 4  ;;  %s11992_s26 = smov (!%p1360_p2, %s6082_s26), 0  ;;  %s1375_s6 = int_to_ptr.vmem [resolvable:$true] %s1374_s6 }
 0x65c   :  { %s11994_s26 = smov (!%p6083_p3, %s11992_s26), 49 }
 0x65d   :  { %s6088_s24 = sshll.u32 %s11994_s26, 4 }
 0x65e   :  { %s1365_s17 = scalar_lea.hbm %s11791_s1, %s6088_s24 }
 0x65f   :  { %s9186_s20 = scalar_lea.hbm %s1365_s17, 16  ;;  %p9189_p6 = scmp.lt.u32.totalorder %s1365_s17, %s11791_s1 }
 0x660   :  { %p1380_p10 = scmp.gt.s32.totalorder %s6089_s27, 0  ;;  %p9187_p8 = scmp.ne.s32.totalorder %s1365_s17, %s9186_s20 }
 0x661   :  { %p9190_p9 = scmp.lt.u32.totalorder %s9526_s15, %s9186_s20  ;;  %p9192_p5 = scmp.lt.u32.totalorder %s9186_s20, %s1365_s17 }
 0x663   :  { %p9191_p7 = por %p9190_p9, %p9189_p6 }
 0x665   :  { %p9193_p11 = por %p9192_p5, %p9191_p7 }
 0x667   :  { %p9194_p4 = pnand %p9193_p11, %p9187_p8 }
 0x669   :  { %9197 = shalt.err (!%p9194_p4)  }
 0x66a   :  { %s9198_s7 = scalar_lea.vmem %s1375_s6, 16  ;;  %p9203_p13 = scmp.lt.s32.totalorder %s1375_s6, %s9509_s3 }
 0x66b   :  { %p9199_p12 = scmp.ne.s32.totalorder %s1375_s6, %s9198_s7  ;;  %p9204_p0 = scmp.lt.s32.totalorder %s9535_s25, %s9198_s7 }
 0x66d   :  { %p9205_p1 = por %p9204_p0, %p9203_p13 }
 0x66f   :  { %p9206_p2 = pnand %p9205_p1, %p9199_p12 }
 0x671   :  { %9209 = shalt.err (!%p9206_p2)  }
 0x672   :  { %1377 = dma.hbm_to_vmem [thread:$0]  %s1365_s17, 16, %s1375_s6, [#allocation4] }
 0x673   :  { %s1381_s22 = scalar_select %p1380_p10, %s6089_s27, 0 }
 0x674   :  { %p6090_p3 = scmp.lt.s32.totalorder %s6089_s27, 49  ;;  %s9341_s26 = smov [#allocation2 + $0x3f]  }
 0x675   :  { %s1394_s14 = sshll.u32 %s9341_s26, 4  ;;  %s1395_s14 = int_to_ptr.vmem [resolvable:$true] %s1394_s14 }
 0x676   :  { %s11996_s22 = smov (!%p6090_p3, %s1381_s22), 49 }
 0x677   :  { %s6095_s21 = sshll.u32 %s11996_s22, 4 }
 0x678   :  { %s1385_s23 = scalar_lea.hbm %s11791_s1, %s6095_s21 }
 0x679   :  { %s9210_s29 = scalar_lea.hbm %s1385_s23, 16  ;;  %p9213_p6 = scmp.lt.u32.totalorder %s1385_s23, %s11791_s1 }
 0x67a   :  { %p9211_p8 = scmp.ne.s32.totalorder %s1385_s23, %s9210_s29  ;;  %p9214_p9 = scmp.lt.u32.totalorder %s9526_s15, %s9210_s29 }
 0x67b   :  { %p9216_p5 = scmp.lt.u32.totalorder %s9210_s29, %s1385_s23 }
 0x67c   :  { %p9215_p7 = por %p9214_p9, %p9213_p6 }
 0x67e   :  { %p9217_p10 = por %p9216_p5, %p9215_p7 }
 0x680   :  { %p9218_p11 = pnand %p9217_p10, %p9211_p8 }
 0x682   :  { %9221 = shalt.err (!%p9218_p11)  }
 0x683   :  { %s9222_s18 = scalar_lea.vmem %s1395_s14, 16  ;;  %p9227_p12 = scmp.lt.s32.totalorder %s1395_s14, %s9509_s3 }
 0x684   :  { %p9223_p4 = scmp.ne.s32.totalorder %s1395_s14, %s9222_s18  ;;  %p9228_p13 = scmp.lt.s32.totalorder %s9535_s25, %s9222_s18 }
 0x686   :  { %p9229_p0 = por %p9228_p13, %p9227_p12 }
 0x688   :  { %p9230_p1 = pnand %p9229_p0, %p9223_p4 }
 0x68a   :  { %9233 = shalt.err (!%p9230_p1)  }
 0x68b   :  { %1397 = dma.hbm_to_vmem [thread:$0]  %s1385_s23, 16, %s1395_s14, [#allocation4] }
 0x68c   :  { %9264 = dma.done.wait [#allocation4], 1024 }
 0x68d   :  { %9265 = vsyncadd [#allocation4], 4294966272  ;;  %v11805_v0 = vmov 0   ;;  %v7175_v1 = vld [vmem:[#allocation7 + $0x4] ss:$12 sps:$4 sm:$0xff]   ;;  %v1530_v13 = vld [vmem:[#allocation2 + $0x8] sm:$0xff] }
 0x68e   :  { %1749 = vmatprep.mubr.bf16.mxu0 %v11805_v0  ;;  %v7177_v2 = vld [vmem:[#allocation7] ss:$12 sps:$4 sm:$0xff]   ;;  %1717 = vmatprep.subr.bf16.mxu0 %v7175_v1  ;;  %v7178_v3 = vld [vmem:[#allocation7 + $0x1c] ss:$12 sps:$4 sm:$0xff]   ;;  %v7180_v4 = vld [vmem:[#allocation7 + $0x18] ss:$12 sps:$4 sm:$0xff]  }
 0x68f   :  { %1718 = vmatpush1.bf16.msra.mxu0 %v7177_v2  ;;  %v7181_v5 = vld [vmem:[#allocation7 + $0x34] ss:$12 sps:$4 sm:$0xff]   ;;  %v7183_v6 = vld [vmem:[#allocation7 + $0x30] ss:$12 sps:$4 sm:$0xff]   ;;  %v7184_v7 = vld [vmem:[#allocation7 + $0x4c] ss:$12 sps:$4 sm:$0xff]  }
 0x690   :  { %1719 = vmatprep.subr.bf16.mxu0 %v7178_v3  ;;  %v7195_v8 = vld [vmem:[#allocation7 + $0x8] ss:$12 sps:$4 sm:$0xff]   ;;  %v7187_v10 = vld [vmem:[#allocation7 + $0x64] ss:$12 sps:$4 sm:$0xff]   ;;  %v7199_v11 = vld [vmem:[#allocation7 + $0x20] ss:$12 sps:$4 sm:$0xff]  }
 0x691   :  { %v7186_v9 = vld [vmem:[#allocation7 + $0x48] ss:$12 sps:$4 sm:$0xff]   ;;  %6709 = vmatprep.subr.bf16.mxu1 %v7195_v8  ;;  %v1529_v12 = vld [vmem:[#allocation2] sm:$0xff]  ;;  %v7205_v18 = vld [vmem:[#allocation7 + $0x50] ss:$12 sps:$4 sm:$0xff]   ;;  %v11807_v42 = vmov 0.0  }
 0x692   :  { %6710 = vmatpush3.bf16.msra.mxu1 %v7195_v8  ;;  %v7201_v14 = vld [vmem:[#allocation7 + $0x38] ss:$12 sps:$4 sm:$0xff]   ;;  %v7189_v15 = vld [vmem:[#allocation7 + $0x60] ss:$12 sps:$4 sm:$0xff]   ;;  %v1537_v16 = vpack.c.bf16 %v1530_v13, %v1529_v12  ;;  %v7190_v17 = vld [vmem:[#allocation7 + $0x7c] ss:$12 sps:$4 sm:$0xff]  }
 0x693   :  { %1720 = vmatpush1.bf16.msra.mxu0 %v7180_v4  ;;  %6711 = vmatprep.subr.bf16.mxu1 %v7199_v11  ;;  %v7192_v19 = vld [vmem:[#allocation7 + $0x78] ss:$12 sps:$4 sm:$0xff]   ;;  %v7193_v20 = vld [vmem:[#allocation7 + $0x94] ss:$12 sps:$4 sm:$0xff]   ;;  %v7196_v22 = vld [vmem:[#allocation7 + $0x90] ss:$12 sps:$4 sm:$0xff]  }
 0x694   :  { %1721 = vmatprep.subr.bf16.mxu0 %v7181_v5  ;;  %6725 = vmatprep.mubr.bf16.mxu1 %v1537_v16  ;;  %v7209_v21 = vld [vmem:[#allocation7 + $0x68] ss:$12 sps:$4 sm:$0xff]   ;;  %v7197_v23 = vld [vmem:[#allocation7 + $0xac] ss:$12 sps:$4 sm:$0xff]   ;;  %v10870_v26 = vld [vmem:[#allocation10 + $0x4] ss:$12 sps:$4 sm:$0xff]  }
 0x695   :  { %v7213_v24 = vld [vmem:[#allocation7 + $0x80] ss:$12 sps:$4 sm:$0xff]   ;;  %v7200_v25 = vld [vmem:[#allocation7 + $0xa8] ss:$12 sps:$4 sm:$0xff]   ;;  %v7217_v27 = vld [vmem:[#allocation7 + $0x98] ss:$12 sps:$4 sm:$0xff]  }
 0x696   :  { %6712 = vmatpush3.bf16.msra.mxu1 %v7199_v11  ;;  %v10872_v28 = vld [vmem:[#allocation10] ss:$12 sps:$4 sm:$0xff]   ;;  %v10875_v29 = vld [vmem:[#allocation10 + $0x1c] ss:$12 sps:$4 sm:$0xff]   ;;  %v10877_v30 = vld [vmem:[#allocation10 + $0x18] ss:$12 sps:$4 sm:$0xff]  }
 0x697   :  { %1722 = vmatpush1.bf16.msra.mxu0 %v7183_v6  ;;  %6713 = vmatprep.subr.bf16.mxu1 %v7201_v14  ;;  %v7221_v31 = vld [vmem:[#allocation7 + $0xb0] ss:$12 sps:$4 sm:$0xff]   ;;  %v10882_v34 = vld [vmem:[#allocation10 + $0x34] ss:$12 sps:$4 sm:$0xff]   ;;  %v10886_v37 = vld [vmem:[#allocation10 + $0x4c] ss:$12 sps:$4 sm:$0xff]  }
 0x698   :  { %1723 = vmatprep.subr.bf16.mxu0 %v7184_v7  ;;  %v1531_v32 = vld [vmem:[#allocation2 + $0x10] sm:$0xff]  ;;  %v1532_v33 = vld [vmem:[#allocation2 + $0x18] sm:$0xff]  ;;  %v1533_v38 = vld [vmem:[#allocation2 + $0x20] sm:$0xff]  ;;  %vm9344_vm0 = vmmov 0   ;;  %v1574_v7 = vlaneseq  ;;  %s9345_s2 = smov [#allocation16]  }
 0x699   :  { %v10884_v35 = vld [vmem:[#allocation10 + $0x30] ss:$12 sps:$4 sm:$0xff]   ;;  %v1538_v36 = vpack.c.bf16 %v1532_v33, %v1531_v32  ;;  %v1534_v39 = vld [vmem:[#allocation2 + $0x28] sm:$0xff]  ;;  %v7233_v50 = vld [vmem:[#allocation10 + $0x38] ss:$12 sps:$4 sm:$0xff]   ;;  %s5504_s17 = sshll.u32 %s9345_s2, 4  ;;  %s5505_s17 = int_to_ptr.vmem [resolvable:$true] %s5504_s17 }
 0x69a   :  { %6714 = vmatpush3.bf16.msra.mxu1 %v7201_v14  ;;  %v7228_v40 = vld [vmem:[#allocation10 + $0x8] ss:$12 sps:$4 sm:$0xff]   ;;  %v10893_v43 = vld [vmem:[#allocation10 + $0x64] ss:$12 sps:$4 sm:$0xff]   ;;  %v1539_v44 = vpack.c.bf16 %v1534_v39, %v1533_v38  ;;  %v7232_v45 = vld [vmem:[#allocation10 + $0x20] ss:$12 sps:$4 sm:$0xff]   ;;  %p9239_p3 = scmp.lt.s32.totalorder %s5505_s17, %s5505_s17 }
 0x69b   :  { %1724 = vmatpush1.bf16.msra.mxu0 %v7186_v9  ;;  %6715 = vmatprep.subr.bf16.mxu1 %v7205_v18  ;;  %v10890_v41 = vld [vmem:[#allocation10 + $0x48] ss:$12 sps:$4 sm:$0xff]   ;;  %v10898_v46 = vld [vmem:[#allocation10 + $0x60] ss:$12 sps:$4 sm:$0xff]   ;;  %v1536_v48 = vld [vmem:[#allocation2 + $0x38] sm:$0xff]  ;;  %v10963_v8 = vshrl.u32 %v1574_v7, 7 }
 0x69c   :  { %1725 = vmatprep.subr.bf16.mxu0 %v7187_v10  ;;  %v1535_v47 = vld [vmem:[#allocation2 + $0x30] sm:$0xff]  ;;  %v10900_v49 = vld [vmem:[#allocation10 + $0x7c] ss:$12 sps:$4 sm:$0xff]   ;;  %v10905_v51 = vld [vmem:[#allocation10 + $0x78] ss:$12 sps:$4 sm:$0xff]   ;;  %s9234_s20 = scalar_lea.vmem %s5505_s17, 128 }
 0x69d   :  { %v1540_v52 = vpack.c.bf16 %v1536_v48, %v1535_v47  ;;  %v10907_v53 = vld [vmem:[#allocation10 + $0x94] ss:$12 sps:$4 sm:$0xff]   ;;  %v7234_v54 = vld [vmem:[#allocation10 + $0x50] ss:$12 sps:$4 sm:$0xff]   ;;  %v10917_v56 = vld [vmem:[#allocation10 + $0xac] ss:$12 sps:$4 sm:$0xff]   ;;  %p9235_p2 = scmp.ne.s32.totalorder %s5505_s17, %s9234_s20  ;;  %p9240_p8 = scmp.lt.s32.totalorder %s9234_s20, %s9234_s20 }
 0x69e   :  { %6716 = vmatpush3.bf16.msra.mxu1 %v7205_v18  ;;  %v10913_v55 = vld [vmem:[#allocation10 + $0x90] ss:$12 sps:$4 sm:$0xff]   ;;  %v7235_v57 = vld [vmem:[#allocation10 + $0x68] ss:$12 sps:$4 sm:$0xff]   ;;  %v7236_v59 = vld [vmem:[#allocation10 + $0x80] ss:$12 sps:$4 sm:$0xff]  }
 0x69f   :  { %1726 = vmatpush1.bf16.msra.mxu0 %v7189_v15  ;;  %6717 = vmatprep.subr.bf16.mxu1 %v7209_v21  ;;  %v10922_v58 = vld [vmem:[#allocation10 + $0xa8] ss:$12 sps:$4 sm:$0xff]   ;;  %v7237_v60 = vld [vmem:[#allocation10 + $0x98] ss:$12 sps:$4 sm:$0xff]   ;;  %v7238_v61 = vld [vmem:[#allocation10 + $0xb0] ss:$12 sps:$4 sm:$0xff]   ;;  %p9241_p6 = por %p9240_p8, %p9239_p3 }
 0x6a0   :  { %1727 = vmatprep.subr.bf16.mxu0 %v7190_v17  ;;  %v7239_v62 = vld [vmem:[#allocation10 + $0x8] ss:$12 sps:$4 sm:$0xff]   ;;  %v7240_v63 = vld [vmem:[#allocation10 + $0x20] ss:$12 sps:$4 sm:$0xff]   ;;  %v7241_v1 = vld [vmem:[#allocation10 + $0x38] ss:$12 sps:$4 sm:$0xff]  }
 0x6a1   :  { %v7242_v2 = vld [vmem:[#allocation10 + $0x50] ss:$12 sps:$4 sm:$0xff]   ;;  %v7243_v3 = vld [vmem:[#allocation10 + $0x68] ss:$12 sps:$4 sm:$0xff]   ;;  %v7244_v4 = vld [vmem:[#allocation10 + $0x80] ss:$12 sps:$4 sm:$0xff]   ;;  %p9242_p9 = pnand %p9241_p6, %p9235_p2 }
 0x6a2   :  { %6718 = vmatpush3.bf16.msra.mxu1 %v7209_v21  ;;  %v7245_v5 = vld [vmem:[#allocation10 + $0x98] ss:$12 sps:$4 sm:$0xff]   ;;  %v7246_v6 = vld [vmem:[#allocation10 + $0xb0] ss:$12 sps:$4 sm:$0xff]   ;;  %v1576_v9 = vsub.s32 0, %v10963_v8  ;;  %v11804_v11 = vsub.s32 1, %v10963_v8 }
 0x6a3   :  { %1728 = vmatpush1.bf16.msra.mxu0 %v7192_v19  ;;  %6719 = vmatprep.subr.bf16.mxu1 %v7213_v24  ;;  %v1527_v10 = vld [vmem:[%s11794_s4] sm:$0x7]  ;;  %v11803_v19 = vsub.s32 2, %v10963_v8 }
 0x6a4   :  { %1729 = vmatprep.subr.bf16.mxu0 %v7193_v20  ;;  %v1577_v13 = vrot.slane %v1527_v10, %v1576_v9  ;;  %v1581_v15 = vrot.slane %v1527_v10, %v11804_v11 }
 0x6a5   :  { %v10981_v21 = vrot.slane %v1527_v10, %v11803_v19 }
 0x6a6   :  { %6720 = vmatpush3.bf16.msra.mxu1 %v7213_v24 }
 0x6a7   :  { %1730 = vmatpush1.bf16.msra.mxu0 %v7196_v22  ;;  %6721 = vmatprep.subr.bf16.mxu1 %v7217_v27 }
 0x6a8   :  { %1731 = vmatprep.subr.bf16.mxu0 %v7197_v23 }
 0x6aa   :  { %6722 = vmatpush3.bf16.msra.mxu1 %v7217_v27 }
 0x6ab   :  { %1732 = vmatpush1.bf16.msra.mxu0 %v7200_v25  ;;  %6723 = vmatprep.subr.bf16.mxu1 %v7221_v31 }
 0x6ac   :  { %2042 = vmatprep.subr.bf16.mxu0 %v10870_v26 }
 0x6ae   :  { %1750 = vmatmul.mubr.bf16.vlgmr.msra.gmra.mrb[0].mxu0 %v1537_v16  ;;  %6724 = vmatpush3.bf16.msra.mxu1 %v7221_v31 }
 0x6af   :  { %2043 = vmatpush1.bf16.msra.mxu0 %v10872_v28  ;;  %1759 = vmatprep.mubr.bf16.mxu0 %v11805_v0 }
 0x6b0   :  { %2044 = vmatprep.subr.bf16.mxu0 %v10875_v29  ;;  %6733 = vmatprep.subr.bf16.mxu1 %v11807_v42 }
 0x6b1   :  { %6726 = vmatmul.mubr.bf16.vlgmr.msra.gmra.mrb[0].mxu1 %v1538_v36 }
 0x6b2   :  { %6734 = vmatpush3.bf16.msra.mxu1 %v7228_v40  ;;  %6729 = vmatprep.mubr.bf16.mxu1 %v1539_v44 }
 0x6b3   :  { %2045 = vmatpush1.bf16.msra.mxu0 %v10877_v30  ;;  %6735 = vmatprep.subr.bf16.mxu1 %v11807_v42 }
 0x6b4   :  { %2046 = vmatprep.subr.bf16.mxu0 %v10882_v34 }
 0x6b6   :  { %1760 = vmatmul.mubr.bf16.gmra.mrb[4].mxu0 %v1538_v36  ;;  %6736 = vmatpush3.bf16.msra.mxu1 %v7232_v45 }
 0x6b7   :  { %2047 = vmatpush1.bf16.msra.mxu0 %v10884_v35  ;;  %1769 = vmatprep.mubr.bf16.mxu0 %v11805_v0 }
 0x6b8   :  { %2048 = vmatprep.subr.bf16.mxu0 %v10886_v37  ;;  %6737 = vmatprep.subr.bf16.mxu1 %v11807_v42 }
 0x6b9   :  { %6730 = vmatmul.mubr.bf16.gmra.mrb[4].mxu1 %v1540_v52 }
 0x6ba   :  { %6738 = vmatpush3.bf16.msra.mxu1 %v7233_v50  ;;  %6749 = vmatprep.mubr.msk.bf16.mxu1 %vm9344_vm0, %v11807_v42 }
 0x6bb   :  { %2049 = vmatpush1.bf16.msra.mxu0 %v10890_v41  ;;  %6739 = vmatprep.subr.bf16.mxu1 %v11807_v42 }
 0x6bc   :  { %2050 = vmatprep.subr.bf16.mxu0 %v10893_v43 }
 0x6be   :  { %1770 = vmatmul.mubr.bf16.gmra.mrb[8].mxu0 %v1539_v44  ;;  %6740 = vmatpush3.bf16.msra.mxu1 %v7234_v54 }
 0x6bf   :  { %2051 = vmatpush1.bf16.msra.mxu0 %v10898_v46  ;;  %1779 = vmatprep.mubr.bf16.mxu0 %v11805_v0 }
 0x6c0   :  { %2052 = vmatprep.subr.bf16.mxu0 %v10900_v49  ;;  %6741 = vmatprep.subr.bf16.mxu1 %v11807_v42 }
 0x6c2   :  { %6742 = vmatpush3.bf16.msra.mxu1 %v7235_v57 }
 0x6c3   :  { %2053 = vmatpush1.bf16.msra.mxu0 %v10905_v51  ;;  %6743 = vmatprep.subr.bf16.mxu1 %v11807_v42 }
 0x6c4   :  { %2054 = vmatprep.subr.bf16.mxu0 %v10907_v53 }
 0x6c6   :  { %1780 = vmatmul.mubr.bf16.gmra.mrb[12].mxu0 %v1540_v52  ;;  %6744 = vmatpush3.bf16.msra.mxu1 %v7236_v59 }
 0x6c7   :  { %2055 = vmatpush1.bf16.msra.mxu0 %v10913_v55  ;;  %2074 = vmatprep.mubr.bf16.mxu0 %v11805_v0 }
 0x6c8   :  { %2056 = vmatprep.subr.bf16.mxu0 %v10917_v56  ;;  %6745 = vmatprep.subr.bf16.mxu1 %v11807_v42 }
 0x6ca   :  { %6746 = vmatpush3.bf16.msra.mxu1 %v7237_v60 }
 0x6cb   :  { %2057 = vmatpush1.bf16.msra.mxu0 %v10922_v58  ;;  %6747 = vmatprep.subr.bf16.mxu1 %v11807_v42 }
 0x6cc   :  { %2315 = vmatprep.subr.bf16.mxu0 %v10870_v26 }
 0x6ce   :  { %2075 = vmatmul.mubr.bf16.vlgmr.msra.gmra.mrb[16].mxu0 %v11805_v0  ;;  %6748 = vmatpush3.bf16.msra.mxu1 %v7238_v61 }
 0x6cf   :  { %2316 = vmatpush1.bf16.msra.mxu0 %v10872_v28  ;;  %2347 = vmatprep.mubr.bf16.mxu0 %v11805_v0 }
 0x6d0   :  { %2317 = vmatprep.subr.bf16.mxu0 %v10875_v29  ;;  %6753 = vmatprep.subr.bf16.mxu1 %v11807_v42 }
 0x6d1   :  { %6750 = vmatmul.mubr.bf16.vlgmr.msra.gmra.mrb[8].mxu1 %v11805_v0 }
 0x6d2   :  { %6769 = vmatprep.mubr.msk.bf16.mxu1 %vm9344_vm0, %v11807_v42  ;;  %6754 = vmatpush3.bf16.msra.mxu1 %v7239_v62 }
 0x6d3   :  { %2318 = vmatpush1.bf16.msra.mxu0 %v10877_v30  ;;  %6755 = vmatprep.subr.bf16.mxu1 %v11807_v42 }
 0x6d4   :  { %2319 = vmatprep.subr.bf16.mxu0 %v10882_v34 }
 0x6d6   :  { %6756 = vmatpush3.bf16.msra.mxu1 %v7240_v63 }
 0x6d7   :  { %2320 = vmatpush1.bf16.msra.mxu0 %v10884_v35  ;;  %6757 = vmatprep.subr.bf16.mxu1 %v11807_v42 }
 0x6d8   :  { %2321 = vmatprep.subr.bf16.mxu0 %v10886_v37 }
 0x6da   :  { %6758 = vmatpush3.bf16.msra.mxu1 %v7241_v1 }
 0x6db   :  { %2322 = vmatpush1.bf16.msra.mxu0 %v10890_v41  ;;  %6759 = vmatprep.subr.bf16.mxu1 %v11807_v42 }
 0x6dc   :  { %2323 = vmatprep.subr.bf16.mxu0 %v10893_v43 }
 0x6de   :  { %6760 = vmatpush3.bf16.msra.mxu1 %v7242_v2 }
 0x6df   :  { %2324 = vmatpush1.bf16.msra.mxu0 %v10898_v46  ;;  %6761 = vmatprep.subr.bf16.mxu1 %v11807_v42 }
 0x6e0   :  { %2325 = vmatprep.subr.bf16.mxu0 %v10900_v49 }
 0x6e2   :  { %6762 = vmatpush3.bf16.msra.mxu1 %v7243_v3 }
 0x6e3   :  { %2326 = vmatpush1.bf16.msra.mxu0 %v10905_v51  ;;  %6763 = vmatprep.subr.bf16.mxu1 %v11807_v42 }
 0x6e4   :  { %2327 = vmatprep.subr.bf16.mxu0 %v10907_v53 }
 0x6e6   :  { %6764 = vmatpush3.bf16.msra.mxu1 %v7244_v4 }
 0x6e7   :  { %2328 = vmatpush1.bf16.msra.mxu0 %v10913_v55  ;;  %6765 = vmatprep.subr.bf16.mxu1 %v11807_v42 }
 0x6e8   :  { %2329 = vmatprep.subr.bf16.mxu0 %v10917_v56 }
 0x6ea   :  { %6766 = vmatpush3.bf16.msra.mxu1 %v7245_v5 }
 0x6eb   :  { %2330 = vmatpush1.bf16.msra.mxu0 %v10922_v58  ;;  %6767 = vmatprep.subr.bf16.mxu1 %v11807_v42 }
 0x6ec   :  { %2582 = vmatprep.subr.bf16.mxu0 %v10870_v26 }
 0x6ee   :  { %6768 = vmatpush3.bf16.msra.mxu1 %v7246_v6 }
 0x6ef   :  { %6773 = vmatprep.subr.bf16.mxu1 %v11807_v42 }
 0x781   :  { %v1751_v12 = vpop.f32.mrb[0].mxu0 }
 0x782   :  { %v1753_v14 = vpop.f32.mrb[1].mxu0 }
 0x783   :  { %v1755_v16 = vpop.f32.mrb[2].mxu0 }
 0x784   :  { %v10974_v17 = vadd.f32 %v1755_v16, %v1577_v13  ;;  %v1757_v18 = vpop.f32.mrb[3].mxu0  ;;  %v6727_v31 = vpop.f32.mrb[0].mxu1 }
 0x785   :  { %v10977_v20 = vadd.f32 %v1757_v18, %v1581_v15  ;;  %v10990_v36 = vadd.f32 %v6727_v31, %v10981_v21  ;;  %v1824_v38 = vpop.f32.mrb[1].mxu1 }
 0x786   :  { %v6728_v40 = vpop.f32.mrb[2].mxu1 }
 0x787   :  { %v10995_v44 = vadd.f32 %v6728_v40, %v10981_v21  ;;  %v1827_v45 = vpop.f32.mrb[3].mxu1  ;;  %v1754_v40 = vadd.f32 %v1753_v14, %v1581_v15 }
 0x788   :  { %v10998_v47 = vadd.f32 %v1827_v45, %v10981_v21 }
 0x789   :  { %v1761_v22 = vpop.f32.mrb[4].mxu0 }
 0x78a   :  { %v10983_v23 = vadd.f32 %v1761_v22, %v1577_v13  ;;  %v1763_v24 = vpop.f32.mrb[5].mxu0 }
 0x78b   :  { %v10985_v25 = vadd.f32 %v1763_v24, %v1581_v15  ;;  %v1765_v27 = vpop.f32.mrb[6].mxu0 }
 0x78c   :  { %v10987_v32 = vadd.f32 %v1765_v27, %v1577_v13  ;;  %v1767_v33 = vpop.f32.mrb[7].mxu0  ;;  %v6731_v59 = vpop.f32.mrb[4].mxu1 }
 0x78d   :  { %v10992_v39 = vadd.f32 %v1767_v33, %v1581_v15  ;;  %v11007_v62 = vadd.f32 %v6731_v59, %v10981_v21  ;;  %v1840_v63 = vpop.f32.mrb[5].mxu1  ;;  %v1752_v33 = vadd.f32 %v1751_v12, %v1577_v13  ;;  %v11031_v12 = vld [vmem:[%s11795_s5] ss:$0 sm:$0xff] }
 0x78e   :  { %v11012_v2 = vadd.f32 %v1840_v63, %v10981_v21  ;;  %v6732_v3 = vpop.f32.mrb[6].mxu1 }
 0x78f   :  { %v11015_v4 = vadd.f32 %v6732_v3, %v10981_v21  ;;  %v1843_v5 = vpop.f32.mrb[7].mxu1 }
 0x790   :  { %v11018_v6 = vadd.f32 %v1843_v5, %v10981_v21 }
 0x791   :  { %v1771_v48 = vpop.f32.mrb[8].mxu0 }
 0x792   :  { %v11000_v50 = vadd.f32 %v1771_v48, %v1577_v13  ;;  %v1773_v52 = vpop.f32.mrb[9].mxu0 }
 0x793   :  { %v11002_v54 = vadd.f32 %v1773_v52, %v1581_v15  ;;  %v1775_v57 = vpop.f32.mrb[10].mxu0 }
 0x794   :  { %v11004_v60 = vadd.f32 %v1775_v57, %v1577_v13  ;;  %v1777_v61 = vpop.f32.mrb[11].mxu0 }
 0x795   :  { %v11009_v1 = vadd.f32 %v1777_v61, %v1581_v15 }
 0x799   :  { %v1781_v7 = vpop.f32.mrb[12].mxu0 }
 0x79a   :  { %v11020_v10 = vadd.f32 %v1781_v7, %v1577_v13  ;;  %v1783_v16 = vpop.f32.mrb[13].mxu0 }
 0x79b   :  { %v11022_v18 = vadd.f32 %v1783_v16, %v1581_v15  ;;  %v1785_v22 = vpop.f32.mrb[14].mxu0 }
 0x79c   :  { %v11024_v24 = vadd.f32 %v1785_v22, %v1577_v13  ;;  %v1787_v27 = vpop.f32.mrb[15].mxu0 }
 0x79d   :  { %v11026_v31 = vadd.f32 %v1787_v27, %v1581_v15  ;;  %v1825_v27 = vadd.f32 %v1824_v38, %v10981_v21  ;;  %v7250_v21 = vld [vmem:[#allocation10 + $0x50] ss:$12 sps:$4 sm:$0xff]   ;;  %v7251_v38 = vld [vmem:[#allocation10 + $0x68] ss:$12 sps:$4 sm:$0xff]  }
 0x7a1   :  { %v2076_v45 = vpop.f32.mrb[16].mxu0 }
 0x7a2   :  { %v2123_v48 = vadd.f32 %v2076_v45, %v1752_v33  ;;  %v2078_v52 = vpop.f32.mrb[17].mxu0 }
 0x7a3   :  { %v2124_v57 = vadd.f32 %v2078_v52, %v1754_v40  ;;  %v2080_v59 = vpop.f32.mrb[18].mxu0 }
 0x7a4   :  { %v6144_v61 = vmul.f32 -1.442695, %v2123_v48  ;;  %v2081_v63 = vpop.f32.mrb[19].mxu0  ;;  %v2117_v3 = vpop.f32.mrb[8].mxu1 }
 0x7a5   :  { %v6751_v5 = vpop.f32.mrb[9].mxu1  ;;  %v6145_v16 = vmul.f32 -1.442695, %v2124_v57  ;;  %v2143_v13 = vadd.f32 %v11031_v12, %v2117_v3  ;;  %v7254_v63 = vld [vmem:[#allocation10 + $0xb0] ss:$12 sps:$4 sm:$0xff]  }
 0x7a6   :  { %7391 = vpow2.f32 %v6144_v61  ;;  %v2120_v7 = vpop.f32.mrb[10].mxu1  ;;  %v7252_v61 = vld [vmem:[#allocation10 + $0x80] ss:$12 sps:$4 sm:$0xff]  }
 0x7a7   :  { %v6752_v19 = vpop.f32.mrb[11].mxu1  ;;  %7393 = vpow2.f32 %v6145_v16 }
 0x7b0   :  { %v7392_v22 = vpop.eup %7391 }
 0x7b1   :  { %v2131_v11 = vadd.f32 1.0, %v7392_v22  ;;  %v7394_v14 = vpop.eup %7393 }
 0x7b2   :  { %v2132_v40 = vadd.f32 1.0, %v7394_v14 }
 0x7b3   :  { %7395 = vrcp.f32 %v2131_v11 }
 0x7bd   :  { %v7396_v15 = vpop.eup %7395 }
 0x7be   :  { %v2144_v33 = vmul.f32 %v7396_v15, %v2143_v13 }
 0x7c0   :  { %v2145_v45 = vadd.f32 %v2144_v33, %v1825_v27 }
 0x7c2   :  { %7397 = vtanh.f32 %v2145_v45 }
 0x7c3   :  { %7399 = vrcp.f32 %v2132_v40 }
 0x7cc   :  { %v7398_v19 = vpop.eup %7397 }
 0x7cd   :  { %v2147_v48 = vsub.f32 0.0, %v7398_v19  ;;  %v7400_v52 = vpop.eup %7399 }
 0x7cf   :  { %v2148_v11 = vmul.f32 %v7400_v52, %v2147_v48 }
 0x7d1   :  { %v11035_v57 = vadd.f32 %v7398_v19, %v2148_v11 }
 0x7d3   :  { %2150 = vst [vmem:[#allocation2] sm:$0xff] %v11035_v57  ;;  %v2154_v59 = vpack.c.bf16 %v11035_v57, %v11035_v57 }
 0x7d5   :  { %2348 = vmatmul.mubr.bf16.vlgmr.msra.gmra.mrb[20].mxu0 %v2154_v59  ;;  %6770 = vmatmul.mubr.bf16.vlgmr.msra.gmra.mrb[12].mxu1 %v2154_v59 }
 0x7d6   :  { %2583 = vmatpush1.bf16.msra.mxu0 %v10872_v28  ;;  %2614 = vmatprep.mubr.bf16.mxu0 %v11805_v0  ;;  %v7247_v28 = vld [vmem:[#allocation10 + $0x8] ss:$12 sps:$4 sm:$0xff]  }
 0x7d7   :  { %2584 = vmatprep.subr.bf16.mxu0 %v10875_v29  ;;  %6789 = vmatprep.mubr.msk.bf16.mxu1 %vm9344_vm0, %v11807_v42  ;;  %v7248_v29 = vld [vmem:[#allocation10 + $0x20] ss:$12 sps:$4 sm:$0xff]  }
 0x7d8   :  { %6774 = vmatpush3.bf16.msra.mxu1 %v7247_v28 }
 0x7d9   :  { %6775 = vmatprep.subr.bf16.mxu1 %v11807_v42 }
 0x7da   :  { %2585 = vmatpush1.bf16.msra.mxu0 %v10877_v30  ;;  %v7249_v30 = vld [vmem:[#allocation10 + $0x38] ss:$12 sps:$4 sm:$0xff]  }
 0x7db   :  { %2586 = vmatprep.subr.bf16.mxu0 %v10882_v34 }
 0x7dc   :  { %6776 = vmatpush3.bf16.msra.mxu1 %v7248_v29 }
 0x7dd   :  { %6777 = vmatprep.subr.bf16.mxu1 %v11807_v42 }
 0x7de   :  { %2587 = vmatpush1.bf16.msra.mxu0 %v10884_v35 }
 0x7df   :  { %2588 = vmatprep.subr.bf16.mxu0 %v10886_v37 }
 0x7e0   :  { %6778 = vmatpush3.bf16.msra.mxu1 %v7249_v30 }
 0x7e1   :  { %6779 = vmatprep.subr.bf16.mxu1 %v11807_v42 }
 0x7e2   :  { %2589 = vmatpush1.bf16.msra.mxu0 %v10890_v41 }
 0x7e3   :  { %2590 = vmatprep.subr.bf16.mxu0 %v10893_v43 }
 0x7e4   :  { %6780 = vmatpush3.bf16.msra.mxu1 %v7250_v21 }
 0x7e5   :  { %6781 = vmatprep.subr.bf16.mxu1 %v11807_v42 }
 0x7e6   :  { %2591 = vmatpush1.bf16.msra.mxu0 %v10898_v46 }
 0x7e7   :  { %2592 = vmatprep.subr.bf16.mxu0 %v10900_v49 }
 0x7e8   :  { %6782 = vmatpush3.bf16.msra.mxu1 %v7251_v38 }
 0x7e9   :  { %6783 = vmatprep.subr.bf16.mxu1 %v11807_v42 }
 0x7ea   :  { %2593 = vmatpush1.bf16.msra.mxu0 %v10905_v51 }
 0x7eb   :  { %2594 = vmatprep.subr.bf16.mxu0 %v10907_v53 }
 0x7ec   :  { %6784 = vmatpush3.bf16.msra.mxu1 %v7252_v61 }
 0x7ed   :  { %6785 = vmatprep.subr.bf16.mxu1 %v11807_v42 }
 0x7ee   :  { %2595 = vmatpush1.bf16.msra.mxu0 %v10913_v55 }
 0x7ef   :  { %2596 = vmatprep.subr.bf16.mxu0 %v10917_v56 }
 0x7f2   :  { %2597 = vmatpush1.bf16.msra.mxu0 %v10922_v58 }
 0x7f3   :  { %2849 = vmatprep.subr.bf16.mxu0 %v10870_v26  ;;  %v7253_v26 = vld [vmem:[#allocation10 + $0x98] ss:$12 sps:$4 sm:$0xff]  }
 0x7f4   :  { %6786 = vmatpush3.bf16.msra.mxu1 %v7253_v26 }
 0x7f5   :  { %6787 = vmatprep.subr.bf16.mxu1 %v11807_v42 }
 0x7f8   :  { %6788 = vmatpush3.bf16.msra.mxu1 %v7254_v63  ;;  %v7551_v63 = vld [vmem:[#allocation10] ss:$12 sps:$4 sm:$0xff]  }
 0x7f9   :  { %6793 = vmatprep.subr.bf16.mxu1 %v11807_v42 }
 0x8a8   :  { %v2349_v3 = vpop.f32.mrb[20].mxu0  ;;  %v2390_v5 = vpop.f32.mrb[12].mxu1 }
 0x8a9   :  { %v2396_v7 = vadd.f32 %v2349_v3, %v10974_v17  ;;  %v2351_v16 = vpop.f32.mrb[21].mxu0  ;;  %v6771_v22 = vpop.f32.mrb[13].mxu1  ;;  %v2410_v11 = vadd.f32 %v11031_v12, %v2390_v5 }
 0x8aa   :  { %v2397_v13 = vadd.f32 %v2351_v16, %v10977_v20  ;;  %v2353_v14 = vpop.f32.mrb[22].mxu0  ;;  %v2393_v15 = vpop.f32.mrb[14].mxu1 }
 0x8ab   :  { %v6171_v27 = vmul.f32 -1.442695, %v2396_v7  ;;  %v2354_v33 = vpop.f32.mrb[23].mxu0  ;;  %v6772_v40 = vpop.f32.mrb[15].mxu1 }
 0x8ac   :  { %v6172_v45 = vmul.f32 -1.442695, %v2397_v13 }
 0x8ad   :  { %7401 = vpow2.f32 %v6171_v27 }
 0x8ae   :  { %7403 = vpow2.f32 %v6172_v45 }
 0x8b7   :  { %v7402_v19 = vpop.eup %7401 }
 0x8b8   :  { %v2404_v48 = vadd.f32 1.0, %v7402_v19  ;;  %v7404_v52 = vpop.eup %7403 }
 0x8b9   :  { %v2405_v29 = vadd.f32 1.0, %v7404_v52 }
 0x8ba   :  { %7405 = vrcp.f32 %v2404_v48 }
 0x8c4   :  { %v7406_v59 = vpop.eup %7405 }
 0x8c5   :  { %v2411_v17 = vmul.f32 %v7406_v59, %v2410_v11 }
 0x8c7   :  { %v2412_v28 = vadd.f32 %v2411_v17, %v10998_v47  ;;  %v7552_v47 = vld [vmem:[#allocation10 + $0x1c] ss:$12 sps:$4 sm:$0xff]  }
 0x8c9   :  { %7407 = vtanh.f32 %v2412_v28 }
 0x8ca   :  { %7409 = vrcp.f32 %v2405_v29 }
 0x8d3   :  { %v7408_v20 = vpop.eup %7407 }
 0x8d4   :  { %v2414_v30 = vsub.f32 %v11035_v57, %v7408_v20  ;;  %v7410_v21 = vpop.eup %7409  ;;  %v7553_v57 = vld [vmem:[#allocation10 + $0x18] ss:$12 sps:$4 sm:$0xff]  }
 0x8d6   :  { %v2415_v38 = vmul.f32 %v7410_v21, %v2414_v30  ;;  %v7266_v30 = vld [vmem:[#allocation10 + $0x8] ss:$12 sps:$4 sm:$0xff]  }
 0x8d7   :  { %v11119_v21 = vld [vmem:[#allocation10 + $0x1c] ss:$12 sps:$4 sm:$0xff]  }
 0x8d8   :  { %v11072_v61 = vadd.f32 %v7408_v20, %v2415_v38  ;;  %v11115_v20 = vld [vmem:[#allocation10] ss:$12 sps:$4 sm:$0xff]   ;;  %v11122_v38 = vld [vmem:[#allocation10 + $0x18] ss:$12 sps:$4 sm:$0xff]  }
 0x8da   :  { %2417 = vst [vmem:[#allocation2 + $0x8] sm:$0xff] %v11072_v61  ;;  %v2421_v26 = vpack.c.bf16 %v11072_v61, %v11072_v61 }
 0x8dc   :  { %2615 = vmatmul.mubr.bf16.vlgmr.msra.gmra.mrb[24].mxu0 %v2421_v26  ;;  %6790 = vmatmul.mubr.bf16.vlgmr.msra.gmra.mrb[16].mxu1 %v2421_v26  ;;  %v11126_v26 = vld [vmem:[#allocation10 + $0x34] ss:$12 sps:$4 sm:$0xff]  }
 0x8dd   :  { %2850 = vmatpush1.bf16.msra.mxu0 %v7551_v63  ;;  %2881 = vmatprep.mubr.bf16.mxu0 %v11805_v0  ;;  %v11129_v63 = vld [vmem:[#allocation10 + $0x30] ss:$12 sps:$4 sm:$0xff]  }
 0x8de   :  { %2851 = vmatprep.subr.bf16.mxu0 %v7552_v47  ;;  %6809 = vmatprep.mubr.msk.bf16.mxu1 %vm9344_vm0, %v11807_v42  ;;  %v7274_v47 = vld [vmem:[#allocation10 + $0x38] ss:$12 sps:$4 sm:$0xff]  }
 0x8e1   :  { %2852 = vmatpush1.bf16.msra.mxu0 %v7553_v57  ;;  %v11133_v57 = vld [vmem:[#allocation10 + $0x4c] ss:$12 sps:$4 sm:$0xff]  }
 0x8e2   :  { %2853 = vmatprep.subr.bf16.mxu0 %v10882_v34  ;;  %v7255_v34 = vld [vmem:[#allocation10 + $0x8] ss:$12 sps:$4 sm:$0xff]  }
 0x8e3   :  { %6794 = vmatpush3.bf16.msra.mxu1 %v7255_v34  ;;  %v11136_v34 = vld [vmem:[#allocation10 + $0x48] ss:$12 sps:$4 sm:$0xff]  }
 0x8e4   :  { %6795 = vmatprep.subr.bf16.mxu1 %v11807_v42 }
 0x8e5   :  { %2854 = vmatpush1.bf16.msra.mxu0 %v10884_v35  ;;  %v7256_v35 = vld [vmem:[#allocation10 + $0x20] ss:$12 sps:$4 sm:$0xff]  }
 0x8e6   :  { %2855 = vmatprep.subr.bf16.mxu0 %v10886_v37  ;;  %v7257_v37 = vld [vmem:[#allocation10 + $0x38] ss:$12 sps:$4 sm:$0xff]  }
 0x8e7   :  { %6796 = vmatpush3.bf16.msra.mxu1 %v7256_v35  ;;  %v7278_v35 = vld [vmem:[#allocation10 + $0x50] ss:$12 sps:$4 sm:$0xff]  }
 0x8e8   :  { %6797 = vmatprep.subr.bf16.mxu1 %v11807_v42 }
 0x8e9   :  { %2856 = vmatpush1.bf16.msra.mxu0 %v10890_v41  ;;  %v7258_v41 = vld [vmem:[#allocation10 + $0x50] ss:$12 sps:$4 sm:$0xff]  }
 0x8ea   :  { %2857 = vmatprep.subr.bf16.mxu0 %v10893_v43  ;;  %v7259_v43 = vld [vmem:[#allocation10 + $0x68] ss:$12 sps:$4 sm:$0xff]  }
 0x8eb   :  { %6798 = vmatpush3.bf16.msra.mxu1 %v7257_v37  ;;  %v11140_v37 = vld [vmem:[#allocation10 + $0x60] ss:$12 sps:$4 sm:$0xff]  }
 0x8ec   :  { %6799 = vmatprep.subr.bf16.mxu1 %v11807_v42 }
 0x8ed   :  { %2858 = vmatpush1.bf16.msra.mxu0 %v10898_v46  ;;  %v7260_v46 = vld [vmem:[#allocation10 + $0x80] ss:$12 sps:$4 sm:$0xff]  }
 0x8ee   :  { %2859 = vmatprep.subr.bf16.mxu0 %v10900_v49  ;;  %v7261_v49 = vld [vmem:[#allocation10 + $0x98] ss:$12 sps:$4 sm:$0xff]  }
 0x8ef   :  { %6800 = vmatpush3.bf16.msra.mxu1 %v7258_v41  ;;  %v11142_v41 = vld [vmem:[#allocation10 + $0x64] ss:$12 sps:$4 sm:$0xff]  }
 0x8f0   :  { %6801 = vmatprep.subr.bf16.mxu1 %v11807_v42 }
 0x8f1   :  { %2860 = vmatpush1.bf16.msra.mxu0 %v10905_v51  ;;  %v7262_v51 = vld [vmem:[#allocation10 + $0xb0] ss:$12 sps:$4 sm:$0xff]  }
 0x8f2   :  { %2861 = vmatprep.subr.bf16.mxu0 %v10907_v53 }
 0x8f3   :  { %6802 = vmatpush3.bf16.msra.mxu1 %v7259_v43  ;;  %v7282_v43 = vld [vmem:[#allocation10 + $0x68] ss:$12 sps:$4 sm:$0xff]  }
 0x8f4   :  { %6803 = vmatprep.subr.bf16.mxu1 %v11807_v42 }
 0x8f5   :  { %2862 = vmatpush1.bf16.msra.mxu0 %v10913_v55 }
 0x8f6   :  { %2863 = vmatprep.subr.bf16.mxu0 %v10917_v56 }
 0x8f7   :  { %6804 = vmatpush3.bf16.msra.mxu1 %v7260_v46  ;;  %v11145_v46 = vld [vmem:[#allocation10 + $0x7c] ss:$12 sps:$4 sm:$0xff]  }
 0x8f8   :  { %6805 = vmatprep.subr.bf16.mxu1 %v11807_v42 }
 0x8f9   :  { %2864 = vmatpush1.bf16.msra.mxu0 %v10922_v58 }
 0x8fb   :  { %6806 = vmatpush3.bf16.msra.mxu1 %v7261_v49  ;;  %v11149_v49 = vld [vmem:[#allocation10 + $0x78] ss:$12 sps:$4 sm:$0xff]  }
 0x8fc   :  { %6807 = vmatprep.subr.bf16.mxu1 %v11807_v42 }
 0x8ff   :  { %6808 = vmatpush3.bf16.msra.mxu1 %v7262_v51  ;;  %v7286_v51 = vld [vmem:[#allocation10 + $0x80] ss:$12 sps:$4 sm:$0xff]  }
 0x900   :  { %6813 = vmatprep.subr.bf16.mxu1 %v11807_v42 }
 0x9af   :  { %v2616_v53 = vpop.f32.mrb[24].mxu0  ;;  %v2657_v55 = vpop.f32.mrb[16].mxu1 }
 0x9b0   :  { %v2663_v56 = vadd.f32 %v2616_v53, %v10983_v23  ;;  %v2618_v58 = vpop.f32.mrb[25].mxu0  ;;  %v6791_v3 = vpop.f32.mrb[17].mxu1  ;;  %v2677_v45 = vadd.f32 %v11031_v12, %v2657_v55  ;;  %v11153_v53 = vld [vmem:[#allocation10 + $0x94] ss:$12 sps:$4 sm:$0xff]   ;;  %v11156_v55 = vld [vmem:[#allocation10 + $0x90] ss:$12 sps:$4 sm:$0xff]  }
 0x9b1   :  { %v2664_v5 = vadd.f32 %v2618_v58, %v10985_v25  ;;  %v2620_v7 = vpop.f32.mrb[26].mxu0  ;;  %v2660_v16 = vpop.f32.mrb[18].mxu1  ;;  %v11160_v58 = vld [vmem:[#allocation10 + $0xac] ss:$12 sps:$4 sm:$0xff]   ;;  %v11163_v3 = vld [vmem:[#allocation10 + $0xa8] ss:$12 sps:$4 sm:$0xff]  }
 0x9b2   :  { %v6197_v22 = vmul.f32 -1.442695, %v2663_v56  ;;  %v2621_v13 = vpop.f32.mrb[27].mxu0  ;;  %v6792_v14 = vpop.f32.mrb[19].mxu1  ;;  %v7290_v56 = vld [vmem:[#allocation10 + $0x98] ss:$12 sps:$4 sm:$0xff]  }
 0x9b3   :  { %v6198_v15 = vmul.f32 -1.442695, %v2664_v5  ;;  %v7294_v5 = vld [vmem:[#allocation10 + $0xb0] ss:$12 sps:$4 sm:$0xff]  }
 0x9b4   :  { %7411 = vpow2.f32 %v6197_v22 }
 0x9b5   :  { %7413 = vpow2.f32 %v6198_v15 }
 0x9be   :  { %v7412_v27 = vpop.eup %7411 }
 0x9bf   :  { %v2671_v33 = vadd.f32 1.0, %v7412_v27  ;;  %v7414_v40 = vpop.eup %7413 }
 0x9c0   :  { %v2672_v52 = vadd.f32 1.0, %v7414_v40 }
 0x9c1   :  { %7415 = vrcp.f32 %v2671_v33 }
 0x9cb   :  { %v7416_v19 = vpop.eup %7415 }
 0x9cc   :  { %v2678_v23 = vmul.f32 %v7416_v19, %v2677_v45 }
 0x9ce   :  { %v2679_v48 = vadd.f32 %v2678_v23, %v10990_v36  ;;  %v11113_v36 = vld [vmem:[#allocation10 + $0x4] ss:$12 sps:$4 sm:$0xff]  }
 0x9cf   :  { %3116 = vmatprep.subr.bf16.mxu0 %v11113_v36 }
 0x9d0   :  { %7417 = vtanh.f32 %v2679_v48 }
 0x9d1   :  { %7419 = vrcp.f32 %v2672_v52 }
 0x9da   :  { %v7418_v25 = vpop.eup %7417 }
 0x9db   :  { %v2681_v11 = vsub.f32 %v11072_v61, %v7418_v25  ;;  %v7420_v59 = vpop.eup %7419  ;;  %v7270_v61 = vld [vmem:[#allocation10 + $0x20] ss:$12 sps:$4 sm:$0xff]  }
 0x9dd   :  { %v2682_v17 = vmul.f32 %v7420_v59, %v2681_v11 }
 0x9df   :  { %v11105_v28 = vadd.f32 %v7418_v25, %v2682_v17 }
 0x9e1   :  { %2684 = vst [vmem:[#allocation2 + $0x10] sm:$0xff] %v11105_v28  ;;  %v2688_v29 = vpack.c.bf16 %v11105_v28, %v11105_v28 }
 0x9e3   :  { %2882 = vmatmul.mubr.bf16.vlgmr.msra.gmra.mrb[28].mxu0 %v2688_v29  ;;  %6810 = vmatmul.mubr.bf16.vlgmr.msra.gmra.mrb[20].mxu1 %v2688_v29 }
 0x9e4   :  { %3148 = vmatprep.mubr.bf16.mxu0 %v11805_v0  ;;  %6829 = vmatprep.mubr.msk.bf16.mxu1 %vm9344_vm0, %v11807_v42 }
 0x9e5   :  { %3117 = vmatpush1.bf16.msra.mxu0 %v11115_v20  ;;  %6814 = vmatpush3.bf16.msra.mxu1 %v7266_v30 }
 0x9e6   :  { %6815 = vmatprep.subr.bf16.mxu1 %v11807_v42  ;;  %3118 = vmatprep.subr.bf16.mxu0 %v11119_v21 }
 0x9e9   :  { %3119 = vmatpush1.bf16.msra.mxu0 %v11122_v38  ;;  %6816 = vmatpush3.bf16.msra.mxu1 %v7270_v61 }
 0x9ea   :  { %6817 = vmatprep.subr.bf16.mxu1 %v11807_v42  ;;  %3120 = vmatprep.subr.bf16.mxu0 %v11126_v26 }
 0x9ed   :  { %3121 = vmatpush1.bf16.msra.mxu0 %v11129_v63  ;;  %6818 = vmatpush3.bf16.msra.mxu1 %v7274_v47 }
 0x9ee   :  { %6819 = vmatprep.subr.bf16.mxu1 %v11807_v42  ;;  %3122 = vmatprep.subr.bf16.mxu0 %v11133_v57 }
 0x9f1   :  { %3123 = vmatpush1.bf16.msra.mxu0 %v11136_v34  ;;  %6820 = vmatpush3.bf16.msra.mxu1 %v7278_v35 }
 0x9f2   :  { %6821 = vmatprep.subr.bf16.mxu1 %v11807_v42  ;;  %3124 = vmatprep.subr.bf16.mxu0 %v11142_v41 }
 0x9f5   :  { %3125 = vmatpush1.bf16.msra.mxu0 %v11140_v37  ;;  %6822 = vmatpush3.bf16.msra.mxu1 %v7282_v43 }
 0x9f6   :  { %3126 = vmatprep.subr.bf16.mxu0 %v11145_v46  ;;  %6823 = vmatprep.subr.bf16.mxu1 %v11807_v42 }
 0x9f9   :  { %3127 = vmatpush1.bf16.msra.mxu0 %v11149_v49  ;;  %6824 = vmatpush3.bf16.msra.mxu1 %v7286_v51  ;;  %v7297_v51 = vld [vmem:[#allocation10 + $0x38] ss:$12 sps:$4 sm:$0xff]  }
 0x9fa   :  { %3128 = vmatprep.subr.bf16.mxu0 %v11153_v53  ;;  %6825 = vmatprep.subr.bf16.mxu1 %v11807_v42 }
 0x9fd   :  { %3129 = vmatpush1.bf16.msra.mxu0 %v11156_v55  ;;  %6826 = vmatpush3.bf16.msra.mxu1 %v7290_v56  ;;  %v7298_v56 = vld [vmem:[#allocation10 + $0x50] ss:$12 sps:$4 sm:$0xff]  }
 0x9fe   :  { %3130 = vmatprep.subr.bf16.mxu0 %v11160_v58  ;;  %6827 = vmatprep.subr.bf16.mxu1 %v11807_v42 }
 0xa01   :  { %3131 = vmatpush1.bf16.msra.mxu0 %v11163_v3  ;;  %6828 = vmatpush3.bf16.msra.mxu1 %v7294_v5  ;;  %v7299_v5 = vld [vmem:[#allocation10 + $0x68] ss:$12 sps:$4 sm:$0xff]  }
 0xa02   :  { %3383 = vmatprep.subr.bf16.mxu0 %v11113_v36  ;;  %6833 = vmatprep.subr.bf16.mxu1 %v11807_v42 }
 0xab6   :  { %v2883_v7 = vpop.f32.mrb[28].mxu0  ;;  %v2924_v16 = vpop.f32.mrb[20].mxu1 }
 0xab7   :  { %v2930_v22 = vadd.f32 %v2883_v7, %v10987_v32  ;;  %v2885_v13 = vpop.f32.mrb[29].mxu0  ;;  %v6811_v14 = vpop.f32.mrb[21].mxu1  ;;  %v2944_v11 = vadd.f32 %v11031_v12, %v2924_v16  ;;  %v7300_v7 = vld [vmem:[#allocation10 + $0x80] ss:$12 sps:$4 sm:$0xff]   ;;  %v7301_v16 = vld [vmem:[#allocation10 + $0x98] ss:$12 sps:$4 sm:$0xff]  }
 0xab8   :  { %v2931_v15 = vadd.f32 %v2885_v13, %v10992_v39  ;;  %v2887_v27 = vpop.f32.mrb[30].mxu0  ;;  %v2927_v33 = vpop.f32.mrb[22].mxu1 }
 0xab9   :  { %v6223_v40 = vmul.f32 -1.442695, %v2930_v22  ;;  %v2888_v45 = vpop.f32.mrb[31].mxu0  ;;  %v6812_v19 = vpop.f32.mrb[23].mxu1  ;;  %v7302_v22 = vld [vmem:[#allocation10 + $0xb0] ss:$12 sps:$4 sm:$0xff]  }
 0xaba   :  { %v6224_v23 = vmul.f32 -1.442695, %v2931_v15 }
 0xabb   :  { %7421 = vpow2.f32 %v6223_v40 }
 0xabc   :  { %7423 = vpow2.f32 %v6224_v23 }
 0xac5   :  { %v7422_v48 = vpop.eup %7421 }
 0xac6   :  { %v2938_v52 = vadd.f32 1.0, %v7422_v48  ;;  %v7424_v25 = vpop.eup %7423 }
 0xac7   :  { %v2939_v29 = vadd.f32 1.0, %v7424_v25 }
 0xac8   :  { %7425 = vrcp.f32 %v2938_v52 }
 0xad2   :  { %v7426_v59 = vpop.eup %7425 }
 0xad3   :  { %v2945_v32 = vmul.f32 %v7426_v59, %v2944_v11 }
 0xad5   :  { %v2946_v17 = vadd.f32 %v2945_v32, %v10995_v44  ;;  %v7295_v44 = vld [vmem:[#allocation10 + $0x8] ss:$12 sps:$4 sm:$0xff]  }
 0xad7   :  { %7427 = vtanh.f32 %v2946_v17 }
 0xad8   :  { %7429 = vrcp.f32 %v2939_v29 }
 0xae1   :  { %v7428_v39 = vpop.eup %7427 }
 0xae2   :  { %v2948_v30 = vsub.f32 %v11105_v28, %v7428_v39  ;;  %v7430_v61 = vpop.eup %7429  ;;  %v7296_v28 = vld [vmem:[#allocation10 + $0x20] ss:$12 sps:$4 sm:$0xff]  }
 0xae4   :  { %v2949_v47 = vmul.f32 %v7430_v61, %v2948_v30 }
 0xae6   :  { %v11175_v35 = vadd.f32 %v7428_v39, %v2949_v47 }
 0xae8   :  { %2951 = vst [vmem:[#allocation2 + $0x18] sm:$0xff] %v11175_v35  ;;  %v2955_v43 = vpack.c.bf16 %v11175_v35, %v11175_v35 }
 0xaea   :  { %3149 = vmatmul.mubr.bf16.vlgmr.msra.gmra.mrb[32].mxu0 %v2955_v43  ;;  %6830 = vmatmul.mubr.bf16.vlgmr.msra.gmra.mrb[24].mxu1 %v2955_v43 }
 0xaeb   :  { %3384 = vmatpush1.bf16.msra.mxu0 %v11115_v20  ;;  %3415 = vmatprep.mubr.bf16.mxu0 %v11805_v0 }
 0xaec   :  { %3385 = vmatprep.subr.bf16.mxu0 %v11119_v21  ;;  %6849 = vmatprep.mubr.msk.bf16.mxu1 %vm9344_vm0, %v11807_v42 }
 0xaed   :  { %6834 = vmatpush3.bf16.msra.mxu1 %v7295_v44 }
 0xaee   :  { %6835 = vmatprep.subr.bf16.mxu1 %v11807_v42 }
 0xaef   :  { %3386 = vmatpush1.bf16.msra.mxu0 %v11122_v38 }
 0xaf0   :  { %3387 = vmatprep.subr.bf16.mxu0 %v11126_v26 }
 0xaf1   :  { %6836 = vmatpush3.bf16.msra.mxu1 %v7296_v28 }
 0xaf2   :  { %6837 = vmatprep.subr.bf16.mxu1 %v11807_v42 }
 0xaf3   :  { %3388 = vmatpush1.bf16.msra.mxu0 %v11129_v63 }
 0xaf4   :  { %3389 = vmatprep.subr.bf16.mxu0 %v11133_v57 }
 0xaf5   :  { %6838 = vmatpush3.bf16.msra.mxu1 %v7297_v51  ;;  %v7304_v51 = vld [vmem:[#allocation10 + $0x20] ss:$12 sps:$4 sm:$0xff]  }
 0xaf6   :  { %6839 = vmatprep.subr.bf16.mxu1 %v11807_v42 }
 0xaf7   :  { %3390 = vmatpush1.bf16.msra.mxu0 %v11136_v34 }
 0xaf8   :  { %3391 = vmatprep.subr.bf16.mxu0 %v11142_v41 }
 0xaf9   :  { %6840 = vmatpush3.bf16.msra.mxu1 %v7298_v56  ;;  %v7305_v56 = vld [vmem:[#allocation10 + $0x38] ss:$12 sps:$4 sm:$0xff]  }
 0xafa   :  { %6841 = vmatprep.subr.bf16.mxu1 %v11807_v42 }
 0xafb   :  { %3392 = vmatpush1.bf16.msra.mxu0 %v11140_v37 }
 0xafc   :  { %3393 = vmatprep.subr.bf16.mxu0 %v11145_v46 }
 0xafd   :  { %6842 = vmatpush3.bf16.msra.mxu1 %v7299_v5  ;;  %v7306_v5 = vld [vmem:[#allocation10 + $0x50] ss:$12 sps:$4 sm:$0xff]  }
 0xafe   :  { %6843 = vmatprep.subr.bf16.mxu1 %v11807_v42 }
 0xaff   :  { %3394 = vmatpush1.bf16.msra.mxu0 %v11149_v49 }
 0xb00   :  { %3395 = vmatprep.subr.bf16.mxu0 %v11153_v53 }
 0xb01   :  { %6844 = vmatpush3.bf16.msra.mxu1 %v7300_v7  ;;  %v7307_v7 = vld [vmem:[#allocation10 + $0x68] ss:$12 sps:$4 sm:$0xff]  }
 0xb02   :  { %6845 = vmatprep.subr.bf16.mxu1 %v11807_v42 }
 0xb03   :  { %3396 = vmatpush1.bf16.msra.mxu0 %v11156_v55 }
 0xb04   :  { %3397 = vmatprep.subr.bf16.mxu0 %v11160_v58 }
 0xb05   :  { %6846 = vmatpush3.bf16.msra.mxu1 %v7301_v16  ;;  %v7308_v16 = vld [vmem:[#allocation10 + $0x80] ss:$12 sps:$4 sm:$0xff]  }
 0xb06   :  { %6847 = vmatprep.subr.bf16.mxu1 %v11807_v42 }
 0xb07   :  { %3398 = vmatpush1.bf16.msra.mxu0 %v11163_v3 }
 0xb08   :  { %3650 = vmatprep.subr.bf16.mxu0 %v11113_v36 }
 0xb09   :  { %6848 = vmatpush3.bf16.msra.mxu1 %v7302_v22  ;;  %v7310_v22 = vld [vmem:[#allocation10 + $0xb0] ss:$12 sps:$4 sm:$0xff]  }
 0xb0a   :  { %6853 = vmatprep.subr.bf16.mxu1 %v11807_v42 }
 0xbbd   :  { %v3150_v13 = vpop.f32.mrb[32].mxu0  ;;  %v3191_v14 = vpop.f32.mrb[24].mxu1 }
 0xbbe   :  { %v3197_v15 = vadd.f32 %v3150_v13, %v11000_v50  ;;  %v3152_v27 = vpop.f32.mrb[33].mxu0  ;;  %v6831_v33 = vpop.f32.mrb[25].mxu1  ;;  %v3211_v17 = vadd.f32 %v11031_v12, %v3191_v14 }
 0xbbf   :  { %v3198_v40 = vadd.f32 %v3152_v27, %v11002_v54  ;;  %v3154_v45 = vpop.f32.mrb[34].mxu0  ;;  %v3194_v19 = vpop.f32.mrb[26].mxu1 }
 0xbc0   :  { %v6249_v23 = vmul.f32 -1.442695, %v3197_v15  ;;  %v3155_v48 = vpop.f32.mrb[35].mxu0  ;;  %v6832_v52 = vpop.f32.mrb[27].mxu1 }
 0xbc1   :  { %v6250_v25 = vmul.f32 -1.442695, %v3198_v40 }
 0xbc2   :  { %7431 = vpow2.f32 %v6249_v23 }
 0xbc3   :  { %7433 = vpow2.f32 %v6250_v25 }
 0xbcc   :  { %v7432_v11 = vpop.eup %7431 }
 0xbcd   :  { %v3205_v59 = vadd.f32 1.0, %v7432_v11  ;;  %v7434_v32 = vpop.eup %7433 }
 0xbce   :  { %v3206_v30 = vadd.f32 1.0, %v7434_v32 }
 0xbcf   :  { %7435 = vrcp.f32 %v3205_v59 }
 0xbd9   :  { %v7436_v29 = vpop.eup %7435 }
 0xbda   :  { %v3212_v50 = vmul.f32 %v7436_v29, %v3211_v17 }
 0xbdc   :  { %v3213_v39 = vadd.f32 %v3212_v50, %v11012_v2  ;;  %v7303_v2 = vld [vmem:[#allocation10 + $0x8] ss:$12 sps:$4 sm:$0xff]  }
 0xbde   :  { %7437 = vtanh.f32 %v3213_v39 }
 0xbdf   :  { %7439 = vrcp.f32 %v3206_v30 }
 0xbe8   :  { %v7438_v54 = vpop.eup %7437 }
 0xbe9   :  { %v3215_v61 = vsub.f32 %v11175_v35, %v7438_v54  ;;  %v7440_v47 = vpop.eup %7439 }
 0xbeb   :  { %v3216_v43 = vmul.f32 %v7440_v47, %v3215_v61 }
 0xbed   :  { %v11212_v44 = vadd.f32 %v7438_v54, %v3216_v43 }
 0xbef   :  { %3218 = vst [vmem:[#allocation2 + $0x20] sm:$0xff] %v11212_v44  ;;  %v3222_v28 = vpack.c.bf16 %v11212_v44, %v11212_v44 }
 0xbf1   :  { %3416 = vmatmul.mubr.bf16.vlgmr.msra.gmra.mrb[36].mxu0 %v3222_v28  ;;  %6850 = vmatmul.mubr.bf16.vlgmr.msra.gmra.mrb[28].mxu1 %v3222_v28 }
 0xbf2   :  { %3651 = vmatpush1.bf16.msra.mxu0 %v11115_v20  ;;  %3682 = vmatprep.mubr.bf16.mxu0 %v11805_v0 }
 0xbf3   :  { %3652 = vmatprep.subr.bf16.mxu0 %v11119_v21  ;;  %6869 = vmatprep.mubr.msk.bf16.mxu1 %vm9344_vm0, %v11807_v42 }
 0xbf4   :  { %6854 = vmatpush3.bf16.msra.mxu1 %v7303_v2 }
 0xbf5   :  { %6855 = vmatprep.subr.bf16.mxu1 %v11807_v42 }
 0xbf6   :  { %3653 = vmatpush1.bf16.msra.mxu0 %v11122_v38 }
 0xbf7   :  { %3654 = vmatprep.subr.bf16.mxu0 %v11126_v26 }
 0xbf8   :  { %6856 = vmatpush3.bf16.msra.mxu1 %v7304_v51 }
 0xbf9   :  { %6857 = vmatprep.subr.bf16.mxu1 %v11807_v42 }
 0xbfa   :  { %3655 = vmatpush1.bf16.msra.mxu0 %v11129_v63 }
 0xbfb   :  { %3656 = vmatprep.subr.bf16.mxu0 %v11133_v57 }
 0xbfc   :  { %6858 = vmatpush3.bf16.msra.mxu1 %v7305_v56 }
 0xbfd   :  { %6859 = vmatprep.subr.bf16.mxu1 %v11807_v42 }
 0xbfe   :  { %3657 = vmatpush1.bf16.msra.mxu0 %v11136_v34 }
 0xbff   :  { %3658 = vmatprep.subr.bf16.mxu0 %v11142_v41 }
 0xc00   :  { %6860 = vmatpush3.bf16.msra.mxu1 %v7306_v5 }
 0xc01   :  { %6861 = vmatprep.subr.bf16.mxu1 %v11807_v42 }
 0xc02   :  { %3659 = vmatpush1.bf16.msra.mxu0 %v11140_v37 }
 0xc03   :  { %3660 = vmatprep.subr.bf16.mxu0 %v11145_v46 }
 0xc04   :  { %6862 = vmatpush3.bf16.msra.mxu1 %v7307_v7 }
 0xc05   :  { %6863 = vmatprep.subr.bf16.mxu1 %v11807_v42 }
 0xc06   :  { %3661 = vmatpush1.bf16.msra.mxu0 %v11149_v49 }
 0xc07   :  { %3662 = vmatprep.subr.bf16.mxu0 %v11153_v53 }
 0xc08   :  { %6864 = vmatpush3.bf16.msra.mxu1 %v7308_v16 }
 0xc09   :  { %6865 = vmatprep.subr.bf16.mxu1 %v11807_v42 }
 0xc0a   :  { %3663 = vmatpush1.bf16.msra.mxu0 %v11156_v55 }
 0xc0b   :  { %3664 = vmatprep.subr.bf16.mxu0 %v11160_v58 }
 0xc0e   :  { %3665 = vmatpush1.bf16.msra.mxu0 %v11163_v3 }
 0xc0f   :  { %3917 = vmatprep.subr.bf16.mxu0 %v11113_v36  ;;  %v7309_v36 = vld [vmem:[#allocation10 + $0x98] ss:$12 sps:$4 sm:$0xff]  }
 0xc10   :  { %6866 = vmatpush3.bf16.msra.mxu1 %v7309_v36 }
 0xc11   :  { %6867 = vmatprep.subr.bf16.mxu1 %v11807_v42 }
 0xc14   :  { %6868 = vmatpush3.bf16.msra.mxu1 %v7310_v22 }
 0xc15   :  { %6873 = vmatprep.subr.bf16.mxu1 %v11807_v42 }
 0xcc4   :  { %v3417_v13 = vpop.f32.mrb[36].mxu0  ;;  %v3458_v14 = vpop.f32.mrb[28].mxu1 }
 0xcc5   :  { %v3464_v15 = vadd.f32 %v3417_v13, %v11004_v60  ;;  %v3419_v27 = vpop.f32.mrb[37].mxu0  ;;  %v6851_v33 = vpop.f32.mrb[29].mxu1  ;;  %v3478_v17 = vadd.f32 %v11031_v12, %v3458_v14 }
 0xcc6   :  { %v3465_v40 = vadd.f32 %v3419_v27, %v11009_v1  ;;  %v3421_v45 = vpop.f32.mrb[38].mxu0  ;;  %v3461_v19 = vpop.f32.mrb[30].mxu1 }
 0xcc7   :  { %v6275_v23 = vmul.f32 -1.442695, %v3464_v15  ;;  %v3422_v48 = vpop.f32.mrb[39].mxu0  ;;  %v6852_v52 = vpop.f32.mrb[31].mxu1 }
 0xcc8   :  { %v6276_v25 = vmul.f32 -1.442695, %v3465_v40  ;;  %v4023_v48 = vld [vmem:[#allocation2 + $0x8] sm:$0xff] }
 0xcc9   :  { %7441 = vpow2.f32 %v6275_v23  ;;  %v7319_v23 = vld [vmem:[#allocation12] ss:$12 sps:$4 sm:$0xff]   ;;  %v7325_v52 = vld [vmem:[#allocation12 + $0x1c] ss:$12 sps:$4 sm:$0xff]  }
 0xcca   :  { %7443 = vpow2.f32 %v6276_v25  ;;  %v4022_v25 = vld [vmem:[#allocation2] sm:$0xff] }
 0xcd3   :  { %v7442_v11 = vpop.eup %7441 }
 0xcd4   :  { %v3472_v59 = vadd.f32 1.0, %v7442_v11  ;;  %v7444_v32 = vpop.eup %7443  ;;  %v4030_v11 = vpack.c.bf16 %v4023_v48, %v4022_v25 }
 0xcd5   :  { %v3473_v39 = vadd.f32 1.0, %v7444_v32  ;;  %v7329_v32 = vld [vmem:[#allocation12 + $0x34] ss:$12 sps:$4 sm:$0xff]  }
 0xcd6   :  { %7445 = vrcp.f32 %v3472_v59  ;;  %v7323_v59 = vld [vmem:[#allocation12 + $0x18] ss:$12 sps:$4 sm:$0xff]  }
 0xce0   :  { %v7446_v29 = vpop.eup %7445 }
 0xce1   :  { %v3479_v60 = vmul.f32 %v7446_v29, %v3478_v17  ;;  %v7330_v17 = vld [vmem:[#allocation12 + $0x38] ss:$12 sps:$4 sm:$0xff]   ;;  %v7327_v29 = vld [vmem:[#allocation12 + $0x30] ss:$12 sps:$4 sm:$0xff]  }
 0xce3   :  { %v3480_v50 = vadd.f32 %v3479_v60, %v11018_v6  ;;  %v7311_v6 = vld [vmem:[#allocation10 + $0x8] ss:$12 sps:$4 sm:$0xff]   ;;  %v7333_v60 = vld [vmem:[#allocation12 + $0x4c] ss:$12 sps:$4 sm:$0xff]  }
 0xce5   :  { %7447 = vtanh.f32 %v3480_v50  ;;  %v7334_v50 = vld [vmem:[#allocation12 + $0x50] ss:$12 sps:$4 sm:$0xff]  }
 0xce6   :  { %7449 = vrcp.f32 %v3473_v39  ;;  %v7331_v39 = vld [vmem:[#allocation12 + $0x48] ss:$12 sps:$4 sm:$0xff]  }
 0xcef   :  { %v7448_v1 = vpop.eup %7447 }
 0xcf0   :  { %v3482_v30 = vsub.f32 %v11212_v44, %v7448_v1  ;;  %v7450_v54 = vpop.eup %7449 }
 0xcf2   :  { %v3483_v61 = vmul.f32 %v7450_v54, %v3482_v30  ;;  %v7338_v30 = vld [vmem:[#allocation12 + $0x68] ss:$12 sps:$4 sm:$0xff]   ;;  %v7335_v54 = vld [vmem:[#allocation12 + $0x60] ss:$12 sps:$4 sm:$0xff]  }
 0xcf4   :  { %v11249_v47 = vadd.f32 %v7448_v1, %v3483_v61  ;;  %v7337_v1 = vld [vmem:[#allocation12 + $0x64] ss:$12 sps:$4 sm:$0xff]   ;;  %v7341_v61 = vld [vmem:[#allocation12 + $0x7c] ss:$12 sps:$4 sm:$0xff]  }
 0xcf6   :  { %3485 = vst [vmem:[#allocation2 + $0x28] sm:$0xff] %v11249_v47  ;;  %v3489_v43 = vpack.c.bf16 %v11249_v47, %v11249_v47 }
 0xcf8   :  { %3683 = vmatmul.mubr.bf16.vlgmr.msra.gmra.mrb[40].mxu0 %v3489_v43  ;;  %6870 = vmatmul.mubr.bf16.vlgmr.msra.gmra.mrb[32].mxu1 %v3489_v43  ;;  %v7342_v43 = vld [vmem:[#allocation12 + $0x80] ss:$12 sps:$4 sm:$0xff]  }
 0xcf9   :  { %3918 = vmatpush1.bf16.msra.mxu0 %v11115_v20  ;;  %3949 = vmatprep.mubr.bf16.mxu0 %v11805_v0  ;;  %v7312_v20 = vld [vmem:[#allocation10 + $0x20] ss:$12 sps:$4 sm:$0xff]  }
 0xcfa   :  { %3919 = vmatprep.subr.bf16.mxu0 %v11119_v21  ;;  %6889 = vmatprep.mubr.msk.bf16.mxu1 %vm9344_vm0, %v11807_v42  ;;  %v7313_v21 = vld [vmem:[#allocation10 + $0x38] ss:$12 sps:$4 sm:$0xff]  }
 0xcfb   :  { %6874 = vmatpush3.bf16.msra.mxu1 %v7311_v6  ;;  %v7339_v6 = vld [vmem:[#allocation12 + $0x78] ss:$12 sps:$4 sm:$0xff]  }
 0xcfc   :  { %6875 = vmatprep.subr.bf16.mxu1 %v11807_v42 }
 0xcfd   :  { %3920 = vmatpush1.bf16.msra.mxu0 %v11122_v38  ;;  %v7314_v38 = vld [vmem:[#allocation10 + $0x50] ss:$12 sps:$4 sm:$0xff]  }
 0xcfe   :  { %3921 = vmatprep.subr.bf16.mxu0 %v11126_v26  ;;  %v7315_v26 = vld [vmem:[#allocation10 + $0x68] ss:$12 sps:$4 sm:$0xff]  }
 0xcff   :  { %6876 = vmatpush3.bf16.msra.mxu1 %v7312_v20  ;;  %v7345_v20 = vld [vmem:[#allocation12 + $0x94] ss:$12 sps:$4 sm:$0xff]  }
 0xd00   :  { %6877 = vmatprep.subr.bf16.mxu1 %v11807_v42 }
 0xd01   :  { %3922 = vmatpush1.bf16.msra.mxu0 %v11129_v63  ;;  %v7321_v63 = vld [vmem:[#allocation12 + $0x4] ss:$12 sps:$4 sm:$0xff]  }
 0xd02   :  { %3923 = vmatprep.subr.bf16.mxu0 %v11133_v57  ;;  %v7316_v57 = vld [vmem:[#allocation10 + $0x80] ss:$12 sps:$4 sm:$0xff]  }
 0xd03   :  { %6878 = vmatpush3.bf16.msra.mxu1 %v7313_v21  ;;  %v7346_v21 = vld [vmem:[#allocation12 + $0x98] ss:$12 sps:$4 sm:$0xff]  }
 0xd04   :  { %6879 = vmatprep.subr.bf16.mxu1 %v11807_v42 }
 0xd05   :  { %3924 = vmatpush1.bf16.msra.mxu0 %v11136_v34  ;;  %v7317_v34 = vld [vmem:[#allocation10 + $0x98] ss:$12 sps:$4 sm:$0xff]  }
 0xd06   :  { %3925 = vmatprep.subr.bf16.mxu0 %v11142_v41  ;;  %v7322_v41 = vld [vmem:[#allocation12 + $0x8] ss:$12 sps:$4 sm:$0xff]  }
 0xd07   :  { %6880 = vmatpush3.bf16.msra.mxu1 %v7314_v38  ;;  %v7343_v38 = vld [vmem:[#allocation12 + $0x90] ss:$12 sps:$4 sm:$0xff]  }
 0xd08   :  { %6881 = vmatprep.subr.bf16.mxu1 %v11807_v42 }
 0xd09   :  { %3926 = vmatpush1.bf16.msra.mxu0 %v11140_v37  ;;  %v7318_v37 = vld [vmem:[#allocation10 + $0xb0] ss:$12 sps:$4 sm:$0xff]  }
 0xd0a   :  { %3927 = vmatprep.subr.bf16.mxu0 %v11145_v46 }
 0xd0b   :  { %6882 = vmatpush3.bf16.msra.mxu1 %v7315_v26  ;;  %v7349_v26 = vld [vmem:[#allocation12 + $0xac] ss:$12 sps:$4 sm:$0xff]  }
 0xd0c   :  { %6883 = vmatprep.subr.bf16.mxu1 %v11807_v42 }
 0xd0d   :  { %3928 = vmatpush1.bf16.msra.mxu0 %v11149_v49 }
 0xd0e   :  { %3929 = vmatprep.subr.bf16.mxu0 %v11153_v53 }
 0xd0f   :  { %6884 = vmatpush3.bf16.msra.mxu1 %v7316_v57  ;;  %v7347_v57 = vld [vmem:[#allocation12 + $0xa8] ss:$12 sps:$4 sm:$0xff]  }
 0xd10   :  { %6885 = vmatprep.subr.bf16.mxu1 %v11807_v42 }
 0xd11   :  { %3930 = vmatpush1.bf16.msra.mxu0 %v11156_v55 }
 0xd12   :  { %3931 = vmatprep.subr.bf16.mxu0 %v11160_v58 }
 0xd13   :  { %6886 = vmatpush3.bf16.msra.mxu1 %v7317_v34  ;;  %v4024_v34 = vld [vmem:[#allocation2 + $0x10] sm:$0xff] }
 0xd14   :  { %6887 = vmatprep.subr.bf16.mxu1 %v11807_v42 }
 0xd15   :  { %3932 = vmatpush1.bf16.msra.mxu0 %v11163_v3 }
 0xd16   :  { %4210 = vmatprep.subr.bf16.mxu0 %v7321_v63  ;;  %v7350_v63 = vld [vmem:[#allocation12 + $0xb0] ss:$12 sps:$4 sm:$0xff]  }
 0xd17   :  { %6888 = vmatpush3.bf16.msra.mxu1 %v7318_v37  ;;  %v4031_v37 = vpack.c.bf16 %v11175_v35, %v4024_v34  ;;  %v11303_v35 = vld [vmem:[#allocation13 + $0x1c] ss:$12 sps:$4 sm:$0xff]  }
 0xd18   :  { %6893 = vmatprep.subr.bf16.mxu1 %v7322_v41 }
 0xdcb   :  { %v3684_v46 = vpop.f32.mrb[40].mxu0  ;;  %v3725_v49 = vpop.f32.mrb[32].mxu1 }
 0xdcc   :  { %v3731_v53 = vadd.f32 %v3684_v46, %v11020_v10  ;;  %v3686_v55 = vpop.f32.mrb[41].mxu0  ;;  %v6871_v58 = vpop.f32.mrb[33].mxu1  ;;  %v3745_v13 = vadd.f32 %v11031_v12, %v3725_v49  ;;  %v11297_v46 = vld [vmem:[#allocation13 + $0x4] ss:$12 sps:$4 sm:$0xff]   ;;  %v11299_v49 = vld [vmem:[#allocation13] ss:$12 sps:$4 sm:$0xff]  }
 0xdcd   :  { %v3732_v3 = vadd.f32 %v3686_v55, %v11022_v18  ;;  %v3688_v28 = vpop.f32.mrb[42].mxu0  ;;  %v3728_v2 = vpop.f32.mrb[34].mxu1  ;;  %v11315_v55 = vld [vmem:[#allocation13 + $0x4c] ss:$12 sps:$4 sm:$0xff]   ;;  %v11317_v58 = vld [vmem:[#allocation13 + $0x48] ss:$12 sps:$4 sm:$0xff]  }
 0xdce   :  { %v6301_v51 = vmul.f32 -1.442695, %v3731_v53  ;;  %v3689_v56 = vpop.f32.mrb[43].mxu0  ;;  %v6872_v5 = vpop.f32.mrb[35].mxu1  ;;  %v11311_v53 = vld [vmem:[#allocation13 + $0x30] ss:$12 sps:$4 sm:$0xff]  }
 0xdcf   :  { %v6302_v7 = vmul.f32 -1.442695, %v3732_v3  ;;  %v11321_v3 = vld [vmem:[#allocation13 + $0x64] ss:$12 sps:$4 sm:$0xff]   ;;  %v11323_v28 = vld [vmem:[#allocation13 + $0x60] ss:$12 sps:$4 sm:$0xff]  }
 0xdd0   :  { %7451 = vpow2.f32 %v6301_v51  ;;  %v11327_v2 = vld [vmem:[#allocation13 + $0x7c] ss:$12 sps:$4 sm:$0xff]   ;;  %v11329_v51 = vld [vmem:[#allocation13 + $0x78] ss:$12 sps:$4 sm:$0xff]   ;;  %v11333_v56 = vld [vmem:[#allocation13 + $0x94] ss:$12 sps:$4 sm:$0xff]  }
 0xdd1   :  { %7453 = vpow2.f32 %v6302_v7  ;;  %v11335_v5 = vld [vmem:[#allocation13 + $0x8] ss:$12 sps:$4 sm:$0xff]   ;;  %v11337_v7 = vld [vmem:[#allocation13 + $0x90] ss:$12 sps:$4 sm:$0xff]  }
 0xdda   :  { %v7452_v16 = vpop.eup %7451 }
 0xddb   :  { %v3739_v36 = vadd.f32 1.0, %v7452_v16  ;;  %v7454_v22 = vpop.eup %7453  ;;  %v11339_v16 = vld [vmem:[#allocation13 + $0xac] ss:$12 sps:$4 sm:$0xff]  }
 0xddc   :  { %v3740_v27 = vadd.f32 1.0, %v7454_v22  ;;  %v11347_v22 = vld [vmem:[#allocation13 + $0xa8] ss:$12 sps:$4 sm:$0xff]  }
 0xddd   :  { %7455 = vrcp.f32 %v3739_v36  ;;  %v11343_v36 = vld [vmem:[#allocation13 + $0x20] ss:$12 sps:$4 sm:$0xff]  }
 0xde7   :  { %v7456_v14 = vpop.eup %7455 }
 0xde8   :  { %v3746_v10 = vmul.f32 %v7456_v14, %v3745_v13  ;;  %v11353_v13 = vld [vmem:[#allocation13 + $0x38] ss:$12 sps:$4 sm:$0xff]   ;;  %v11357_v14 = vld [vmem:[#allocation13 + $0x50] ss:$12 sps:$4 sm:$0xff]  }
 0xdea   :  { %v3747_v15 = vadd.f32 %v3746_v10, %v11007_v62  ;;  %v7326_v62 = vld [vmem:[#allocation12 + $0x20] ss:$12 sps:$4 sm:$0xff]   ;;  %v11361_v10 = vld [vmem:[#allocation13 + $0x68] ss:$12 sps:$4 sm:$0xff]  }
 0xdec   :  { %7457 = vtanh.f32 %v3747_v15  ;;  %v11365_v15 = vld [vmem:[#allocation13 + $0x80] ss:$12 sps:$4 sm:$0xff]  }
 0xded   :  { %7459 = vrcp.f32 %v3740_v27  ;;  %v11369_v27 = vld [vmem:[#allocation13 + $0x98] ss:$12 sps:$4 sm:$0xff]  }
 0xdf6   :  { %v7458_v18 = vpop.eup %7457 }
 0xdf7   :  { %v3749_v33 = vsub.f32 %v11249_v47, %v7458_v18  ;;  %v7460_v40 = vpop.eup %7459 }
 0xdf9   :  { %v3750_v45 = vmul.f32 %v7460_v40, %v3749_v33 }
 0xdfb   :  { %v11284_v19 = vadd.f32 %v7458_v18, %v3750_v45  ;;  %v11373_v18 = vld [vmem:[#allocation13 + $0xb0] ss:$12 sps:$4 sm:$0xff]  }
 0xdfd   :  { %3752 = vst [vmem:[#allocation2 + $0x30] sm:$0xff] %v11284_v19  ;;  %v3756_v12 = vpack.c.bf16 %v11284_v19, %v11284_v19 }
 0xdff   :  { %3950 = vmatmul.mubr.bf16.vlgmr.msra.gmra.mrb[44].mxu0 %v3756_v12  ;;  %6890 = vmatmul.mubr.bf16.vlgmr.msra.gmra.mrb[36].mxu1 %v3756_v12 }
 0xe00   :  { %4211 = vmatpush1.bf16.msra.mxu0 %v7319_v23  ;;  %6894 = vmatpush3.bf16.msra.mxu1 %v7322_v41  ;;  %v4032_v41 = vpack.c.bf16 %v11249_v47, %v11212_v44  ;;  %v11305_v44 = vld [vmem:[#allocation13 + $0x18] ss:$12 sps:$4 sm:$0xff]   ;;  %v11309_v47 = vld [vmem:[#allocation13 + $0x34] ss:$12 sps:$4 sm:$0xff]  }
 0xe01   :  { %6909 = vmatprep.mubr.bf16.mxu1 %v4030_v11  ;;  %4212 = vmatprep.subr.bf16.mxu0 %v7325_v52 }
 0xe02   :  { %6895 = vmatprep.subr.bf16.mxu1 %v7326_v62  ;;  %4242 = vmatprep.mubr.bf16.mxu0 %v11805_v0 }
 0xe04   :  { %4213 = vmatpush1.bf16.msra.mxu0 %v7323_v59  ;;  %6896 = vmatpush3.bf16.msra.mxu1 %v7326_v62 }
 0xe05   :  { %4214 = vmatprep.subr.bf16.mxu0 %v7329_v32  ;;  %6897 = vmatprep.subr.bf16.mxu1 %v7330_v17 }
 0xe08   :  { %4215 = vmatpush1.bf16.msra.mxu0 %v7327_v29  ;;  %6898 = vmatpush3.bf16.msra.mxu1 %v7330_v17 }
 0xe09   :  { %4216 = vmatprep.subr.bf16.mxu0 %v7333_v60  ;;  %6899 = vmatprep.subr.bf16.mxu1 %v7334_v50 }
 0xe0c   :  { %4217 = vmatpush1.bf16.msra.mxu0 %v7331_v39  ;;  %6900 = vmatpush3.bf16.msra.mxu1 %v7334_v50 }
 0xe0d   :  { %4218 = vmatprep.subr.bf16.mxu0 %v7337_v1  ;;  %6901 = vmatprep.subr.bf16.mxu1 %v7338_v30 }
 0xe10   :  { %4219 = vmatpush1.bf16.msra.mxu0 %v7335_v54  ;;  %6902 = vmatpush3.bf16.msra.mxu1 %v7338_v30 }
 0xe11   :  { %4220 = vmatprep.subr.bf16.mxu0 %v7341_v61  ;;  %6903 = vmatprep.subr.bf16.mxu1 %v7342_v43 }
 0xe14   :  { %4221 = vmatpush1.bf16.msra.mxu0 %v7339_v6  ;;  %6904 = vmatpush3.bf16.msra.mxu1 %v7342_v43 }
 0xe15   :  { %4222 = vmatprep.subr.bf16.mxu0 %v7345_v20  ;;  %6905 = vmatprep.subr.bf16.mxu1 %v7346_v21 }
 0xe18   :  { %4223 = vmatpush1.bf16.msra.mxu0 %v7343_v38  ;;  %6906 = vmatpush3.bf16.msra.mxu1 %v7346_v21 }
 0xe19   :  { %4224 = vmatprep.subr.bf16.mxu0 %v7349_v26  ;;  %6907 = vmatprep.subr.bf16.mxu1 %v7350_v63 }
 0xe1c   :  { %4225 = vmatpush1.bf16.msra.mxu0 %v7347_v57  ;;  %6908 = vmatpush3.bf16.msra.mxu1 %v7350_v63 }
 0xe1d   :  { %6917 = vmatprep.subr.bf16.mxu1 %v11807_v42  ;;  %4535 = vmatprep.subr.bf16.mxu0 %v11297_v46 }
 0xe1f   :  { %4243 = vmatmul.mubr.bf16.vlgmr.msra.gmra.mrb[48].mxu0 %v4030_v11  ;;  %6910 = vmatmul.mubr.bf16.vlgmr.msra.gmra.mrb[40].mxu1 %v4031_v37 }
 0xe20   :  { %6913 = vmatprep.mubr.bf16.mxu1 %v4032_v41  ;;  %4252 = vmatprep.mubr.bf16.mxu0 %v11805_v0 }
 0xe21   :  { %4536 = vmatpush1.bf16.msra.mxu0 %v11299_v49  ;;  %6918 = vmatpush3.bf16.msra.mxu1 %v11335_v5 }
 0xe22   :  { %4537 = vmatprep.subr.bf16.mxu0 %v11303_v35  ;;  %6919 = vmatprep.subr.bf16.mxu1 %v11807_v42 }
 0xe25   :  { %4538 = vmatpush1.bf16.msra.mxu0 %v11305_v44  ;;  %6920 = vmatpush3.bf16.msra.mxu1 %v11343_v36 }
 0xe26   :  { %4539 = vmatprep.subr.bf16.mxu0 %v11309_v47  ;;  %6921 = vmatprep.subr.bf16.mxu1 %v11807_v42 }
 0xe27   :  { %4253 = vmatmul.mubr.bf16.gmra.mrb[52].mxu0 %v4031_v37 }
 0xe28   :  { %4262 = vmatprep.mubr.bf16.mxu0 %v11805_v0 }
 0xe29   :  { %4540 = vmatpush1.bf16.msra.mxu0 %v11311_v53  ;;  %6922 = vmatpush3.bf16.msra.mxu1 %v11353_v13 }
 0xe2a   :  { %4541 = vmatprep.subr.bf16.mxu0 %v11315_v55  ;;  %6923 = vmatprep.subr.bf16.mxu1 %v11807_v42 }
 0xe2d   :  { %4542 = vmatpush1.bf16.msra.mxu0 %v11317_v58  ;;  %6924 = vmatpush3.bf16.msra.mxu1 %v11357_v14 }
 0xe2e   :  { %4543 = vmatprep.subr.bf16.mxu0 %v11321_v3  ;;  %6925 = vmatprep.subr.bf16.mxu1 %v11807_v42 }
 0xe2f   :  { %4263 = vmatmul.mubr.bf16.gmra.mrb[56].mxu0 %v4032_v41 }
 0xe30   :  { %4272 = vmatprep.mubr.bf16.mxu0 %v11805_v0 }
 0xe31   :  { %4544 = vmatpush1.bf16.msra.mxu0 %v11323_v28  ;;  %6926 = vmatpush3.bf16.msra.mxu1 %v11361_v10 }
 0xe32   :  { %4545 = vmatprep.subr.bf16.mxu0 %v11327_v2  ;;  %6927 = vmatprep.subr.bf16.mxu1 %v11807_v42 }
 0xe35   :  { %4546 = vmatpush1.bf16.msra.mxu0 %v11329_v51  ;;  %6928 = vmatpush3.bf16.msra.mxu1 %v11365_v15 }
 0xe36   :  { %4547 = vmatprep.subr.bf16.mxu0 %v11333_v56  ;;  %6929 = vmatprep.subr.bf16.mxu1 %v11807_v42 }
 0xe39   :  { %4548 = vmatpush1.bf16.msra.mxu0 %v11337_v7  ;;  %6930 = vmatpush3.bf16.msra.mxu1 %v11369_v27 }
 0xe3a   :  { %4549 = vmatprep.subr.bf16.mxu0 %v11339_v16  ;;  %6931 = vmatprep.subr.bf16.mxu1 %v11807_v42 }
 0xe3d   :  { %4550 = vmatpush1.bf16.msra.mxu0 %v11347_v22  ;;  %6932 = vmatpush3.bf16.msra.mxu1 %v11373_v18 }
 0xe3e   :  { %4647 = vmatprep.subr.bf16.mxu0 %v11297_v46  ;;  %6937 = vmatprep.subr.bf16.mxu1 %v11807_v42 }
 0xed2   :  { %v3951_v33 = vpop.f32.mrb[44].mxu0  ;;  %v3992_v40 = vpop.f32.mrb[36].mxu1 }
 0xed3   :  { %v3998_v45 = vadd.f32 %v3951_v33, %v11024_v24  ;;  %v3953_v23 = vpop.f32.mrb[45].mxu0  ;;  %v6891_v48 = vpop.f32.mrb[37].mxu1  ;;  %v7554_v24 = vld [vmem:[%s11795_s5] ss:$0 sm:$0xff] }
 0xed4   :  { %v3999_v12 = vadd.f32 %v3953_v23, %v11026_v31  ;;  %v3955_v52 = vpop.f32.mrb[46].mxu0  ;;  %v3995_v25 = vpop.f32.mrb[38].mxu1  ;;  %v4012_v50 = vadd.f32 %v7554_v24, %v3992_v40 }
 0xed5   :  { %v6327_v62 = vmul.f32 -1.442695, %v3998_v45  ;;  %v3956_v11 = vpop.f32.mrb[47].mxu0  ;;  %v6892_v59 = vpop.f32.mrb[39].mxu1 }
 0xed6   :  { %v6328_v32 = vmul.f32 -1.442695, %v3999_v12 }
 0xed7   :  { %7461 = vpow2.f32 %v6327_v62 }
 0xed8   :  { %7463 = vpow2.f32 %v6328_v32 }
 0xee1   :  { %v7462_v17 = vpop.eup %7461 }
 0xee2   :  { %v4006_v29 = vadd.f32 1.0, %v7462_v17  ;;  %v7464_v60 = vpop.eup %7463 }
 0xee3   :  { %v4007_v30 = vadd.f32 1.0, %v7464_v60 }
 0xee4   :  { %7465 = vrcp.f32 %v4006_v29 }
 0xeee   :  { %v7466_v39 = vpop.eup %7465 }
 0xeef   :  { %v4013_v1 = vmul.f32 %v7466_v39, %v4012_v50  ;;  %v11828_v39 = vsub.s32 1, %v10963_v8 }
 0xef1   :  { %v4014_v31 = vadd.f32 %v4013_v1, %v11015_v4 }
 0xef2   :  { %v11384_v54 = vpop.f32.mrb[48].mxu0  ;;  %v11386_v61 = vpop.f32.mrb[40].mxu1 }
 0xef3   :  { %7467 = vtanh.f32 %v4014_v31  ;;  %v11388_v43 = vpop.f32.mrb[49].mxu0  ;;  %v11390_v6 = vpop.f32.mrb[41].mxu1 }
 0xef4   :  { %v11392_v20 = vpop.f32.mrb[50].mxu0  ;;  %v11394_v21 = vpop.f32.mrb[42].mxu1  ;;  %7469 = vrcp.f32 %v4007_v30 }
 0xef5   :  { %v11396_v38 = vpop.f32.mrb[51].mxu0  ;;  %v11398_v26 = vpop.f32.mrb[43].mxu1 }
 0xefa   :  { %v11400_v4 = vpop.f32.mrb[52].mxu0 }
 0xefb   :  { %v11402_v63 = vpop.f32.mrb[53].mxu0 }
 0xefc   :  { %v11404_v57 = vpop.f32.mrb[54].mxu0 }
 0xefd   :  { %v7468_v34 = vpop.eup %7467  ;;  %v11406_v37 = vpop.f32.mrb[55].mxu0 }
 0xefe   :  { %v4016_v41 = vsub.f32 %v11284_v19, %v7468_v34  ;;  %v7470_v33 = vpop.eup %7469 }
 0xf00   :  { %v4017_v40 = vmul.f32 %v7470_v33, %v4016_v41 }
 0xf02   :  { %v4018_v45 = vadd.f32 %v7468_v34, %v4017_v40  ;;  %v11409_v23 = vpop.f32.mrb[56].mxu0 }
 0xf03   :  { %v11411_v48 = vpop.f32.mrb[57].mxu0 }
 0xf04   :  { %4019 = vst [vmem:[#allocation2 + $0x38] sm:$0xff] %v4018_v45  ;;  %v11413_v12 = vpop.f32.mrb[58].mxu0  ;;  %v4033_v52 = vpack.c.bf16 %v4018_v45, %v11284_v19  ;;  %v4020_v19 = vld [vmem:[%s11798_s8] sm:$0x7] }
 0xf05   :  { %v11416_v25 = vpop.f32.mrb[59].mxu0  ;;  %v11475_v60 = vrot.slane %v4020_v19, %v1576_v9  ;;  %v11483_v1 = vrot.slane %v4020_v19, %v11828_v39 }
 0xf06   :  { %4273 = vmatmul.mubr.bf16.gmra.mrb[60].mxu0 %v4033_v52  ;;  %6914 = vmatmul.mubr.bf16.gmra.mrb[44].mxu1 %v4033_v52 }
 0xf07   :  { %4567 = vmatprep.mubr.bf16.mxu0 %v11805_v0  ;;  %6933 = vmatprep.mubr.msk.bf16.mxu1 %vm9344_vm0, %v11807_v42  ;;  %v4245_v31 = vadd.f32 %v11384_v54, %v11475_v60  ;;  %v4247_v30 = vadd.f32 %v11388_v43, %v11483_v1  ;;  %v11492_v54 = vld [vmem:[%s11799_s9] ss:$0 sm:$0xff]  ;;  %v11829_v43 = vsub.s32 2, %v10963_v8 }
 0xf0e   :  { %4568 = vmatmul.mubr.bf16.vlgmr.msra.gmra.mrb[64].mxu0 %v11805_v0  ;;  %6934 = vmatmul.mubr.bf16.vlgmr.msra.gmra.mrb[48].mxu1 %v11805_v0 }
 0xf0f   :  { %4648 = vmatpush1.bf16.msra.mxu0 %v11299_v49  ;;  %6938 = vmatpush3.bf16.msra.mxu1 %v11335_v5 }
 0xf10   :  { %4649 = vmatprep.subr.bf16.mxu0 %v11303_v35  ;;  %6939 = vmatprep.subr.bf16.mxu1 %v11807_v42 }
 0xf11   :  { %4679 = vmatprep.mubr.bf16.mxu0 %v11805_v0  ;;  %6953 = vmatprep.mubr.msk.bf16.mxu1 %vm9344_vm0, %v11807_v42 }
 0xf13   :  { %4650 = vmatpush1.bf16.msra.mxu0 %v11305_v44  ;;  %6940 = vmatpush3.bf16.msra.mxu1 %v11343_v36 }
 0xf14   :  { %4651 = vmatprep.subr.bf16.mxu0 %v11309_v47  ;;  %6941 = vmatprep.subr.bf16.mxu1 %v11807_v42 }
 0xf17   :  { %4652 = vmatpush1.bf16.msra.mxu0 %v11311_v53  ;;  %6942 = vmatpush3.bf16.msra.mxu1 %v11353_v13 }
 0xf18   :  { %4653 = vmatprep.subr.bf16.mxu0 %v11315_v55  ;;  %6943 = vmatprep.subr.bf16.mxu1 %v11807_v42 }
 0xf1b   :  { %4654 = vmatpush1.bf16.msra.mxu0 %v11317_v58  ;;  %6944 = vmatpush3.bf16.msra.mxu1 %v11357_v14 }
 0xf1c   :  { %4655 = vmatprep.subr.bf16.mxu0 %v11321_v3  ;;  %6945 = vmatprep.subr.bf16.mxu1 %v11807_v42 }
 0xf1f   :  { %4656 = vmatpush1.bf16.msra.mxu0 %v11323_v28  ;;  %6946 = vmatpush3.bf16.msra.mxu1 %v11361_v10 }
 0xf20   :  { %4657 = vmatprep.subr.bf16.mxu0 %v11327_v2  ;;  %6947 = vmatprep.subr.bf16.mxu1 %v11807_v42 }
 0xf23   :  { %4658 = vmatpush1.bf16.msra.mxu0 %v11329_v51  ;;  %6948 = vmatpush3.bf16.msra.mxu1 %v11365_v15 }
 0xf24   :  { %4659 = vmatprep.subr.bf16.mxu0 %v11333_v56  ;;  %6949 = vmatprep.subr.bf16.mxu1 %v11807_v42 }
 0xf27   :  { %4660 = vmatpush1.bf16.msra.mxu0 %v11337_v7  ;;  %6950 = vmatpush3.bf16.msra.mxu1 %v11369_v27 }
 0xf28   :  { %4661 = vmatprep.subr.bf16.mxu0 %v11339_v16  ;;  %6951 = vmatprep.subr.bf16.mxu1 %v11807_v42 }
 0xf2b   :  { %4662 = vmatpush1.bf16.msra.mxu0 %v11347_v22  ;;  %6952 = vmatpush3.bf16.msra.mxu1 %v11373_v18 }
 0xf2c   :  { %4753 = vmatprep.subr.bf16.mxu0 %v11297_v46  ;;  %6957 = vmatprep.subr.bf16.mxu1 %v11807_v42 }
 0xfd9   :  { %v11461_v62 = vpop.f32.mrb[60].mxu0  ;;  %v11463_v11 = vpop.f32.mrb[44].mxu1 }
 0xfda   :  { %11823 = vst [vmem:[#allocation153_spill] sm:$0xff] %v11463_v11  ;;  %v11465_v59 = vpop.f32.mrb[61].mxu0  ;;  %v11467_v32 = vpop.f32.mrb[45].mxu1 }
 0xfdb   :  { %11824 = vst [vmem:[#allocation154_spill] sm:$0xff] %v11465_v59  ;;  %v11469_v17 = vpop.f32.mrb[62].mxu0  ;;  %v11471_v29 = vpop.f32.mrb[46].mxu1 }
 0xfdc   :  { %11825 = vst [vmem:[#allocation155_spill] sm:$0xff] %v11469_v17  ;;  %11826 = vst [vmem:[#allocation156_spill] sm:$0xff] %v11471_v29  ;;  %v11477_v24 = vpop.f32.mrb[63].mxu0  ;;  %v11479_v50 = vpop.f32.mrb[47].mxu1 }
 0xfdd   :  { %11827 = vst [vmem:[#allocation157_spill] sm:$0xff] %v11477_v24 }
 0xfe1   :  { %v4569_v34 = vpop.f32.mrb[64].mxu0  ;;  %v4610_v41 = vpop.f32.mrb[48].mxu1 }
 0xfe2   :  { %v4616_v33 = vadd.f32 %v4569_v34, %v4245_v31  ;;  %v4571_v40 = vpop.f32.mrb[65].mxu0  ;;  %v6935_v9 = vpop.f32.mrb[49].mxu1  ;;  %v11496_v31 = vrot.slane %v4020_v19, %v11829_v43  ;;  %v11831_v19 = vmov 0  }
 0xfe3   :  { %v4617_v45 = vadd.f32 %v4571_v40, %v4247_v30  ;;  %v4573_v52 = vpop.f32.mrb[66].mxu0  ;;  %v4613_v0 = vpop.f32.mrb[50].mxu1 }
 0xfe4   :  { %v6377_v42 = vmul.f32 -1.442695, %v4616_v33  ;;  %v4574_v29 = vpop.f32.mrb[67].mxu0  ;;  %v6936_v24 = vpop.f32.mrb[51].mxu1  ;;  %v4636_v0 = vadd.f32 %v11492_v54, %v4610_v41  ;;  %v4249_v41 = vadd.f32 %v11392_v20, %v11475_v60  ;;  %v4251_v52 = vadd.f32 %v11396_v38, %v11483_v1 }
 0xfe5   :  { %v6378_v39 = vmul.f32 -1.442695, %v4617_v45 }
 0xfe6   :  { %7471 = vpow2.f32 %v6377_v42  ;;  %v4318_v42 = vadd.f32 %v11390_v6, %v11496_v31  ;;  %v11830_v6 = vmov 0.0  }
 0xfe7   :  { %7473 = vpow2.f32 %v6378_v39 }
 0xff0   :  { %v7472_v17 = vpop.eup %7471 }
 0xff1   :  { %v4624_v11 = vadd.f32 1.0, %v7472_v17  ;;  %v7474_v30 = vpop.eup %7473 }
 0xff2   :  { %v4625_v17 = vadd.f32 1.0, %v7474_v30 }
 0xff3   :  { %7475 = vrcp.f32 %v4624_v11 }
 0xffd   :  { %v7476_v29 = vpop.eup %7475 }
 0xffe   :  { %v4637_v24 = vmul.f32 %v7476_v29, %v4636_v0 }
0x1000   :  { %v4638_v34 = vadd.f32 %v4637_v24, %v4318_v42 }
0x1002   :  { %7477 = vtanh.f32 %v4638_v34 }
0x1003   :  { %7479 = vrcp.f32 %v4625_v17 }
0x100c   :  { %v7478_v11 = vpop.eup %7477 }
0x100d   :  { %v4640_v33 = vsub.f32 0.0, %v7478_v11  ;;  %v7480_v40 = vpop.eup %7479 }
0x100f   :  { %v4641_v9 = vmul.f32 %v7480_v40, %v4640_v33 }
0x1011   :  { %v11501_v45 = vadd.f32 %v7478_v11, %v4641_v9 }
0x1013   :  { %v4646_v8 = vpack.c.bf16 %v11501_v45, %v11501_v45 }
0x1015   :  { %4680 = vmatmul.mubr.bf16.vlgmr.msra.gmra.mrb[68].mxu0 %v4646_v8  ;;  %6954 = vmatmul.mubr.bf16.vlgmr.msra.gmra.mrb[52].mxu1 %v4646_v8 }
0x1016   :  { %4754 = vmatpush1.bf16.msra.mxu0 %v11299_v49  ;;  %6958 = vmatpush3.bf16.msra.mxu1 %v11335_v5 }
0x1017   :  { %4755 = vmatprep.subr.bf16.mxu0 %v11303_v35  ;;  %6959 = vmatprep.subr.bf16.mxu1 %v11830_v6 }
0x1018   :  { %4785 = vmatprep.mubr.bf16.mxu0 %v11831_v19  ;;  %6973 = vmatprep.mubr.msk.bf16.mxu1 %vm9344_vm0, %v11830_v6 }
0x101a   :  { %4756 = vmatpush1.bf16.msra.mxu0 %v11305_v44  ;;  %6960 = vmatpush3.bf16.msra.mxu1 %v11343_v36 }
0x101b   :  { %4757 = vmatprep.subr.bf16.mxu0 %v11309_v47  ;;  %6961 = vmatprep.subr.bf16.mxu1 %v11830_v6 }
0x101e   :  { %4758 = vmatpush1.bf16.msra.mxu0 %v11311_v53  ;;  %6962 = vmatpush3.bf16.msra.mxu1 %v11353_v13 }
0x101f   :  { %4759 = vmatprep.subr.bf16.mxu0 %v11315_v55  ;;  %6963 = vmatprep.subr.bf16.mxu1 %v11830_v6 }
0x1022   :  { %4760 = vmatpush1.bf16.msra.mxu0 %v11317_v58  ;;  %6964 = vmatpush3.bf16.msra.mxu1 %v11357_v14 }
0x1023   :  { %4761 = vmatprep.subr.bf16.mxu0 %v11321_v3  ;;  %6965 = vmatprep.subr.bf16.mxu1 %v11830_v6 }
0x1026   :  { %4762 = vmatpush1.bf16.msra.mxu0 %v11323_v28  ;;  %6966 = vmatpush3.bf16.msra.mxu1 %v11361_v10 }
0x1027   :  { %4763 = vmatprep.subr.bf16.mxu0 %v11327_v2  ;;  %6967 = vmatprep.subr.bf16.mxu1 %v11830_v6 }
0x102a   :  { %4764 = vmatpush1.bf16.msra.mxu0 %v11329_v51  ;;  %6968 = vmatpush3.bf16.msra.mxu1 %v11365_v15 }
0x102b   :  { %4765 = vmatprep.subr.bf16.mxu0 %v11333_v56  ;;  %6969 = vmatprep.subr.bf16.mxu1 %v11830_v6 }
0x102e   :  { %4766 = vmatpush1.bf16.msra.mxu0 %v11337_v7  ;;  %6970 = vmatpush3.bf16.msra.mxu1 %v11369_v27 }
0x102f   :  { %4767 = vmatprep.subr.bf16.mxu0 %v11339_v16  ;;  %6971 = vmatprep.subr.bf16.mxu1 %v11830_v6 }
0x1032   :  { %4768 = vmatpush1.bf16.msra.mxu0 %v11347_v22  ;;  %6972 = vmatpush3.bf16.msra.mxu1 %v11373_v18 }
0x1033   :  { %4859 = vmatprep.subr.bf16.mxu0 %v11297_v46  ;;  %6977 = vmatprep.subr.bf16.mxu1 %v11830_v6 }
0x10e8   :  { %v4681_v39 = vpop.f32.mrb[68].mxu0  ;;  %v4722_v43 = vpop.f32.mrb[52].mxu1 }
0x10e9   :  { %v4728_v0 = vadd.f32 %v4681_v39, %v4249_v41  ;;  %v4683_v30 = vpop.f32.mrb[69].mxu0  ;;  %v6955_v29 = vpop.f32.mrb[53].mxu1  ;;  %v4742_v38 = vadd.f32 %v11492_v54, %v4722_v43  ;;  %v4321_v41 = vadd.f32 %v11398_v26, %v11496_v31  ;;  %v4255_v26 = vadd.f32 %v11400_v4, %v11475_v60 }
0x10ea   :  { %v4729_v42 = vadd.f32 %v4683_v30, %v4251_v52  ;;  %v4685_v24 = vpop.f32.mrb[70].mxu0  ;;  %v4725_v17 = vpop.f32.mrb[54].mxu1 }
0x10eb   :  { %v6380_v34 = vmul.f32 -1.442695, %v4728_v0  ;;  %v4686_v11 = vpop.f32.mrb[71].mxu0  ;;  %v6956_v33 = vpop.f32.mrb[55].mxu1 }
0x10ec   :  { %v6381_v40 = vmul.f32 -1.442695, %v4729_v42 }
0x10ed   :  { %7481 = vpow2.f32 %v6380_v34 }
0x10ee   :  { %7483 = vpow2.f32 %v6381_v40 }
0x10f7   :  { %v7482_v9 = vpop.eup %7481 }
0x10f8   :  { %v4736_v8 = vadd.f32 1.0, %v7482_v9  ;;  %v7484_v20 = vpop.eup %7483 }
0x10f9   :  { %v4737_v30 = vadd.f32 1.0, %v7484_v20 }
0x10fa   :  { %7485 = vrcp.f32 %v4736_v8 }
0x1104   :  { %v7486_v59 = vpop.eup %7485 }
0x1105   :  { %v4743_v39 = vmul.f32 %v7486_v59, %v4742_v38  ;;  %v4257_v59 = vadd.f32 %v11402_v63, %v11483_v1 }
0x1107   :  { %v4744_v52 = vadd.f32 %v4743_v39, %v4321_v41 }
0x1109   :  { %7487 = vtanh.f32 %v4744_v52 }
0x110a   :  { %7489 = vrcp.f32 %v4737_v30 }
0x1113   :  { %v7488_v0 = vpop.eup %7487 }
0x1114   :  { %v4746_v29 = vsub.f32 %v11501_v45, %v7488_v0  ;;  %v7490_v42 = vpop.eup %7489 }
0x1116   :  { %v4747_v24 = vmul.f32 %v7490_v42, %v4746_v29  ;;  %v4326_v42 = vadd.f32 %v11386_v61, %v11496_v31  ;;  %v4259_v61 = vadd.f32 %v11404_v57, %v11475_v60 }
0x1118   :  { %v11548_v17 = vadd.f32 %v7488_v0, %v4747_v24 }
0x111a   :  { %v4752_v34 = vpack.c.bf16 %v11548_v17, %v11548_v17 }
0x111c   :  { %4786 = vmatmul.mubr.bf16.vlgmr.msra.gmra.mrb[72].mxu0 %v4752_v34  ;;  %6974 = vmatmul.mubr.bf16.vlgmr.msra.gmra.mrb[56].mxu1 %v4752_v34 }
0x111d   :  { %4860 = vmatpush1.bf16.msra.mxu0 %v11299_v49  ;;  %6978 = vmatpush3.bf16.msra.mxu1 %v11335_v5 }
0x111e   :  { %4861 = vmatprep.subr.bf16.mxu0 %v11303_v35  ;;  %6979 = vmatprep.subr.bf16.mxu1 %v11830_v6 }
0x111f   :  { %4891 = vmatprep.mubr.bf16.mxu0 %v11831_v19  ;;  %6993 = vmatprep.mubr.msk.bf16.mxu1 %vm9344_vm0, %v11830_v6 }
0x1121   :  { %4862 = vmatpush1.bf16.msra.mxu0 %v11305_v44  ;;  %6980 = vmatpush3.bf16.msra.mxu1 %v11343_v36 }
0x1122   :  { %4863 = vmatprep.subr.bf16.mxu0 %v11309_v47  ;;  %6981 = vmatprep.subr.bf16.mxu1 %v11830_v6 }
0x1125   :  { %4864 = vmatpush1.bf16.msra.mxu0 %v11311_v53  ;;  %6982 = vmatpush3.bf16.msra.mxu1 %v11353_v13 }
0x1126   :  { %4865 = vmatprep.subr.bf16.mxu0 %v11315_v55  ;;  %6983 = vmatprep.subr.bf16.mxu1 %v11830_v6 }
0x1129   :  { %4866 = vmatpush1.bf16.msra.mxu0 %v11317_v58  ;;  %6984 = vmatpush3.bf16.msra.mxu1 %v11357_v14 }
0x112a   :  { %4867 = vmatprep.subr.bf16.mxu0 %v11321_v3  ;;  %6985 = vmatprep.subr.bf16.mxu1 %v11830_v6 }
0x112d   :  { %4868 = vmatpush1.bf16.msra.mxu0 %v11323_v28  ;;  %6986 = vmatpush3.bf16.msra.mxu1 %v11361_v10 }
0x112e   :  { %4869 = vmatprep.subr.bf16.mxu0 %v11327_v2  ;;  %6987 = vmatprep.subr.bf16.mxu1 %v11830_v6 }
0x1131   :  { %4870 = vmatpush1.bf16.msra.mxu0 %v11329_v51  ;;  %6988 = vmatpush3.bf16.msra.mxu1 %v11365_v15 }
0x1132   :  { %4871 = vmatprep.subr.bf16.mxu0 %v11333_v56  ;;  %6989 = vmatprep.subr.bf16.mxu1 %v11830_v6 }
0x1135   :  { %4872 = vmatpush1.bf16.msra.mxu0 %v11337_v7  ;;  %6990 = vmatpush3.bf16.msra.mxu1 %v11369_v27 }
0x1136   :  { %4873 = vmatprep.subr.bf16.mxu0 %v11339_v16  ;;  %6991 = vmatprep.subr.bf16.mxu1 %v11830_v6 }
0x1139   :  { %4874 = vmatpush1.bf16.msra.mxu0 %v11347_v22  ;;  %6992 = vmatpush3.bf16.msra.mxu1 %v11373_v18 }
0x113a   :  { %4965 = vmatprep.subr.bf16.mxu0 %v11297_v46  ;;  %6997 = vmatprep.subr.bf16.mxu1 %v11830_v6 }
0x11ef   :  { %v4787_v45 = vpop.f32.mrb[72].mxu0  ;;  %v4828_v43 = vpop.f32.mrb[56].mxu1 }
0x11f0   :  { %v4834_v11 = vadd.f32 %v4787_v45, %v4255_v26  ;;  %v4789_v33 = vpop.f32.mrb[73].mxu0  ;;  %v6975_v40 = vpop.f32.mrb[57].mxu1  ;;  %v4848_v63 = vadd.f32 %v11492_v54, %v4828_v43 }
0x11f1   :  { %v4835_v9 = vadd.f32 %v4789_v33, %v4257_v59  ;;  %v4791_v8 = vpop.f32.mrb[74].mxu0  ;;  %v4831_v20 = vpop.f32.mrb[58].mxu1 }
0x11f2   :  { %v6382_v38 = vmul.f32 -1.442695, %v4834_v11  ;;  %v4792_v41 = vpop.f32.mrb[75].mxu0  ;;  %v6976_v39 = vpop.f32.mrb[59].mxu1 }
0x11f3   :  { %v6383_v52 = vmul.f32 -1.442695, %v4835_v9 }
0x11f4   :  { %7491 = vpow2.f32 %v6382_v38 }
0x11f5   :  { %7493 = vpow2.f32 %v6383_v52 }
0x11fe   :  { %v7492_v30 = vpop.eup %7491 }
0x11ff   :  { %v4842_v0 = vadd.f32 1.0, %v7492_v30  ;;  %v7494_v4 = vpop.eup %7493 }
0x1200   :  { %v4843_v26 = vadd.f32 1.0, %v7494_v4 }
0x1201   :  { %7495 = vrcp.f32 %v4842_v0 }
0x120b   :  { %v7496_v29 = vpop.eup %7495 }
0x120c   :  { %v4849_v24 = vmul.f32 %v7496_v29, %v4848_v63 }
0x120e   :  { %v4850_v34 = vadd.f32 %v4849_v24, %v4326_v42 }
0x1210   :  { %7497 = vtanh.f32 %v4850_v34 }
0x1211   :  { %7499 = vrcp.f32 %v4843_v26  ;;  %v4329_v26 = vadd.f32 %v11394_v21, %v11496_v31  ;;  %v4265_v21 = vadd.f32 %v11409_v23, %v11475_v60 }
0x121a   :  { %v7498_v59 = vpop.eup %7497 }
0x121b   :  { %v4852_v45 = vsub.f32 %v11548_v17, %v7498_v59  ;;  %v7500_v11 = vpop.eup %7499  ;;  %v4261_v17 = vadd.f32 %v11406_v37, %v11483_v1 }
0x121d   :  { %v4853_v33 = vmul.f32 %v7500_v11, %v4852_v45 }
0x121f   :  { %v11595_v40 = vadd.f32 %v7498_v59, %v4853_v33 }
0x1221   :  { %v4858_v9 = vpack.c.bf16 %v11595_v40, %v11595_v40 }
0x1223   :  { %4892 = vmatmul.mubr.bf16.vlgmr.msra.gmra.mrb[76].mxu0 %v4858_v9  ;;  %6994 = vmatmul.mubr.bf16.vlgmr.msra.gmra.mrb[60].mxu1 %v4858_v9 }
0x1224   :  { %4966 = vmatpush1.bf16.msra.mxu0 %v11299_v49  ;;  %6998 = vmatpush3.bf16.msra.mxu1 %v11335_v5 }
0x1225   :  { %4967 = vmatprep.subr.bf16.mxu0 %v11303_v35  ;;  %6999 = vmatprep.subr.bf16.mxu1 %v11830_v6 }
0x1226   :  { %4997 = vmatprep.mubr.bf16.mxu0 %v11831_v19  ;;  %7013 = vmatprep.mubr.msk.bf16.mxu1 %vm9344_vm0, %v11830_v6 }
0x1228   :  { %4968 = vmatpush1.bf16.msra.mxu0 %v11305_v44  ;;  %7000 = vmatpush3.bf16.msra.mxu1 %v11343_v36 }
0x1229   :  { %4969 = vmatprep.subr.bf16.mxu0 %v11309_v47  ;;  %7001 = vmatprep.subr.bf16.mxu1 %v11830_v6 }
0x122c   :  { %4970 = vmatpush1.bf16.msra.mxu0 %v11311_v53  ;;  %7002 = vmatpush3.bf16.msra.mxu1 %v11353_v13 }
0x122d   :  { %4971 = vmatprep.subr.bf16.mxu0 %v11315_v55  ;;  %7003 = vmatprep.subr.bf16.mxu1 %v11830_v6 }
0x1230   :  { %4972 = vmatpush1.bf16.msra.mxu0 %v11317_v58  ;;  %7004 = vmatpush3.bf16.msra.mxu1 %v11357_v14 }
0x1231   :  { %4973 = vmatprep.subr.bf16.mxu0 %v11321_v3  ;;  %7005 = vmatprep.subr.bf16.mxu1 %v11830_v6 }
0x1234   :  { %4974 = vmatpush1.bf16.msra.mxu0 %v11323_v28  ;;  %7006 = vmatpush3.bf16.msra.mxu1 %v11361_v10 }
0x1235   :  { %4975 = vmatprep.subr.bf16.mxu0 %v11327_v2  ;;  %7007 = vmatprep.subr.bf16.mxu1 %v11830_v6 }
0x1238   :  { %4976 = vmatpush1.bf16.msra.mxu0 %v11329_v51  ;;  %7008 = vmatpush3.bf16.msra.mxu1 %v11365_v15 }
0x1239   :  { %4977 = vmatprep.subr.bf16.mxu0 %v11333_v56  ;;  %7009 = vmatprep.subr.bf16.mxu1 %v11830_v6 }
0x123c   :  { %4978 = vmatpush1.bf16.msra.mxu0 %v11337_v7  ;;  %7010 = vmatpush3.bf16.msra.mxu1 %v11369_v27 }
0x123d   :  { %4979 = vmatprep.subr.bf16.mxu0 %v11339_v16  ;;  %7011 = vmatprep.subr.bf16.mxu1 %v11830_v6 }
0x1240   :  { %4980 = vmatpush1.bf16.msra.mxu0 %v11347_v22  ;;  %7012 = vmatpush3.bf16.msra.mxu1 %v11373_v18 }
0x1241   :  { %5071 = vmatprep.subr.bf16.mxu0 %v11297_v46  ;;  %7017 = vmatprep.subr.bf16.mxu1 %v11830_v6 }
0x12f6   :  { %v4893_v43 = vpop.f32.mrb[76].mxu0  ;;  %v4934_v8 = vpop.f32.mrb[60].mxu1 }
0x12f7   :  { %v4940_v20 = vadd.f32 %v4893_v43, %v4259_v61  ;;  %v4895_v38 = vpop.f32.mrb[77].mxu0  ;;  %v6995_v41 = vpop.f32.mrb[61].mxu1  ;;  %v4954_v37 = vadd.f32 %v11492_v54, %v4934_v8 }
0x12f8   :  { %v4941_v39 = vadd.f32 %v4895_v38, %v4261_v17  ;;  %v4897_v52 = vpop.f32.mrb[78].mxu0  ;;  %v4937_v30 = vpop.f32.mrb[62].mxu1 }
0x12f9   :  { %v6384_v0 = vmul.f32 -1.442695, %v4940_v20  ;;  %v4898_v4 = vpop.f32.mrb[79].mxu0  ;;  %v6996_v63 = vpop.f32.mrb[63].mxu1 }
0x12fa   :  { %v6385_v29 = vmul.f32 -1.442695, %v4941_v39 }
0x12fb   :  { %7501 = vpow2.f32 %v6384_v0 }
0x12fc   :  { %7503 = vpow2.f32 %v6385_v29 }
0x1305   :  { %v7502_v42 = vpop.eup %7501 }
0x1306   :  { %v4948_v24 = vadd.f32 1.0, %v7502_v42  ;;  %v7504_v57 = vpop.eup %7503 }
0x1307   :  { %v4949_v11 = vadd.f32 1.0, %v7504_v57 }
0x1308   :  { %7505 = vrcp.f32 %v4948_v24 }
0x1312   :  { %v7506_v34 = vpop.eup %7505 }
0x1313   :  { %v4955_v59 = vmul.f32 %v7506_v34, %v4954_v37 }
0x1315   :  { %v4956_v45 = vadd.f32 %v4955_v59, %v4329_v26  ;;  %v4334_v26 = vadd.f32 %v11467_v32, %v11496_v31 }
0x1317   :  { %7507 = vtanh.f32 %v4956_v45 }
0x1318   :  { %7509 = vrcp.f32 %v4949_v11 }
0x1321   :  { %v7508_v33 = vpop.eup %7507 }
0x1322   :  { %v4958_v9 = vsub.f32 %v11595_v40, %v7508_v33  ;;  %v7510_v61 = vpop.eup %7509  ;;  %v4267_v40 = vadd.f32 %v11411_v48, %v11483_v1 }
0x1324   :  { %v4959_v17 = vmul.f32 %v7510_v61, %v4958_v9 }
0x1326   :  { %v11642_v43 = vadd.f32 %v7508_v33, %v4959_v17 }
0x1328   :  { %v4964_v20 = vpack.c.bf16 %v11642_v43, %v11642_v43 }
0x132a   :  { %4998 = vmatmul.mubr.bf16.vlgmr.msra.gmra.mrb[80].mxu0 %v4964_v20  ;;  %7014 = vmatmul.mubr.bf16.vlgmr.msra.gmra.mrb[64].mxu1 %v4964_v20 }
0x132b   :  { %5072 = vmatpush1.bf16.msra.mxu0 %v11299_v49  ;;  %7018 = vmatpush3.bf16.msra.mxu1 %v11335_v5 }
0x132c   :  { %5073 = vmatprep.subr.bf16.mxu0 %v11303_v35  ;;  %7019 = vmatprep.subr.bf16.mxu1 %v11830_v6 }
0x132d   :  { %5103 = vmatprep.mubr.bf16.mxu0 %v11831_v19  ;;  %7033 = vmatprep.mubr.msk.bf16.mxu1 %vm9344_vm0, %v11830_v6 }
0x132f   :  { %5074 = vmatpush1.bf16.msra.mxu0 %v11305_v44  ;;  %7020 = vmatpush3.bf16.msra.mxu1 %v11343_v36 }
0x1330   :  { %5075 = vmatprep.subr.bf16.mxu0 %v11309_v47  ;;  %7021 = vmatprep.subr.bf16.mxu1 %v11830_v6 }
0x1333   :  { %5076 = vmatpush1.bf16.msra.mxu0 %v11311_v53  ;;  %7022 = vmatpush3.bf16.msra.mxu1 %v11353_v13 }
0x1334   :  { %5077 = vmatprep.subr.bf16.mxu0 %v11315_v55  ;;  %7023 = vmatprep.subr.bf16.mxu1 %v11830_v6 }
0x1337   :  { %5078 = vmatpush1.bf16.msra.mxu0 %v11317_v58  ;;  %7024 = vmatpush3.bf16.msra.mxu1 %v11357_v14 }
0x1338   :  { %5079 = vmatprep.subr.bf16.mxu0 %v11321_v3  ;;  %7025 = vmatprep.subr.bf16.mxu1 %v11830_v6 }
0x133b   :  { %5080 = vmatpush1.bf16.msra.mxu0 %v11323_v28  ;;  %7026 = vmatpush3.bf16.msra.mxu1 %v11361_v10 }
0x133c   :  { %5081 = vmatprep.subr.bf16.mxu0 %v11327_v2  ;;  %7027 = vmatprep.subr.bf16.mxu1 %v11830_v6 }
0x133f   :  { %5082 = vmatpush1.bf16.msra.mxu0 %v11329_v51  ;;  %7028 = vmatpush3.bf16.msra.mxu1 %v11365_v15 }
0x1340   :  { %5083 = vmatprep.subr.bf16.mxu0 %v11333_v56  ;;  %7029 = vmatprep.subr.bf16.mxu1 %v11830_v6 }
0x1343   :  { %5084 = vmatpush1.bf16.msra.mxu0 %v11337_v7  ;;  %7030 = vmatpush3.bf16.msra.mxu1 %v11369_v27 }
0x1344   :  { %5085 = vmatprep.subr.bf16.mxu0 %v11339_v16  ;;  %7031 = vmatprep.subr.bf16.mxu1 %v11830_v6 }
0x1347   :  { %5086 = vmatpush1.bf16.msra.mxu0 %v11347_v22  ;;  %7032 = vmatpush3.bf16.msra.mxu1 %v11373_v18 }
0x1348   :  { %5177 = vmatprep.subr.bf16.mxu0 %v11297_v46  ;;  %7037 = vmatprep.subr.bf16.mxu1 %v11830_v6 }
0x13fd   :  { %v4999_v8 = vpop.f32.mrb[80].mxu0  ;;  %v5040_v38 = vpop.f32.mrb[64].mxu1 }
0x13fe   :  { %v5046_v41 = vadd.f32 %v4999_v8, %v4265_v21  ;;  %v5001_v39 = vpop.f32.mrb[81].mxu0  ;;  %v7015_v52 = vpop.f32.mrb[65].mxu1  ;;  %v5060_v48 = vadd.f32 %v11492_v54, %v5040_v38  ;;  %v7555_v8 = vld [vmem:[#allocation13] ss:$12 sps:$4 sm:$0xff]   ;;  %v7557_v38 = vld [vmem:[#allocation13 + $0x1c] ss:$12 sps:$4 sm:$0xff]  }
0x13ff   :  { %v5047_v30 = vadd.f32 %v5001_v39, %v4267_v40  ;;  %v5003_v0 = vpop.f32.mrb[82].mxu0  ;;  %v5043_v4 = vpop.f32.mrb[66].mxu1  ;;  %v7559_v39 = vld [vmem:[#allocation13 + $0x20] ss:$12 sps:$4 sm:$0xff]  }
0x1400   :  { %v6386_v63 = vmul.f32 -1.442695, %v5046_v41  ;;  %v5004_v29 = vpop.f32.mrb[83].mxu0  ;;  %v7016_v42 = vpop.f32.mrb[67].mxu1  ;;  %v7558_v41 = vld [vmem:[#allocation13 + $0x18] ss:$12 sps:$4 sm:$0xff]  }
0x1401   :  { %v6387_v24 = vmul.f32 -1.442695, %v5047_v30  ;;  %v7560_v52 = vld [vmem:[#allocation13 + $0x34] ss:$12 sps:$4 sm:$0xff]   ;;  %v7561_v30 = vld [vmem:[#allocation13 + $0x30] ss:$12 sps:$4 sm:$0xff]  }
0x1402   :  { %7511 = vpow2.f32 %v6386_v63  ;;  %v7562_v0 = vld [vmem:[#allocation13 + $0x38] ss:$12 sps:$4 sm:$0xff]   ;;  %v7565_v63 = vld [vmem:[#allocation13 + $0x50] ss:$12 sps:$4 sm:$0xff]   ;;  %v7567_v42 = vld [vmem:[#allocation13 + $0x60] ss:$12 sps:$4 sm:$0xff]  }
0x1403   :  { %7513 = vpow2.f32 %v6387_v24  ;;  %v7563_v4 = vld [vmem:[#allocation13 + $0x4c] ss:$12 sps:$4 sm:$0xff]   ;;  %v7566_v29 = vld [vmem:[#allocation13 + $0x64] ss:$12 sps:$4 sm:$0xff]   ;;  %v7568_v24 = vld [vmem:[#allocation13 + $0x68] ss:$12 sps:$4 sm:$0xff]  }
0x140c   :  { %v7512_v57 = vpop.eup %7511 }
0x140d   :  { %v5054_v37 = vadd.f32 1.0, %v7512_v57  ;;  %v7514_v23 = vpop.eup %7513  ;;  %v7569_v57 = vld [vmem:[#allocation13 + $0x7c] ss:$12 sps:$4 sm:$0xff]  }
0x140e   :  { %v5055_v11 = vadd.f32 1.0, %v7514_v23  ;;  %v7571_v23 = vld [vmem:[#allocation13 + $0x80] ss:$12 sps:$4 sm:$0xff]  }
0x140f   :  { %7515 = vrcp.f32 %v5054_v37  ;;  %v7570_v37 = vld [vmem:[#allocation13 + $0x78] ss:$12 sps:$4 sm:$0xff]  }
0x1419   :  { %v7516_v34 = vpop.eup %7515 }
0x141a   :  { %v5061_v59 = vmul.f32 %v7516_v34, %v5060_v48  ;;  %v7572_v48 = vld [vmem:[#allocation13 + $0x94] ss:$12 sps:$4 sm:$0xff]   ;;  %v7573_v34 = vld [vmem:[#allocation13 + $0x90] ss:$12 sps:$4 sm:$0xff]  }
0x141c   :  { %v5062_v45 = vadd.f32 %v5061_v59, %v4334_v26  ;;  %v7574_v26 = vld [vmem:[#allocation13 + $0x98] ss:$12 sps:$4 sm:$0xff]  }
0x141d   :  { %v7575_v59 = vld [vmem:[#allocation13 + $0xac] ss:$12 sps:$4 sm:$0xff]  }
0x141e   :  { %7517 = vtanh.f32 %v5062_v45  ;;  %v7576_v45 = vld [vmem:[#allocation13 + $0xa8] ss:$12 sps:$4 sm:$0xff]  }
0x141f   :  { %7519 = vrcp.f32 %v5055_v11  ;;  %v7577_v11 = vld [vmem:[#allocation13 + $0xb0] ss:$12 sps:$4 sm:$0xff]  }
0x1428   :  { %v7518_v33 = vpop.eup %7517 }
0x1429   :  { %v5064_v9 = vsub.f32 %v11642_v43, %v7518_v33  ;;  %v7520_v61 = vpop.eup %7519 }
0x142b   :  { %v5065_v17 = vmul.f32 %v7520_v61, %v5064_v9  ;;  %v11832_v9 = vld [vmem:[#allocation154_spill] sm:$0xff] }
0x142c   :  { %v4277_v61 = vadd.f32 %v11832_v9, %v11483_v1 }
0x142d   :  { %v11689_v20 = vadd.f32 %v7518_v33, %v5065_v17  ;;  %v4275_v33 = vadd.f32 %v11461_v62, %v11475_v60 }
0x142f   :  { %v5070_v21 = vpack.c.bf16 %v11689_v20, %v11689_v20 }
0x1431   :  { %5104 = vmatmul.mubr.bf16.vlgmr.msra.gmra.mrb[84].mxu0 %v5070_v21  ;;  %7034 = vmatmul.mubr.bf16.vlgmr.msra.gmra.mrb[68].mxu1 %v5070_v21 }
0x1432   :  { %5178 = vmatpush1.bf16.msra.mxu0 %v11299_v49  ;;  %7038 = vmatpush3.bf16.msra.mxu1 %v11335_v5  ;;  %v4269_v49 = vadd.f32 %v11413_v12, %v11475_v60 }
0x1433   :  { %5179 = vmatprep.subr.bf16.mxu0 %v11303_v35  ;;  %7039 = vmatprep.subr.bf16.mxu1 %v11830_v6  ;;  %v4271_v35 = vadd.f32 %v11416_v25, %v11483_v1 }
0x1434   :  { %5209 = vmatprep.mubr.bf16.mxu0 %v11831_v19  ;;  %7053 = vmatprep.mubr.msk.bf16.mxu1 %vm9344_vm0, %v11830_v6 }
0x1436   :  { %5180 = vmatpush1.bf16.msra.mxu0 %v11305_v44  ;;  %7040 = vmatpush3.bf16.msra.mxu1 %v11343_v36 }
0x1437   :  { %5181 = vmatprep.subr.bf16.mxu0 %v11309_v47  ;;  %7041 = vmatprep.subr.bf16.mxu1 %v11830_v6 }
0x143a   :  { %5182 = vmatpush1.bf16.msra.mxu0 %v11311_v53  ;;  %7042 = vmatpush3.bf16.msra.mxu1 %v11353_v13 }
0x143b   :  { %5183 = vmatprep.subr.bf16.mxu0 %v11315_v55  ;;  %7043 = vmatprep.subr.bf16.mxu1 %v11830_v6 }
0x143e   :  { %5184 = vmatpush1.bf16.msra.mxu0 %v11317_v58  ;;  %7044 = vmatpush3.bf16.msra.mxu1 %v11357_v14  ;;  %v4337_v14 = vadd.f32 %v11479_v50, %v11496_v31  ;;  %v7556_v50 = vld [vmem:[#allocation13 + $0x8] ss:$12 sps:$4 sm:$0xff]  }
0x143f   :  { %5185 = vmatprep.subr.bf16.mxu0 %v11321_v3  ;;  %7045 = vmatprep.subr.bf16.mxu1 %v11830_v6 }
0x1442   :  { %5186 = vmatpush1.bf16.msra.mxu0 %v11323_v28  ;;  %7046 = vmatpush3.bf16.msra.mxu1 %v11361_v10 }
0x1443   :  { %5187 = vmatprep.subr.bf16.mxu0 %v11327_v2  ;;  %7047 = vmatprep.subr.bf16.mxu1 %v11830_v6 }
0x1446   :  { %5188 = vmatpush1.bf16.msra.mxu0 %v11329_v51  ;;  %7048 = vmatpush3.bf16.msra.mxu1 %v11365_v15 }
0x1447   :  { %5189 = vmatprep.subr.bf16.mxu0 %v11333_v56  ;;  %7049 = vmatprep.subr.bf16.mxu1 %v11830_v6 }
0x144a   :  { %5190 = vmatpush1.bf16.msra.mxu0 %v11337_v7  ;;  %7050 = vmatpush3.bf16.msra.mxu1 %v11369_v27 }
0x144b   :  { %5191 = vmatprep.subr.bf16.mxu0 %v11339_v16  ;;  %7051 = vmatprep.subr.bf16.mxu1 %v11830_v6 }
0x144e   :  { %5192 = vmatpush1.bf16.msra.mxu0 %v11347_v22  ;;  %7052 = vmatpush3.bf16.msra.mxu1 %v11373_v18 }
0x144f   :  { %5283 = vmatprep.subr.bf16.mxu0 %v11297_v46  ;;  %7057 = vmatprep.subr.bf16.mxu1 %v11830_v6 }
0x1504   :  { %v5105_v44 = vpop.f32.mrb[84].mxu0  ;;  %v5146_v47 = vpop.f32.mrb[68].mxu1 }
0x1505   :  { %v5152_v53 = vadd.f32 %v5105_v44, %v4269_v49  ;;  %v5107_v55 = vpop.f32.mrb[85].mxu0  ;;  %v7035_v58 = vpop.f32.mrb[69].mxu1  ;;  %v5166_v22 = vadd.f32 %v11492_v54, %v5146_v47 }
0x1506   :  { %v5153_v3 = vadd.f32 %v5107_v55, %v4271_v35  ;;  %v5109_v28 = vpop.f32.mrb[86].mxu0  ;;  %v5149_v2 = vpop.f32.mrb[70].mxu1 }
0x1507   :  { %v6388_v51 = vmul.f32 -1.442695, %v5152_v53  ;;  %v5110_v56 = vpop.f32.mrb[87].mxu0  ;;  %v7036_v5 = vpop.f32.mrb[71].mxu1 }
0x1508   :  { %v6389_v46 = vmul.f32 -1.442695, %v5153_v3 }
0x1509   :  { %7521 = vpow2.f32 %v6388_v51 }
0x150a   :  { %7523 = vpow2.f32 %v6389_v46  ;;  %v11833_v46 = vld [vmem:[#allocation153_spill] sm:$0xff] }
0x1513   :  { %v7522_v7 = vpop.eup %7521 }
0x1514   :  { %v5160_v16 = vadd.f32 1.0, %v7522_v7  ;;  %v7524_v36 = vpop.eup %7523  ;;  %v4342_v7 = vadd.f32 %v11833_v46, %v11496_v31 }
0x1515   :  { %v5161_v27 = vadd.f32 1.0, %v7524_v36 }
0x1516   :  { %7525 = vrcp.f32 %v5160_v16 }
0x1520   :  { %v7526_v13 = vpop.eup %7525 }
0x1521   :  { %v5167_v10 = vmul.f32 %v7526_v13, %v5166_v22 }
0x1523   :  { %v5168_v15 = vadd.f32 %v5167_v10, %v4337_v14 }
0x1525   :  { %7527 = vtanh.f32 %v5168_v15 }
0x1526   :  { %7529 = vrcp.f32 %v5161_v27 }
0x152f   :  { %v7528_v18 = vpop.eup %7527 }
0x1530   :  { %v5170_v12 = vsub.f32 %v11689_v20, %v7528_v18  ;;  %v7530_v25 = vpop.eup %7529 }
0x1532   :  { %v5171_v32 = vmul.f32 %v7530_v25, %v5170_v12  ;;  %v7383_v12 = vld [vmem:[#allocation15] sm:$0xff]   ;;  %v7384_v25 = vld [vmem:[#allocation15 + $0x8] sm:$0xff]  }
0x1534   :  { %v11736_v43 = vadd.f32 %v7528_v18, %v5171_v32  ;;  %v7385_v32 = vld [vmem:[#allocation15 + $0x10] sm:$0xff]  }
0x1536   :  { %v5176_v40 = vpack.c.bf16 %v11736_v43, %v11736_v43 }
0x1538   :  { %5210 = vmatmul.mubr.bf16.vlgmr.msra.gmra.mrb[88].mxu0 %v5176_v40  ;;  %7054 = vmatmul.mubr.bf16.vlgmr.msra.gmra.mrb[72].mxu1 %v5176_v40  ;;  %v7387_v40 = vld [vmem:[#allocation15 + $0x20] sm:$0xff]  }
0x1539   :  { %5284 = vmatpush1.bf16.msra.mxu0 %v7555_v8  ;;  %7058 = vmatpush3.bf16.msra.mxu1 %v7556_v50  ;;  %v7388_v8 = vld [vmem:[#allocation15 + $0x28] sm:$0xff]   ;;  %v7389_v50 = vld [vmem:[#allocation15 + $0x30] sm:$0xff]  }
0x153a   :  { %5285 = vmatprep.subr.bf16.mxu0 %v7557_v38  ;;  %7059 = vmatprep.subr.bf16.mxu1 %v11830_v6  ;;  %v7390_v38 = vld [vmem:[#allocation15 + $0x38] sm:$0xff]  }
0x153b   :  { %5315 = vmatprep.mubr.bf16.mxu0 %v11831_v19  ;;  %7073 = vmatprep.mubr.msk.bf16.mxu1 %vm9344_vm0, %v11830_v6  ;;  %v7564_v19 = vld [vmem:[#allocation13 + $0x48] ss:$12 sps:$4 sm:$0xff]  }
0x153d   :  { %5286 = vmatpush1.bf16.msra.mxu0 %v7558_v41  ;;  %7060 = vmatpush3.bf16.msra.mxu1 %v7559_v39  ;;  %v11834_v41 = vld [vmem:[#allocation155_spill] sm:$0xff] }
0x153e   :  { %5287 = vmatprep.subr.bf16.mxu0 %v7560_v52  ;;  %7061 = vmatprep.subr.bf16.mxu1 %v11830_v6  ;;  %v4279_v39 = vadd.f32 %v11834_v41, %v11475_v60  ;;  %v11835_v52 = vld [vmem:[#allocation157_spill] sm:$0xff] }
0x1541   :  { %5288 = vmatpush1.bf16.msra.mxu0 %v7561_v30  ;;  %7062 = vmatpush3.bf16.msra.mxu1 %v7562_v0  ;;  %v4281_v30 = vadd.f32 %v11835_v52, %v11483_v1 }
0x1542   :  { %5289 = vmatprep.subr.bf16.mxu0 %v7563_v4  ;;  %7063 = vmatprep.subr.bf16.mxu1 %v11830_v6 }
0x1545   :  { %5290 = vmatpush1.bf16.msra.mxu0 %v7564_v19  ;;  %7064 = vmatpush3.bf16.msra.mxu1 %v7565_v63 }
0x1546   :  { %5291 = vmatprep.subr.bf16.mxu0 %v7566_v29  ;;  %7065 = vmatprep.subr.bf16.mxu1 %v11830_v6 }
0x1549   :  { %5292 = vmatpush1.bf16.msra.mxu0 %v7567_v42  ;;  %7066 = vmatpush3.bf16.msra.mxu1 %v7568_v24 }
0x154a   :  { %5293 = vmatprep.subr.bf16.mxu0 %v7569_v57  ;;  %7067 = vmatprep.subr.bf16.mxu1 %v11830_v6 }
0x154d   :  { %5294 = vmatpush1.bf16.msra.mxu0 %v7570_v37  ;;  %7068 = vmatpush3.bf16.msra.mxu1 %v7571_v23 }
0x154e   :  { %5295 = vmatprep.subr.bf16.mxu0 %v7572_v48  ;;  %7069 = vmatprep.subr.bf16.mxu1 %v11830_v6 }
0x1551   :  { %5296 = vmatpush1.bf16.msra.mxu0 %v7573_v34  ;;  %7070 = vmatpush3.bf16.msra.mxu1 %v7574_v26 }
0x1552   :  { %5297 = vmatprep.subr.bf16.mxu0 %v7575_v59  ;;  %7071 = vmatprep.subr.bf16.mxu1 %v11830_v6 }
0x1555   :  { %5298 = vmatpush1.bf16.msra.mxu0 %v7576_v45  ;;  %7072 = vmatpush3.bf16.msra.mxu1 %v7577_v11  ;;  %v11836_v45 = vld [vmem:[#allocation156_spill] sm:$0xff] }
0x1556   :  { %7077 = vmatprep.subr.bf16.mxu0 %v11830_v6  ;;  %v4345_v11 = vadd.f32 %v11836_v45, %v11496_v31 }
0x160b   :  { %v5211_v17 = vpop.f32.mrb[88].mxu0  ;;  %v5252_v20 = vpop.f32.mrb[72].mxu1 }
0x160c   :  { %v5258_v21 = vadd.f32 %v5211_v17, %v4275_v33  ;;  %v5213_v49 = vpop.f32.mrb[89].mxu0  ;;  %v7055_v35 = vpop.f32.mrb[73].mxu1  ;;  %v5272_v56 = vadd.f32 %v11492_v54, %v5252_v20 }
0x160d   :  { %v5259_v44 = vadd.f32 %v5213_v49, %v4277_v61  ;;  %v5215_v47 = vpop.f32.mrb[90].mxu0  ;;  %v5255_v53 = vpop.f32.mrb[74].mxu1 }
0x160e   :  { %v6390_v55 = vmul.f32 -1.442695, %v5258_v21  ;;  %v5216_v58 = vpop.f32.mrb[91].mxu0  ;;  %v7056_v3 = vpop.f32.mrb[75].mxu1 }
0x160f   :  { %v6391_v28 = vmul.f32 -1.442695, %v5259_v44 }
0x1610   :  { %7531 = vpow2.f32 %v6390_v55 }
0x1611   :  { %7533 = vpow2.f32 %v6391_v28 }
0x161a   :  { %v7532_v2 = vpop.eup %7531 }
0x161b   :  { %v5266_v51 = vadd.f32 1.0, %v7532_v2  ;;  %v7534_v62 = vpop.eup %7533 }
0x161c   :  { %v5267_v22 = vadd.f32 1.0, %v7534_v62 }
0x161d   :  { %7535 = vrcp.f32 %v5266_v51 }
0x1627   :  { %v7536_v5 = vpop.eup %7535 }
0x1628   :  { %v5273_v16 = vmul.f32 %v7536_v5, %v5272_v56 }
0x162a   :  { %v5274_v36 = vadd.f32 %v5273_v16, %v4342_v7 }
0x162c   :  { %7537 = vtanh.f32 %v5274_v36 }
0x162d   :  { %7539 = vrcp.f32 %v5267_v22 }
0x1636   :  { %v7538_v13 = vpop.eup %7537 }
0x1637   :  { %v5276_v14 = vsub.f32 %v11736_v43, %v7538_v13  ;;  %v7540_v10 = vpop.eup %7539  ;;  %v7386_v43 = vld [vmem:[#allocation15 + $0x18] sm:$0xff]  }
0x1639   :  { %v5277_v15 = vmul.f32 %v7540_v10, %v5276_v14 }
0x163b   :  { %v5278_v27 = vadd.f32 %v7538_v13, %v5277_v15 }
0x163d   :  { %v5282_v18 = vpack.c.bf16 %v5278_v27, %v5278_v27 }
0x163f   :  { %5316 = vmatmul.mubr.bf16.vlgmr.msra.gmra.mrb[92].mxu0 %v5282_v18  ;;  %7074 = vmatmul.mubr.bf16.vlgmr.msra.gmra.mrb[76].mxu1 %v5282_v18 }
0x1640   :  { %7093 = vmatprep.mubr.msk.bf16.mxu0 %vm9344_vm0, %v11830_v6  ;;  %7078 = vmatpush3.bf16.msra.mxu0 %v7383_v12 }
0x1641   :  { %7079 = vmatprep.subr.bf16.mxu0 %v11830_v6 }
0x1644   :  { %7080 = vmatpush3.bf16.msra.mxu0 %v7384_v25 }
0x1645   :  { %7081 = vmatprep.subr.bf16.mxu0 %v11830_v6 }
0x1648   :  { %7082 = vmatpush3.bf16.msra.mxu0 %v7385_v32 }
0x1649   :  { %7083 = vmatprep.subr.bf16.mxu0 %v11830_v6 }
0x164c   :  { %7084 = vmatpush3.bf16.msra.mxu0 %v7386_v43 }
0x164d   :  { %7085 = vmatprep.subr.bf16.mxu0 %v11830_v6 }
0x1650   :  { %7086 = vmatpush3.bf16.msra.mxu0 %v7387_v40 }
0x1651   :  { %7087 = vmatprep.subr.bf16.mxu0 %v11830_v6 }
0x1654   :  { %7088 = vmatpush3.bf16.msra.mxu0 %v7388_v8 }
0x1655   :  { %7089 = vmatprep.subr.bf16.mxu0 %v11830_v6 }
0x1658   :  { %7090 = vmatpush3.bf16.msra.mxu0 %v7389_v50 }
0x1659   :  { %7091 = vmatprep.subr.bf16.mxu0 %v11830_v6 }
0x165c   :  { %7092 = vmatpush3.bf16.msra.mxu0 %v7390_v38 }
0x1712   :  { %v5317_v0 = vpop.f32.mrb[92].mxu0  ;;  %v5358_v4 = vpop.f32.mrb[76].mxu1 }
0x1713   :  { %v5364_v19 = vadd.f32 %v5317_v0, %v4279_v39  ;;  %v5319_v63 = vpop.f32.mrb[93].mxu0  ;;  %v7075_v29 = vpop.f32.mrb[77].mxu1  ;;  %v5378_v1 = vadd.f32 %v11492_v54, %v5358_v4  ;;  %v6394_v54 = vld [vmem:[%s11801_s11] ss:$0 sm:$0xff] }
0x1714   :  { %v5365_v42 = vadd.f32 %v5319_v63, %v4281_v30  ;;  %v5321_v24 = vpop.f32.mrb[94].mxu0  ;;  %v5361_v57 = vpop.f32.mrb[78].mxu1 }
0x1715   :  { %v6392_v37 = vmul.f32 -1.442695, %v5364_v19  ;;  %v5322_v23 = vpop.f32.mrb[95].mxu0  ;;  %v7076_v48 = vpop.f32.mrb[79].mxu1 }
0x1716   :  { %v6393_v6 = vmul.f32 -1.442695, %v5365_v42 }
0x1717   :  { %7541 = vpow2.f32 %v6392_v37 }
0x1718   :  { %7543 = vpow2.f32 %v6393_v6 }
0x1721   :  { %v7542_v34 = vpop.eup %7541 }
0x1722   :  { %v5372_v26 = vadd.f32 1.0, %v7542_v34  ;;  %v7544_v60 = vpop.eup %7543 }
0x1723   :  { %v5373_v61 = vadd.f32 1.0, %v7544_v60 }
0x1724   :  { %7545 = vrcp.f32 %v5372_v26 }
0x172e   :  { %v7546_v59 = vpop.eup %7545 }
0x172f   :  { %v5379_v33 = vmul.f32 %v7546_v59, %v5378_v1 }
0x1731   :  { %v5380_v9 = vadd.f32 %v5379_v33, %v4345_v11 }
0x1733   :  { %7547 = vtanh.f32 %v5380_v9 }
0x1734   :  { %7549 = vrcp.f32 %v5373_v61 }
0x173d   :  { %v7548_v17 = vpop.eup %7547 }
0x173e   :  { %v5382_v20 = vsub.f32 %v5278_v27, %v7548_v17  ;;  %v7550_v21 = vpop.eup %7549 }
0x1740   :  { %v5383_v49 = vmul.f32 %v7550_v21, %v5382_v20 }
0x1742   :  { %v5384_v35 = vadd.f32 %v7548_v17, %v5383_v49 }
0x1744   :  { %v5385_v44 = vpack.c.bf16 %v5384_v35, %v5384_v35 }
0x1746   :  { %7094 = vmatmul.mubr.bf16.vlgmr.msra.gmra.mrb[96].mxu0 %v5385_v44 }
0x1819   :  { %v5491_v47 = vpop.f32.mrb[96].mxu0 }
0x181a   :  { %v5492_v31 = vadd.f32 %v6394_v54, %v5491_v47  ;;  %v7095_v53 = vpop.f32.mrb[97].mxu0 }
0x181b   :  { %v5494_v55 = vpop.f32.mrb[98].mxu0 }
0x181c   :  { %5497 = vst [vmem:[#allocation16] sm:$0xff] %v5492_v31  ;;  %v7096_v58 = vpop.f32.mrb[99].mxu0 }
0x181d   :  { %9245 = shalt.err (!%p9242_p9)
}
0x181e   :  { %s9246_s11 = scalar_lea.hbm %s11802_s12, 128 }
0x181f   :  { %p9247_p7 = scmp.ne.s32.totalorder %s11802_s12, %s9246_s11  ;;  %p9250_p5 = scmp.lt.u32.totalorder %s9246_s11, %s11802_s12 }
0x1821   :  { %p9252_p10 = pnand %p9250_p5, %p9247_p7 }
0x1823   :  { %9255 = shalt.err (!%p9252_p10)
}
0x1824   :  { %5507 = dma.vmem_to_hbm [thread:$0]  %s5505_s17, 128, %s11802_s12, [#allocation9]  }
0x1825   :  { %9266 = dma.done.wait [#allocation9], 128  }
0x1826   :  { %9267 = vsyncadd [#allocation9], 4294967168 }
0x1827   :  { %5511 = vsyncpa [#allocation8], 1 }
0x1828   :  { %5512 = vsyncpa [#allocation11], 1 }
0x1829   :  { %5513 = vsyncpa [#allocation14], 1 }
0x182a   :  { %5514 = vsyncpa [#allocation9], 1 }
0x182b   :  { %5515 = vsyncmov [#allocation4] }
0x182e   :  { %s5516_s0 = vpop.sfrf %5515 }
0x182f   :  { %p6403_p11 = scmp.ne.s32.totalorder %s5516_s0, 0 }
0x1831   :  { %5520 = shalt.err (%p6403_p11)  }

</bundles_post_ra>
